<compile_context>
chip_gen: v7x
topology: tpu7x:2x2x1
jax: 0.10.0
libtpu: 0.0.40
codegen_flags: <defaults>
</compile_context>

<pallas_src>
import functools
import math

import jax
import jax.numpy as jnp
from jax.experimental import pallas as pl
from jax.experimental.pallas import tpu as pltpu

BBOX_XFORM_CLIP = math.log(1000.0 / 16.0)


def _round_up(v, m):
    return -(-v // m) * m


def _cdiv(a, b):
    return -(-a // b)


def _matmul_tile_caps():
    """Output-tile caps matched to the MXU: 256 on v6e/v7x (2x256x256), 128 on <=v5."""
    try:
        kind = jax.devices()[0].device_kind.lower()
    except Exception:  # pragma: no cover
        kind = ""
    if any(t in kind for t in ("v2", "v3", "v4", "v5")):
        return 128, 2048
    return 256, 2048


def _pick_tile(dim, cap, align):
    """Tile (multiple of align, <= cap): fewest blocks, then least padding, then largest."""
    d = _round_up(dim, align)
    if d <= cap:
        return d, d
    best = None
    for t in range(align, cap + 1, align):
        p = _round_up(d, t)
        key = (p // t, p, -t)
        if best is None or key < best[0]:
            best = (key, t, p)
    return best[1], best[2]


def _vmem_limit(est_bytes):
    """Explicit scoped-VMEM limit: >= 32 MiB, capped at 48 MiB (safe under v7x's 64 MiB)."""
    return int(min(max(2 * est_bytes + (8 << 20), 32 << 20), 48 << 20))


# ----------------------------------------------------------------------------
# 3x3 conv (stride 1, pad 1) in NHWC, halo-tiled over H.
# The 9 shifted taps are concatenated in VMEM and contracted in ONE K=9*C matmul.
# Optionally a 1x1 head matmul is fused into the epilogue (RPN cls/bbox heads).
# ----------------------------------------------------------------------------
def _conv3x3_body(x_ref, w_ref, b_ref, tH, W, relu):
    C = x_ref.shape[-1]
    taps = [x_ref[di:di + tH, dj:dj + W, :].reshape(tH * W, C)
            for di in range(3) for dj in range(3)]
    patch = jnp.concatenate(taps, axis=-1)                  # (tH*W, 9*C) bf16, VMEM only
    acc = jnp.dot(patch, w_ref[...], preferred_element_type=jnp.float32)
    acc = acc + b_ref[...]
    if relu:
        acc = jnp.maximum(acc, 0.0)
    return acc                                              # (tH*W, CoutP) f32


def _conv3x3_kernel(x_ref, w_ref, b_ref, o_ref, *, relu):
    tH, W, CoutP = o_ref.shape
    acc = _conv3x3_body(x_ref, w_ref, b_ref, tH, W, relu)
    o_ref[...] = acc.reshape(tH, W, CoutP).astype(o_ref.dtype)


def _conv3x3_head_kernel(x_ref, w_ref, b_ref, hw_ref, hb_ref, o_ref, *, relu):
    # conv(+relu) output stays in VMEM; only the fused 1x1 head result is stored.
    tH, W, HeadP = o_ref.shape
    acc = _conv3x3_body(x_ref, w_ref, b_ref, tH, W, relu)
    head = jnp.dot(acc.astype(jnp.bfloat16), hw_ref[...],
                   preferred_element_type=jnp.float32) + hb_ref[...]
    o_ref[...] = head.reshape(tH, W, HeadP).astype(o_ref.dtype)


def conv2d_3x3_nhwc(x, w, b, *, relu=True, out_dtype=jnp.bfloat16,
                    head_w=None, head_b=None, vmem_budget=8 << 20):
    """3x3 stride-1 pad-1 conv in NHWC.

    x: (B, H, W, C); w: torch layout (Cout, C, 3, 3); b: (Cout,).
    Cout is zero-padded to 128 lanes.  If head_w/head_b are given (head_w: (Cout, Nh)),
    the 1x1 head is applied to the relu'd conv output inside the kernel epilogue and ONLY
    the head map (B, H, W, round_up(Nh, 128)) is returned; otherwise the padded conv
    output (B, H, W, CoutP) is returned.
    """
    B, H, W, C = x.shape
    Cout, Cin, kh, kw = w.shape
    assert (Cin, kh, kw) == (C, 3, 3)
    CoutP = _round_up(Cout, 128)

    w9 = jnp.transpose(w, (2, 3, 1, 0)).reshape(9 * C, Cout)
    w9 = jnp.pad(w9, ((0, 0), (0, CoutP - Cout))).astype(jnp.bfloat16)
    b1 = jnp.pad(b.astype(jnp.float32).reshape(1, Cout), ((0, 0), (0, CoutP - Cout)))

    fused = head_w is not None
    out_bytes = jnp.dtype(out_dtype).itemsize
    if fused:
        assert head_w.shape[0] == Cout
        Nh = head_w.shape[1]
        HeadP = _round_up(Nh, 128)
        hw = jnp.pad(head_w.astype(jnp.bfloat16), ((0, CoutP - Cout), (0, HeadP - Nh)))
        hb = jnp.pad(head_b.astype(jnp.float32).reshape(1, Nh), ((0, 0), (0, HeadP - Nh)))
        out_ch = HeadP
    else:
        out_ch = CoutP

    # Halo tile height: bound the per-strip VMEM working set (input strip x2 buffers,
    # im2col patch, f32 accumulator, output strip x2 buffers).
    per_row = ((W + 2) * C * 2 * 2 + W * 9 * C * 2
               + W * CoutP * 4 + W * out_ch * out_bytes * 2)
    tH = int(max(1, min(H, vmem_budget // max(per_row, 1))))
    nH = _cdiv(H, tH)
    tH = _cdiv(H, nH)
    nH = _cdiv(H, tH)
    Hp = nH * tH

    xb = x.astype(jnp.bfloat16)
    xp = jnp.pad(xb, ((0, 0), (1, 1 + Hp - H), (1, 1), (0, 0)))     # (B, Hp+2, W+2, C)
    if nH == 1:
        strips = xp
    else:
        # TODO(synk): an Element-indexed (overlapping) BlockSpec would avoid duplicating
        # the 2 halo rows per strip in HBM.
        strips = jnp.stack([xp[:, s * tH:s * tH + tH + 2] for s in range(nH)], axis=1)
        strips = strips.reshape(B * nH, tH + 2, W + 2, C)

    est = ((tH + 2) * (W + 2) * C * 2 * 2 + 9 * C * CoutP * 2
           + (CoutP * out_ch * 2 if fused else 0)
           + tH * W * 9 * C * 2 + tH * W * CoutP * 4
           + tH * W * out_ch * out_bytes * 2)

    in_specs = [
        pl.BlockSpec((None, tH + 2, W + 2, C), lambda i: (i, 0, 0, 0)),
        pl.BlockSpec((9 * C, CoutP), lambda i: (0, 0)),
        pl.BlockSpec((1, CoutP), lambda i: (0, 0)),
    ]
    args = [strips, w9, b1]
    if fused:
        in_specs += [pl.BlockSpec((CoutP, out_ch), lambda i: (0, 0)),
                     pl.BlockSpec((1, out_ch), lambda i: (0, 0))]
        args += [hw, hb]
        kern = functools.partial(_conv3x3_head_kernel, relu=relu)
    else:
        kern = functools.partial(_conv3x3_kernel, relu=relu)

    out = pl.pallas_call(
        kern,
        out_shape=jax.ShapeDtypeStruct((B * nH, tH, W, out_ch), out_dtype),
        grid=(B * nH,),
        in_specs=in_specs,
        out_specs=pl.BlockSpec((None, tH, W, out_ch), lambda i: (i, 0, 0, 0)),
        compiler_params=pltpu.CompilerParams(
            dimension_semantics=("parallel",),
            vmem_limit_bytes=_vmem_limit(est)),
    )(*args)
    return out.reshape(B, nH * tH, W, out_ch)[:, :H]


# ----------------------------------------------------------------------------
# Batched tiled matmul (used by RoIAlign): (B, M, K) @ (B, K, N) -> (B, M, N)
# ----------------------------------------------------------------------------
def _bmm_kernel(x_ref, w_ref, o_ref, acc_ref):
    k = pl.program_id(2)

    @pl.when(k == 0)
    def _():
        acc_ref[...] = jnp.zeros_like(acc_ref)

    acc_ref[...] += jnp.dot(x_ref[...], w_ref[...], preferred_element_type=jnp.float32)

    @pl.when(k == pl.num_programs(2) - 1)
    def _():
        o_ref[...] = acc_ref[...].astype(o_ref.dtype)


def pallas_bmm(x, w, *, out_dtype=jnp.bfloat16):
    """Batched matmul, bf16 MXU inputs, f32 VMEM accumulation, single lane-dense N block."""
    B, M, K = x.shape
    Bw, Kw, N = w.shape
    assert B == Bw and K == Kw
    tm_cap, tk_cap = _matmul_tile_caps()
    Np = _round_up(N, 128)
    assert Np <= 512, "pallas_bmm keeps N as a single lane-dense block"
    tm, Mp = _pick_tile(M, tm_cap, 16)
    tk, Kp = _pick_tile(K, tk_cap, 128)

    xp = jnp.pad(x.astype(jnp.bfloat16), ((0, 0), (0, Mp - M), (0, Kp - K)))
    wp = jnp.pad(w.astype(jnp.bfloat16), ((0, 0), (0, Kp - K), (0, Np - N)))

    est = 2 * (tm * tk + tk * Np) * 2 + tm * Np * (4 + 2 * jnp.dtype(out_dtype).itemsize)
    out = pl.pallas_call(
        _bmm_kernel,
        out_shape=jax.ShapeDtypeStruct((B, Mp, Np), out_dtype),
        grid=(B, Mp // tm, Kp // tk),
        in_specs=[
            pl.BlockSpec((None, tm, tk), lambda b, i, k: (b, i, k)),
            pl.BlockSpec((None, tk, Np), lambda b, i, k: (b, k, 0)),
        ],
        out_specs=pl.BlockSpec((None, tm, Np), lambda b, i, k: (b, i, 0)),
        scratch_shapes=[pltpu.VMEM((tm, Np), jnp.float32)],
        compiler_params=pltpu.CompilerParams(
            dimension_semantics=("parallel", "parallel", "arbitrary"),
            vmem_limit_bytes=_vmem_limit(est)),
    )(xp, wp)
    return out[:, :M, :N]


# ----------------------------------------------------------------------------
# Fused RCNN tail: relu(x @ fc_w + fc_b) @ [cls_w | bbox_w] + [cls_b | bbox_b],
# with an exact softmax over the class columns, all in one kernel.
# ----------------------------------------------------------------------------
def _fc_head_kernel(x_ref, w1_ref, b1_ref, w2_ref, b2_ref, o_ref, acc_ref,
                    *, softmax_cols):
    k = pl.program_id(1)

    @pl.when(k == 0)
    def _():
        acc_ref[...] = jnp.zeros_like(acc_ref)

    acc_ref[...] += jnp.dot(x_ref[...], w1_ref[...], preferred_element_type=jnp.float32)

    @pl.when(k == pl.num_programs(1) - 1)
    def _():
        fc = jnp.maximum(acc_ref[...] + b1_ref[...], 0.0)          # _head_to_tail
        head = jnp.dot(fc.astype(jnp.bfloat16), w2_ref[...],
                       preferred_element_type=jnp.float32) + b2_ref[...]
        # exact softmax over the first `softmax_cols` columns (cls scores);
        # the remaining columns carry the raw bbox regression deltas.
        col = jax.lax.broadcasted_iota(jnp.int32, head.shape, 1)
        is_cls = col < softmax_cols
        logits = jnp.where(is_cls, head, -jnp.inf)
        m = jnp.max(logits, axis=-1, keepdims=True)
        e = jnp.exp(logits - m)
        s = jnp.sum(e, axis=-1, keepdims=True)
        head = jnp.where(is_cls, e / s, head)
        o_ref[...] = head.astype(o_ref.dtype)


def fc_head_fused(x, w1, b1, w2, b2, *, softmax_cols):
    M, K = x.shape
    K1, hidden = w1.shape
    hid2, N = w2.shape
    assert K == K1 and hidden == hid2
    tm_cap, tk_cap = _matmul_tile_caps()
    hidP = _round_up(hidden, 128)
    Np = _round_up(N, 128)
    assert hidP <= 512 and Np <= 512
    tm, Mp = _pick_tile(M, tm_cap, 16)
    tk, Kp = _pick_tile(K, tk_cap, 128)

    xp = jnp.pad(x.astype(jnp.bfloat16), ((0, Mp - M), (0, Kp - K)))
    w1p = jnp.pad(w1.astype(jnp.bfloat16), ((0, Kp - K), (0, hidP - hidden)))
    b1p = jnp.pad(b1.astype(jnp.float32).reshape(1, hidden), ((0, 0), (0, hidP - hidden)))
    w2p = jnp.pad(w2.astype(jnp.bfloat16), ((0, hidP - hidden), (0, Np - N)))
    b2p = jnp.pad(b2.astype(jnp.float32).reshape(1, N), ((0, 0), (0, Np - N)))

    est = 2 * (tm * tk + tk * hidP) * 2 + hidP * Np * 2 + tm * hidP * 4 + tm * Np * 4 * 2
    out = pl.pallas_call(
        functools.partial(_fc_head_kernel, softmax_cols=softmax_cols),
        out_shape=jax.ShapeDtypeStruct((Mp, Np), jnp.float32),
        grid=(Mp // tm, Kp // tk),
        in_specs=[
            pl.BlockSpec((tm, tk), lambda i, k: (i, k)),
            pl.BlockSpec((tk, hidP), lambda i, k: (k, 0)),
            pl.BlockSpec((1, hidP), lambda i, k: (0, 0)),
            pl.BlockSpec((hidP, Np), lambda i, k: (0, 0)),
            pl.BlockSpec((1, Np), lambda i, k: (0, 0)),
        ],
        out_specs=pl.BlockSpec((tm, Np), lambda i, k: (i, 0)),
        scratch_shapes=[pltpu.VMEM((tm, hidP), jnp.float32)],
        compiler_params=pltpu.CompilerParams(
            dimension_semantics=("parallel", "arbitrary"),
            vmem_limit_bytes=_vmem_limit(est)),
    )(xp, w1p, b1p, w2p, b2p)
    return out[:M, :N]


# ----------------------------------------------------------------------------
# RPN proposal machinery (JAX glue, tiny tensors)
# ----------------------------------------------------------------------------
def generate_anchors(Hf, Wf, stride=16, scales=(8.0, 16.0, 32.0)):
    ctr = (stride - 1.0) / 2.0
    base = []
    for s in scales:
        size = stride * s
        half = 0.5 * (size - 1.0)
        base.append([ctr - half, ctr - half, ctr + half, ctr + half])
    base_anchors = jnp.array(base, dtype=jnp.float32)                    # (A, 4)
    sx = jnp.arange(Wf, dtype=jnp.float32) * stride
    sy = jnp.arange(Hf, dtype=jnp.float32) * stride
    gy, gx = jnp.meshgrid(sy, sx, indexing="ij")
    shifts = jnp.stack([gx, gy, gx, gy], axis=-1).reshape(-1, 4)         # (Hf*Wf, 4)
    return (shifts[:, None, :] + base_anchors[None, :, :]).reshape(-1, 4)


def bbox_transform_inv(boxes, deltas):
    widths = boxes[:, 2] - boxes[:, 0] + 1.0
    heights = boxes[:, 3] - boxes[:, 1] + 1.0
    ctr_x = boxes[:, 0] + 0.5 * widths
    ctr_y = boxes[:, 1] + 0.5 * heights
    dx, dy = deltas[:, 0], deltas[:, 1]
    dw = jnp.minimum(deltas[:, 2], BBOX_XFORM_CLIP)   # clamp exp() args like the ref impl
    dh = jnp.minimum(deltas[:, 3], BBOX_XFORM_CLIP)
    pcx = dx * widths + ctr_x
    pcy = dy * heights + ctr_y
    pw = jnp.exp(dw) * widths
    ph = jnp.exp(dh) * heights
    return jnp.stack(
        [pcx - 0.5 * pw, pcy - 0.5 * ph, pcx + 0.5 * pw, pcy + 0.5 * ph], axis=1)


def clip_boxes(boxes, im_info):
    h, w = im_info[0], im_info[1]
    return jnp.stack(
        [jnp.clip(boxes[:, 0], 0.0, w - 1.0),
         jnp.clip(boxes[:, 1], 0.0, h - 1.0),
         jnp.clip(boxes[:, 2], 0.0, w - 1.0),
         jnp.clip(boxes[:, 3], 0.0, h - 1.0)], axis=1)


# ----------------------------------------------------------------------------
# RoIAlign as a batched bf16 one-hot bilinear matmul (MXU gather)
# ----------------------------------------------------------------------------
def roi_align_onehot(feat_nhwc, rois, pool_size, spatial_scale):
    """feat_nhwc: (B, Hf, Wf, Cp); rois: (B, R, 5).  Returns (B*R, P*P, Cp) bf16."""
    B, Hf, Wf, Cp = feat_nhwc.shape
    R = rois.shape[1]
    P = pool_size
    boxes = rois[..., 1:5].astype(jnp.float32) * spatial_scale           # (B, R, 4)
    x1, y1, x2, y2 = boxes[..., 0], boxes[..., 1], boxes[..., 2], boxes[..., 3]
    bw = (x2 - x1) / P
    bh = (y2 - y1) / P
    centers = jnp.arange(P, dtype=jnp.float32) + 0.5
    gx = x1[..., None, None] + centers[None, None, None, :] * bw[..., None, None]
    gy = y1[..., None, None] + centers[None, None, :, None] * bh[..., None, None]
    gx = jnp.broadcast_to(gx, (B, R, P, P))
    gy = jnp.broadcast_to(gy, (B, R, P, P))
    x0 = jnp.floor(gx)
    y0 = jnp.floor(gy)
    wx1, wy1 = gx - x0, gy - y0
    wx0, wy0 = 1.0 - wx1, 1.0 - wy1
    x0i = jnp.clip(x0, 0, Wf - 1).astype(jnp.int32)
    x1i = jnp.clip(x0 + 1, 0, Wf - 1).astype(jnp.int32)
    y0i = jnp.clip(y0, 0, Hf - 1).astype(jnp.int32)
    y1i = jnp.clip(y0 + 1, 0, Hf - 1).astype(jnp.int32)

    hw = jnp.arange(Hf * Wf, dtype=jnp.int32)

    def corner(yi, xi, wgt):
        idx = yi * Wf + xi                                               # (B, R, P, P)
        return ((idx[..., None] == hw).astype(jnp.bfloat16)
                * wgt[..., None].astype(jnp.bfloat16))

    # TODO(synk): single bilinear sample per bin (sampling_ratio=1), not the torchvision
    # grid-and-average RoIAlign.
    # TODO(synk): for realistic Hf*Wf the dense one-hot should become a scalar-prefetch
    # row gather (PrefetchScalarGridSpec + pl.Element row indices) instead of a matmul.
    onehot = (corner(y0i, x0i, wy0 * wx0) + corner(y0i, x1i, wy0 * wx1)
              + corner(y1i, x0i, wy1 * wx0) + corner(y1i, x1i, wy1 * wx1))
    onehot = onehot.reshape(B, R * P * P, Hf * Wf)
    feat_flat = feat_nhwc.reshape(B, Hf * Wf, Cp)
    pooled = pallas_bmm(onehot, feat_flat, out_dtype=jnp.bfloat16)       # (B, R*P*P, Cp)
    return pooled.reshape(B * R, P * P, Cp)


# ----------------------------------------------------------------------------
# Faster R-CNN forward (eval mode)
# ----------------------------------------------------------------------------
def faster_rcnn_forward(params, im_data, im_info, gt_boxes, num_boxes,
                        n_classes=5, num_anchors=3, pool_size=7,
                        post_nms_topN=8, feat_stride=16):
    del gt_boxes, num_boxes          # training-branch only (losses); eval mode here
    b = im_data.shape[0]
    A = num_anchors

    # single layout change at the boundary; everything downstream is NHWC
    x_nhwc = jnp.transpose(im_data, (0, 2, 3, 1))

    # --- RCNN_base (synthetic backbone -> 1/16 feature map, channels padded to 128) ---
    base_feat = conv2d_3x3_nhwc(x_nhwc, params["base_w"], params["base_b"],
                                relu=True, out_dtype=jnp.bfloat16)       # (b, Hf, Wf, Cp)
    _, Hf, Wf, Cp = base_feat.shape
    C = params["base_w"].shape[0]

    # --- RCNN_rpn: 3x3 conv + relu with the 1x1 cls/bbox heads fused into the epilogue.
    # rpn_feat never leaves VMEM; only the (6A -> 128)-wide head map is written to HBM.
    rpn_conv_w = jnp.pad(params["rpn_conv_w"], ((0, 0), (0, Cp - C), (0, 0), (0, 0)))
    w_cls = params["rpn_cls_w"].reshape(2 * A, C).T                      # (C, 2A)
    w_box = params["rpn_bbox_w"].reshape(4 * A, C).T                     # (C, 4A)
    w_rpn = jnp.concatenate([w_cls, w_box], axis=1)                      # (C, 6A)
    b_rpn = jnp.concatenate([params["rpn_cls_b"], params["rpn_bbox_b"]])
    rpn_head = conv2d_3x3_nhwc(base_feat, rpn_conv_w, params["rpn_conv_b"],
                               relu=True, out_dtype=jnp.float32,
                               head_w=w_rpn, head_b=b_rpn)               # (b, Hf, Wf, 128)

    rpn_cls = rpn_head[..., :2 * A]                                      # bg=[:A], fg=[A:2A]
    deltas = rpn_head[..., 2 * A:6 * A].reshape(b, Hf * Wf * A, 4)
    # fg prob over {bg, fg} == sigmoid(fg_logit - bg_logit)  (replaces the N=2 softmax)
    fg_scores = jax.nn.sigmoid(rpn_cls[..., A:] - rpn_cls[..., :A]).reshape(b, -1)

    anchors = generate_anchors(Hf, Wf, feat_stride)                      # (Hf*Wf*A, 4)

    def per_image(deltas_i, scores_i, info_i):
        props = bbox_transform_inv(anchors, deltas_i)
        props = clip_boxes(props, info_i)
        # TODO(synk): the proposal layer's NMS has no clean Pallas equivalent; proposals
        # are selected by plain top-k foreground score instead.
        _, idx = jax.lax.top_k(scores_i, post_nms_topN)
        return props[idx]

    props = jax.vmap(per_image)(deltas, fg_scores, im_info)              # (b, topN, 4)
    batch_idx = jnp.broadcast_to(
        jnp.arange(b, dtype=jnp.float32)[:, None, None], (b, post_nms_topN, 1))
    rois = jnp.concatenate([batch_idx, props], axis=2)                   # (b, topN, 5)

    rpn_loss_cls = 0
    rpn_loss_bbox = 0

    # --- RoIAlign (cfg.POOLING_MODE == 'align') via batched one-hot MXU gather ---
    pooled_feat = roi_align_onehot(base_feat, rois, pool_size,
                                   1.0 / feat_stride)                    # (b*topN, P*P, Cp)

    # --- _head_to_tail + fused cls/bbox heads + class softmax, in one kernel ---
    R_tot = pooled_feat.shape[0]
    flat = pooled_feat.reshape(R_tot, pool_size * pool_size * Cp)        # (ph, pw, Cp) order
    hidden = params["fc_w"].shape[1]
    fc_w = params["fc_w"].reshape(pool_size, pool_size, C, hidden)
    fc_w = jnp.pad(fc_w, ((0, 0), (0, 0), (0, Cp - C), (0, 0)))
    fc_w = fc_w.reshape(pool_size * pool_size * Cp, hidden)
    w_head = jnp.concatenate([params["cls_w"], params["bbox_w"]], axis=1)  # (hid, 5n)
    b_head = jnp.concatenate([params["cls_b"], params["bbox_b"]])

    head = fc_head_fused(flat, fc_w, params["fc_b"], w_head, b_head,
                         softmax_cols=n_classes)                         # (R_tot, 5n) f32
    cls_prob = head[:, :n_classes].reshape(b, post_nms_topN, -1)
    bbox_pred = head[:, n_classes:5 * n_classes].reshape(b, post_nms_topN, -1)

    RCNN_loss_cls = 0
    RCNN_loss_bbox = 0
    rois_label = None   # eval mode
    # TODO(synk): training branch (_ProposalTargetLayer, cross-entropy / smooth-L1 losses)
    # is not implemented; eval path only.
    return (rois, cls_prob, bbox_pred, rpn_loss_cls, rpn_loss_bbox,
            RCNN_loss_cls, RCNN_loss_bbox, rois_label)


# ----------------------------------------------------------------------------
# Deterministic parameter init (mirrors normal_init: N(0, 0.01), bbox N(0, 0.001))
# ----------------------------------------------------------------------------
def init_params(key, in_ch=3, base_ch=32, num_anchors=3, n_classes=5,
                hidden=64, pool=7):
    ks = jax.random.split(key, 7)

    def nrm(k, shape, std):
        return std * jax.random.normal(k, shape, jnp.float32)

    return {
        "base_w": nrm(ks[0], (base_ch, in_ch, 3, 3), 0.01),
        "base_b": jnp.zeros((base_ch,), jnp.float32),
        "rpn_conv_w": nrm(ks[1], (base_ch, base_ch, 3, 3), 0.01),
        "rpn_conv_b": jnp.zeros((base_ch,), jnp.float32),
        "rpn_cls_w": nrm(ks[2], (2 * num_anchors, base_ch, 1, 1), 0.01),
        "rpn_cls_b": jnp.zeros((2 * num_anchors,), jnp.float32),
        "rpn_bbox_w": nrm(ks[3], (4 * num_anchors, base_ch, 1, 1), 0.01),
        "rpn_bbox_b": jnp.zeros((4 * num_anchors,), jnp.float32),
        # fc consumes pooled features flattened in (ph, pw, C) NHWC order
        "fc_w": nrm(ks[4], (pool * pool * base_ch, hidden), 0.01),
        "fc_b": jnp.zeros((hidden,), jnp.float32),
        "cls_w": nrm(ks[5], (hidden, n_classes), 0.01),
        "cls_b": jnp.zeros((n_classes,), jnp.float32),
        "bbox_w": nrm(ks[6], (hidden, 4 * n_classes), 0.001),   # std 0.001 for bbox_pred
        "bbox_b": jnp.zeros((4 * n_classes,), jnp.float32),
    }


if __name__ == "__main__":
    key = jax.random.PRNGKey(0)
    k_par, k_im, k_gt = jax.random.split(key, 3)

    B, Hf, Wf = 2, 16, 16            # feature map at stride 16 => 256x256 image
    n_classes = 5                    # e.g. ('__background__','aeroplane','bicycle','bird','car')
    params = init_params(k_par, n_classes=n_classes)

    im_data = jax.random.normal(k_im, (B, 3, Hf, Wf), jnp.float32)       # NCHW
    im_info = jnp.array([[256.0, 256.0, 1.0], [256.0, 256.0, 1.0]], jnp.float32)
    gt_boxes = jnp.zeros((B, 20, 5), jnp.float32).at[:, :3, :].set(
        jnp.abs(jax.random.normal(k_gt, (B, 3, 5))) * 50.0)              # unused in eval
    num_boxes = jnp.array([3, 2], jnp.int32)                             # unused in eval

    fwd = jax.jit(functools.partial(faster_rcnn_forward, n_classes=n_classes))
    (rois, cls_prob, bbox_pred, rpn_lc, rpn_lb,
     rcnn_lc, rcnn_lb, rois_label) = fwd(params, im_data, im_info, gt_boxes, num_boxes)

    jax.block_until_ready((rois, cls_prob, bbox_pred))
    assert rois.shape == (B, 8, 5)
    assert cls_prob.shape == (B, 8, n_classes)
    assert bbox_pred.shape == (B, 8, 4 * n_classes)
    assert bool(jnp.all(jnp.isfinite(cls_prob)))
    print("KERNEL_OK")
</pallas_src>

<mosaic_0001>
module attributes {stable_mosaic.version = 11 : i64} {
  func.func @_conv3x3_kernel(%arg0: i32, %arg1: memref<1x18x18x3xbf16, #tpu.memory_space<vmem>>, %arg2: memref<27x128xbf16, #tpu.memory_space<vmem>>, %arg3: memref<1x128xf32, #tpu.memory_space<vmem>>, %arg4: memref<1x16x16x128xbf16, #tpu.memory_space<vmem>>) attributes {dimension_semantics = [#tpu.dimension_semantics<parallel>], iteration_bounds = array<i64: 2>, scalar_prefetch = 0 : i64, scratch_operands = 0 : i64, tpu.core_type = #tpu.core_type<tc>, window_params = [{transform_indices = @transform_0, window_bounds = array<i64: 1, 18, 18, 3>}, {pipeline_mode = #tpu.pipeline_mode<synchronous>, transform_indices = @transform_1, window_bounds = array<i64: 27, 128>}, {pipeline_mode = #tpu.pipeline_mode<synchronous>, transform_indices = @transform_2, window_bounds = array<i64: 1, 128>}, {transform_indices = @transform_3, window_bounds = array<i64: 1, 16, 16, 128>}]} {
    %c0 = arith.constant 0 : index
    %c0_0 = arith.constant 0 : index
    %c0_1 = arith.constant 0 : index
    %c0_2 = arith.constant 0 : index
    %0 = vector.load %arg1[%c0, %c0_0, %c0_1, %c0_2] : memref<1x18x18x3xbf16, #tpu.memory_space<vmem>>, vector<1x16x16x3xbf16>
    %1 = vector.shape_cast %0 : vector<1x16x16x3xbf16> to vector<16x16x3xbf16>
    %2 = vector.shape_cast %1 : vector<16x16x3xbf16> to vector<256x3xbf16>
    %c0_3 = arith.constant 0 : index
    %c0_4 = arith.constant 0 : index
    %c1 = arith.constant 1 : index
    %c0_5 = arith.constant 0 : index
    %3 = vector.load %arg1[%c0_3, %c0_4, %c1, %c0_5] : memref<1x18x18x3xbf16, #tpu.memory_space<vmem>>, vector<1x16x16x3xbf16>
    %4 = vector.shape_cast %3 : vector<1x16x16x3xbf16> to vector<16x16x3xbf16>
    %5 = vector.shape_cast %4 : vector<16x16x3xbf16> to vector<256x3xbf16>
    %c0_6 = arith.constant 0 : index
    %c0_7 = arith.constant 0 : index
    %c2 = arith.constant 2 : index
    %c0_8 = arith.constant 0 : index
    %6 = vector.load %arg1[%c0_6, %c0_7, %c2, %c0_8] : memref<1x18x18x3xbf16, #tpu.memory_space<vmem>>, vector<1x16x16x3xbf16>
    %7 = vector.shape_cast %6 : vector<1x16x16x3xbf16> to vector<16x16x3xbf16>
    %8 = vector.shape_cast %7 : vector<16x16x3xbf16> to vector<256x3xbf16>
    %c0_9 = arith.constant 0 : index
    %c1_10 = arith.constant 1 : index
    %c0_11 = arith.constant 0 : index
    %c0_12 = arith.constant 0 : index
    %9 = vector.load %arg1[%c0_9, %c1_10, %c0_11, %c0_12] : memref<1x18x18x3xbf16, #tpu.memory_space<vmem>>, vector<1x16x16x3xbf16>
    %10 = vector.shape_cast %9 : vector<1x16x16x3xbf16> to vector<16x16x3xbf16>
    %11 = vector.shape_cast %10 : vector<16x16x3xbf16> to vector<256x3xbf16>
    %c0_13 = arith.constant 0 : index
    %c1_14 = arith.constant 1 : index
    %c1_15 = arith.constant 1 : index
    %c0_16 = arith.constant 0 : index
    %12 = vector.load %arg1[%c0_13, %c1_14, %c1_15, %c0_16] : memref<1x18x18x3xbf16, #tpu.memory_space<vmem>>, vector<1x16x16x3xbf16>
    %13 = vector.shape_cast %12 : vector<1x16x16x3xbf16> to vector<16x16x3xbf16>
    %14 = vector.shape_cast %13 : vector<16x16x3xbf16> to vector<256x3xbf16>
    %c0_17 = arith.constant 0 : index
    %c1_18 = arith.constant 1 : index
    %c2_19 = arith.constant 2 : index
    %c0_20 = arith.constant 0 : index
    %15 = vector.load %arg1[%c0_17, %c1_18, %c2_19, %c0_20] : memref<1x18x18x3xbf16, #tpu.memory_space<vmem>>, vector<1x16x16x3xbf16>
    %16 = vector.shape_cast %15 : vector<1x16x16x3xbf16> to vector<16x16x3xbf16>
    %17 = vector.shape_cast %16 : vector<16x16x3xbf16> to vector<256x3xbf16>
    %c0_21 = arith.constant 0 : index
    %c2_22 = arith.constant 2 : index
    %c0_23 = arith.constant 0 : index
    %c0_24 = arith.constant 0 : index
    %18 = vector.load %arg1[%c0_21, %c2_22, %c0_23, %c0_24] : memref<1x18x18x3xbf16, #tpu.memory_space<vmem>>, vector<1x16x16x3xbf16>
    %19 = vector.shape_cast %18 : vector<1x16x16x3xbf16> to vector<16x16x3xbf16>
    %20 = vector.shape_cast %19 : vector<16x16x3xbf16> to vector<256x3xbf16>
    %c0_25 = arith.constant 0 : index
    %c2_26 = arith.constant 2 : index
    %c1_27 = arith.constant 1 : index
    %c0_28 = arith.constant 0 : index
    %21 = vector.load %arg1[%c0_25, %c2_26, %c1_27, %c0_28] : memref<1x18x18x3xbf16, #tpu.memory_space<vmem>>, vector<1x16x16x3xbf16>
    %22 = vector.shape_cast %21 : vector<1x16x16x3xbf16> to vector<16x16x3xbf16>
    %23 = vector.shape_cast %22 : vector<16x16x3xbf16> to vector<256x3xbf16>
    %c0_29 = arith.constant 0 : index
    %c2_30 = arith.constant 2 : index
    %c2_31 = arith.constant 2 : index
    %c0_32 = arith.constant 0 : index
    %24 = vector.load %arg1[%c0_29, %c2_30, %c2_31, %c0_32] : memref<1x18x18x3xbf16, #tpu.memory_space<vmem>>, vector<1x16x16x3xbf16>
    %25 = vector.shape_cast %24 : vector<1x16x16x3xbf16> to vector<16x16x3xbf16>
    %26 = vector.shape_cast %25 : vector<16x16x3xbf16> to vector<256x3xbf16>
    %27 = tpu.concatenate %2, %5, %8, %11, %14, %17, %20, %23, %26 in 1 : vector<256x3xbf16>, vector<256x3xbf16>, vector<256x3xbf16>, vector<256x3xbf16>, vector<256x3xbf16>, vector<256x3xbf16>, vector<256x3xbf16>, vector<256x3xbf16>, vector<256x3xbf16> -> vector<256x27xbf16>
    %c0_33 = arith.constant 0 : index
    %c0_34 = arith.constant 0 : index
    %28 = vector.load %arg2[%c0_33, %c0_34] : memref<27x128xbf16, #tpu.memory_space<vmem>>, vector<27x128xbf16>
    %cst = arith.constant dense<0.000000e+00> : vector<256x128xf32>
    %29 = tpu.matmul %27, %28, %cst {dimension_numbers = #tpu.dot_dimension_numbers<[1], [0], [0], [1], [0, 0, 1, 1], [], []>} : vector<256x27xbf16>, vector<27x128xbf16>, vector<256x128xf32> -> vector<256x128xf32>
    %c0_35 = arith.constant 0 : index
    %c0_36 = arith.constant 0 : index
    %30 = vector.load %arg3[%c0_35, %c0_36] : memref<1x128xf32, #tpu.memory_space<vmem>>, vector<1x128xf32>
    %31 = vector.broadcast %30 : vector<1x128xf32> to vector<256x128xf32>
    %32 = arith.addf %29, %31 : vector<256x128xf32>
    %cst_37 = arith.constant 0.000000e+00 : f32
    %33 = vector.broadcast %cst_37 : f32 to vector<256x128xf32>
    %34 = arith.maximumf %32, %33 : vector<256x128xf32>
    %35 = vector.shape_cast %34 : vector<256x128xf32> to vector<16x16x128xf32>
    %36 = arith.truncf %35 : vector<16x16x128xf32> to vector<16x16x128xbf16>
    %c0_38 = arith.constant 0 : index
    %c0_39 = arith.constant 0 : index
    %c0_40 = arith.constant 0 : index
    %c0_41 = arith.constant 0 : index
    %37 = vector.load %arg4[%c0_38, %c0_39, %c0_40, %c0_41] : memref<1x16x16x128xbf16, #tpu.memory_space<vmem>>, vector<1x16x16x128xbf16>
    %38 = vector.shape_cast %37 : vector<1x16x16x128xbf16> to vector<16x16x128xbf16>
    %39 = vector.shape_cast %36 : vector<16x16x128xbf16> to vector<1x16x16x128xbf16>
    tpu.vector_store %arg4[%c0_38, %c0_39, %c0_40, %c0_41], %39 {strides = array<i32>} : memref<1x16x16x128xbf16, #tpu.memory_space<vmem>>, vector<1x16x16x128xbf16>,
    return
  }
  func.func @transform_0(%arg0: i32) -> (i32, i32, i32, i32) {
    %c0_i32 = arith.constant 0 : i32
    %c0_i32_0 = arith.constant 0 : i32
    %c0_i32_1 = arith.constant 0 : i32
    %c0_i32_2 = arith.constant 0 : i32
    return %arg0, %c0_i32, %c0_i32_0, %c0_i32_1 : i32, i32, i32, i32
  }
  func.func @transform_1(%arg0: i32) -> (i32, i32) {
    %c0_i32 = arith.constant 0 : i32
    %c0_i32_0 = arith.constant 0 : i32
    %c0_i32_1 = arith.constant 0 : i32
    return %c0_i32, %c0_i32_0 : i32, i32
  }
  func.func @transform_2(%arg0: i32) -> (i32, i32) {
    %c0_i32 = arith.constant 0 : i32
    %c0_i32_0 = arith.constant 0 : i32
    %c0_i32_1 = arith.constant 0 : i32
    return %c0_i32, %c0_i32_0 : i32, i32
  }
  func.func @transform_3(%arg0: i32) -> (i32, i32, i32, i32) {
    %c0_i32 = arith.constant 0 : i32
    %c0_i32_0 = arith.constant 0 : i32
    %c0_i32_1 = arith.constant 0 : i32
    %c0_i32_2 = arith.constant 0 : i32
    return %arg0, %c0_i32, %c0_i32_0, %c0_i32_1 : i32, i32, i32, i32
  }
}

module attributes {stable_mosaic.version = 11 : i64} {
  func.func @_conv3x3_head_kernel(%arg0: i32, %arg1: memref<1x18x18x128xbf16, #tpu.memory_space<vmem>>, %arg2: memref<1152x128xbf16, #tpu.memory_space<vmem>>, %arg3: memref<1x128xf32, #tpu.memory_space<vmem>>, %arg4: memref<128x128xbf16, #tpu.memory_space<vmem>>, %arg5: memref<1x128xf32, #tpu.memory_space<vmem>>, %arg6: memref<1x16x16x128xf32, #tpu.memory_space<vmem>>) attributes {dimension_semantics = [#tpu.dimension_semantics<parallel>], iteration_bounds = array<i64: 2>, scalar_prefetch = 0 : i64, scratch_operands = 0 : i64, tpu.core_type = #tpu.core_type<tc>, window_params = [{transform_indices = @transform_0, window_bounds = array<i64: 1, 18, 18, 128>}, {pipeline_mode = #tpu.pipeline_mode<synchronous>, transform_indices = @transform_1, window_bounds = array<i64: 1152, 128>}, {pipeline_mode = #tpu.pipeline_mode<synchronous>, transform_indices = @transform_2, window_bounds = array<i64: 1, 128>}, {pipeline_mode = #tpu.pipeline_mode<synchronous>, transform_indices = @transform_3, window_bounds = array<i64: 128, 128>}, {pipeline_mode = #tpu.pipeline_mode<synchronous>, transform_indices = @transform_4, window_bounds = array<i64: 1, 128>}, {transform_indices = @transform_5, window_bounds = array<i64: 1, 16, 16, 128>}]} {
    %c0 = arith.constant 0 : index
    %c0_0 = arith.constant 0 : index
    %c0_1 = arith.constant 0 : index
    %c0_2 = arith.constant 0 : index
    %0 = vector.load %arg1[%c0, %c0_0, %c0_1, %c0_2] : memref<1x18x18x128xbf16, #tpu.memory_space<vmem>>, vector<1x16x16x128xbf16>
    %1 = vector.shape_cast %0 : vector<1x16x16x128xbf16> to vector<16x16x128xbf16>
    %2 = vector.shape_cast %1 : vector<16x16x128xbf16> to vector<256x128xbf16>
    %c0_3 = arith.constant 0 : index
    %c0_4 = arith.constant 0 : index
    %c1 = arith.constant 1 : index
    %c0_5 = arith.constant 0 : index
    %3 = vector.load %arg1[%c0_3, %c0_4, %c1, %c0_5] : memref<1x18x18x128xbf16, #tpu.memory_space<vmem>>, vector<1x16x16x128xbf16>
    %4 = vector.shape_cast %3 : vector<1x16x16x128xbf16> to vector<16x16x128xbf16>
    %5 = vector.shape_cast %4 : vector<16x16x128xbf16> to vector<256x128xbf16>
    %c0_6 = arith.constant 0 : index
    %c0_7 = arith.constant 0 : index
    %c2 = arith.constant 2 : index
    %c0_8 = arith.constant 0 : index
    %6 = vector.load %arg1[%c0_6, %c0_7, %c2, %c0_8] : memref<1x18x18x128xbf16, #tpu.memory_space<vmem>>, vector<1x16x16x128xbf16>
    %7 = vector.shape_cast %6 : vector<1x16x16x128xbf16> to vector<16x16x128xbf16>
    %8 = vector.shape_cast %7 : vector<16x16x128xbf16> to vector<256x128xbf16>
    %c0_9 = arith.constant 0 : index
    %c1_10 = arith.constant 1 : index
    %c0_11 = arith.constant 0 : index
    %c0_12 = arith.constant 0 : index
    %9 = vector.load %arg1[%c0_9, %c1_10, %c0_11, %c0_12] : memref<1x18x18x128xbf16, #tpu.memory_space<vmem>>, vector<1x16x16x128xbf16>
    %10 = vector.shape_cast %9 : vector<1x16x16x128xbf16> to vector<16x16x128xbf16>
    %11 = vector.shape_cast %10 : vector<16x16x128xbf16> to vector<256x128xbf16>
    %c0_13 = arith.constant 0 : index
    %c1_14 = arith.constant 1 : index
    %c1_15 = arith.constant 1 : index
    %c0_16 = arith.constant 0 : index
    %12 = vector.load %arg1[%c0_13, %c1_14, %c1_15, %c0_16] : memref<1x18x18x128xbf16, #tpu.memory_space<vmem>>, vector<1x16x16x128xbf16>
    %13 = vector.shape_cast %12 : vector<1x16x16x128xbf16> to vector<16x16x128xbf16>
    %14 = vector.shape_cast %13 : vector<16x16x128xbf16> to vector<256x128xbf16>
    %c0_17 = arith.constant 0 : index
    %c1_18 = arith.constant 1 : index
    %c2_19 = arith.constant 2 : index
    %c0_20 = arith.constant 0 : index
    %15 = vector.load %arg1[%c0_17, %c1_18, %c2_19, %c0_20] : memref<1x18x18x128xbf16, #tpu.memory_space<vmem>>, vector<1x16x16x128xbf16>
    %16 = vector.shape_cast %15 : vector<1x16x16x128xbf16> to vector<16x16x128xbf16>
    %17 = vector.shape_cast %16 : vector<16x16x128xbf16> to vector<256x128xbf16>
    %c0_21 = arith.constant 0 : index
    %c2_22 = arith.constant 2 : index
    %c0_23 = arith.constant 0 : index
    %c0_24 = arith.constant 0 : index
    %18 = vector.load %arg1[%c0_21, %c2_22, %c0_23, %c0_24] : memref<1x18x18x128xbf16, #tpu.memory_space<vmem>>, vector<1x16x16x128xbf16>
    %19 = vector.shape_cast %18 : vector<1x16x16x128xbf16> to vector<16x16x128xbf16>
    %20 = vector.shape_cast %19 : vector<16x16x128xbf16> to vector<256x128xbf16>
    %c0_25 = arith.constant 0 : index
    %c2_26 = arith.constant 2 : index
    %c1_27 = arith.constant 1 : index
    %c0_28 = arith.constant 0 : index
    %21 = vector.load %arg1[%c0_25, %c2_26, %c1_27, %c0_28] : memref<1x18x18x128xbf16, #tpu.memory_space<vmem>>, vector<1x16x16x128xbf16>
    %22 = vector.shape_cast %21 : vector<1x16x16x128xbf16> to vector<16x16x128xbf16>
    %23 = vector.shape_cast %22 : vector<16x16x128xbf16> to vector<256x128xbf16>
    %c0_29 = arith.constant 0 : index
    %c2_30 = arith.constant 2 : index
    %c2_31 = arith.constant 2 : index
    %c0_32 = arith.constant 0 : index
    %24 = vector.load %arg1[%c0_29, %c2_30, %c2_31, %c0_32] : memref<1x18x18x128xbf16, #tpu.memory_space<vmem>>, vector<1x16x16x128xbf16>
    %25 = vector.shape_cast %24 : vector<1x16x16x128xbf16> to vector<16x16x128xbf16>
    %26 = vector.shape_cast %25 : vector<16x16x128xbf16> to vector<256x128xbf16>
    %27 = tpu.concatenate %2, %5, %8, %11, %14, %17, %20, %23, %26 in 1 : vector<256x128xbf16>, vector<256x128xbf16>, vector<256x128xbf16>, vector<256x128xbf16>, vector<256x128xbf16>, vector<256x128xbf16>, vector<256x128xbf16>, vector<256x128xbf16>, vector<256x128xbf16> -> vector<256x1152xbf16>
    %c0_33 = arith.constant 0 : index
    %c0_34 = arith.constant 0 : index
    %28 = vector.load %arg2[%c0_33, %c0_34] : memref<1152x128xbf16, #tpu.memory_space<vmem>>, vector<1152x128xbf16>
    %cst = arith.constant dense<0.000000e+00> : vector<256x128xf32>
    %29 = tpu.matmul %27, %28, %cst {dimension_numbers = #tpu.dot_dimension_numbers<[1], [0], [0], [1], [0, 0, 1, 1], [], []>} : vector<256x1152xbf16>, vector<1152x128xbf16>, vector<256x128xf32> -> vector<256x128xf32>
    %c0_35 = arith.constant 0 : index
    %c0_36 = arith.constant 0 : index
    %30 = vector.load %arg3[%c0_35, %c0_36] : memref<1x128xf32, #tpu.memory_space<vmem>>, vector<1x128xf32>
    %31 = vector.broadcast %30 : vector<1x128xf32> to vector<256x128xf32>
    %32 = arith.addf %29, %31 : vector<256x128xf32>
    %cst_37 = arith.constant 0.000000e+00 : f32
    %33 = vector.broadcast %cst_37 : f32 to vector<256x128xf32>
    %34 = arith.maximumf %32, %33 : vector<256x128xf32>
    %35 = arith.truncf %34 : vector<256x128xf32> to vector<256x128xbf16>
    %c0_38 = arith.constant 0 : index
    %c0_39 = arith.constant 0 : index
    %36 = vector.load %arg4[%c0_38, %c0_39] : memref<128x128xbf16, #tpu.memory_space<vmem>>, vector<128x128xbf16>
    %cst_40 = arith.constant dense<0.000000e+00> : vector<256x128xf32>
    %37 = tpu.matmul %35, %36, %cst_40 {dimension_numbers = #tpu.dot_dimension_numbers<[1], [0], [0], [1], [0, 0, 1, 1], [], []>} : vector<256x128xbf16>, vector<128x128xbf16>, vector<256x128xf32> -> vector<256x128xf32>
    %c0_41 = arith.constant 0 : index
    %c0_42 = arith.constant 0 : index
    %38 = vector.load %arg5[%c0_41, %c0_42] : memref<1x128xf32, #tpu.memory_space<vmem>>, vector<1x128xf32>
    %39 = vector.broadcast %38 : vector<1x128xf32> to vector<256x128xf32>
    %40 = arith.addf %37, %39 : vector<256x128xf32>
    %41 = vector.shape_cast %40 : vector<256x128xf32> to vector<16x16x128xf32>
    %c0_43 = arith.constant 0 : index
    %c0_44 = arith.constant 0 : index
    %c0_45 = arith.constant 0 : index
    %c0_46 = arith.constant 0 : index
    %42 = vector.load %arg6[%c0_43, %c0_44, %c0_45, %c0_46] : memref<1x16x16x128xf32, #tpu.memory_space<vmem>>, vector<1x16x16x128xf32>
    %43 = vector.shape_cast %42 : vector<1x16x16x128xf32> to vector<16x16x128xf32>
    %44 = vector.shape_cast %41 : vector<16x16x128xf32> to vector<1x16x16x128xf32>
    tpu.vector_store %arg6[%c0_43, %c0_44, %c0_45, %c0_46], %44 {strides = array<i32>} : memref<1x16x16x128xf32, #tpu.memory_space<vmem>>, vector<1x16x16x128xf32>,
    return
  }
  func.func @transform_0(%arg0: i32) -> (i32, i32, i32, i32) {
    %c0_i32 = arith.constant 0 : i32
    %c0_i32_0 = arith.constant 0 : i32
    %c0_i32_1 = arith.constant 0 : i32
    %c0_i32_2 = arith.constant 0 : i32
    return %arg0, %c0_i32, %c0_i32_0, %c0_i32_1 : i32, i32, i32, i32
  }
  func.func @transform_1(%arg0: i32) -> (i32, i32) {
    %c0_i32 = arith.constant 0 : i32
    %c0_i32_0 = arith.constant 0 : i32
    %c0_i32_1 = arith.constant 0 : i32
    return %c0_i32, %c0_i32_0 : i32, i32
  }
  func.func @transform_2(%arg0: i32) -> (i32, i32) {
    %c0_i32 = arith.constant 0 : i32
    %c0_i32_0 = arith.constant 0 : i32
    %c0_i32_1 = arith.constant 0 : i32
    return %c0_i32, %c0_i32_0 : i32, i32
  }
  func.func @transform_3(%arg0: i32) -> (i32, i32) {
    %c0_i32 = arith.constant 0 : i32
    %c0_i32_0 = arith.constant 0 : i32
    %c0_i32_1 = arith.constant 0 : i32
    return %c0_i32, %c0_i32_0 : i32, i32
  }
  func.func @transform_4(%arg0: i32) -> (i32, i32) {
    %c0_i32 = arith.constant 0 : i32
    %c0_i32_0 = arith.constant 0 : i32
    %c0_i32_1 = arith.constant 0 : i32
    return %c0_i32, %c0_i32_0 : i32, i32
  }
  func.func @transform_5(%arg0: i32) -> (i32, i32, i32, i32) {
    %c0_i32 = arith.constant 0 : i32
    %c0_i32_0 = arith.constant 0 : i32
    %c0_i32_1 = arith.constant 0 : i32
    %c0_i32_2 = arith.constant 0 : i32
    return %arg0, %c0_i32, %c0_i32_0, %c0_i32_1 : i32, i32, i32, i32
  }
}

module attributes {stable_mosaic.version = 11 : i64} {
  func.func @_bmm_kernel(%arg0: i32, %arg1: i32, %arg2: i32, %arg3: memref<1x208x256xbf16, #tpu.memory_space<vmem>>, %arg4: memref<1x256x128xbf16, #tpu.memory_space<vmem>>, %arg5: memref<1x208x128xbf16, #tpu.memory_space<vmem>>, %arg6: memref<208x128xf32, #tpu.memory_space<vmem>>) attributes {dimension_semantics = [#tpu.dimension_semantics<parallel>, #tpu.dimension_semantics<parallel>, #tpu.dimension_semantics<arbitrary>], iteration_bounds = array<i64: 2, 2, 1>, scalar_prefetch = 0 : i64, scratch_operands = 1 : i64, tpu.core_type = #tpu.core_type<tc>, window_params = [{transform_indices = @transform_0, window_bounds = array<i64: 1, 208, 256>}, {transform_indices = @transform_1, window_bounds = array<i64: 1, 256, 128>}, {transform_indices = @transform_2, window_bounds = array<i64: 1, 208, 128>}]} {
    %c0_i32 = arith.constant 0 : i32
    %0 = arith.cmpi eq, %arg2, %c0_i32 : i32
    %1 = arith.extui %0 : i1 to i32
    %c0_i32_0 = arith.constant 0 : i32
    %2 = arith.cmpi ne, %1, %c0_i32_0 : i32
    scf.if %2 {
      %cst_12 = arith.constant 0.000000e+00 : f32
      %14 = vector.broadcast %cst_12 : f32 to vector<208x128xf32>
      %c0_13 = arith.constant 0 : index
      %c0_14 = arith.constant 0 : index
      %15 = vector.load %arg6[%c0_13, %c0_14] : memref<208x128xf32, #tpu.memory_space<vmem>>, vector<208x128xf32>
      tpu.vector_store %arg6[%c0_13, %c0_14], %14 {strides = array<i32>} : memref<208x128xf32, #tpu.memory_space<vmem>>, vector<208x128xf32>,
    } else {
    }
    %c0 = arith.constant 0 : index
    %c0_1 = arith.constant 0 : index
    %3 = vector.load %arg6[%c0, %c0_1] : memref<208x128xf32, #tpu.memory_space<vmem>>, vector<208x128xf32>
    %c0_2 = arith.constant 0 : index
    %c0_3 = arith.constant 0 : index
    %c0_4 = arith.constant 0 : index
    %4 = vector.load %arg3[%c0_2, %c0_3, %c0_4] : memref<1x208x256xbf16, #tpu.memory_space<vmem>>, vector<1x208x256xbf16>
    %5 = vector.shape_cast %4 : vector<1x208x256xbf16> to vector<208x256xbf16>
    %c0_5 = arith.constant 0 : index
    %c0_6 = arith.constant 0 : index
    %c0_7 = arith.constant 0 : index
    %6 = vector.load %arg4[%c0_5, %c0_6, %c0_7] : memref<1x256x128xbf16, #tpu.memory_space<vmem>>, vector<1x256x128xbf16>
    %7 = vector.shape_cast %6 : vector<1x256x128xbf16> to vector<256x128xbf16>
    %cst = arith.constant dense<0.000000e+00> : vector<208x128xf32>
    %8 = tpu.matmul %5, %7, %cst {dimension_numbers = #tpu.dot_dimension_numbers<[1], [0], [0], [1], [0, 0, 1, 1], [], []>} : vector<208x256xbf16>, vector<256x128xbf16>, vector<208x128xf32> -> vector<208x128xf32>
    %9 = arith.addf %3, %8 : vector<208x128xf32>
    %c0_8 = arith.constant 0 : index
    %c0_9 = arith.constant 0 : index
    %10 = vector.load %arg6[%c0_8, %c0_9] : memref<208x128xf32, #tpu.memory_space<vmem>>, vector<208x128xf32>
    tpu.vector_store %arg6[%c0_8, %c0_9], %9 {strides = array<i32>} : memref<208x128xf32, #tpu.memory_space<vmem>>, vector<208x128xf32>,
    %c0_i32_10 = arith.constant 0 : i32
    %11 = arith.cmpi eq, %arg2, %c0_i32_10 : i32
    %12 = arith.extui %11 : i1 to i32
    %c0_i32_11 = arith.constant 0 : i32
    %13 = arith.cmpi ne, %12, %c0_i32_11 : i32
    scf.if %13 {
      %c0_12 = arith.constant 0 : index
      %c0_13 = arith.constant 0 : index
      %14 = vector.load %arg6[%c0_12, %c0_13] : memref<208x128xf32, #tpu.memory_space<vmem>>, vector<208x128xf32>
      %15 = arith.truncf %14 : vector<208x128xf32> to vector<208x128xbf16>
      %c0_14 = arith.constant 0 : index
      %c0_15 = arith.constant 0 : index
      %c0_16 = arith.constant 0 : index
      %16 = vector.load %arg5[%c0_14, %c0_15, %c0_16] : memref<1x208x128xbf16, #tpu.memory_space<vmem>>, vector<1x208x128xbf16>
      %17 = vector.shape_cast %16 : vector<1x208x128xbf16> to vector<208x128xbf16>
      %18 = vector.shape_cast %15 : vector<208x128xbf16> to vector<1x208x128xbf16>
      tpu.vector_store %arg5[%c0_14, %c0_15, %c0_16], %18 {strides = array<i32>} : memref<1x208x128xbf16, #tpu.memory_space<vmem>>, vector<1x208x128xbf16>,
    } else {
    }
    return
  }
  func.func @transform_0(%arg0: i32, %arg1: i32, %arg2: i32) -> (i32, i32, i32) {
    %c0_i32 = arith.constant 0 : i32
    return %arg0, %arg1, %arg2 : i32, i32, i32
  }
  func.func @transform_1(%arg0: i32, %arg1: i32, %arg2: i32) -> (i32, i32, i32) {
    %c0_i32 = arith.constant 0 : i32
    %c0_i32_0 = arith.constant 0 : i32
    return %arg0, %arg2, %c0_i32 : i32, i32, i32
  }
  func.func @transform_2(%arg0: i32, %arg1: i32, %arg2: i32) -> (i32, i32, i32) {
    %c0_i32 = arith.constant 0 : i32
    %c0_i32_0 = arith.constant 0 : i32
    return %arg0, %arg1, %c0_i32 : i32, i32, i32
  }
}

module attributes {stable_mosaic.version = 11 : i64} {
  func.func @_fc_head_kernel(%arg0: i32, %arg1: i32, %arg2: memref<16x1664xbf16, #tpu.memory_space<vmem>>, %arg3: memref<1664x128xbf16, #tpu.memory_space<vmem>>, %arg4: memref<1x128xf32, #tpu.memory_space<vmem>>, %arg5: memref<128x128xbf16, #tpu.memory_space<vmem>>, %arg6: memref<1x128xf32, #tpu.memory_space<vmem>>, %arg7: memref<16x128xf32, #tpu.memory_space<vmem>>, %arg8: memref<16x128xf32, #tpu.memory_space<vmem>>) attributes {dimension_semantics = [#tpu.dimension_semantics<parallel>, #tpu.dimension_semantics<arbitrary>], iteration_bounds = array<i64: 1, 4>, scalar_prefetch = 0 : i64, scratch_operands = 1 : i64, tpu.core_type = #tpu.core_type<tc>, window_params = [{transform_indices = @transform_0, window_bounds = array<i64: 16, 1664>}, {transform_indices = @transform_1, window_bounds = array<i64: 1664, 128>}, {pipeline_mode = #tpu.pipeline_mode<synchronous>, transform_indices = @transform_2, window_bounds = array<i64: 1, 128>}, {pipeline_mode = #tpu.pipeline_mode<synchronous>, transform_indices = @transform_3, window_bounds = array<i64: 128, 128>}, {pipeline_mode = #tpu.pipeline_mode<synchronous>, transform_indices = @transform_4, window_bounds = array<i64: 1, 128>}, {transform_indices = @transform_5, window_bounds = array<i64: 16, 128>}]} {
    %c0_i32 = arith.constant 0 : i32
    %0 = arith.cmpi eq, %arg1, %c0_i32 : i32
    %1 = arith.extui %0 : i1 to i32
    %c0_i32_0 = arith.constant 0 : i32
    %2 = arith.cmpi ne, %1, %c0_i32_0 : i32
    scf.if %2 {
      %cst_9 = arith.constant 0.000000e+00 : f32
      %12 = vector.broadcast %cst_9 : f32 to vector<16x128xf32>
      %c0_10 = arith.constant 0 : index
      %c0_11 = arith.constant 0 : index
      %13 = vector.load %arg8[%c0_10, %c0_11] : memref<16x128xf32, #tpu.memory_space<vmem>>, vector<16x128xf32>
      tpu.vector_store %arg8[%c0_10, %c0_11], %12 {strides = array<i32>} : memref<16x128xf32, #tpu.memory_space<vmem>>, vector<16x128xf32>,
    } else {
    }
    %c0 = arith.constant 0 : index
    %c0_1 = arith.constant 0 : index
    %3 = vector.load %arg8[%c0, %c0_1] : memref<16x128xf32, #tpu.memory_space<vmem>>, vector<16x128xf32>
    %c0_2 = arith.constant 0 : index
    %c0_3 = arith.constant 0 : index
    %4 = vector.load %arg2[%c0_2, %c0_3] : memref<16x1664xbf16, #tpu.memory_space<vmem>>, vector<16x1664xbf16>
    %c0_4 = arith.constant 0 : index
    %c0_5 = arith.constant 0 : index
    %5 = vector.load %arg3[%c0_4, %c0_5] : memref<1664x128xbf16, #tpu.memory_space<vmem>>, vector<1664x128xbf16>
    %cst = arith.constant dense<0.000000e+00> : vector<16x128xf32>
    %6 = tpu.matmul %4, %5, %cst {dimension_numbers = #tpu.dot_dimension_numbers<[1], [0], [0], [1], [0, 0, 1, 1], [], []>} : vector<16x1664xbf16>, vector<1664x128xbf16>, vector<16x128xf32> -> vector<16x128xf32>
    %7 = arith.addf %3, %6 : vector<16x128xf32>
    %c0_6 = arith.constant 0 : index
    %c0_7 = arith.constant 0 : index
    %8 = vector.load %arg8[%c0_6, %c0_7] : memref<16x128xf32, #tpu.memory_space<vmem>>, vector<16x128xf32>
    tpu.vector_store %arg8[%c0_6, %c0_7], %7 {strides = array<i32>} : memref<16x128xf32, #tpu.memory_space<vmem>>, vector<16x128xf32>,
    %c3_i32 = arith.constant 3 : i32
    %9 = arith.cmpi eq, %arg1, %c3_i32 : i32
    %10 = arith.extui %9 : i1 to i32
    %c0_i32_8 = arith.constant 0 : i32
    %11 = arith.cmpi ne, %10, %c0_i32_8 : i32
    scf.if %11 {
      %c0_9 = arith.constant 0 : index
      %c0_10 = arith.constant 0 : index
      %12 = vector.load %arg8[%c0_9, %c0_10] : memref<16x128xf32, #tpu.memory_space<vmem>>, vector<16x128xf32>
      %c0_11 = arith.constant 0 : index
      %c0_12 = arith.constant 0 : index
      %13 = vector.load %arg4[%c0_11, %c0_12] : memref<1x128xf32, #tpu.memory_space<vmem>>, vector<1x128xf32>
      %14 = vector.broadcast %13 : vector<1x128xf32> to vector<16x128xf32>
      %15 = arith.addf %12, %14 : vector<16x128xf32>
      %cst_13 = arith.constant 0.000000e+00 : f32
      %16 = vector.broadcast %cst_13 : f32 to vector<16x128xf32>
      %17 = arith.maximumf %15, %16 : vector<16x128xf32>
      %18 = arith.truncf %17 : vector<16x128xf32> to vector<16x128xbf16>
      %c0_14 = arith.constant 0 : index
      %c0_15 = arith.constant 0 : index
      %19 = vector.load %arg5[%c0_14, %c0_15] : memref<128x128xbf16, #tpu.memory_space<vmem>>, vector<128x128xbf16>
      %cst_16 = arith.constant dense<0.000000e+00> : vector<16x128xf32>
      %20 = tpu.matmul %18, %19, %cst_16 {dimension_numbers = #tpu.dot_dimension_numbers<[1], [0], [0], [1], [0, 0, 1, 1], [], []>} : vector<16x128xbf16>, vector<128x128xbf16>, vector<16x128xf32> -> vector<16x128xf32>
      %c0_17 = arith.constant 0 : index
      %c0_18 = arith.constant 0 : index
      %21 = vector.load %arg6[%c0_17, %c0_18] : memref<1x128xf32, #tpu.memory_space<vmem>>, vector<1x128xf32>
      %22 = vector.broadcast %21 : vector<1x128xf32> to vector<16x128xf32>
      %23 = arith.addf %20, %22 : vector<16x128xf32>
      %24 = tpu.iota {dimensions = array<i32: 1>} : vector<16x128xi32>
      %c5_i32 = arith.constant 5 : i32
      %25 = vector.broadcast %c5_i32 : i32 to vector<16x128xi32>
      %26 = arith.cmpi slt, %24, %25 : vector<16x128xi32>
      %cst_19 = arith.constant 0xFF800000 : f32
      %27 = vector.broadcast %cst_19 : f32 to vector<16x128xf32>
      %28 = arith.select %26, %23, %27 : vector<16x128xi1>, vector<16x128xf32>
      %cst_20 = arith.constant dense<0xFF800000> : vector<16xf32>
      %29 = vector.multi_reduction <maximumf>, %28, %cst_20 [1] : vector<16x128xf32> to vector<16xf32>
      %30 = vector.shape_cast %29 : vector<16xf32> to vector<16x1xf32>
      %31 = vector.broadcast %30 : vector<16x1xf32> to vector<16x128xf32>
      %32 = arith.subf %28, %31 : vector<16x128xf32>
      %33 = math.exp %32 : vector<16x128xf32>
      %cst_21 = arith.constant dense<0.000000e+00> : vector<16xf32>
      %34 = vector.multi_reduction <add>, %33, %cst_21 [1] : vector<16x128xf32> to vector<16xf32>
      %35 = vector.shape_cast %34 : vector<16xf32> to vector<16x1xf32>
      %36 = vector.broadcast %35 : vector<16x1xf32> to vector<16x128xf32>
      %37 = arith.divf %33, %36 : vector<16x128xf32>
      %38 = arith.select %26, %37, %23 : vector<16x128xi1>, vector<16x128xf32>
      %c0_22 = arith.constant 0 : index
      %c0_23 = arith.constant 0 : index
      %39 = vector.load %arg7[%c0_22, %c0_23] : memref<16x128xf32, #tpu.memory_space<vmem>>, vector<16x128xf32>
      tpu.vector_store %arg7[%c0_22, %c0_23], %38 {strides = array<i32>} : memref<16x128xf32, #tpu.memory_space<vmem>>, vector<16x128xf32>,
    } else {
    }
    return
  }
  func.func @transform_0(%arg0: i32, %arg1: i32) -> (i32, i32) {
    %c0_i32 = arith.constant 0 : i32
    return %arg0, %arg1 : i32, i32
  }
  func.func @transform_1(%arg0: i32, %arg1: i32) -> (i32, i32) {
    %c0_i32 = arith.constant 0 : i32
    %c0_i32_0 = arith.constant 0 : i32
    return %arg1, %c0_i32 : i32, i32
  }
  func.func @transform_2(%arg0: i32, %arg1: i32) -> (i32, i32) {
    %c0_i32 = arith.constant 0 : i32
    %c0_i32_0 = arith.constant 0 : i32
    %c0_i32_1 = arith.constant 0 : i32
    return %c0_i32, %c0_i32_0 : i32, i32
  }
  func.func @transform_3(%arg0: i32, %arg1: i32) -> (i32, i32) {
    %c0_i32 = arith.constant 0 : i32
    %c0_i32_0 = arith.constant 0 : i32
    %c0_i32_1 = arith.constant 0 : i32
    return %c0_i32, %c0_i32_0 : i32, i32
  }
  func.func @transform_4(%arg0: i32, %arg1: i32) -> (i32, i32) {
    %c0_i32 = arith.constant 0 : i32
    %c0_i32_0 = arith.constant 0 : i32
    %c0_i32_1 = arith.constant 0 : i32
    return %c0_i32, %c0_i32_0 : i32, i32
  }
  func.func @transform_5(%arg0: i32, %arg1: i32) -> (i32, i32) {
    %c0_i32 = arith.constant 0 : i32
    %c0_i32_0 = arith.constant 0 : i32
    return %arg0, %c0_i32 : i32, i32
  }
}

</mosaic_0001>

<bundles_post_ra>
// kernel: faster_rcnn_forward.4
= control target key start
LH: loop header
LB: loop body
LE: loop exit
PB: predicated region body
PF: predicated region fallthrough
CT: control target
= control target key end

     0   :  { %s4190_s12 = smov 0   ;;  %s6049_s0 = inlined_call_operand.vmem [shape: bf16[2,18,18,3], index: 0, kind: input, shape index: {}]   ;;  %s6050_s1 = inlined_call_operand.vmem [shape: bf16[27,128], index: 1, kind: input, shape index: {}]   ;;  %s6051_s2 = inlined_call_operand.vmem [shape: f32[1,128], index: 2, kind: input, shape index: {}]   ;;  %s6052_s3 = inlined_call_operand.vmem [shape: bf16[2,16,16,128], index: 3, kind: output, shape index: {}]  }
   0x1 LB: > { %s3490_s13 = sadd.s32 4294967295, %s4159_s12   ;;  %p3494_p0 = scmp.ge.s32.totalorder %s4159_s12, 1  ;;  %s4159_s12 = sphi %s4190_s12, %s13_s12  }
   0x2   : > { %p137_p1 = scmp.lt.s32.totalorder %s4159_s12, 3 }
   0x4   : > { %p138_p2 = pnand %p3494_p0, %p137_p1 }
   0x5   : > { %p161_p3 = scmp.lt.s32.totalorder (!%p138_p2), %s3490_s13, 1  ;;  %vm671_vm0 = vcmask (!%p138_p2), 1042432   ;;  %vm672_vm1 = vcmask (!%p138_p2), 1046532   ;;  %s4161_s18 = smov (!%p138_p2), 9   ;;  %vm220_vm3 = vsmask.f32 (!%p138_p2), 3328 }
   0x6   : > { %141 = sbr.rel (%p138_p2) target bundleno = 679 (0x2a7), region = 32  ;;  %vm4235_vm2 = vmor (!%p138_p2), %vm671_vm0, %vm672_vm1  ;;  %vm221_vm4 = vsmask.f32 (!%p138_p2), 7440  ;;  %s4162_s19 = smov (!%p138_p2), 6   ;;  %vm2740_vm6 = vcmask (!%p138_p2), 23552   ;;  %vm2789_vm7 = vcmask (!%p138_p2), 48128  }
   0x7   : > { %vm4293_vm5 = vmor (!%p138_p2), %vm220_vm3, %vm221_vm4  ;;  %s4163_s20 = smov (!%p138_p2), 3   ;;  %s4164_s21 = smov (!%p138_p2), 12   ;;  %vm2822_vm8 = vcmask (!%p138_p2), 72704   ;;  %vm2855_vm9 = vcmask (!%p138_p2), 97280   ;;  %vm2888_vm10 = vcmask (!%p138_p2), 121856   ;;  %vm2921_vm11 = vcmask (!%p138_p2), 146432  }
   0x8   : > { %s4165_s22 = smov (!%p138_p2), 15   ;;  %s4166_s23 = smov (!%p138_p2), 18   ;;  %vm2954_vm12 = vcmask (!%p138_p2), 171008   ;;  %vm2987_vm13 = vcmask (!%p138_p2), 195584   ;;  %vm3042_vm14 = vcmask (!%p138_p2), 220160   ;;  %vm3075_vm15 = vcmask (!%p138_p2), 1044480  }
   0x9   : > { %s4167_s24 = smov (!%p138_p2), 21   ;;  %s4168_s25 = smov (!%p138_p2), 24   ;;  %vm3076_vm0 = vcmask (!%p138_p2), 1045504  }
   0xd   : > { %s6058_s13 = smov (!%p161_p3, %s3490_s13), 1 }
   0xe   : > { %s4057_s14 = smul.u32 216, %s6058_s13  ;;  %s3871_s5 = sshll.u32 %s6058_s13, 7 }
   0xf   : > { %s6004_s8 = scalar_lea.vmem %s6052_s3, %s3871_s5 }
  0x10   : > { %s4204_s17 = scalar_lea.vmem %s6049_s0, %s4057_s14 }
  0x11   : > { %v3530_v0 = vld [vmem:[%s4204_s17 + $0x6c] sm:$0xf]  ;;  %v4208_v1 = vld [vmem:[%s4204_s17 + $0x70] sm:$0xf]  ;;  %v4221_v12 = vld [vmem:[%s4204_s17 + $0x64] sm:$0xf] }
  0x12   : > { %v3514_v2 = vld [vmem:[%s4204_s17 + $0xc] sm:$0xf]  ;;  %v1037_v3 = vshll.u32 %v4208_v1, 16  ;;  %v1041_v4 = vshrl.u32 %v4208_v1, 16  ;;  %v3730_v5 = vcombine.low %v3530_v0, %v4208_v1  ;;  %v1028_v6 = vshrl.u32 %v3530_v0, 16 }
  0x13   : > { %v4215_v7 = vld [vmem:[%s4204_s17 + $0x10] sm:$0xf]  ;;  %v1031_v8 = vshll.u32 %v3530_v0, 16  ;;  %v836_v15 = vshrl.u32 %v3514_v2, 16  ;;  %v839_v16 = vshll.u32 %v3514_v2, 16  ;;  %v732_v22 = vrot.slane %v4221_v12, 5 }
  0x14   : > { %v845_v9 = vshll.u32 %v4215_v7, 16  ;;  %v849_v10 = vshrl.u32 %v4215_v7, 16  ;;  %v3722_v11 = vcombine.low %v3514_v2, %v4215_v7  ;;  %v4223_v13 = vrot.slane %v1041_v4, 4  ;;  %2308 = vrot.lane.b32.xlu1 %v3730_v5, %s4161_s18  ;;  %v4227_v17 = vld [vmem:[%s4204_s17 + $0x68] sm:$0x1] }
  0x15   : > { %v1030_v14 = vrot.slane %v1028_v6, 4  ;;  %v1033_v18 = vrot.slane %v1031_v8, 5  ;;  %v615_v20 = vld [vmem:[%s4204_s17 + $0x60] sm:$0xe]  ;;  %v735_v23 = vrot.slane %v4227_v17, 5  ;;  %v838_v24 = vrot.slane %v836_v15, 4 }
  0x16   : > { %v4229_v19 = vrot.slane %v849_v10, 4  ;;  %2292 = vrot.lane.b32.xlu0 %v3722_v11, %s4161_s18  ;;  %v841_v25 = vrot.slane %v839_v16, 5  ;;  %v3506_v26 = vrot.slane %v615_v20, 9  ;;  %v4242_v27 = vld [vmem:[%s4204_s17 + $0x4] sm:$0xf]  ;;  %v425_v28 = vshll.u32 %v4221_v12, 16 }
  0x17   : > { %v1034_v29 = vor.u32 %v1033_v18, %v1030_v14  ;;  %v734_v30 = vrot.slane %v732_v22, 4  ;;  %v4246_v31 = vld [vmem:[%s4204_s17 + $0x8] sm:$0x1]  ;;  %v607_v32 = vld [vmem:[%s4204_s17] sm:$0xe]  ;;  %v676_v33 = vrot.slane %v4242_v27, 5 }
  0x18   : > { %v842_v34 = vor.u32 %v841_v25, %v838_v24  ;;  %v733_v35 = vsel %vm4235_vm2, %v3506_v26, %v732_v22  ;;  %v3498_v36 = vrot.slane %v607_v32, 9  ;;  %v679_v37 = vrot.slane %v4246_v31, 5  ;;  %v4254_v38 = vld [vmem:[%s4204_s17 + $0x70] sm:$0xf]  ;;  %v4257_v39 = vld [vmem:[%s4204_s17 + $0x74] sm:$0x1] }
  0x19   : > { %v4259_v40 = vrot.slane %v1034_v29, 4  ;;  %v736_v41 = vsel %vm4235_vm2, %v734_v30, %v735_v23  ;;  %v678_v42 = vrot.slane %v676_v33, 4  ;;  %v616_v43 = vld [vmem:[%s4204_s17 + $0x6c] sm:$0xe]  ;;  %v739_v44 = vrot.slane %v4254_v38, 5 }
  0x1a   : > { %v4265_v45 = vrot.slane %v842_v34, 4  ;;  %v3714_v46 = vcombine.low %v733_v35, %v736_v41  ;;  %v677_v47 = vsel %vm4235_vm2, %v3498_v36, %v676_v33  ;;  %v3507_v48 = vrot.slane %v616_v43, 9  ;;  %v175_v49 = vld [vmem:[%s4204_s17 + $0x10] sm:$0xf]  ;;  %v205_v50 = vld [vmem:[%s4204_s17 + $0x14] sm:$0x1] }
  0x1b   : > { %v680_v51 = vsel %vm4235_vm2, %v678_v42, %v679_v37  ;;  %v741_v52 = vrot.slane %v739_v44, 4  ;;  %v742_v53 = vrot.slane %v4257_v39, 5  ;;  %v608_v54 = vld [vmem:[%s4204_s17 + $0xc] sm:$0xe]  ;;  %v683_v55 = vrot.slane %v175_v49, 5 }
  0x1c   : > { %2212 = vrot.lane.b32.xlu1 %v3714_v46, %s4162_s19  ;;  %v3706_v56 = vcombine.low %v677_v47, %v680_v51  ;;  %v740_v57 = vsel %vm4235_vm2, %v3507_v48, %v739_v44  ;;  %v3499_v58 = vrot.slane %v608_v54, 9  ;;  %v686_v59 = vrot.slane %v205_v50, 5  ;;  %v174_v60 = vld [vmem:[%s4204_s17 + $0xc] sm:$0xf]  ;;  %v172_v2 = vld [vmem:[%s4204_s17] sm:$0xf] }
  0x1d   : > { %v743_v61 = vsel %vm4235_vm2, %v741_v52, %v742_v53  ;;  %v685_v62 = vrot.slane %v683_v55, 4  ;;  %v248_v63 = vshrl.u32 %v174_v60, 16  ;;  %v251_v0 = vshll.u32 %v174_v60, 16  ;;  %v190_v23 = vld [vmem:[%s4204_s17 + $0x6c] sm:$0xf] }
  0x1e   : > { %2196 = vrot.lane.b32.xlu0 %v3706_v56, %s4162_s19  ;;  %v3715_v4 = vcombine.low %v740_v57, %v743_v61  ;;  %v684_v5 = vsel %vm4235_vm2, %v3499_v58, %v683_v55  ;;  %v257_v6 = vshll.u32 %v175_v49, 16  ;;  %v261_v8 = vshrl.u32 %v175_v49, 16  ;;  %v188_v52 = vld [vmem:[%s4204_s17 + $0x60] sm:$0xf] }
  0x1f   : > { %v687_v10 = vsel %vm4235_vm2, %v685_v62, %v686_v59  ;;  %v250_v11 = vrot.slane %v248_v63, 4  ;;  %v253_v14 = vrot.slane %v251_v0, 5  ;;  %v267_v15 = vshll.u32 %v205_v50, 16 }
  0x20   : > { %2214 = vrot.lane.b32.xlu1 %v3715_v4, %s4162_s19  ;;  %v3707_v16 = vcombine.low %v684_v5, %v687_v10  ;;  %v259_v18 = vrot.slane %v257_v6, 5  ;;  %v263_v20 = vrot.slane %v261_v8, 4  ;;  %v224_v22 = vshrl.u32 %v172_v2, 16  ;;  %v3532_v4 = vld [vmem:[%s4204_s17 + $0x78] sm:$0xf] }
  0x21   : > { %v254_v24 = vor.u32 %v253_v14, %v250_v11  ;;  %v269_v25 = vrot.slane %v267_v15, 5  ;;  %v227_v26 = vshll.u32 %v172_v2, 16  ;;  %v233_v29 = vshll.u32 %v4242_v27, 16  ;;  %v4316_v10 = vld [vmem:[%s4204_s17 + $0x7c] sm:$0xf] }
  0x22   : > { %2198 = vrot.lane.b32.xlu0 %v3707_v16, %s4162_s19  ;;  %v264_v32 = vor.u32 %v263_v20, %v259_v18  ;;  %v226_v33 = vrot.slane %v224_v22, 4  ;;  %v237_v34 = vshrl.u32 %v4242_v27, 16  ;;  %v243_v35 = vshll.u32 %v4246_v31, 16 }
  0x23   : > { %v255_v36 = vrot.slane %v254_v24, 4  ;;  %v229_v37 = vrot.slane %v227_v26, 5  ;;  %v235_v41 = vrot.slane %v233_v29, 5  ;;  %v440_v42 = vshrl.u32 %v190_v23, 16 }
  0x24   : > { %v265_v43 = vrot.slane %v264_v32, 4  ;;  %v239_v44 = vrot.slane %v237_v34, 4  ;;  %v245_v46 = vrot.slane %v243_v35, 5  ;;  %v443_v47 = vshll.u32 %v190_v23, 16  ;;  %v4323_v23 = vld [vmem:[%s4204_s17 + $0x18] sm:$0xf] }
  0x25   : > { %v260_v48 = vsel %vm4293_vm5, %v255_v36, %v259_v18  ;;  %v230_v49 = vor.u32 %v229_v37, %v226_v33  ;;  %v442_v50 = vrot.slane %v440_v42, 4  ;;  %v449_v51 = vshll.u32 %v4254_v38, 16  ;;  %v4334_v35 = vld [vmem:[%s4204_s17 + $0x74] sm:$0x1] }
  0x26   : > { %v270_v27 = vsel %vm4293_vm5, %v265_v43, %v269_v25  ;;  %v240_v31 = vor.u32 %v239_v44, %v235_v41  ;;  %v445_v53 = vrot.slane %v443_v47, 5  ;;  %v453_v54 = vshrl.u32 %v4254_v38, 16 }
  0x27   : > { %v3691_v55 = vcombine.low %v260_v48, %v270_v27  ;;  %v231_v56 = vrot.slane %v230_v49, 4  ;;  %v451_v57 = vrot.slane %v449_v51, 5  ;;  %v459_v58 = vshll.u32 %v4257_v39, 16  ;;  %v4344_v48 = vld [vmem:[%s4204_s17 + $0x14] sm:$0x1] }
  0x28   : > { %v241_v59 = vrot.slane %v240_v31, 4  ;;  %v446_v60 = vor.u32 %v445_v53, %v442_v50  ;;  %v455_v61 = vrot.slane %v453_v54, 4  ;;  %v416_v62 = vshrl.u32 %v188_v52, 16 }
  0x29   : > { %2118 = vrot.lane.b32.xlu1 %v3691_v55, %s4163_s20  ;;  %v236_v63 = vsel %vm4293_vm5, %v231_v56, %v235_v41  ;;  %v461_v0 = vrot.slane %v459_v58, 5  ;;  %v419_v2 = vshll.u32 %v188_v52, 16  ;;  %v427_v38 = vrot.slane %v425_v28, 5 }
  0x2a   : > { %v246_v39 = vsel %vm4293_vm5, %v241_v59, %v245_v46  ;;  %v447_v5 = vrot.slane %v446_v60, 4  ;;  %v456_v6 = vor.u32 %v455_v61, %v451_v57  ;;  %v418_v8 = vrot.slane %v416_v62, 4 }
  0x2b   : > { %v3690_v11 = vcombine.low %v236_v63, %v246_v39  ;;  %v421_v14 = vrot.slane %v419_v2, 5  ;;  %v429_v15 = vshrl.u32 %v4221_v12, 16  ;;  %v435_v16 = vshll.u32 %v4227_v17, 16  ;;  %v4328_v12 = vld [vmem:[%s4204_s17 + $0x1c] sm:$0xf] }
  0x2c   : > { %v452_v28 = vsel %vm4293_vm5, %v447_v5, %v451_v57  ;;  %v457_v18 = vrot.slane %v456_v6, 4  ;;  %v1052_v20 = vshrl.u32 %v3532_v4, 16  ;;  %v1055_v22 = vshll.u32 %v3532_v4, 16  ;;  %v4360_v57 = vld [vmem:[%s4204_s17 + $0x80] sm:$0x1] }
  0x2d   : > { %2116 = vrot.lane.b32.xlu0 %v3690_v11, %s4163_s20  ;;  %v422_v24 = vor.u32 %v421_v14, %v418_v8  ;;  %v431_v25 = vrot.slane %v429_v15, 4  ;;  %v437_v26 = vrot.slane %v435_v16, 5  ;;  %v1065_v29 = vshrl.u32 %v4316_v10, 16  ;;  %v3570_v8 = vld [vmem:[%s4204_s17 + $0x6c] sm:$0xe] }
  0x2e   : > { %v462_v17 = vsel %vm4293_vm5, %v457_v18, %v461_v0  ;;  %v1054_v32 = vrot.slane %v1052_v20, 4  ;;  %v1057_v33 = vrot.slane %v1055_v22, 5  ;;  %v3731_v34 = vcombine.low %v3532_v4, %v4316_v10  ;;  %v4369_v0 = vld [vmem:[%s4204_s17 + $0x20] sm:$0x1] }
  0x2f   : > { %v3699_v36 = vcombine.low %v452_v28, %v462_v17  ;;  %v423_v37 = vrot.slane %v422_v24, 4  ;;  %v432_v41 = vor.u32 %v431_v25, %v427_v38  ;;  %v860_v42 = vshrl.u32 %v4323_v23, 16  ;;  %v3562_v28 = vld [vmem:[%s4204_s17 + $0xc] sm:$0xe]  ;;  %v3571_v17 = vld [vmem:[%s4204_s17 + $0x78] sm:$0xe] }
  0x30   : > { %v863_v43 = vshll.u32 %v4323_v23, 16  ;;  %v873_v44 = vshrl.u32 %v4328_v12, 16  ;;  %v3723_v46 = vcombine.low %v4323_v23, %v4328_v12  ;;  %v1039_v47 = vrot.slane %v1037_v3, 5 }
  0x31   : > { %2134 = vrot.lane.b32.xlu1 %v3699_v36, %s4163_s20  ;;  %v428_v49 = vsel %vm4293_vm5, %v423_v37, %v427_v38  ;;  %v433_v50 = vrot.slane %v432_v41, 4  ;;  %v862_v51 = vrot.slane %v860_v42, 4  ;;  %v1047_v52 = vshll.u32 %v4334_v35, 16 }
  0x32   : > { %v865_v27 = vrot.slane %v863_v43, 5  ;;  %v1040_v31 = vsel %vm4293_vm5, %v4259_v40, %v1039_v47  ;;  %v1044_v53 = vor.u32 %v4223_v13, %v1039_v47  ;;  %v847_v3 = vrot.slane %v845_v9, 5  ;;  %v3563_v47 = vld [vmem:[%s4204_s17 + $0x18] sm:$0xe] }
  0x33   : > { %v438_v54 = vsel %vm4293_vm5, %v433_v50, %v437_v26  ;;  %v1049_v55 = vrot.slane %v1047_v52, 5  ;;  %v855_v56 = vshll.u32 %v4344_v48, 16  ;;  %v1058_v58 = vor.u32 %v1057_v33, %v1054_v32 }
  0x34   : > { %v3698_v59 = vcombine.low %v428_v49, %v438_v54  ;;  %v1045_v60 = vrot.slane %v1044_v53, 4  ;;  %v848_v40 = vsel %vm4293_vm5, %v4265_v45, %v847_v3  ;;  %v852_v13 = vor.u32 %v4229_v19, %v847_v3  ;;  %v4411_v53 = vld [vmem:[%s4204_s17 + $0x7c] sm:$0xf] }
  0x35   : > { %2310 = vrot.lane.b32.xlu1 %v3731_v34, %s4161_s18  ;;  %v857_v9 = vrot.slane %v855_v56, 5  ;;  %v1059_v61 = vrot.slane %v1058_v58, 4  ;;  %v1061_v62 = vshll.u32 %v4316_v10, 16  ;;  %v1067_v63 = vrot.slane %v1065_v29, 4  ;;  %v4418_v58 = vld [vmem:[%s4204_s17 + $0x18] sm:$0xf] }
  0x36   : > { %2132 = vrot.lane.b32.xlu0 %v3698_v59, %s4163_s20  ;;  %v1050_v2 = vsel %vm4293_vm5, %v1045_v60, %v1049_v55  ;;  %v853_v38 = vrot.slane %v852_v13, 4  ;;  %v1071_v45 = vshll.u32 %v4360_v57, 16  ;;  %v866_v19 = vor.u32 %v865_v27, %v862_v51  ;;  %v4404_v51 = vld [vmem:[%s4204_s17 + $0x78] sm:$0xf] }
  0x37   : > { %v3746_v4 = vcombine.low %v1040_v31, %v1050_v2  ;;  %v1063_v39 = vrot.slane %v1061_v62, 5  ;;  %v869_v5 = vshll.u32 %v4328_v12, 16  ;;  %v875_v6 = vrot.slane %v873_v44, 4 }
  0x38   : > { %v858_v11 = vsel %vm4293_vm5, %v853_v38, %v857_v9  ;;  %v1073_v14 = vrot.slane %v1071_v45, 5  ;;  %v867_v15 = vrot.slane %v866_v19, 4  ;;  %v879_v16 = vshll.u32 %v4369_v0, 16  ;;  %v4424_v9 = vld [vmem:[%s4204_s17 + $0x1c] sm:$0xf] }
  0x39   : > { %2388 = vrot.lane.b32.xlu1 %v3746_v4, %s4164_s21  ;;  %v3738_v18 = vcombine.low %v848_v40, %v858_v11  ;;  %v1064_v20 = vsel %vm4293_vm5, %v1059_v61, %v1063_v39  ;;  %v1068_v22 = vor.u32 %v1067_v63, %v1063_v39  ;;  %v871_v23 = vrot.slane %v869_v5, 5  ;;  %v4439_v19 = vld [vmem:[%s4204_s17 + $0x88] sm:$0xf] }
  0x3a   : > { %2294 = vrot.lane.b32.xlu0 %v3723_v46, %s4161_s18  ;;  %v881_v24 = vrot.slane %v879_v16, 5  ;;  %v3586_v25 = vrot.slane %v3570_v8, 9  ;;  %v1341_v26 = vrot.slane %v4208_v1, 5  ;;  %v1344_v29 = vrot.slane %v4334_v35, 5  ;;  %v4446_v8 = vld [vmem:[%s4204_s17 + $0x24] sm:$0xf] }
  0x3b   : > { %v1069_v32 = vrot.slane %v1068_v22, 4  ;;  %v872_v33 = vsel %vm4293_vm5, %v867_v15, %v871_v23  ;;  %v876_v34 = vor.u32 %v875_v6, %v871_v23  ;;  %v3578_v36 = vrot.slane %v3562_v28, 9  ;;  %v4455_v28 = vld [vmem:[%s4204_s17 + $0x28] sm:$0xf] }
  0x3c   : > { %v1342_v37 = vsel %vm4235_vm2, %v3586_v25, %v1341_v26  ;;  %v1343_v41 = vrot.slane %v1341_v26, 4  ;;  %v1285_v42 = vrot.slane %v4215_v7, 5  ;;  %v1288_v43 = vrot.slane %v4344_v48, 5 }
  0x3d   : > { %v1074_v1 = vsel %vm4293_vm5, %v1069_v32, %v1073_v14  ;;  %v877_v35 = vrot.slane %v876_v34, 4  ;;  %v3587_v44 = vrot.slane %v3571_v17, 9  ;;  %v1348_v46 = vrot.slane %v4316_v10, 5 }
  0x3e   : > { %2372 = vrot.lane.b32.xlu0 %v3738_v18, %s4164_s21  ;;  %v3747_v49 = vcombine.low %v1064_v20, %v1074_v1  ;;  %v1345_v50 = vsel %vm4235_vm2, %v1343_v41, %v1344_v29  ;;  %v1286_v7 = vsel %vm4235_vm2, %v3578_v36, %v1285_v42  ;;  %v1287_v48 = vrot.slane %v1285_v42, 4 }
  0x3f   : > { %v882_v52 = vsel %vm4293_vm5, %v877_v35, %v881_v24  ;;  %v3762_v27 = vcombine.low %v1342_v37, %v1345_v50  ;;  %v1349_v10 = vsel %vm4235_vm2, %v3587_v44, %v1348_v46  ;;  %v1350_v31 = vrot.slane %v1348_v46, 4  ;;  %v4460_v24 = vld [vmem:[%s4204_s17 + $0x80] sm:$0x1] }
  0x40   : > { %2390 = vrot.lane.b32.xlu1 %v3747_v49, %s4164_s21  ;;  %v3739_v3 = vcombine.low %v872_v33, %v882_v52  ;;  %v1289_v54 = vsel %vm4235_vm2, %v1287_v48, %v1288_v43  ;;  %v1351_v55 = vrot.slane %v4360_v57, 5  ;;  %v3579_v56 = vrot.slane %v3563_v47, 9  ;;  %v4471_v37 = vld [vmem:[%s4204_s17 + $0x20] sm:$0x1] }
  0x41   : > { %v3754_v59 = vcombine.low %v1286_v7, %v1289_v54  ;;  %v1292_v60 = vrot.slane %v4328_v12, 5  ;;  %v1295_v40 = vrot.slane %v4369_v0, 5  ;;  %v1637_v13 = vshrl.u32 %v4404_v51, 16  ;;  %v4434_v12 = vld [vmem:[%s4204_s17 + $0x84] sm:$0xf] }
  0x42   : > { %2374 = vrot.lane.b32.xlu0 %v3739_v3, %s4164_s21  ;;  %v1352_v61 = vsel %vm4235_vm2, %v1350_v31, %v1351_v55  ;;  %v1640_v57 = vshll.u32 %v4404_v51, 16  ;;  %v1650_v62 = vshrl.u32 %v4411_v53, 16  ;;  %v3778_v63 = vcombine.low %v4404_v51, %v4411_v53 }
  0x43   : > { %v3763_v0 = vcombine.low %v1349_v10, %v1352_v61  ;;  %v1293_v2 = vsel %vm4235_vm2, %v3579_v56, %v1292_v60  ;;  %v1294_v38 = vrot.slane %v1292_v60, 4  ;;  %v1639_v45 = vrot.slane %v1637_v13, 4 }
  0x44   : > { %2468 = vrot.lane.b32.xlu1 %v3762_v27, %s4165_s22  ;;  %v1642_v4 = vrot.slane %v1640_v57, 5  ;;  %v1445_v39 = vshrl.u32 %v4418_v58, 16  ;;  %v1448_v5 = vshll.u32 %v4418_v58, 16  ;;  %v1458_v6 = vshrl.u32 %v4424_v9, 16  ;;  %v4480_v27 = vld [vmem:[%s4204_s17 + $0x8c] sm:$0x1] }
  0x45   : > { %v1296_v11 = vsel %vm4235_vm2, %v1294_v38, %v1295_v40  ;;  %v3770_v14 = vcombine.low %v4418_v58, %v4424_v9  ;;  %v1661_v15 = vshrl.u32 %v4434_v12, 16  ;;  %v1664_v16 = vshll.u32 %v4434_v12, 16  ;;  %v4490_v57 = vld [vmem:[%s4204_s17 + $0x2c] sm:$0x1] }
  0x46   : > { %2452 = vrot.lane.b32.xlu0 %v3754_v59, %s4165_s22  ;;  %v3755_v18 = vcombine.low %v1293_v2, %v1296_v11  ;;  %v1447_v20 = vrot.slane %v1445_v39, 4  ;;  %v1450_v22 = vrot.slane %v1448_v5, 5  ;;  %v1674_v23 = vshrl.u32 %v4439_v19, 16 }
  0x47   : > { %v1663_v25 = vrot.slane %v1661_v15, 4  ;;  %v1666_v26 = vrot.slane %v1664_v16, 5  ;;  %v3779_v29 = vcombine.low %v4434_v12, %v4439_v19  ;;  %v1469_v17 = vshrl.u32 %v4446_v8, 16  ;;  %v3642_v16 = vld [vmem:[%s4204_s17 + $0x18] sm:$0xe] }
  0x48   : > { %2470 = vrot.lane.b32.xlu1 %v3763_v0, %s4165_s22  ;;  %v1472_v32 = vshll.u32 %v4446_v8, 16  ;;  %v1482_v33 = vshrl.u32 %v4455_v28, 16  ;;  %v3771_v34 = vcombine.low %v4446_v8, %v4455_v28  ;;  %v1643_v36 = vor.u32 %v1642_v4, %v1639_v45  ;;  %v3650_v45 = vld [vmem:[%s4204_s17 + $0x78] sm:$0xe] }
  0x49   : > { %v1471_v41 = vrot.slane %v1469_v17, 4  ;;  %v1646_v42 = vshll.u32 %v4411_v53, 16  ;;  %v1652_v43 = vrot.slane %v1650_v62, 4  ;;  %v1656_v1 = vshll.u32 %v4460_v24, 16 }
  0x4a   : > { %2454 = vrot.lane.b32.xlu0 %v3755_v18, %s4165_s22  ;;  %v1474_v35 = vrot.slane %v1472_v32, 5  ;;  %v1644_v44 = vrot.slane %v1643_v36, 4  ;;  %v1451_v46 = vor.u32 %v1450_v22, %v1447_v20  ;;  %v1454_v47 = vshll.u32 %v4424_v9, 16 }
  0x4b   : > { %v1648_v49 = vrot.slane %v1646_v42, 5  ;;  %v1658_v50 = vrot.slane %v1656_v1, 5  ;;  %v1460_v7 = vrot.slane %v1458_v6, 4  ;;  %v1464_v48 = vshll.u32 %v4471_v37, 16  ;;  %v4514_v42 = vld [vmem:[%s4204_s17 + $0x7c] sm:$0xf] }
  0x4c   : > { %2564 = vrot.lane.b32.xlu1 %v3778_v63, %s4166_s23  ;;  %v1452_v51 = vrot.slane %v1451_v46, 4  ;;  %v1456_v52 = vrot.slane %v1454_v47, 5  ;;  %v1667_v10 = vor.u32 %v1666_v26, %v1663_v25  ;;  %v1670_v31 = vshll.u32 %v4439_v19, 16  ;;  %v192_v25 = vld [vmem:[%s4204_s17 + $0x78] sm:$0xf] }
  0x4d   : > { %v1649_v3 = vsel %vm4293_vm5, %v1644_v44, %v1648_v49  ;;  %v1653_v54 = vor.u32 %v1652_v43, %v1648_v49  ;;  %v1466_v55 = vrot.slane %v1464_v48, 5  ;;  %v1676_v56 = vrot.slane %v1674_v23, 4  ;;  %v4525_v46 = vld [vmem:[%s4204_s17 + $0x80] sm:$0x1]  ;;  %v176_v49 = vld [vmem:[%s4204_s17 + $0x18] sm:$0xf] }
  0x4e   : > { %2548 = vrot.lane.b32.xlu0 %v3770_v14, %s4166_s23  ;;  %v1457_v58 = vsel %vm4293_vm5, %v1452_v51, %v1456_v52  ;;  %v1461_v59 = vor.u32 %v1460_v7, %v1456_v52  ;;  %v1668_v60 = vrot.slane %v1667_v10, 4  ;;  %v1672_v40 = vrot.slane %v1670_v31, 5  ;;  %v4533_v51 = vld [vmem:[%s4204_s17 + $0x1c] sm:$0xf] }
  0x4f   : > { %v1654_v13 = vrot.slane %v1653_v54, 4  ;;  %v1680_v61 = vshll.u32 %v4480_v27, 16  ;;  %v1475_v62 = vor.u32 %v1474_v35, %v1471_v41  ;;  %v1478_v63 = vshll.u32 %v4455_v28, 16  ;;  %v4539_v54 = vld [vmem:[%s4204_s17 + $0x20] sm:$0x1] }
  0x50   : > { %2566 = vrot.lane.b32.xlu1 %v3779_v29, %s4166_s23  ;;  %v1462_v12 = vrot.slane %v1461_v59, 4  ;;  %v1673_v0 = vsel %vm4293_vm5, %v1668_v60, %v1672_v40  ;;  %v1677_v2 = vor.u32 %v1676_v56, %v1672_v40  ;;  %v1484_v38 = vrot.slane %v1482_v33, 4 }
  0x51   : > { %v1659_v4 = vsel %vm4293_vm5, %v1654_v13, %v1658_v50  ;;  %v1682_v39 = vrot.slane %v1680_v61, 5  ;;  %v1476_v5 = vrot.slane %v1475_v62, 4  ;;  %v1480_v6 = vrot.slane %v1478_v63, 5  ;;  %v3651_v62 = vld [vmem:[%s4204_s17 + $0x84] sm:$0xe] }
  0x52   : > { %2550 = vrot.lane.b32.xlu0 %v3771_v34, %s4166_s23  ;;  %v3794_v8 = vcombine.low %v1649_v3, %v1659_v4  ;;  %v1467_v11 = vsel %vm4293_vm5, %v1462_v12, %v1466_v55  ;;  %v1678_v14 = vrot.slane %v1677_v2, 4  ;;  %v1488_v15 = vshll.u32 %v4490_v57, 16 }
  0x53   : > { %v3786_v18 = vcombine.low %v1457_v58, %v1467_v11  ;;  %v1481_v20 = vsel %vm4293_vm5, %v1476_v5, %v1480_v6  ;;  %v1485_v22 = vor.u32 %v1484_v38, %v1480_v6  ;;  %v3666_v23 = vrot.slane %v3650_v45, 9  ;;  %v3643_v5 = vld [vmem:[%s4204_s17 + $0x24] sm:$0xe] }
  0x54   : > { %2644 = vrot.lane.b32.xlu1 %v3794_v8, %s4167_s24  ;;  %v1683_v26 = vsel %vm4293_vm5, %v1678_v14, %v1682_v39  ;;  %v1490_v29 = vrot.slane %v1488_v15, 5  ;;  %v1950_v17 = vrot.slane %v4411_v53, 5  ;;  %v1953_v32 = vrot.slane %v4460_v24, 5 }
  0x55   : > { %v3795_v33 = vcombine.low %v1673_v0, %v1683_v26  ;;  %v1486_v34 = vrot.slane %v1485_v22, 4  ;;  %v3658_v36 = vrot.slane %v3642_v16, 9  ;;  %v1894_v41 = vrot.slane %v4424_v9, 5  ;;  %v194_v22 = vld [vmem:[%s4204_s17 + $0x84] sm:$0xf] }
  0x56   : > { %2628 = vrot.lane.b32.xlu0 %v3786_v18, %s4167_s24  ;;  %v1951_v43 = vsel %vm4235_vm2, %v3666_v23, %v1950_v17  ;;  %v1952_v1 = vrot.slane %v1950_v17, 4  ;;  %v1897_v35 = vrot.slane %v4471_v37, 5  ;;  %v464_v53 = vshrl.u32 %v192_v25, 16 }
  0x57   : > { %v1491_v24 = vsel %vm4293_vm5, %v1486_v34, %v1490_v29  ;;  %v1895_v44 = vsel %vm4235_vm2, %v3658_v36, %v1894_v41  ;;  %v1896_v9 = vrot.slane %v1894_v41, 4  ;;  %v467_v47 = vshll.u32 %v192_v25, 16  ;;  %v4562_v34 = vld [vmem:[%s4204_s17 + $0x88] sm:$0xf] }
  0x58   : > { %2646 = vrot.lane.b32.xlu1 %v3795_v33, %s4167_s24  ;;  %v3787_v50 = vcombine.low %v1481_v20, %v1491_v24  ;;  %v1954_v7 = vsel %vm4235_vm2, %v1952_v1, %v1953_v32  ;;  %v466_v37 = vrot.slane %v464_v53, 4  ;;  %v473_v48 = vshll.u32 %v4514_v42, 16  ;;  %v178_v24 = vld [vmem:[%s4204_s17 + $0x24] sm:$0xf] }
  0x59   : > { %v3810_v52 = vcombine.low %v1951_v43, %v1954_v7  ;;  %v1898_v10 = vsel %vm4235_vm2, %v1896_v9, %v1897_v35  ;;  %v469_v31 = vrot.slane %v467_v47, 5  ;;  %v477_v3 = vshrl.u32 %v4514_v42, 16  ;;  %v4567_v43 = vld [vmem:[%s4204_s17 + $0x8c] sm:$0x1] }
  0x5a   : > { %2630 = vrot.lane.b32.xlu0 %v3787_v50, %s4167_s24  ;;  %v3802_v55 = vcombine.low %v1895_v44, %v1898_v10  ;;  %v475_v56 = vrot.slane %v473_v48, 5  ;;  %v483_v58 = vshll.u32 %v4525_v46, 16  ;;  %v272_v59 = vshrl.u32 %v176_v49, 16  ;;  %v4579_v50 = vld [vmem:[%s4204_s17 + $0x28] sm:$0xf] }
  0x5b   : > { %v470_v60 = vor.u32 %v469_v31, %v466_v37  ;;  %v479_v40 = vrot.slane %v477_v3, 4  ;;  %v275_v13 = vshll.u32 %v176_v49, 16  ;;  %v281_v61 = vshll.u32 %v4533_v51, 16  ;;  %v4586_v10 = vld [vmem:[%s4204_s17 + $0x2c] sm:$0x1] }
  0x5c   : > { %2724 = vrot.lane.b32.xlu1 %v3810_v52, %s4168_s25  ;;  %v485_v63 = vrot.slane %v483_v58, 5  ;;  %v274_v12 = vrot.slane %v272_v59, 4  ;;  %v285_v0 = vshrl.u32 %v4533_v51, 16  ;;  %v291_v2 = vshll.u32 %v4539_v54, 16  ;;  %v617_v58 = vld [vmem:[%s4204_s17 + $0x78] sm:$0xe] }
  0x5d   : > { %v471_v38 = vrot.slane %v470_v60, 4  ;;  %v480_v45 = vor.u32 %v479_v40, %v475_v56  ;;  %v277_v4 = vrot.slane %v275_v13, 5  ;;  %v283_v39 = vrot.slane %v281_v61, 5 }
  0x5e   : > { %2708 = vrot.lane.b32.xlu0 %v3802_v55, %s4168_s25  ;;  %v287_v6 = vrot.slane %v285_v0, 4  ;;  %v293_v8 = vrot.slane %v291_v2, 5  ;;  %v3667_v11 = vrot.slane %v3651_v62, 9  ;;  %v1957_v14 = vrot.slane %v4439_v19, 5  ;;  %v609_v0 = vld [vmem:[%s4204_s17 + $0x18] sm:$0xe] }
  0x5f   : > { %v476_v15 = vsel %vm4293_vm5, %v471_v38, %v475_v56  ;;  %v481_v16 = vrot.slane %v480_v45, 4  ;;  %v278_v18 = vor.u32 %v277_v4, %v274_v12  ;;  %v1960_v20 = vrot.slane %v4480_v27, 5 }
  0x60   : > { %v288_v23 = vor.u32 %v287_v6, %v283_v39  ;;  %v1958_v25 = vsel %vm4235_vm2, %v3667_v11, %v1957_v14  ;;  %v1959_v26 = vrot.slane %v1957_v14, 4  ;;  %v3659_v29 = vrot.slane %v3643_v5, 9 }
  0x61   : > { %v486_v17 = vsel %vm4293_vm5, %v481_v16, %v485_v63  ;;  %v279_v19 = vrot.slane %v278_v18, 4  ;;  %v1901_v32 = vrot.slane %v4455_v28, 5  ;;  %v1904_v33 = vrot.slane %v4490_v57, 5 }
  0x62   : > { %v3700_v27 = vcombine.low %v476_v15, %v486_v17  ;;  %v289_v36 = vrot.slane %v288_v23, 4  ;;  %v1961_v41 = vsel %vm4235_vm2, %v1959_v26, %v1960_v20  ;;  %v488_v1 = vshrl.u32 %v194_v22, 16  ;;  %v618_v20 = vld [vmem:[%s4204_s17 + $0x84] sm:$0xe] }
  0x63   : > { %v284_v35 = vsel %vm4293_vm5, %v279_v19, %v283_v39  ;;  %v3811_v53 = vcombine.low %v1958_v25, %v1961_v41  ;;  %v1902_v28 = vsel %vm4235_vm2, %v3659_v29, %v1901_v32  ;;  %v1903_v57 = vrot.slane %v1901_v32, 4  ;;  %v4101_v39 = vld [vmem:[%s6050_s1] sm:$0xff]  }
  0x64   : > { %2136 = vrot.lane.b32.xlu1 %v3700_v27, %s4163_s20  ;;  %v294_v44 = vsel %vm4293_vm5, %v289_v36, %v293_v8  ;;  %v490_v9 = vrot.slane %v488_v1, 4  ;;  %v491_v47 = vshll.u32 %v194_v22, 16  ;;  %v497_v49 = vshll.u32 %v4562_v34, 16  ;;  %4017 = vmatprep.subr.bf16.mxu0 %v4101_v39  ;;  %v610_v19 = vld [vmem:[%s4204_s17 + $0x24] sm:$0xe] }
  0x65   : > { %v3692_v7 = vcombine.low %v284_v35, %v294_v44  ;;  %v1905_v37 = vsel %vm4235_vm2, %v1903_v57, %v1904_v33  ;;  %v501_v48 = vshrl.u32 %v4562_v34, 16  ;;  %v507_v52 = vshll.u32 %v4567_v43, 16  ;;  %4053 = vmatprep.subr.bf16.mxu1 %v4101_v39  ;;  %4018 = vmatpush3.bf16.msra.mxu0 %v4101_v39  ;;  %v4626_v44 = vld [vmem:[%s4204_s17 + $0x88] sm:$0xf] }
  0x66   : > { %v3803_v31 = vcombine.low %v1902_v28, %v1905_v37  ;;  %v493_v3 = vrot.slane %v491_v47, 5  ;;  %v499_v55 = vrot.slane %v497_v49, 5  ;;  %v296_v56 = vshrl.u32 %v178_v24, 16  ;;  %4055 = vmatpush3.bf16.msra.mxu1 %v4101_v39  ;;  %v4633_v37 = vld [vmem:[%s4204_s17 + $0x24] sm:$0xf] }
  0x67   : > { %2120 = vrot.lane.b32.xlu0 %v3692_v7, %s4163_s20  ;;  %v503_v59 = vrot.slane %v501_v48, 4  ;;  %v509_v60 = vrot.slane %v507_v52, 5  ;;  %v299_v40 = vshll.u32 %v178_v24, 16  ;;  %v305_v13 = vshll.u32 %v4579_v50, 16 }
  0x68   : > { %2726 = vrot.lane.b32.xlu1 %v3811_v53, %s4168_s25  ;;  %v494_v61 = vor.u32 %v493_v3, %v490_v9  ;;  %v298_v62 = vrot.slane %v296_v56, 4  ;;  %v309_v63 = vshrl.u32 %v4579_v50, 16  ;;  %v315_v12 = vshll.u32 %v4586_v10, 16  ;;  %v4618_v53 = vld [vmem:[%s4204_s17 + $0x84] sm:$0xf] }
  0x69   : > { %v504_v2 = vor.u32 %v503_v59, %v499_v55  ;;  %v301_v38 = vrot.slane %v299_v40, 5  ;;  %v307_v45 = vrot.slane %v305_v13, 5  ;;  %v3508_v4 = vrot.slane %v617_v58, 9  ;;  %v3536_v40 = vld [vmem:[%s4204_s17 + $0x90] sm:$0xf] }
  0x6a   : > { %v495_v5 = vrot.slane %v494_v61, 4  ;;  %v311_v6 = vrot.slane %v309_v63, 4  ;;  %v317_v8 = vrot.slane %v315_v12, 5  ;;  %v746_v11 = vrot.slane %v4514_v42, 5  ;;  %v4654_v13 = vld [vmem:[%s4204_s17 + $0x94] sm:$0xf] }
  0x6b   : > { %2710 = vrot.lane.b32.xlu0 %v3803_v31, %s4168_s25  ;;  %v505_v14 = vrot.slane %v504_v2, 4  ;;  %v302_v15 = vor.u32 %v301_v38, %v298_v62  ;;  %v749_v16 = vrot.slane %v4525_v46, 5  ;;  %v3500_v18 = vrot.slane %v609_v0, 9  ;;  %v4660_v0 = vld [vmem:[%s4204_s17 + $0x30] sm:$0xf] }
  0x6c   : > { %v500_v22 = vsel %vm4293_vm5, %v495_v5, %v499_v55  ;;  %v312_v23 = vor.u32 %v311_v6, %v307_v45  ;;  %v747_v25 = vsel %vm4235_vm2, %v3508_v4, %v746_v11  ;;  %v748_v26 = vrot.slane %v746_v11, 4  ;;  %v4644_v55 = vld [vmem:[%s4204_s17 + $0x28] sm:$0xf]  ;;  %v4663_v2 = vld [vmem:[%s4204_s17 + $0x34] sm:$0xf] }
  0x6d   : > { %v510_v42 = vsel %vm4293_vm5, %v505_v14, %v509_v60  ;;  %v303_v29 = vrot.slane %v302_v15, 4  ;;  %v690_v46 = vrot.slane %v4533_v51, 5  ;;  %v693_v17 = vrot.slane %v4539_v54, 5 }
  0x6e   : > { %v3701_v32 = vcombine.low %v500_v22, %v510_v42  ;;  %v313_v33 = vrot.slane %v312_v23, 4  ;;  %v750_v27 = vsel %vm4235_vm2, %v748_v26, %v749_v16  ;;  %v3509_v36 = vrot.slane %v618_v20, 9  ;;  %v4676_v20 = vld [vmem:[%s4204_s17 + $0x8c] sm:$0x1] }
  0x6f   : > { %v308_v41 = vsel %vm4293_vm5, %v303_v29, %v307_v45  ;;  %v3716_v1 = vcombine.low %v747_v25, %v750_v27  ;;  %v691_v35 = vsel %vm4235_vm2, %v3500_v18, %v690_v46  ;;  %v692_v51 = vrot.slane %v690_v46, 4  ;;  %v4681_v42 = vld [vmem:[%s4204_s17 + $0x2c] sm:$0x1] }
  0x70   : > { %2138 = vrot.lane.b32.xlu1 %v3701_v32, %s4163_s20  ;;  %v318_v54 = vsel %vm4293_vm5, %v313_v33, %v317_v8  ;;  %v753_v28 = vrot.slane %v4562_v34, 5  ;;  %v756_v57 = vrot.slane %v4567_v43, 5  ;;  %v3501_v24 = vrot.slane %v610_v19, 9 }
  0x71   : > { %v3693_v9 = vcombine.low %v308_v41, %v318_v54  ;;  %v694_v47 = vsel %vm4235_vm2, %v692_v51, %v693_v17  ;;  %v697_v49 = vrot.slane %v4579_v50, 5  ;;  %v700_v7 = vrot.slane %v4586_v10, 5 }
  0x72   : > { %v3708_v48 = vcombine.low %v691_v35, %v694_v47  ;;  %v754_v34 = vsel %vm4235_vm2, %v3509_v36, %v753_v28  ;;  %v755_v43 = vrot.slane %v753_v28, 4  ;;  %v1076_v52 = vshrl.u32 %v4618_v53, 16 }
  0x73   : > { %2122 = vrot.lane.b32.xlu0 %v3693_v9, %s4163_s20  ;;  %v698_v31 = vsel %vm4235_vm2, %v3501_v24, %v697_v49  ;;  %v699_v50 = vrot.slane %v697_v49, 4  ;;  %v1079_v10 = vshll.u32 %v4618_v53, 16  ;;  %v1089_v3 = vshrl.u32 %v4626_v44, 16 }
  0x74   : > { %2216 = vrot.lane.b32.xlu1 %v3716_v1, %s4162_s19  ;;  %v757_v56 = vsel %vm4235_vm2, %v755_v43, %v756_v57  ;;  %v1078_v58 = vrot.slane %v1076_v52, 4  ;;  %v3732_v59 = vcombine.low %v4618_v53, %v4626_v44  ;;  %v884_v60 = vshrl.u32 %v4633_v37, 16  ;;  %v4690_v57 = vld [vmem:[%s4204_s17 + $0x98] sm:$0x1] }
  0x75   : > { %v3717_v61 = vcombine.low %v754_v34, %v757_v56  ;;  %v701_v62 = vsel %vm4235_vm2, %v699_v50, %v700_v7  ;;  %v1081_v63 = vrot.slane %v1079_v10, 5  ;;  %v887_v12 = vshll.u32 %v4633_v37, 16  ;;  %v4701_v50 = vld [vmem:[%s4204_s17 + $0x38] sm:$0x1] }
  0x76   : > { %v3709_v38 = vcombine.low %v698_v31, %v701_v62  ;;  %v886_v45 = vrot.slane %v884_v60, 4  ;;  %v897_v4 = vshrl.u32 %v4644_v55, 16  ;;  %v3724_v39 = vcombine.low %v4633_v37, %v4644_v55 }
  0x77   : > { %2200 = vrot.lane.b32.xlu0 %v3708_v48, %s4162_s19  ;;  %v889_v5 = vrot.slane %v887_v12, 5  ;;  %v1100_v6 = vshrl.u32 %v3536_v40, 16  ;;  %v1103_v8 = vshll.u32 %v3536_v40, 16  ;;  %v1113_v11 = vshrl.u32 %v4654_v13, 16 }
  0x78   : > { %2218 = vrot.lane.b32.xlu1 %v3717_v61, %s4162_s19  ;;  %v3733_v14 = vcombine.low %v3536_v40, %v4654_v13  ;;  %v908_v15 = vshrl.u32 %v4660_v0, 16  ;;  %v911_v16 = vshll.u32 %v4660_v0, 16  ;;  %v921_v18 = vshrl.u32 %v4663_v2, 16  ;;  %v3572_v40 = vld [vmem:[%s4204_s17 + $0x84] sm:$0xe] }
  0x79   : > { %v1102_v22 = vrot.slane %v1100_v6, 4  ;;  %v1105_v23 = vrot.slane %v1103_v8, 5  ;;  %v3725_v25 = vcombine.low %v4660_v0, %v4663_v2  ;;  %v1082_v26 = vor.u32 %v1081_v63, %v1078_v58 }
  0x7a   : > { %v910_v29 = vrot.slane %v908_v15, 4  ;;  %v913_v46 = vrot.slane %v911_v16, 5  ;;  %v1085_v17 = vshll.u32 %v4626_v44, 16  ;;  %v1091_v19 = vrot.slane %v1089_v3, 4 }
  0x7b   : > { %2202 = vrot.lane.b32.xlu0 %v3709_v38, %s4162_s19  ;;  %v1083_v32 = vrot.slane %v1082_v26, 4  ;;  %v1095_v33 = vshll.u32 %v4676_v20, 16  ;;  %v890_v27 = vor.u32 %v889_v5, %v886_v45  ;;  %v893_v36 = vshll.u32 %v4644_v55, 16 }
  0x7c   : > { %2312 = vrot.lane.b32.xlu1 %v3732_v59, %s4161_s18  ;;  %v1087_v41 = vrot.slane %v1085_v17, 5  ;;  %v899_v1 = vrot.slane %v897_v4, 4  ;;  %v903_v35 = vshll.u32 %v4681_v42, 16  ;;  %v1106_v51 = vor.u32 %v1105_v23, %v1102_v22 }
  0x7d   : > { %v1097_v53 = vrot.slane %v1095_v33, 5  ;;  %v891_v54 = vrot.slane %v890_v27, 4  ;;  %v895_v28 = vrot.slane %v893_v36, 5  ;;  %v1109_v24 = vshll.u32 %v4654_v13, 16  ;;  %v4734_v36 = vld [vmem:[%s4204_s17 + $0x90] sm:$0xf] }
  0x7e   : > { %v1088_v9 = vsel %vm4293_vm5, %v1083_v32, %v1087_v41  ;;  %v1092_v47 = vor.u32 %v1091_v19, %v1087_v41  ;;  %v905_v49 = vrot.slane %v903_v35, 5  ;;  %v1107_v7 = vrot.slane %v1106_v51, 4  ;;  %v4741_v51 = vld [vmem:[%s4204_s17 + $0x94] sm:$0xf] }
  0x7f   : > { %2296 = vrot.lane.b32.xlu0 %v3724_v39, %s4161_s18  ;;  %v896_v37 = vsel %vm4293_vm5, %v891_v54, %v895_v28  ;;  %v900_v48 = vor.u32 %v899_v1, %v895_v28  ;;  %v1111_v34 = vrot.slane %v1109_v24, 5  ;;  %v1115_v43 = vrot.slane %v1113_v11, 4  ;;  %v3564_v39 = vld [vmem:[%s4204_s17 + $0x24] sm:$0xe]  ;;  %v4748_v24 = vld [vmem:[%s4204_s17 + $0x30] sm:$0xf] }
  0x80   : > { %2314 = vrot.lane.b32.xlu1 %v3733_v14, %s4161_s18  ;;  %v1093_v52 = vrot.slane %v1092_v47, 4  ;;  %v1119_v31 = vshll.u32 %v4690_v57, 16  ;;  %v914_v10 = vor.u32 %v913_v46, %v910_v29  ;;  %v917_v3 = vshll.u32 %v4663_v2, 16  ;;  %v3573_v14 = vld [vmem:[%s4204_s17 + $0x90] sm:$0xe] }
  0x81   : > { %v901_v56 = vrot.slane %v900_v48, 4  ;;  %v1112_v58 = vsel %vm4293_vm5, %v1107_v7, %v1111_v34  ;;  %v1116_v59 = vor.u32 %v1115_v43, %v1111_v34  ;;  %v923_v60 = vrot.slane %v921_v18, 4  ;;  %v3565_v46 = vld [vmem:[%s4204_s17 + $0x30] sm:$0xe]  ;;  %v4755_v7 = vld [vmem:[%s4204_s17 + $0x34] sm:$0xf] }
  0x82   : > { %v1098_v61 = vsel %vm4293_vm5, %v1093_v52, %v1097_v53  ;;  %v1121_v62 = vrot.slane %v1119_v31, 5  ;;  %v915_v63 = vrot.slane %v914_v10, 4  ;;  %v919_v12 = vrot.slane %v917_v3, 5 }
  0x83   : > { %2298 = vrot.lane.b32.xlu0 %v3725_v25, %s4161_s18  ;;  %v3748_v0 = vcombine.low %v1088_v9, %v1098_v61  ;;  %v906_v38 = vsel %vm4293_vm5, %v901_v56, %v905_v49  ;;  %v1117_v45 = vrot.slane %v1116_v59, 4  ;;  %v927_v4 = vshll.u32 %v4701_v50, 16  ;;  %v4772_v56 = vld [vmem:[%s4204_s17 + $0xa0] sm:$0xf]  ;;  %v4778_v61 = vld [vmem:[%s4204_s17 + $0x3c] sm:$0xf] }
  0x84   : > { %v3740_v5 = vcombine.low %v896_v37, %v906_v38  ;;  %v920_v6 = vsel %vm4293_vm5, %v915_v63, %v919_v12  ;;  %v924_v8 = vor.u32 %v923_v60, %v919_v12  ;;  %v3588_v11 = vrot.slane %v3572_v40, 9  ;;  %v4788_v38 = vld [vmem:[%s4204_s17 + $0x40] sm:$0xf] }
  0x85   : > { %2392 = vrot.lane.b32.xlu1 %v3748_v0, %s4164_s21  ;;  %v1122_v15 = vsel %vm4293_vm5, %v1117_v45, %v1121_v62  ;;  %v929_v16 = vrot.slane %v927_v4, 5  ;;  %v1355_v18 = vrot.slane %v4626_v44, 5  ;;  %v1358_v22 = vrot.slane %v4676_v20, 5 }
  0x86   : > { %v3749_v23 = vcombine.low %v1112_v58, %v1122_v15  ;;  %v925_v25 = vrot.slane %v924_v8, 4  ;;  %v3580_v26 = vrot.slane %v3564_v39, 9  ;;  %v1299_v29 = vrot.slane %v4644_v55, 5  ;;  %v4757_v37 = vpop.permute.xlu1 %2308 }
  0x87   : > { %2376 = vrot.lane.b32.xlu0 %v3740_v5, %s4164_s21  ;;  %v1356_v17 = vsel %vm4235_vm2, %v3588_v11, %v1355_v18  ;;  %v1357_v19 = vrot.slane %v1355_v18, 4  ;;  %v1302_v32 = vrot.slane %v4681_v42, 5  ;;  %v3589_v33 = vrot.slane %v3573_v14, 9 }
  0x88   : > { %v930_v44 = vsel %vm4293_vm5, %v925_v25, %v929_v16  ;;  %v1300_v20 = vsel %vm4235_vm2, %v3580_v26, %v1299_v29  ;;  %v1301_v27 = vrot.slane %v1299_v29, 4  ;;  %v1362_v55 = vrot.slane %v4654_v13, 5  ;;  %v4794_v8 = vpop.permute.xlu0 %2292  ;;  %v4807_v29 = vld [vmem:[%s4204_s17 + $0x38] sm:$0x1] }
  0x89   : > { %2394 = vrot.lane.b32.xlu1 %v3749_v23, %s4164_s21  ;;  %v3741_v41 = vcombine.low %v920_v6, %v930_v44  ;;  %v1359_v42 = vsel %vm4235_vm2, %v1357_v19, %v1358_v22  ;;  %v1365_v1 = vrot.slane %v4690_v57, 5  ;;  %v3581_v35 = vrot.slane %v3565_v46, 9  ;;  %v4792_v6 = vld [vmem:[%s4204_s17 + $0x98] sm:$0x1] }
  0x8a   : > { %v3764_v53 = vcombine.low %v1356_v17, %v1359_v42  ;;  %v1303_v54 = vsel %vm4235_vm2, %v1301_v27, %v1302_v32  ;;  %v1363_v13 = vsel %vm4235_vm2, %v3589_v33, %v1362_v55  ;;  %v1364_v28 = vrot.slane %v1362_v55, 4 }
  0x8b   : > { %2378 = vrot.lane.b32.xlu0 %v3741_v41, %s4164_s21  ;;  %v3756_v9 = vcombine.low %v1300_v20, %v1303_v54  ;;  %v1306_v57 = vrot.slane %v4663_v2, 5  ;;  %v1309_v47 = vrot.slane %v4701_v50, 5  ;;  %v1685_v49 = vshrl.u32 %v4734_v36, 16  ;;  %v4766_v2 = vld [vmem:[%s4204_s17 + $0x9c] sm:$0xf] }
  0x8c   : > { %v1366_v48 = vsel %vm4235_vm2, %v1364_v28, %v1365_v1  ;;  %v1688_v34 = vshll.u32 %v4734_v36, 16  ;;  %v1698_v43 = vshrl.u32 %v4741_v51, 16  ;;  %v3780_v52 = vcombine.low %v4734_v36, %v4741_v51 }
  0x8d   : > { %2472 = vrot.lane.b32.xlu1 %v3764_v53, %s4165_s22  ;;  %v3765_v31 = vcombine.low %v1363_v13, %v1366_v48  ;;  %v1307_v50 = vsel %vm4235_vm2, %v3581_v35, %v1306_v57  ;;  %v1308_v10 = vrot.slane %v1306_v57, 4  ;;  %v1687_v3 = vrot.slane %v1685_v49, 4  ;;  %v4816_v53 = vld [vmem:[%s4204_s17 + $0xa4] sm:$0x1] }
  0x8e   : > { %v1690_v58 = vrot.slane %v1688_v34, 5  ;;  %v1493_v59 = vshrl.u32 %v4748_v24, 16  ;;  %v1496_v60 = vshll.u32 %v4748_v24, 16  ;;  %v1506_v40 = vshrl.u32 %v4755_v7, 16  ;;  %v4800_v18 = vpop.permute.xlu1 %2212 }
  0x8f   : > { %2456 = vrot.lane.b32.xlu0 %v3756_v9, %s4165_s22  ;;  %v1310_v62 = vsel %vm4235_vm2, %v1308_v10, %v1309_v47  ;;  %v3772_v63 = vcombine.low %v4748_v24, %v4755_v7  ;;  %v1709_v12 = vshrl.u32 %v4766_v2, 16  ;;  %v1712_v0 = vshll.u32 %v4766_v2, 16 }
  0x90   : > { %v3757_v45 = vcombine.low %v1307_v50, %v1310_v62  ;;  %v1495_v4 = vrot.slane %v1493_v59, 4  ;;  %v1498_v39 = vrot.slane %v1496_v60, 5  ;;  %v1722_v5 = vshrl.u32 %v4772_v56, 16  ;;  %v4819_v28 = vpop.permute.xlu0 %2196  ;;  %v4831_v50 = vld [vmem:[%s4204_s17 + $0x44] sm:$0x1] }
  0x91   : > { %2474 = vrot.lane.b32.xlu1 %v3765_v31, %s4165_s22  ;;  %v1711_v11 = vrot.slane %v1709_v12, 4  ;;  %v1714_v14 = vrot.slane %v1712_v0, 5  ;;  %v3781_v15 = vcombine.low %v4766_v2, %v4772_v56  ;;  %v1517_v16 = vshrl.u32 %v4778_v61, 16 }
  0x92   : > { %v1520_v22 = vshll.u32 %v4778_v61, 16  ;;  %v1530_v23 = vshrl.u32 %v4788_v38, 16  ;;  %v3773_v25 = vcombine.low %v4778_v61, %v4788_v38  ;;  %v1691_v26 = vor.u32 %v1690_v58, %v1687_v3  ;;  %v4824_v49 = vpop.permute.xlu1 %2214  ;;  %v3652_v61 = vld [vmem:[%s4204_s17 + $0x90] sm:$0xe] }
  0x93   : > { %2458 = vrot.lane.b32.xlu0 %v3757_v45, %s4165_s22  ;;  %v1519_v46 = vrot.slane %v1517_v16, 4  ;;  %v1694_v17 = vshll.u32 %v4741_v51, 16  ;;  %v1700_v19 = vrot.slane %v1698_v43, 4  ;;  %v1704_v32 = vshll.u32 %v4792_v6, 16 }
  0x94   : > { %v1522_v33 = vrot.slane %v1520_v22, 5  ;;  %v1692_v44 = vrot.slane %v1691_v26, 4  ;;  %v1499_v20 = vor.u32 %v1498_v39, %v1495_v4  ;;  %v1502_v27 = vshll.u32 %v4755_v7, 16 }
  0x95   : > { %2568 = vrot.lane.b32.xlu1 %v3780_v52, %s4166_s23  ;;  %v1696_v55 = vrot.slane %v1694_v17, 5  ;;  %v1706_v36 = vrot.slane %v1704_v32, 5  ;;  %v1508_v41 = vrot.slane %v1506_v40, 4  ;;  %v1512_v42 = vshll.u32 %v4807_v29, 16 }
  0x96   : > { %v1500_v1 = vrot.slane %v1499_v20, 4  ;;  %v1504_v35 = vrot.slane %v1502_v27, 5  ;;  %v1715_v54 = vor.u32 %v1714_v14, %v1711_v11  ;;  %v1718_v13 = vshll.u32 %v4772_v56, 16  ;;  %v3644_v11 = vld [vmem:[%s4204_s17 + $0x30] sm:$0xe]  ;;  %v4844_v14 = vpop.permute.xlu0 %2198 }
  0x97   : > { %2552 = vrot.lane.b32.xlu0 %v3772_v63, %s4166_s23  ;;  %v1697_v24 = vsel %vm4293_vm5, %v1692_v44, %v1696_v55  ;;  %v1701_v9 = vor.u32 %v1700_v19, %v1696_v55  ;;  %v1514_v57 = vrot.slane %v1512_v42, 5  ;;  %v1724_v47 = vrot.slane %v1722_v5, 4  ;;  %v4859_v55 = vld [vmem:[%s4204_s17 + $0x94] sm:$0xf] }
  0x98   : > { %v1505_v48 = vsel %vm4293_vm5, %v1500_v1, %v1504_v35  ;;  %v1509_v34 = vor.u32 %v1508_v41, %v1504_v35  ;;  %v1716_v43 = vrot.slane %v1715_v54, 4  ;;  %v1720_v52 = vrot.slane %v1718_v13, 5  ;;  %v4869_v54 = vld [vmem:[%s4204_s17 + $0x98] sm:$0x1]  ;;  %v180_v13 = vld [vmem:[%s4204_s17 + $0x30] sm:$0xf] }
  0x99   : > { %2570 = vrot.lane.b32.xlu1 %v3781_v15, %s4166_s23  ;;  %v1702_v2 = vrot.slane %v1701_v9, 4  ;;  %v1728_v31 = vshll.u32 %v4816_v53, 16  ;;  %v1523_v10 = vor.u32 %v1522_v33, %v1519_v46  ;;  %v1526_v3 = vshll.u32 %v4788_v38, 16 }
  0x9a   : > { %v1510_v58 = vrot.slane %v1509_v34, 4  ;;  %v1721_v59 = vsel %vm4293_vm5, %v1716_v43, %v1720_v52  ;;  %v1725_v60 = vor.u32 %v1724_v47, %v1720_v52  ;;  %v1532_v40 = vrot.slane %v1530_v23, 4  ;;  %v4877_v47 = vld [vmem:[%s4204_s17 + $0x34] sm:$0xf] }
  0x9b   : > { %2554 = vrot.lane.b32.xlu0 %v3773_v25, %s4166_s23  ;;  %v1707_v62 = vsel %vm4293_vm5, %v1702_v2, %v1706_v36  ;;  %v1730_v63 = vrot.slane %v1728_v31, 5  ;;  %v1524_v12 = vrot.slane %v1523_v10, 4  ;;  %v1528_v0 = vrot.slane %v1526_v3, 5  ;;  %v196_v25 = vld [vmem:[%s4204_s17 + $0x90] sm:$0xf]  ;;  %v4849_v26 = vpop.permute.xlu1 %2118 }
  0x9c   : > { %v3796_v45 = vcombine.low %v1697_v24, %v1707_v62  ;;  %v1515_v4 = vsel %vm4293_vm5, %v1510_v58, %v1514_v57  ;;  %v1726_v39 = vrot.slane %v1725_v60, 4  ;;  %v1536_v5 = vshll.u32 %v4831_v50, 16  ;;  %v4885_v31 = vld [vmem:[%s4204_s17 + $0x38] sm:$0x1] }
  0x9d   : > { %v3788_v15 = vcombine.low %v1505_v48, %v1515_v4  ;;  %v1529_v16 = vsel %vm4293_vm5, %v1524_v12, %v1528_v0  ;;  %v1533_v22 = vor.u32 %v1532_v40, %v1528_v0  ;;  %v3668_v23 = vrot.slane %v3652_v61, 9 }
  0x9e   : > { %2648 = vrot.lane.b32.xlu1 %v3796_v45, %s4167_s24  ;;  %v1731_v46 = vsel %vm4293_vm5, %v1726_v39, %v1730_v63  ;;  %v1538_v17 = vrot.slane %v1536_v5, 5  ;;  %v1964_v19 = vrot.slane %v4741_v51, 5  ;;  %v1967_v32 = vrot.slane %v4792_v6, 5 }
  0x9f   : > { %2632 = vrot.lane.b32.xlu0 %v3788_v15, %s4167_s24  ;;  %v3797_v33 = vcombine.low %v1721_v59, %v1731_v46  ;;  %v1534_v44 = vrot.slane %v1533_v22, 4  ;;  %v3660_v20 = vrot.slane %v3644_v11, 9  ;;  %v1908_v27 = vrot.slane %v4755_v7, 5  ;;  %v4879_v48 = vpop.permute.xlu0 %2116  ;;  %v4126_v46 = vld [vmem:[%s4204_s17 + $0xc] sm:$0xf] }
  0xa0   : > { %v1965_v36 = vsel %vm4235_vm2, %v3668_v23, %v1964_v19  ;;  %v1966_v41 = vrot.slane %v1964_v19, 4  ;;  %v1911_v42 = vrot.slane %v4807_v29, 5  ;;  %v512_v51 = vshrl.u32 %v196_v25, 16 }
  0xa1   : > { %v1539_v6 = vsel %vm4293_vm5, %v1534_v44, %v1538_v17  ;;  %v1909_v1 = vsel %vm4235_vm2, %v3660_v20, %v1908_v27  ;;  %v1910_v35 = vrot.slane %v1908_v27, 4  ;;  %v515_v7 = vshll.u32 %v196_v25, 16  ;;  %v4125_v25 = vld [vmem:[%s4204_s17 + $0x10] sm:$0xf] }
  0xa2   : > { %2650 = vrot.lane.b32.xlu1 %v3797_v33, %s4167_s24  ;;  %v3789_v24 = vcombine.low %v1529_v16, %v1539_v6  ;;  %v1968_v9 = vsel %vm4235_vm2, %v1966_v41, %v1967_v32  ;;  %v514_v29 = vrot.slane %v512_v51, 4  ;;  %v521_v57 = vshll.u32 %v4859_v55, 16  ;;  %v3653_v16 = vld [vmem:[%s4204_s17 + $0x9c] sm:$0xe]  ;;  %v4127_v6 = vld [vmem:[%s4204_s17 + $0x4] sm:$0xf] }
  0xa3   : > { %v3812_v34 = vcombine.low %v1965_v36, %v1968_v9  ;;  %v1912_v43 = vsel %vm4235_vm2, %v1910_v35, %v1911_v42  ;;  %v517_v52 = vrot.slane %v515_v7, 5  ;;  %v525_v2 = vshrl.u32 %v4859_v55, 16  ;;  %v4887_v10 = vpop.permute.xlu1 %2134  ;;  %v3645_v41 = vld [vmem:[%s4204_s17 + $0x3c] sm:$0xe] }
  0xa4   : > { %2634 = vrot.lane.b32.xlu0 %v3789_v24, %s4167_s24  ;;  %v3804_v3 = vcombine.low %v1909_v1, %v1912_v43  ;;  %v523_v58 = vrot.slane %v521_v57, 5  ;;  %v531_v59 = vshll.u32 %v4869_v54, 16  ;;  %v320_v60 = vshrl.u32 %v180_v13, 16  ;;  %v4128_v1 = vld [vmem:[%s4204_s17] sm:$0xf] }
  0xa5   : > { %v518_v40 = vor.u32 %v517_v52, %v514_v29  ;;  %v527_v61 = vrot.slane %v525_v2, 4  ;;  %v323_v62 = vshll.u32 %v180_v13, 16  ;;  %v329_v63 = vshll.u32 %v4877_v47, 16  ;;  %v198_v57 = vld [vmem:[%s4204_s17 + $0x9c] sm:$0xf] }
  0xa6   : > { %2728 = vrot.lane.b32.xlu1 %v3812_v34, %s4168_s25  ;;  %v533_v12 = vrot.slane %v531_v59, 5  ;;  %v322_v0 = vrot.slane %v320_v60, 4  ;;  %v333_v45 = vshrl.u32 %v4877_v47, 16  ;;  %v339_v4 = vshll.u32 %v4885_v31, 16  ;;  %v4129_v59 = vld [vmem:[%s4204_s17 + $0x70] sm:$0xf] }
  0xa7   : > { %v519_v39 = vrot.slane %v518_v40, 4  ;;  %v528_v5 = vor.u32 %v527_v61, %v523_v58  ;;  %v325_v11 = vrot.slane %v323_v62, 5  ;;  %v331_v15 = vrot.slane %v329_v63, 5  ;;  %v4896_v22 = vpop.permute.xlu1 %2310  ;;  %v4130_v60 = vld [vmem:[%s4204_s17 + $0x6c] sm:$0xf] }
  0xa8   : > { %2712 = vrot.lane.b32.xlu0 %v3804_v3, %s4168_s25  ;;  %v335_v23 = vrot.slane %v333_v45, 4  ;;  %v3675_v17 = vcombine.low %v4126_v46, %v4125_v25  ;;  %v4901_v19 = vpop.permute.xlu0 %2132  ;;  %v341_v27 = vrot.slane %v339_v4, 5  ;;  %v3669_v36 = vrot.slane %v3653_v16, 9  ;;  %v4933_v61 = vld [vmem:[%s4204_s17 + $0xa0] sm:$0xf] }
  0xa9   : > { %v524_v32 = vsel %vm4293_vm5, %v519_v39, %v523_v58  ;;  %v529_v33 = vrot.slane %v528_v5, 4  ;;  %v326_v44 = vor.u32 %v325_v11, %v322_v0  ;;  %v3674_v35 = vcombine.low %v4128_v1, %v4127_v6  ;;  %v4131_v4 = vld [vmem:[%s4204_s17 + $0x64] sm:$0xf]  ;;  %v4132_v39 = vld [vmem:[%s4204_s17 + $0x60] sm:$0xf] }
  0xaa   : > { %v336_v20 = vor.u32 %v335_v23, %v331_v15  ;;  %v1971_v7 = vrot.slane %v4772_v56, 5  ;;  %v4913_v9 = vsel %vm2740_vm6, %v3675_v17, %v4849_v26  ;;  %v1974_v29 = vrot.slane %v4816_v53, 5  ;;  %v182_v11 = vld [vmem:[%s4204_s17 + $0x3c] sm:$0xf]  ;;  %v4952_v17 = vld [vmem:[%s4204_s17 + $0x40] sm:$0xf] }
  0xab   : > { %v534_v42 = vsel %vm4293_vm5, %v529_v33, %v533_v12  ;;  %v327_v51 = vrot.slane %v326_v44, 4  ;;  %v4919_v43 = vpop.permute.xlu1 %2388  ;;  %v3661_v3 = vrot.slane %v3645_v41, 9  ;;  %v1915_v26 = vrot.slane %v4788_v38, 5  ;;  %v4938_v12 = vld [vmem:[%s4204_s17 + $0xa4] sm:$0x1] }
  0xac   : > { %v3702_v13 = vcombine.low %v524_v32, %v534_v42  ;;  %v337_v24 = vrot.slane %v336_v20, 4  ;;  %v4917_v34 = vpop.permute.xlu0 %2294  ;;  %v1972_v52 = vsel %vm4235_vm2, %v3669_v36, %v1971_v7  ;;  %v1973_v2 = vrot.slane %v1971_v7, 4 }
  0xad   : > { %v332_v56 = vsel %vm4293_vm5, %v327_v51, %v331_v15  ;;  %v1918_v58 = vrot.slane %v4831_v50, 5  ;;  %v3683_v40 = vcombine.low %v4130_v60, %v4129_v59  ;;  %v536_v0 = vshrl.u32 %v198_v57, 16 }
  0xae   : > { %2140 = vrot.lane.b32.xlu1 %v3702_v13, %s4163_s20  ;;  %v342_v53 = vsel %vm4293_vm5, %v337_v24, %v341_v27  ;;  %v1975_v63 = vsel %vm4235_vm2, %v1973_v2, %v1974_v29  ;;  %v1916_v38 = vsel %vm4235_vm2, %v3661_v3, %v1915_v26  ;;  %v1917_v50 = vrot.slane %v1915_v26, 4  ;;  %v4962_v27 = vld [vmem:[%s4204_s17 + $0x44] sm:$0x1] }
  0xaf   : > { %v3694_v62 = vcombine.low %v332_v56, %v342_v53  ;;  %v3813_v45 = vcombine.low %v1972_v52, %v1975_v63  ;;  %v3682_v5 = vcombine.low %v4132_v39, %v4131_v4  ;;  %v2743_v16 = vsel %vm2740_vm6, %v3674_v35, %v4879_v48 }
  0xb0   : > { %v4945_v15 = vpop.permute.xlu0 %2372  ;;  %v538_v23 = vrot.slane %v536_v0, 4  ;;  %v539_v25 = vshll.u32 %v198_v57, 16  ;;  %v545_v46 = vshll.u32 %v4933_v61, 16  ;;  %v1919_v32 = vsel %vm4235_vm2, %v1917_v50, %v1918_v58 }
  0xb1   : > { %2124 = vrot.lane.b32.xlu0 %v3694_v62, %s4163_s20  ;;  %v2770_v33 = vsel %vm2740_vm6, %v3683_v40, %v4887_v10  ;;  %v549_v44 = vshrl.u32 %v4933_v61, 16  ;;  %v555_v20 = vshll.u32 %v4938_v12, 16  ;;  %v3805_v36 = vcombine.low %v1916_v38, %v1919_v32 }
  0xb2   : > { %2730 = vrot.lane.b32.xlu1 %v3813_v45, %s4168_s25  ;;  %v4964_v48 = vpop.permute.xlu1 %2390  ;;  %v541_v41 = vrot.slane %v539_v25, 5  ;;  %v547_v42 = vrot.slane %v545_v46, 5  ;;  %v344_v51 = vshrl.u32 %v182_v11, 16  ;;  %v2767_v6 = vsel %vm2740_vm6, %v3682_v5, %v4901_v19  ;;  %v619_v19 = vld [vmem:[%s4204_s17 + $0x90] sm:$0xe] }
  0xb3   : > { %v551_v1 = vrot.slane %v549_v44, 4  ;;  %v347_v35 = vshll.u32 %v182_v11, 16  ;;  %v353_v10 = vshll.u32 %v4952_v17, 16  ;;  %v357_v29 = vshrl.u32 %v4952_v17, 16  ;;  %v611_v45 = vld [vmem:[%s4204_s17 + $0x30] sm:$0xe] }
  0xb4   : > { %v4969_v7 = vpop.permute.xlu0 %2374  ;;  %v542_v13 = vor.u32 %v541_v41, %v538_v23  ;;  %v346_v24 = vrot.slane %v344_v51, 4  ;;  %v363_v57 = vshll.u32 %v4962_v27, 16  ;;  %v557_v52 = vrot.slane %v555_v20, 5 }
  0xb5   : > { %2714 = vrot.lane.b32.xlu0 %v3805_v36, %s4168_s25  ;;  %v552_v56 = vor.u32 %v551_v1, %v547_v42  ;;  %v349_v2 = vrot.slane %v347_v35, 5  ;;  %v355_v3 = vrot.slane %v353_v10, 5  ;;  %v2791_v26 = vsel %vm2789_vm7, %v2743_v16, %v4819_v28  ;;  %v612_v35 = vld [vmem:[%s4204_s17 + $0x3c] sm:$0xe] }
  0xb6   : > { %v4975_v53 = vpop.permute.xlu1 %2468  ;;  %v2807_v58 = vsel %vm2789_vm7, %v2767_v6, %v4800_v18  ;;  %v543_v59 = vrot.slane %v542_v13, 4  ;;  %v359_v60 = vrot.slane %v357_v29, 4  ;;  %v365_v63 = vrot.slane %v363_v57, 5 }
  0xb7   : > { %v553_v40 = vrot.slane %v552_v56, 4  ;;  %v350_v62 = vor.u32 %v349_v2, %v346_v24  ;;  %v2809_v0 = vsel %vm2789_vm7, %v2770_v33, %v4824_v49  ;;  %v3510_v28 = vrot.slane %v619_v19, 9  ;;  %v5025_v24 = vld [vmem:[%s4204_s17 + $0x9c] sm:$0xf] }
  0xb8   : > { %v4984_v38 = vpop.permute.xlu0 %2452  ;;  %v548_v50 = vsel %vm4293_vm5, %v543_v59, %v547_v42  ;;  %v360_v4 = vor.u32 %v359_v60, %v355_v3  ;;  %v760_v5 = vrot.slane %v4859_v55, 5  ;;  %v763_v11 = vrot.slane %v4869_v54, 5  ;;  %v620_v42 = vld [vmem:[%s4204_s17 + $0x9c] sm:$0xe]  ;;  %v5043_v59 = vld [vmem:[%s4204_s17 + $0xa0] sm:$0xf] }
  0xb9   : > { %v558_v18 = vsel %vm4293_vm5, %v553_v40, %v557_v52  ;;  %v351_v39 = vrot.slane %v350_v62, 4  ;;  %v3502_v25 = vrot.slane %v611_v45, 9  ;;  %v704_v46 = vrot.slane %v4877_v47, 5  ;;  %v3522_v19 = vld [vmem:[%s4204_s17 + $0x3c] sm:$0xf] }
  0xba   : > { %v4992_v16 = vpop.permute.xlu1 %2470  ;;  %v3703_v49 = vcombine.low %v548_v50, %v558_v18  ;;  %v361_v23 = vrot.slane %v360_v4, 4  ;;  %v761_v33 = vsel %vm4235_vm2, %v3510_v28, %v760_v5  ;;  %v762_v44 = vrot.slane %v760_v5, 4  ;;  %v5067_v18 = vld [vmem:[%s4204_s17 + $0x40] sm:$0xf] }
  0xbb   : > { %v356_v32 = vsel %vm4293_vm5, %v351_v39, %v355_v3  ;;  %v707_v55 = vrot.slane %v4885_v31, 5  ;;  %v2793_v47 = vsel %vm2789_vm7, %v4913_v9, %v4844_v14  ;;  %v705_v36 = vsel %vm4235_vm2, %v3502_v25, %v704_v46 }
  0xbc   : > { %v5000_v20 = vpop.permute.xlu0 %2454  ;;  %2142 = vrot.lane.b32.xlu1 %v3703_v49, %s4163_s20  ;;  %v366_v54 = vsel %vm4293_vm5, %v361_v23, %v365_v63  ;;  %v706_v41 = vrot.slane %v704_v46, 4  ;;  %v2842_v31 = vsel %vm2822_vm8, %v2809_v0, %v4896_v22  ;;  %v2826_v6 = vsel %vm2822_vm8, %v2793_v47, %v4917_v34  ;;  %v3540_v0 = vld [vmem:[%s4204_s17 + $0xa8] sm:$0xf]  ;;  %v5072_v49 = vld [vmem:[%s4204_s17 + $0xac] sm:$0xf] }
  0xbd   : > { %v3695_v51 = vcombine.low %v356_v32, %v366_v54  ;;  %v764_v1 = vsel %vm4235_vm2, %v762_v44, %v763_v11  ;;  %v2840_v9 = vsel %vm2822_vm8, %v2807_v58, %v4757_v37  ;;  %v3511_v34 = vrot.slane %v620_v42, 9  ;;  %v3524_v23 = vld [vmem:[%s4204_s17 + $0x48] sm:$0xf]  ;;  %v5079_v44 = vld [vmem:[%s4204_s17 + $0x4c] sm:$0xf] }
  0xbe   : > { %v5018_v10 = vpop.permute.xlu1 %2564  ;;  %v3718_v13 = vcombine.low %v761_v33, %v764_v1  ;;  %v708_v14 = vsel %vm4235_vm2, %v706_v41, %v707_v55  ;;  %v767_v29 = vrot.slane %v4933_v61, 5  ;;  %v770_v57 = vrot.slane %v4938_v12, 5  ;;  %v5097_v1 = vld [vmem:[%s4204_s17 + $0xa4] sm:$0x1] }
  0xbf   : > { %2126 = vrot.lane.b32.xlu0 %v3695_v51, %s4163_s20  ;;  %v3710_v22 = vcombine.low %v705_v36, %v708_v14  ;;  %v2824_v52 = vsel %vm2822_vm8, %v2791_v26, %v4794_v8  ;;  %v3503_v2 = vrot.slane %v612_v35, 9  ;;  %v711_v37 = vrot.slane %v4952_v17, 5 }
  0xc0   : > { %v5030_v56 = vpop.permute.xlu0 %2548  ;;  %2220 = vrot.lane.b32.xlu1 %v3718_v13, %s4162_s19  ;;  %v714_v3 = vrot.slane %v4962_v27, 5  ;;  %v2873_v58 = vsel %vm2855_vm9, %v2840_v9, %v4919_v43  ;;  %v768_v61 = vsel %vm4235_vm2, %v3511_v34, %v767_v29  ;;  %v769_v12 = vrot.slane %v767_v29, 4 }
  0xc1   : > { %v1124_v60 = vshrl.u32 %v5025_v24, 16  ;;  %v2857_v17 = vsel %vm2855_vm9, %v2824_v52, %v4945_v15  ;;  %v712_v27 = vsel %vm4235_vm2, %v3503_v2, %v711_v37  ;;  %v713_v26 = vrot.slane %v711_v37, 4 }
  0xc2   : > { %v5046_v8 = vpop.permute.xlu1 %2566  ;;  %v1127_v43 = vshll.u32 %v5025_v24, 16  ;;  %v771_v40 = vsel %vm4235_vm2, %v769_v12, %v770_v57  ;;  %v2875_v62 = vsel %vm2855_vm9, %v2842_v31, %v4964_v48  ;;  %v2859_v63 = vsel %vm2855_vm9, %v2826_v6, %v4969_v7 }
  0xc3   : > { %2204 = vrot.lane.b32.xlu0 %v3710_v22, %s4162_s19  ;;  %v932_v15 = vshrl.u32 %v3522_v19, 16  ;;  %v3719_v50 = vcombine.low %v768_v61, %v771_v40  ;;  %v715_v4 = vsel %vm4235_vm2, %v713_v26, %v714_v3  ;;  %v1137_v28 = vshrl.u32 %v5043_v59, 16  ;;  %v5119_v26 = vld [vmem:[%s4204_s17 + $0xb0] sm:$0x1] }
  0xc4   : > { %v5061_v45 = vpop.permute.xlu0 %2550  ;;  %v935_v39 = vshll.u32 %v3522_v19, 16  ;;  %v3711_v5 = vcombine.low %v712_v27, %v715_v4  ;;  %v1126_v11 = vrot.slane %v1124_v60, 4  ;;  %v1129_v48 = vrot.slane %v1127_v43, 5 }
  0xc5   : > { %v3734_v7 = vcombine.low %v5025_v24, %v5043_v59  ;;  %2222 = vrot.lane.b32.xlu1 %v3719_v50, %s4162_s19  ;;  %v934_v46 = vrot.slane %v932_v15, 4  ;;  %v1148_v32 = vshrl.u32 %v3540_v0, 16  ;;  %v1151_v33 = vshll.u32 %v3540_v0, 16 }
  0xc6   : > { %v5075_v25 = vpop.permute.xlu1 %2644  ;;  %v937_v55 = vrot.slane %v935_v39, 5  ;;  %v945_v54 = vshrl.u32 %v5067_v18, 16  ;;  %v3726_v47 = vcombine.low %v3522_v19, %v5067_v18  ;;  %v5086_v36 = vsel %vm2888_vm10, %v2873_v58, %v4975_v53  ;;  %v5101_v53 = vld [vmem:[%s4204_s17 + $0x44] sm:$0x1] }
  0xc7   : > { %2206 = vrot.lane.b32.xlu0 %v3711_v5, %s4162_s19  ;;  %v5092_v42 = vsel %vm2888_vm10, %v2857_v17, %v4984_v38  ;;  %v1150_v51 = vrot.slane %v1148_v32, 4  ;;  %v1161_v31 = vshrl.u32 %v5072_v49, 16  ;;  %v3735_v6 = vcombine.low %v3540_v0, %v5072_v49 }
  0xc8   : > { %v5088_v41 = vpop.permute.xlu0 %2628  ;;  %v1153_v35 = vrot.slane %v1151_v33, 5  ;;  %v956_v13 = vshrl.u32 %v3524_v23, 16  ;;  %v959_v14 = vshll.u32 %v3524_v23, 16  ;;  %v969_v9 = vshrl.u32 %v5079_v44, 16 }
  0xc9   : > { %2316 = vrot.lane.b32.xlu1 %v3734_v7, %s4161_s18  ;;  %v3727_v38 = vcombine.low %v3524_v23, %v5079_v44  ;;  %v5109_v22 = vsel %vm2888_vm10, %v2875_v62, %v4992_v16  ;;  %v1130_v34 = vor.u32 %v1129_v48, %v1126_v11  ;;  %v1133_v29 = vshll.u32 %v5043_v59, 16  ;;  %v5136_v23 = vld [vmem:[%s4204_s17 + $0x50] sm:$0x1] }
  0xca   : > { %v5103_v24 = vpop.permute.xlu1 %2646  ;;  %v1139_v57 = vrot.slane %v1137_v28, 4  ;;  %v1143_v52 = vshll.u32 %v5097_v1, 16  ;;  %v938_v2 = vor.u32 %v937_v55, %v934_v46  ;;  %v941_v37 = vshll.u32 %v5067_v18, 16 }
  0xcb   : > { %2300 = vrot.lane.b32.xlu0 %v3726_v47, %s4161_s18  ;;  %v1131_v3 = vrot.slane %v1130_v34, 4  ;;  %v1135_v19 = vrot.slane %v1133_v29, 5  ;;  %v947_v58 = vrot.slane %v945_v54, 4  ;;  %v951_v61 = vshll.u32 %v5101_v53, 16 }
  0xcc   : > { %v5116_v12 = vpop.permute.xlu0 %2630  ;;  %v958_v16 = vrot.slane %v956_v13, 4  ;;  %v961_v60 = vrot.slane %v959_v14, 5  ;;  %v939_v17 = vrot.slane %v938_v2, 4  ;;  %v943_v27 = vrot.slane %v941_v37, 5  ;;  %v3574_v13 = vld [vmem:[%s4204_s17 + $0x9c] sm:$0xe] }
  0xcd   : > { %2318 = vrot.lane.b32.xlu1 %v3735_v6, %s4161_s18  ;;  %v5124_v43 = vsel %vm2888_vm10, %v2859_v63, %v5000_v20  ;;  %v1136_v40 = vsel %vm4293_vm5, %v1131_v3, %v1135_v19  ;;  %v1140_v62 = vor.u32 %v1139_v57, %v1135_v19  ;;  %v1145_v15 = vrot.slane %v1143_v52, 5  ;;  %v3566_v57 = vld [vmem:[%s4204_s17 + $0x3c] sm:$0xe] }
  0xce   : > { %v944_v0 = vsel %vm4293_vm5, %v939_v17, %v943_v27  ;;  %v948_v50 = vor.u32 %v947_v58, %v943_v27  ;;  %v953_v4 = vrot.slane %v951_v61, 5  ;;  %v1154_v28 = vor.u32 %v1153_v35, %v1150_v51  ;;  %v5131_v39 = vpop.permute.xlu1 %2724  ;;  %v3575_v27 = vld [vmem:[%s4204_s17 + $0xa8] sm:$0xe] }
  0xcf   : > { %2302 = vrot.lane.b32.xlu0 %v3727_v38, %s4161_s18  ;;  %v1141_v5 = vrot.slane %v1140_v62, 4  ;;  %v1157_v20 = vshll.u32 %v5072_v49, 16  ;;  %v1163_v63 = vrot.slane %v1161_v31, 4  ;;  %v1167_v11 = vshll.u32 %v5119_v26, 16 }
  0xd0   : > { %v949_v48 = vrot.slane %v948_v50, 4  ;;  %v1155_v7 = vrot.slane %v1154_v28, 4  ;;  %v962_v46 = vor.u32 %v961_v60, %v958_v16  ;;  %v965_v32 = vshll.u32 %v5079_v44, 16  ;;  %v5141_v47 = vpop.permute.xlu0 %2708  ;;  %v3567_v28 = vld [vmem:[%s4204_s17 + $0x48] sm:$0xe] }
  0xd1   : > { %v1146_v33 = vsel %vm4293_vm5, %v1141_v5, %v1145_v15  ;;  %v1159_v55 = vrot.slane %v1157_v20, 5  ;;  %v971_v54 = vrot.slane %v969_v9, 4  ;;  %v1169_v34 = vrot.slane %v1167_v11, 5 }
  0xd2   : > { %v3750_v51 = vcombine.low %v1136_v40, %v1146_v33  ;;  %v954_v31 = vsel %vm4293_vm5, %v949_v48, %v953_v4  ;;  %v963_v6 = vrot.slane %v962_v46, 4  ;;  %v967_v35 = vrot.slane %v965_v32, 5  ;;  %v5187_v46 = vld [vmem:[%s4204_s17 + $0xa8] sm:$0xf] }
  0xd3   : > { %v3742_v14 = vcombine.low %v944_v0, %v954_v31  ;;  %v1164_v38 = vor.u32 %v1163_v63, %v1159_v55  ;;  %v975_v29 = vshll.u32 %v5136_v23, 16  ;;  %v2939_v9 = vsel %vm2921_vm11, %v5086_v36, %v5018_v10  ;;  %v5202_v31 = vld [vmem:[%s4204_s17 + $0xac] sm:$0xf] }
  0xd4   : > { %2396 = vrot.lane.b32.xlu1 %v3750_v51, %s4164_s21  ;;  %v1160_v52 = vsel %vm4293_vm5, %v1155_v7, %v1159_v55  ;;  %v968_v2 = vsel %vm4293_vm5, %v963_v6, %v967_v35  ;;  %v972_v37 = vor.u32 %v971_v54, %v967_v35  ;;  %v3590_v61 = vrot.slane %v3574_v13, 9  ;;  %v3602_v6 = vld [vmem:[%s4204_s17 + $0x48] sm:$0xf] }
  0xd5   : > { %2380 = vrot.lane.b32.xlu0 %v3742_v14, %s4164_s21  ;;  %v1165_v19 = vrot.slane %v1164_v38, 4  ;;  %v977_v58 = vrot.slane %v975_v29, 5  ;;  %v1369_v16 = vrot.slane %v5043_v59, 5  ;;  %v1372_v10 = vrot.slane %v5097_v1, 5  ;;  %v5221_v14 = vld [vmem:[%s4204_s17 + $0xb4] sm:$0xf] }
  0xd6   : > { %v5156_v3 = vpop.permute.xlu1 %2136  ;;  %v973_v60 = vrot.slane %v972_v37, 4  ;;  %v3582_v36 = vrot.slane %v3566_v57, 9  ;;  %v1313_v17 = vrot.slane %v5067_v18, 5  ;;  %v1316_v0 = vrot.slane %v5101_v53, 5  ;;  %v5232_v29 = vld [vmem:[%s4204_s17 + $0x4c] sm:$0xf] }
  0xd7   : > { %v1170_v40 = vsel %vm4293_vm5, %v1165_v19, %v1169_v34  ;;  %v1370_v62 = vsel %vm4235_vm2, %v3590_v61, %v1369_v16  ;;  %v1371_v15 = vrot.slane %v1369_v16, 4  ;;  %v3591_v63 = vrot.slane %v3575_v27, 9  ;;  %v5239_v37 = vld [vmem:[%s4204_s17 + $0xb8] sm:$0xf]  ;;  %v3604_v19 = vld [vmem:[%s4204_s17 + $0x54] sm:$0xf] }
  0xd8   : > { %v3751_v59 = vcombine.low %v1160_v52, %v1170_v40  ;;  %v978_v1 = vsel %vm4293_vm5, %v973_v60, %v977_v58  ;;  %v1314_v18 = vsel %vm4235_vm2, %v3582_v36, %v1313_v17  ;;  %v1315_v4 = vrot.slane %v1313_v17, 4  ;;  %v5252_v40 = vld [vmem:[%s4204_s17 + $0x58] sm:$0xf] }
  0xd9   : > { %v5168_v50 = vpop.permute.xlu0 %2120  ;;  %v3743_v5 = vcombine.low %v968_v2, %v978_v1  ;;  %v1373_v20 = vsel %vm4235_vm2, %v1371_v15, %v1372_v10  ;;  %v2923_v53 = vsel %vm2921_vm11, %v5092_v42, %v5030_v56  ;;  %v2941_v11 = vsel %vm2921_vm11, %v5109_v22, %v5046_v8 }
  0xda   : > { %2398 = vrot.lane.b32.xlu1 %v3751_v59, %s4164_s21  ;;  %v3766_v48 = vcombine.low %v1370_v62, %v1373_v20  ;;  %v1317_v7 = vsel %vm4235_vm2, %v1315_v4, %v1316_v0  ;;  %v5189_v32 = vpop.permute.xlu1 %2726  ;;  %v1376_v56 = vrot.slane %v5072_v49, 5  ;;  %v1379_v42 = vrot.slane %v5119_v26, 5 }
  0xdb   : > { %2382 = vrot.lane.b32.xlu0 %v3743_v5, %s4164_s21  ;;  %v3758_v33 = vcombine.low %v1314_v18, %v1317_v7  ;;  %v3583_v55 = vrot.slane %v3567_v28, 9  ;;  %v2925_v8 = vsel %vm2921_vm11, %v5124_v43, %v5061_v45  ;;  %v2972_v22 = vsel %vm2954_vm12, %v2939_v9, %v5075_v25 }
  0xdc   : > { %v1320_v54 = vrot.slane %v5079_v44, 5  ;;  %v1323_v51 = vrot.slane %v5136_v23, 5  ;;  %v1377_v49 = vsel %vm4235_vm2, %v3591_v63, %v1376_v56  ;;  %v1378_v26 = vrot.slane %v1376_v56, 4 }
  0xdd   : > { %v1733_v35 = vshrl.u32 %v5187_v46, 16  ;;  %v1736_v45 = vshll.u32 %v5187_v46, 16  ;;  %v5209_v43 = vpop.permute.xlu0 %2710  ;;  %v2956_v25 = vsel %vm2954_vm12, %v2923_v53, %v5088_v41  ;;  %v5218_v13 = vsel %vm2954_vm12, %v2941_v11, %v5103_v24  ;;  %v5270_v11 = vld [vmem:[%s4204_s17 + $0xb0] sm:$0x1] }
  0xde   : > { %2476 = vrot.lane.b32.xlu1 %v3766_v48, %s4165_s22  ;;  %v1321_v44 = vsel %vm4235_vm2, %v3583_v55, %v1320_v54  ;;  %v1322_v23 = vrot.slane %v1320_v54, 4  ;;  %v1380_v38 = vsel %vm4235_vm2, %v1378_v26, %v1379_v42  ;;  %v5228_v34 = vsel %vm2954_vm12, %v2925_v8, %v5116_v12  ;;  %v5286_v55 = vld [vmem:[%s4204_s17 + $0x78] sm:$0xf]  ;;  %v4134_v8 = vld [vmem:[%s4204_s17 + $0x7c] sm:$0xf] }
  0xdf   : > { %2460 = vrot.lane.b32.xlu0 %v3758_v33, %s4165_s22  ;;  %v1746_v41 = vshrl.u32 %v5202_v31, 16  ;;  %v1541_v57 = vshrl.u32 %v3602_v6, 16  ;;  %v3767_v9 = vcombine.low %v1377_v49, %v1380_v38  ;;  %v3782_v52 = vcombine.low %v5187_v46, %v5202_v31  ;;  %v4106_v46 = vld [vmem:[%s6050_s1 + $0x8] sm:$0x3f]   ;;  %v5292_v49 = vld [vmem:[%s4204_s17 + $0x50] sm:$0x1] }
  0xe0   : > { %v1324_v24 = vsel %vm4235_vm2, %v1322_v23, %v1323_v51  ;;  %v1544_v2 = vshll.u32 %v3602_v6, 16  ;;  %v1735_v61 = vrot.slane %v1733_v35, 4  ;;  %v1738_v16 = vrot.slane %v1736_v45, 5  ;;  %v4135_v23 = vld [vmem:[%s4204_s17 + $0x18] sm:$0xf] }
  0xe1   : > { %v3759_v12 = vcombine.low %v1321_v44, %v1324_v24  ;;  %v1757_v60 = vshrl.u32 %v5221_v14, 16  ;;  %v5246_v10 = vrot.slane %v1541_v57, 4  ;;  %v1554_v36 = vshrl.u32 %v5232_v29, 16 }
  0xe2   : > { %v5242_v58 = vpop.permute.xlu1 %2138  ;;  %2478 = vrot.lane.b32.xlu1 %v3767_v9, %s4165_s22  ;;  %v3774_v17 = vcombine.low %v3602_v6, %v5232_v29  ;;  %v1760_v27 = vshll.u32 %v5221_v14, 16  ;;  %v1546_v62 = vrot.slane %v1544_v2, 5  ;;  %v1770_v15 = vshrl.u32 %v5239_v37, 16 }
  0xe3   : > { %2462 = vrot.lane.b32.xlu0 %v3759_v12, %s4165_s22  ;;  %v3783_v0 = vcombine.low %v5221_v14, %v5239_v37  ;;  %v1565_v59 = vshrl.u32 %v3604_v19, 16  ;;  %v5260_v18 = vrot.slane %v1757_v60, 4  ;;  %v1568_v4 = vshll.u32 %v3604_v19, 16  ;;  %v4136_v14 = vld [vmem:[%s4204_s17 + $0x1c] sm:$0xf] }
  0xe4   : > { %v1762_v5 = vrot.slane %v1760_v27, 5  ;;  %v1578_v20 = vshrl.u32 %v5252_v40, 16  ;;  %v2989_v63 = vsel %vm2987_vm13, %v2956_v25, %v5141_v47  ;;  %v3005_v53 = vsel %vm2987_vm13, %v2972_v22, %v5131_v39  ;;  %v5307_v12 = vld [vmem:[%s4204_s17 + $0xbc] sm:$0x1] }
  0xe5   : > { %v5258_v1 = vpop.permute.xlu0 %2122  ;;  %v5273_v48 = vrot.slane %v1565_v59, 4  ;;  %v3775_v7 = vcombine.low %v3604_v19, %v5252_v40  ;;  %4021 = vmatprep.mubr.msk.bf16.mxu0 %vm3042_vm14, %v2989_v63  ;;  %4037 = vmatprep.mubr.msk.bf16.mxu1 %vm3042_vm14, %v3005_v53  ;;  %v1739_v39 = vor.u32 %v1738_v16, %v1735_v61  ;;  %v1742_v47 = vshll.u32 %v5202_v31, 16 }
  0xe6   : > { %v5262_v28 = vpop.permute.xlu1 %2216  ;;  %2572 = vrot.lane.b32.xlu1 %v3782_v52, %s4166_s23  ;;  %v1748_v33 = vrot.slane %v1746_v41, 4  ;;  %v1570_v42 = vrot.slane %v1568_v4, 5  ;;  %v3684_v22 = vcombine.low %v5286_v55, %v4134_v8  ;;  %v4169_v54 = vmov 65535  }
  0xe7   : > { %2556 = vrot.lane.b32.xlu0 %v3774_v17, %s4166_s23  ;;  %v3077_v51 = vsel %vm3075_vm15, 4294967295, %v4169_v54  ;;  %v1752_v6 = vshll.u32 %v5270_v11, 16  ;;  %v1740_v45 = vrot.slane %v1739_v39, 4  ;;  %v1744_v25 = vrot.slane %v1742_v47, 5  ;;  %v3654_v54 = vld [vmem:[%s4204_s17 + $0xa8] sm:$0xe] }
  0xe8   : > { %v3078_v35 = vsel %vm3076_vm0, %v3077_v51, 0  ;;  %v1547_v44 = vor.u32 %v1546_v62, %v5246_v10  ;;  %v3676_v38 = vcombine.low %v4135_v23, %v4136_v14  ;;  %v1550_v57 = vshll.u32 %v5232_v29, 16  ;;  %v3646_v23 = vld [vmem:[%s4204_s17 + $0x48] sm:$0xe] }
  0xe9   : > { %v5283_v56 = vpop.permute.xlu0 %2200  ;;  %v3080_v41 = vand.u32 %v4106_v46, %v3078_v35  ;;  %v1556_v9 = vrot.slane %v1554_v36, 4  ;;  %v1745_v24 = vsel %vm4293_vm5, %v1740_v45, %v1744_v25  ;;  %v1749_v52 = vor.u32 %v1748_v33, %v1744_v25 }
  0xea   : > { %v5294_v26 = vpop.permute.xlu1 %2218  ;;  %2574 = vrot.lane.b32.xlu1 %v3783_v0, %s4166_s23  ;;  %v1754_v2 = vrot.slane %v1752_v6, 5  ;;  %v1560_v19 = vshll.u32 %v5292_v49, 16  ;;  %v1548_v16 = vrot.slane %v1547_v44, 4  ;;  %v1552_v60 = vrot.slane %v1550_v57, 5 }
  0xeb   : > { %2558 = vrot.lane.b32.xlu0 %v3775_v7, %s4166_s23  ;;  %4019 = vmatprep.subr.bf16.mxu0 %v3080_v41  ;;  %v3007_v10 = vsel %vm2987_vm13, %v5218_v13, %v5189_v32  ;;  %v1763_v36 = vor.u32 %v1762_v5, %v5260_v18  ;;  %v1750_v27 = vrot.slane %v1749_v52, 4  ;;  %v2991_v62 = vsel %vm2987_vm13, %v5228_v34, %v5209_v43  ;;  %v5327_v5 = vld [vmem:[%s4204_s17 + $0x5c] sm:$0x1] }
  0xec   : > { %4054 = vmatprep.subr.bf16.mxu1 %v3080_v41  ;;  %4020 = vmatpush3.bf16.msra.mxu0 %v3080_v41  ;;  %v1766_v0 = vshll.u32 %v5239_v37, 16  ;;  %v1772_v59 = vrot.slane %v1770_v15, 4  ;;  %v1557_v4 = vor.u32 %v1556_v9, %v1552_v60  ;;  %v1562_v63 = vrot.slane %v1560_v19, 5 }
  0xed   : > { %v5309_v61 = vpop.permute.xlu0 %2202  ;;  %4056 = vmatpush3.bf16.msra.mxu1 %v3080_v41  ;;  %v1764_v53 = vrot.slane %v1763_v36, 4  ;;  %v1776_v32 = vshll.u32 %v5307_v12, 16  ;;  %v1755_v13 = vsel %vm4293_vm5, %v1750_v27, %v1754_v2  ;;  %v1571_v7 = vor.u32 %v1570_v42, %v5273_v48  ;;  %v5372_v36 = vld [vmem:[%s4204_s17 + $0xac] sm:$0xf] }
  0xee   : > { %v5315_v17 = vpop.permute.xlu1 %2312  ;;  %v1768_v18 = vrot.slane %v1766_v0, 5  ;;  %v1574_v43 = vshll.u32 %v5252_v40, 16  ;;  %v3798_v46 = vcombine.low %v1745_v24, %v1755_v13  ;;  %v1553_v15 = vsel %vm4293_vm5, %v1548_v16, %v1552_v60 }
  0xef   : > { %v1558_v39 = vrot.slane %v1557_v4, 4  ;;  %v1580_v47 = vrot.slane %v1578_v20, 4  ;;  %4022 = vmatmul.mubr.msk.bf16.vlgmr.msra.gmra.mrb[0].mxu0 %vm3042_vm14, %v2991_v62  ;;  %v1778_v42 = vrot.slane %v1776_v32, 5  ;;  %v1572_v55 = vrot.slane %v1571_v7, 4  ;;  %v4137_v62 = vld [vmem:[%s4204_s17 + $0x84] sm:$0xf] }
  0xf0   : > { %4038 = vmatmul.mubr.msk.bf16.vlgmr.msra.gmra.mrb[0].mxu1 %vm3042_vm14, %v3007_v10  ;;  %v1773_v48 = vor.u32 %v1772_v59, %v1768_v18  ;;  %v1576_v8 = vrot.slane %v1574_v43, 5  ;;  %v5344_v51 = vsel %vm2740_vm6, %v3684_v22, %v5156_v3  ;;  %2652 = vrot.lane.b32.xlu1 %v3798_v46, %s4167_s24  ;;  %v1584_v6 = vshll.u32 %v5327_v5, 16  ;;  %v5381_v4 = vld [vmem:[%s4204_s17 + $0xb0] sm:$0x1] }
  0xf1   : > { %v5331_v34 = vpop.permute.xlu0 %2296  ;;  %v1563_v20 = vsel %vm4293_vm5, %v1558_v39, %v1562_v63  ;;  %v1769_v45 = vsel %vm4293_vm5, %v1764_v53, %v1768_v18  ;;  %v5357_v3 = vsel %vm2740_vm6, %v3676_v38, %v5168_v50  ;;  %v3670_v57 = vrot.slane %v3654_v54, 9  ;;  %v200_v50 = vld [vmem:[%s4204_s17 + $0xa8] sm:$0xf]  ;;  %v5402_v54 = vld [vmem:[%s4204_s17 + $0x4c] sm:$0xf] }
  0xf2   : > { %v5339_v33 = vpop.permute.xlu1 %2314  ;;  %v3790_v35 = vcombine.low %v1553_v15, %v1563_v20  ;;  %v1774_v25 = vrot.slane %v1773_v48, 4  ;;  %v1581_v44 = vor.u32 %v1580_v47, %v1576_v8  ;;  %v1577_v22 = vsel %vm4293_vm5, %v1572_v55, %v1576_v8  ;;  %v4140_v53 = vld [vmem:[%s4204_s17 + $0x28] sm:$0xf] }
  0xf3   : > { %v1586_v41 = vrot.slane %v1584_v6, 5  ;;  %v1978_v52 = vrot.slane %v5202_v31, 5  ;;  %v1981_v2 = vrot.slane %v5270_v11, 5  ;;  %v3662_v16 = vrot.slane %v3646_v23, 9  ;;  %v4138_v31 = vld [vmem:[%s4204_s17 + $0x88] sm:$0xf] }
  0xf4   : > { %2636 = vrot.lane.b32.xlu0 %v3790_v35, %s4167_s24  ;;  %v1779_v9 = vsel %vm4293_vm5, %v1774_v25, %v1778_v42  ;;  %v1582_v24 = vrot.slane %v1581_v44, 4  ;;  %v1922_v60 = vrot.slane %v5232_v29, 5  ;;  %v1925_v10 = vrot.slane %v5292_v49, 5  ;;  %v4139_v49 = vld [vmem:[%s4204_s17 + $0x24] sm:$0xf] }
  0xf5   : > { %v5353_v14 = vpop.permute.xlu0 %2298  ;;  %v3799_v19 = vcombine.low %v1769_v45, %v1779_v9  ;;  %v3685_v0 = vcombine.low %v4137_v62, %v4138_v31  ;;  %v1979_v11 = vsel %vm4235_vm2, %v3670_v57, %v1978_v52  ;;  %v1980_v59 = vrot.slane %v1978_v52, 4  ;;  %v184_v39 = vld [vmem:[%s4204_s17 + $0x48] sm:$0xf]  ;;  %v5405_v25 = vld [vmem:[%s4204_s17 + $0x50] sm:$0x1] }
  0xf6   : > { %v1587_v27 = vsel %vm4293_vm5, %v1582_v24, %v1586_v41  ;;  %v3677_v32 = vcombine.low %v4139_v49, %v4140_v53  ;;  %v1923_v13 = vsel %vm4235_vm2, %v3662_v16, %v1922_v60  ;;  %v1924_v18 = vrot.slane %v1922_v60, 4  ;;  %v3655_v60 = vld [vmem:[%s4204_s17 + $0xb4] sm:$0xe] }
  0xf7   : > { %v5367_v38 = vpop.permute.xlu1 %2392  ;;  %2654 = vrot.lane.b32.xlu1 %v3799_v19, %s4167_s24  ;;  %v3791_v29 = vcombine.low %v1577_v22, %v1587_v27  ;;  %v1982_v7 = vsel %vm4235_vm2, %v1980_v59, %v1981_v2  ;;  %v560_v43 = vshrl.u32 %v200_v50, 16  ;;  %v563_v46 = vshll.u32 %v200_v50, 16 }
  0xf8   : > { %v569_v15 = vshll.u32 %v5372_v36, 16  ;;  %v3814_v48 = vcombine.low %v1979_v11, %v1982_v7  ;;  %v1926_v42 = vsel %vm4235_vm2, %v1924_v18, %v1925_v10  ;;  %v573_v55 = vshrl.u32 %v5372_v36, 16 }
  0xf9   : > { %v5383_v63 = vpop.permute.xlu0 %2376  ;;  %2638 = vrot.lane.b32.xlu0 %v3791_v29, %s4167_s24  ;;  %v579_v8 = vshll.u32 %v5381_v4, 16  ;;  %v3806_v20 = vcombine.low %v1923_v13, %v1926_v42  ;;  %v562_v6 = vrot.slane %v560_v43, 4  ;;  %v565_v35 = vrot.slane %v563_v46, 5  ;;  %v5448_v42 = vld [vmem:[%s4204_s17 + $0xb4] sm:$0xf] }
  0xfa   : > { %v571_v45 = vrot.slane %v569_v15, 5  ;;  %v5411_v23 = vsel %vm2740_vm6, %v3685_v0, %v5242_v58  ;;  %v5415_v22 = vsel %vm2740_vm6, %v3677_v32, %v5258_v1  ;;  %v575_v41 = vrot.slane %v573_v55, 4  ;;  %v3647_v0 = vld [vmem:[%s4204_s17 + $0x54] sm:$0xe] }
  0xfb   : > { %v5394_v47 = vpop.permute.xlu1 %2394  ;;  %2732 = vrot.lane.b32.xlu1 %v3814_v48, %s4168_s25  ;;  %v368_v57 = vshrl.u32 %v184_v39, 16  ;;  %v566_v9 = vor.u32 %v565_v35, %v562_v6  ;;  %v371_v24 = vshll.u32 %v184_v39, 16  ;;  %v377_v52 = vshll.u32 %v5402_v54, 16  ;;  %v5457_v6 = vld [vmem:[%s4204_s17 + $0xb8] sm:$0xf] }
  0xfc   : > { %v381_v2 = vshrl.u32 %v5402_v54, 16  ;;  %v576_v58 = vor.u32 %v575_v41, %v571_v45  ;;  %v581_v19 = vrot.slane %v579_v8, 5  ;;  %v387_v1 = vshll.u32 %v5405_v25, 16 }
  0xfd   : > { %v5407_v44 = vpop.permute.xlu0 %2378  ;;  %2716 = vrot.lane.b32.xlu0 %v3806_v20, %s4168_s25  ;;  %v370_v16 = vrot.slane %v368_v57, 4  ;;  %v567_v10 = vrot.slane %v566_v9, 4  ;;  %v373_v27 = vrot.slane %v371_v24, 5  ;;  %v379_v62 = vrot.slane %v377_v52, 5  ;;  %v5467_v57 = vld [vmem:[%s4204_s17 + $0xbc] sm:$0x1] }
  0xfe   : > { %v383_v31 = vrot.slane %v381_v2, 4  ;;  %v5431_v59 = vsel %vm2789_vm7, %v5344_v51, %v5262_v28  ;;  %v5436_v29 = vsel %vm2789_vm7, %v5357_v3, %v5283_v56  ;;  %v577_v49 = vrot.slane %v576_v58, 4  ;;  %v5476_v58 = vld [vmem:[%s4204_s17 + $0x54] sm:$0xf] }
  0xff   : > { %v5420_v50 = vpop.permute.xlu1 %2472  ;;  %v389_v53 = vrot.slane %v387_v1, 5  ;;  %v572_v32 = vsel %vm4293_vm5, %v567_v10, %v571_v45  ;;  %v374_v13 = vor.u32 %v373_v27, %v370_v16  ;;  %v3671_v7 = vrot.slane %v3655_v60, 9  ;;  %v5483_v10 = vld [vmem:[%s4204_s17 + $0x58] sm:$0xf] }
 0x100   : > { %v384_v18 = vor.u32 %v383_v31, %v379_v62  ;;  %v582_v28 = vsel %vm4293_vm5, %v577_v49, %v581_v19  ;;  %v1985_v51 = vrot.slane %v5239_v37, 5  ;;  %v1988_v56 = vrot.slane %v5307_v12, 5 }
 0x101   : > { %v5426_v11 = vpop.permute.xlu0 %2456  ;;  %v3663_v3 = vrot.slane %v3647_v0, 9  ;;  %v3704_v46 = vcombine.low %v572_v32, %v582_v28  ;;  %v375_v15 = vrot.slane %v374_v13, 4  ;;  %v1929_v48 = vrot.slane %v5252_v40, 5 }
 0x102   : > { %v385_v39 = vrot.slane %v384_v18, 4  ;;  %v777_v8 = vrot.slane %v5381_v4, 5  ;;  %v1986_v20 = vsel %vm4235_vm2, %v3671_v7, %v1985_v51  ;;  %v1987_v37 = vrot.slane %v1985_v51, 4 }
 0x103   : > { %v5440_v43 = vpop.permute.xlu1 %2474  ;;  %v1932_v12 = vrot.slane %v5327_v5, 5  ;;  %2144 = vrot.lane.b32.xlu1 %v3704_v46, %s4163_s20  ;;  %v380_v40 = vsel %vm4293_vm5, %v375_v15, %v379_v62  ;;  %v1930_v45 = vsel %vm4235_vm2, %v3663_v3, %v1929_v48  ;;  %v1931_v41 = vrot.slane %v1929_v48, 4 }
 0x104   : > { %v390_v35 = vsel %vm4293_vm5, %v385_v39, %v389_v53  ;;  %v721_v5 = vrot.slane %v5405_v25, 5  ;;  %v1989_v52 = vsel %vm4235_vm2, %v1987_v37, %v1988_v56  ;;  %v584_v2 = vshrl.u32 %v5448_v42, 16  ;;  %v5491_v53 = vld [vmem:[%s4204_s17 + $0x5c] sm:$0x1]  ;;  %v621_v37 = vld [vmem:[%s4204_s17 + $0xa8] sm:$0xe] }
 0x105   : > { %v5450_v55 = vpop.permute.xlu0 %2458  ;;  %v3696_v24 = vcombine.low %v380_v40, %v390_v35  ;;  %v3815_v19 = vcombine.low %v1986_v20, %v1989_v52  ;;  %v1933_v16 = vsel %vm4235_vm2, %v1931_v41, %v1932_v12  ;;  %v587_v1 = vshll.u32 %v5448_v42, 16  ;;  %v613_v41 = vld [vmem:[%s4204_s17 + $0x48] sm:$0xe] }
 0x106   : > { %v593_v60 = vshll.u32 %v5457_v6, 16  ;;  %v3807_v62 = vcombine.low %v1930_v45, %v1933_v16  ;;  %v586_v31 = vrot.slane %v584_v2, 4  ;;  %v597_v0 = vshrl.u32 %v5457_v6, 16 }
 0x107   : > { %v5469_v9 = vpop.permute.xlu1 %2568  ;;  %2128 = vrot.lane.b32.xlu0 %v3696_v24, %s4163_s20  ;;  %v603_v49 = vshll.u32 %v5467_v57, 16  ;;  %2734 = vrot.lane.b32.xlu1 %v3815_v19, %s4168_s25  ;;  %v589_v32 = vrot.slane %v587_v1, 5  ;;  %v392_v18 = vshrl.u32 %v5476_v58, 16  ;;  %v395_v7 = vshll.u32 %v5476_v58, 16 }
 0x108   : > { %v595_v13 = vrot.slane %v593_v60, 5  ;;  %v2813_v51 = vsel %vm2789_vm7, %v5411_v23, %v5294_v26  ;;  %v599_v56 = vrot.slane %v597_v0, 4  ;;  %v401_v3 = vshll.u32 %v5483_v10, 16 }
 0x109   : > { %v5485_v27 = vpop.permute.xlu0 %2552  ;;  %v405_v46 = vshrl.u32 %v5483_v10, 16  ;;  %v590_v15 = vor.u32 %v589_v32, %v586_v31  ;;  %v394_v39 = vrot.slane %v392_v18, 4  ;;  %v397_v48 = vrot.slane %v395_v7, 5 }
 0x10a   : > { %v411_v20 = vshll.u32 %v5491_v53, 16  ;;  %v600_v12 = vor.u32 %v599_v56, %v595_v13  ;;  %v605_v40 = vrot.slane %v603_v49, 5  ;;  %v403_v35 = vrot.slane %v401_v3, 5  ;;  %v622_v56 = vld [vmem:[%s4204_s17 + $0xb4] sm:$0xe] }
 0x10b   : > { %v5496_v28 = vpop.permute.xlu1 %2570  ;;  %2718 = vrot.lane.b32.xlu0 %v3807_v62, %s4168_s25  ;;  %v407_v45 = vrot.slane %v405_v46, 4  ;;  %v2797_v26 = vsel %vm2789_vm7, %v5415_v22, %v5309_v61  ;;  %v591_v23 = vrot.slane %v590_v15, 4  ;;  %v398_v52 = vor.u32 %v397_v48, %v394_v39  ;;  %v614_v46 = vld [vmem:[%s4204_s17 + $0x54] sm:$0xe] }
 0x10c   : > { %v413_v2 = vrot.slane %v411_v20, 5  ;;  %v601_v19 = vrot.slane %v600_v12, 4  ;;  %v3512_v1 = vrot.slane %v621_v37, 9  ;;  %v774_v60 = vrot.slane %v5372_v36, 5 }
 0x10d   : > { %v5507_v24 = vpop.permute.xlu0 %2554  ;;  %v408_v16 = vor.u32 %v407_v45, %v403_v35  ;;  %v596_v62 = vsel %vm4293_vm5, %v591_v23, %v595_v13  ;;  %v399_v31 = vrot.slane %v398_v52, 4  ;;  %v3504_v0 = vrot.slane %v613_v41, 9  ;;  %v3526_v23 = vld [vmem:[%s4204_s17 + $0x54] sm:$0xf] }
 0x10e   : > { %v718_v49 = vrot.slane %v5402_v54, 5  ;;  %v606_v61 = vsel %vm4293_vm5, %v601_v19, %v605_v40  ;;  %v775_v18 = vsel %vm4235_vm2, %v3512_v1, %v774_v60  ;;  %v776_v7 = vrot.slane %v774_v60, 4 }
 0x10f   : > { %v409_v22 = vrot.slane %v408_v16, 4  ;;  %v2844_v36 = vsel %vm2822_vm8, %v5431_v59, %v5315_v17  ;;  %v3705_v13 = vcombine.low %v596_v62, %v606_v61  ;;  %v404_v54 = vsel %vm4293_vm5, %v399_v31, %v403_v35 }
 0x110   : > { %v5516_v32 = vpop.permute.xlu1 %2648  ;;  %v720_v3 = vrot.slane %v718_v49, 4  ;;  %v2828_v15 = vsel %vm2822_vm8, %v5436_v29, %v5331_v34  ;;  %v778_v48 = vsel %vm4235_vm2, %v776_v7, %v777_v8  ;;  %v719_v17 = vsel %vm4235_vm2, %v3504_v0, %v718_v49  ;;  %v5548_v29 = vld [vmem:[%s4204_s17 + $0xb4] sm:$0xf] }
 0x111   : > { %v414_v39 = vsel %vm4293_vm5, %v409_v22, %v413_v2  ;;  %v5540_v59 = vpop.permute.xlu0 %2632  ;;  %2146 = vrot.lane.b32.xlu1 %v3705_v13, %s4163_s20  ;;  %v3720_v37 = vcombine.low %v775_v18, %v778_v48  ;;  %v3513_v4 = vrot.slane %v622_v56, 9  ;;  %v2846_v8 = vsel %vm2822_vm8, %v2813_v51, %v5339_v33  ;;  %v5565_v51 = vld [vmem:[%s4204_s17 + $0xb8] sm:$0xf]  ;;  %v3528_v13 = vld [vmem:[%s4204_s17 + $0x60] sm:$0xf] }
 0x112   : > { %v3697_v20 = vcombine.low %v404_v54, %v414_v39  ;;  %v722_v34 = vsel %vm4235_vm2, %v720_v3, %v721_v5  ;;  %v781_v12 = vrot.slane %v5457_v6, 5  ;;  %v784_v40 = vrot.slane %v5467_v57, 5  ;;  %v5603_v39 = vld [vmem:[%s4204_s17 + $0x64] sm:$0xf] }
 0x113   : > { %v3505_v35 = vrot.slane %v614_v46, 9  ;;  %v2830_v25 = vsel %vm2822_vm8, %v2797_v26, %v5353_v14  ;;  %v3712_v45 = vcombine.low %v719_v17, %v722_v34  ;;  %v725_v5 = vrot.slane %v5483_v10, 5 }
 0x114   : > { %2130 = vrot.lane.b32.xlu0 %v3697_v20, %s4163_s20  ;;  %v728_v41 = vrot.slane %v5491_v53, 5  ;;  %v5560_v52 = vpop.permute.xlu1 %2650  ;;  %v782_v33 = vsel %vm4235_vm2, %v3513_v4, %v781_v12  ;;  %v783_v57 = vrot.slane %v781_v12, 4  ;;  %v1172_v2 = vshrl.u32 %v5548_v29, 16  ;;  %v5617_v4 = vld [vmem:[%s4204_s17 + $0xbc] sm:$0x1] }
 0x115   : > { %v1175_v14 = vshll.u32 %v5548_v29, 16  ;;  %2224 = vrot.lane.b32.xlu1 %v3720_v37, %s4162_s19  ;;  %v2877_v53 = vsel %vm2855_vm9, %v2844_v36, %v5367_v38  ;;  %v2861_v26 = vsel %vm2855_vm9, %v2828_v15, %v5383_v63  ;;  %v726_v19 = vsel %vm4235_vm2, %v3505_v35, %v725_v5  ;;  %v5585_v38 = vld [vmem:[%s4204_s17 + $0x58] sm:$0xf]  ;;  %v3544_v63 = vld [vmem:[%s4204_s17 + $0xc0] sm:$0xf] }
 0x116   : > { %v727_v16 = vrot.slane %v725_v5, 4  ;;  %v785_v1 = vsel %vm4235_vm2, %v783_v57, %v784_v40  ;;  %v2879_v60 = vsel %vm2855_vm9, %v2846_v8, %v5394_v47  ;;  %v5582_v62 = vsel %vm2855_vm9, %v2830_v25, %v5407_v44  ;;  %v5588_v0 = vpop.permute.xlu0 %2634  ;;  %v5597_v36 = vld [vmem:[%s4204_s17 + $0xc4] sm:$0xf]  ;;  %v5623_v35 = vld [vmem:[%s4204_s17 + $0x5c] sm:$0x1] }
 0x117   : > { %v980_v31 = vshrl.u32 %v3526_v23, 16  ;;  %v3721_v49 = vcombine.low %v782_v33, %v785_v1  ;;  %v1185_v47 = vshrl.u32 %v5565_v51, 16  ;;  %v983_v22 = vshll.u32 %v3526_v23, 16 }
 0x118   : > { %2208 = vrot.lane.b32.xlu0 %v3712_v45, %s4162_s19  ;;  %v729_v61 = vsel %vm4235_vm2, %v727_v16, %v728_v41  ;;  %v1174_v7 = vrot.slane %v1172_v2, 4  ;;  %v1177_v44 = vrot.slane %v1175_v14, 5  ;;  %v3736_v56 = vcombine.low %v5548_v29, %v5565_v51  ;;  %v5605_v48 = vpop.permute.xlu1 %2728 }
 0x119   : > { %v3713_v18 = vcombine.low %v726_v19, %v729_v61  ;;  %2226 = vrot.lane.b32.xlu1 %v3721_v49, %s4162_s19  ;;  %v982_v54 = vrot.slane %v980_v31, 4  ;;  %v993_v3 = vshrl.u32 %v5585_v38, 16  ;;  %v1196_v46 = vshrl.u32 %v3544_v63, 16 }
 0x11a   : > { %v1199_v15 = vshll.u32 %v3544_v63, 16  ;;  %v985_v17 = vrot.slane %v983_v22, 5  ;;  %v3728_v20 = vcombine.low %v3526_v23, %v5585_v38  ;;  %v5610_v37 = vsel %vm2888_vm10, %v2877_v53, %v5420_v50 }
 0x11b   : > { %v5614_v34 = vsel %vm2888_vm10, %v2861_v26, %v5426_v11  ;;  %v1209_v29 = vshrl.u32 %v5597_v36, 16  ;;  %v3737_v8 = vcombine.low %v3544_v63, %v5597_v36  ;;  %v1004_v12 = vshrl.u32 %v3528_v13, 16  ;;  %v5627_v11 = vpop.permute.xlu0 %2712  ;;  %v5636_v63 = vld [vmem:[%s4204_s17 + $0xc8] sm:$0x1] }
 0x11c   : > { %2210 = vrot.lane.b32.xlu0 %v3713_v18, %s4162_s19  ;;  %v1007_v40 = vshll.u32 %v3528_v13, 16  ;;  %v1198_v25 = vrot.slane %v1196_v46, 4  ;;  %v1201_v45 = vrot.slane %v1199_v15, 5  ;;  %v1017_v50 = vshrl.u32 %v5603_v39, 16 }
 0x11d   : > { %v3729_v5 = vcombine.low %v3528_v13, %v5603_v39  ;;  %2320 = vrot.lane.b32.xlu1 %v3736_v56, %s4161_s18  ;;  %v1178_v41 = vor.u32 %v1177_v44, %v1174_v7  ;;  %v1181_v23 = vshll.u32 %v5565_v51, 16  ;;  %v1187_v33 = vrot.slane %v1185_v47, 4 }
 0x11e   : > { %v1191_v57 = vshll.u32 %v5617_v4, 16  ;;  %v986_v2 = vor.u32 %v985_v17, %v982_v54  ;;  %v989_v14 = vshll.u32 %v5585_v38, 16  ;;  %v995_v53 = vrot.slane %v993_v3, 4 }
 0x11f   : > { %v999_v26 = vshll.u32 %v5623_v35, 16  ;;  %v1006_v19 = vrot.slane %v1004_v12, 4  ;;  %v1009_v16 = vrot.slane %v1007_v40, 5  ;;  %v1179_v1 = vrot.slane %v1178_v41, 4 }
 0x120   : > { %2304 = vrot.lane.b32.xlu0 %v3728_v20, %s4161_s18  ;;  %v1183_v31 = vrot.slane %v1181_v23, 5  ;;  %v5638_v49 = vpop.permute.xlu1 %2140  ;;  %v5642_v61 = vsel %vm2888_vm10, %v2879_v60, %v5440_v43  ;;  %v1193_v47 = vrot.slane %v1191_v57, 5  ;;  %v987_v22 = vrot.slane %v986_v2, 4  ;;  %v3576_v57 = vld [vmem:[%s4204_s17 + $0xb4] sm:$0xe] }
 0x121   : > { %v991_v18 = vrot.slane %v989_v14, 5  ;;  %2322 = vrot.lane.b32.xlu1 %v3737_v8, %s4161_s18  ;;  %v1001_v44 = vrot.slane %v999_v26, 5  ;;  %v1202_v56 = vor.u32 %v1201_v45, %v1198_v25  ;;  %v1205_v13 = vshll.u32 %v5597_v36, 16  ;;  %v5653_v8 = vld [vmem:[%s4204_s17 + $0x68] sm:$0x1] }
 0x122   : > { %v1188_v7 = vor.u32 %v1187_v33, %v1183_v31  ;;  %v1184_v54 = vsel %vm4293_vm5, %v1179_v1, %v1183_v31  ;;  %v1211_v46 = vrot.slane %v1209_v29, 4  ;;  %v1215_v15 = vshll.u32 %v5636_v63, 16 }
 0x123   : > { %v996_v3 = vor.u32 %v995_v53, %v991_v18  ;;  %v5649_v43 = vpop.permute.xlu0 %2124  ;;  %v1203_v17 = vrot.slane %v1202_v56, 4  ;;  %v1207_v20 = vrot.slane %v1205_v13, 5  ;;  %v1010_v12 = vor.u32 %v1009_v16, %v1006_v19  ;;  %v3568_v16 = vld [vmem:[%s4204_s17 + $0x54] sm:$0xe] }
 0x124   : > { %2306 = vrot.lane.b32.xlu0 %v3729_v5, %s4161_s18  ;;  %v1189_v60 = vrot.slane %v1188_v7, 4  ;;  %v992_v40 = vsel %vm4293_vm5, %v987_v22, %v991_v18  ;;  %v1013_v29 = vshll.u32 %v5603_v39, 16  ;;  %v1019_v45 = vrot.slane %v1017_v50, 4  ;;  %v5661_v2 = vpop.permute.xlu1 %2730 }
 0x125   : > { %v997_v25 = vrot.slane %v996_v3, 4  ;;  %v1212_v23 = vor.u32 %v1211_v46, %v1207_v20  ;;  %v1217_v33 = vrot.slane %v1215_v15, 5  ;;  %v1011_v5 = vrot.slane %v1010_v12, 4  ;;  %v3577_v3 = vld [vmem:[%s4204_s17 + $0xc0] sm:$0xe] }
 0x126   : > { %v1194_v41 = vsel %vm4293_vm5, %v1189_v60, %v1193_v47  ;;  %v1015_v26 = vrot.slane %v1013_v29, 5  ;;  %v1023_v19 = vshll.u32 %v5653_v8, 16  ;;  %v2896_v50 = vsel %vm2888_vm10, %v5582_v62, %v5450_v55 }
 0x127   : > { %v3752_v14 = vcombine.low %v1184_v54, %v1194_v41  ;;  %v1002_v53 = vsel %vm4293_vm5, %v997_v25, %v1001_v44  ;;  %v1208_v31 = vsel %vm4293_vm5, %v1203_v17, %v1207_v20  ;;  %v1213_v47 = vrot.slane %v1212_v23, 4  ;;  %v5675_v56 = vpop.permute.xlu0 %2714 }
 0x128   : > { %v3744_v1 = vcombine.low %v992_v40, %v1002_v53  ;;  %v1016_v22 = vsel %vm4293_vm5, %v1011_v5, %v1015_v26  ;;  %v1020_v18 = vor.u32 %v1019_v45, %v1015_v26  ;;  %v1025_v7 = vrot.slane %v1023_v19, 5  ;;  %v3569_v40 = vld [vmem:[%s4204_s17 + $0x60] sm:$0xe] }
 0x129   : > { %2400 = vrot.lane.b32.xlu1 %v3752_v14, %s4164_s21  ;;  %v3592_v44 = vrot.slane %v3576_v57, 9  ;;  %v1218_v55 = vsel %vm4293_vm5, %v1213_v47, %v1217_v33  ;;  %v1383_v62 = vrot.slane %v5565_v51, 5  ;;  %v1386_v13 = vrot.slane %v5617_v4, 5  ;;  %v3622_v57 = vld [vmem:[%s4204_s17 + $0xc0] sm:$0xf] }
 0x12a   : > { %2384 = vrot.lane.b32.xlu0 %v3744_v1, %s4164_s21  ;;  %v3584_v54 = vrot.slane %v3568_v16, 9  ;;  %v3753_v46 = vcombine.low %v1208_v31, %v1218_v55  ;;  %v1021_v15 = vrot.slane %v1020_v18, 4  ;;  %v1327_v60 = vrot.slane %v5585_v38, 5  ;;  %v5716_v19 = vld [vmem:[%s4204_s17 + $0x60] sm:$0xf] }
 0x12b   : > { %v1330_v17 = vrot.slane %v5623_v35, 5  ;;  %v2943_v20 = vsel %vm2921_vm11, %v5610_v37, %v5469_v9  ;;  %v2927_v12 = vsel %vm2921_vm11, %v5614_v34, %v5485_v27  ;;  %v1384_v51 = vsel %vm4235_vm2, %v3592_v44, %v1383_v62  ;;  %v5733_v18 = vld [vmem:[%s4204_s17 + $0xc4] sm:$0xf] }
 0x12c   : > { %v1385_v4 = vrot.slane %v1383_v62, 4  ;;  %v1026_v38 = vsel %vm4293_vm5, %v1021_v15, %v1025_v7  ;;  %v1328_v9 = vsel %vm4235_vm2, %v3584_v54, %v1327_v60  ;;  %v1329_v37 = vrot.slane %v1327_v60, 4 }
 0x12d   : > { %2402 = vrot.lane.b32.xlu1 %v3753_v46, %s4164_s21  ;;  %v3593_v35 = vrot.slane %v3577_v3, 9  ;;  %v3745_v27 = vcombine.low %v1016_v22, %v1026_v38  ;;  %v1390_v29 = vrot.slane %v5597_v36, 5  ;;  %v1393_v45 = vrot.slane %v5636_v63, 5  ;;  %v5750_v3 = vld [vmem:[%s4204_s17 + $0x6c] sm:$0xf] }
 0x12e   : > { %v5694_v25 = vpop.permute.xlu1 %2142  ;;  %v1387_v34 = vsel %vm4235_vm2, %v1385_v4, %v1386_v13  ;;  %v1331_v23 = vsel %vm4235_vm2, %v1329_v37, %v1330_v17  ;;  %v3585_v33 = vrot.slane %v3569_v40, 9  ;;  %v1334_v5 = vrot.slane %v5603_v39, 5  ;;  %v5756_v17 = vld [vmem:[%s4204_s17 + $0x64] sm:$0xf]  ;;  %v5767_v40 = vld [vmem:[%s4204_s17 + $0x70] sm:$0xf] }
 0x12f   : > { %v3768_v41 = vcombine.low %v1384_v51, %v1387_v34  ;;  %2386 = vrot.lane.b32.xlu0 %v3745_v27, %s4164_s21  ;;  %v3760_v53 = vcombine.low %v1328_v9, %v1331_v23  ;;  %v1391_v26 = vsel %vm4235_vm2, %v3593_v35, %v1390_v29  ;;  %v1392_v36 = vrot.slane %v1390_v29, 4  ;;  %v5775_v27 = vld [vmem:[%s4204_s17 + $0xc8] sm:$0x1] }
 0x130   : > { %v1337_v63 = vrot.slane %v5653_v8, 5  ;;  %v2945_v39 = vsel %vm2921_vm11, %v5642_v61, %v5496_v28  ;;  %v2929_v1 = vsel %vm2921_vm11, %v2896_v50, %v5507_v24  ;;  %v1335_v31 = vsel %vm4235_vm2, %v3585_v33, %v1334_v5 }
 0x131   : > { %v5709_v14 = vpop.permute.xlu0 %2126  ;;  %2480 = vrot.lane.b32.xlu1 %v3768_v41, %s4165_s22  ;;  %v1336_v47 = vrot.slane %v1334_v5, 4  ;;  %v2976_v8 = vsel %vm2954_vm12, %v2943_v20, %v5516_v32  ;;  %v1394_v22 = vsel %vm4235_vm2, %v1392_v36, %v1393_v45  ;;  %v1781_v7 = vshrl.u32 %v3622_v57, 16  ;;  %v3624_v32 = vld [vmem:[%s4204_s17 + $0xcc] sm:$0xf]  ;;  %v5761_v20 = vld [vmem:[%s4204_s17 + $0xd0] sm:$0xf] }
 0x132   : > { %v5718_v16 = vpop.permute.xlu1 %2220  ;;  %v1784_v28 = vshll.u32 %v3622_v57, 16  ;;  %v2960_v24 = vsel %vm2954_vm12, %v2927_v12, %v5540_v59  ;;  %v3769_v61 = vcombine.low %v1391_v26, %v1394_v22  ;;  %v1589_v44 = vshrl.u32 %v5716_v19, 16 }
 0x133   : > { %v1338_v50 = vsel %vm4235_vm2, %v1336_v47, %v1337_v63  ;;  %2464 = vrot.lane.b32.xlu0 %v3760_v53, %s4165_s22  ;;  %v2978_v13 = vsel %vm2954_vm12, %v2945_v39, %v5560_v52  ;;  %v2962_v59 = vsel %vm2954_vm12, %v2929_v1, %v5588_v0  ;;  %v1592_v54 = vshll.u32 %v5716_v19, 16 }
 0x134   : > { %v3761_v62 = vcombine.low %v1335_v31, %v1338_v50  ;;  %v1783_v46 = vrot.slane %v1781_v7, 4  ;;  %v1794_v15 = vshrl.u32 %v5733_v18, 16  ;;  %v3784_v60 = vcombine.low %v3622_v57, %v5733_v18 }
 0x135   : > { %v5741_v55 = vpop.permute.xlu0 %2204  ;;  %2482 = vrot.lane.b32.xlu1 %v3769_v61, %s4165_s22  ;;  %v3009_v52 = vsel %vm2987_vm13, %v2976_v8, %v5605_v48  ;;  %v1786_v0 = vrot.slane %v1784_v28, 5  ;;  %v2993_v12 = vsel %vm2987_vm13, %v2960_v24, %v5627_v11  ;;  %v1805_v51 = vshrl.u32 %v3624_v32, 16 }
 0x136   : > { %v1808_v4 = vshll.u32 %v3624_v32, 16  ;;  %4041 = vmatprep.mubr.msk.bf16.mxu1 %vm3042_vm14, %v3009_v52  ;;  %v1591_v9 = vrot.slane %v1589_v44, 4  ;;  %v1594_v37 = vrot.slane %v1592_v54, 5  ;;  %v1613_v35 = vshrl.u32 %v5750_v3, 16  ;;  %4025 = vmatprep.mubr.msk.bf16.mxu0 %vm3042_vm14, %v2993_v12  ;;  %v5805_v54 = vld [vmem:[%s4204_s17 + $0xd4] sm:$0x1] }
 0x137   : > { %v5769_v38 = vpop.permute.xlu1 %2222  ;;  %v1616_v48 = vshll.u32 %v5750_v3, 16  ;;  %2466 = vrot.lane.b32.xlu0 %v3761_v62, %s4165_s22  ;;  %v1602_v34 = vshrl.u32 %v5756_v17, 16  ;;  %v3776_v29 = vcombine.low %v5716_v19, %v5756_v17  ;;  %v1818_v45 = vshrl.u32 %v5761_v20, 16  ;;  %v5792_v19 = vld [vmem:[%s4204_s17 + $0x68] sm:$0x1] }
 0x138   : > { %v3785_v41 = vcombine.low %v3624_v32, %v5761_v20  ;;  %v1807_v23 = vrot.slane %v1805_v51, 4  ;;  %v1810_v33 = vrot.slane %v1808_v4, 5  ;;  %v1626_v5 = vshrl.u32 %v5767_v40, 16 }
 0x139   : > { %v5777_v11 = vpop.permute.xlu0 %2206  ;;  %2576 = vrot.lane.b32.xlu1 %v3784_v60, %s4166_s23  ;;  %v3777_v57 = vcombine.low %v5750_v3, %v5767_v40  ;;  %v1787_v53 = vor.u32 %v1786_v0, %v1783_v46  ;;  %v1790_v26 = vshll.u32 %v5733_v18, 16  ;;  %v1796_v36 = vrot.slane %v1794_v15, 4 }
 0x13a   : > { %v1800_v63 = vshll.u32 %v5775_v27, 16  ;;  %v1615_v1 = vrot.slane %v1613_v35, 4  ;;  %v1618_v31 = vrot.slane %v1616_v48, 5  ;;  %v1595_v47 = vor.u32 %v1594_v37, %v1591_v9 }
 0x13b   : > { %v5794_v39 = vpop.permute.xlu1 %2316  ;;  %v1598_v8 = vshll.u32 %v5756_v17, 16  ;;  %2560 = vrot.lane.b32.xlu0 %v3776_v29, %s4166_s23  ;;  %v1788_v7 = vrot.slane %v1787_v53, 4  ;;  %v1792_v28 = vrot.slane %v1790_v26, 5  ;;  %v1604_v61 = vrot.slane %v1602_v34, 4 }
 0x13c   : > { %v1802_v24 = vrot.slane %v1800_v63, 5  ;;  %v1596_v50 = vrot.slane %v1595_v47, 4  ;;  %v1608_v32 = vshll.u32 %v5792_v19, 16  ;;  %v3011_v62 = vsel %vm2987_vm13, %v2978_v13, %v5661_v2  ;;  %v5816_v2 = vld [vmem:[%s4204_s17 + $0x74] sm:$0x1] }
 0x13d   : > { %v5797_v22 = vpop.permute.xlu0 %2300  ;;  %2578 = vrot.lane.b32.xlu1 %v3785_v41, %s4166_s23  ;;  %v1600_v44 = vrot.slane %v1598_v8, 5  ;;  %v1793_v3 = vsel %vm4293_vm5, %v1788_v7, %v1792_v28  ;;  %v1797_v46 = vor.u32 %v1796_v36, %v1792_v28  ;;  %v2995_v15 = vsel %vm2987_vm13, %v2962_v59, %v5675_v56  ;;  %4042 = vmatmul.mubr.msk.bf16.gmra.mrb[4].mxu1 %vm3042_vm14, %v3011_v62 }
 0x13e   : > { %v1811_v60 = vor.u32 %v1810_v33, %v1807_v23  ;;  %v1610_v12 = vrot.slane %v1608_v32, 5  ;;  %v1814_v51 = vshll.u32 %v5761_v20, 16  ;;  %4026 = vmatmul.mubr.msk.bf16.gmra.mrb[4].mxu0 %vm3042_vm14, %v2995_v15  ;;  %v1820_v4 = vrot.slane %v1818_v45, 4  ;;  %v3657_v15 = vld [vmem:[%s4204_s17 + $0xcc] sm:$0xe] }
 0x13f   : > { %v1601_v52 = vsel %vm4293_vm5, %v1596_v50, %v1600_v44  ;;  %v1605_v0 = vor.u32 %v1604_v61, %v1600_v44  ;;  %v5819_v13 = vpop.permute.xlu1 %2318  ;;  %2562 = vrot.lane.b32.xlu0 %v3777_v57, %s4166_s23  ;;  %v1798_v56 = vrot.slane %v1797_v46, 4  ;;  %v1824_v9 = vshll.u32 %v5805_v54, 16  ;;  %v3656_v57 = vld [vmem:[%s4204_s17 + $0xc0] sm:$0xe] }
 0x140   : > { %v1812_v59 = vrot.slane %v1811_v60, 4  ;;  %v1816_v48 = vrot.slane %v1814_v51, 5  ;;  %v1619_v34 = vor.u32 %v1618_v31, %v1615_v1  ;;  %v1622_v29 = vshll.u32 %v5767_v40, 16  ;;  %v3648_v1 = vld [vmem:[%s4204_s17 + $0x60] sm:$0xe] }
 0x141   : > { %v5823_v37 = vpop.permute.xlu0 %2302  ;;  %v1606_v35 = vrot.slane %v1605_v0, 4  ;;  %v1803_v41 = vsel %vm4293_vm5, %v1798_v56, %v1802_v24  ;;  %v1628_v23 = vrot.slane %v1626_v5, 4  ;;  %v1632_v33 = vshll.u32 %v5816_v2, 16  ;;  %v3649_v51 = vld [vmem:[%s4204_s17 + $0x6c] sm:$0xe] }
 0x142   : > { %v3800_v53 = vcombine.low %v1793_v3, %v1803_v41  ;;  %v1821_v26 = vor.u32 %v1820_v4, %v1816_v48  ;;  %v1826_v36 = vrot.slane %v1824_v9, 5  ;;  %v1620_v47 = vrot.slane %v1619_v34, 4 }
 0x143   : > { %v1611_v45 = vsel %vm4293_vm5, %v1606_v35, %v1610_v12  ;;  %v1624_v8 = vrot.slane %v1622_v29, 5  ;;  %v1817_v31 = vsel %vm4293_vm5, %v1812_v59, %v1816_v48  ;;  %v3672_v7 = vrot.slane %v3656_v57, 9 }
 0x144   : > { %v3792_v63 = vcombine.low %v1601_v52, %v1611_v45  ;;  %2656 = vrot.lane.b32.xlu1 %v3800_v53, %s4167_s24  ;;  %v1822_v5 = vrot.slane %v1821_v26, 4  ;;  %v1634_v61 = vrot.slane %v1632_v33, 5  ;;  %v1992_v50 = vrot.slane %v5733_v18, 5 }
 0x145   : > { %v1629_v24 = vor.u32 %v1628_v23, %v1624_v8  ;;  %v1995_v44 = vrot.slane %v5775_v27, 5  ;;  %v1625_v3 = vsel %vm4293_vm5, %v1620_v47, %v1624_v8  ;;  %v3664_v46 = vrot.slane %v3648_v1, 9 }
 0x146   : > { %v5836_v28 = vpop.permute.xlu1 %2396  ;;  %2640 = vrot.lane.b32.xlu0 %v3792_v63, %s4167_s24  ;;  %v1827_v62 = vsel %vm4293_vm5, %v1822_v5, %v1826_v36  ;;  %v1993_v0 = vsel %vm4235_vm2, %v3672_v7, %v1992_v50  ;;  %v1994_v12 = vrot.slane %v1992_v50, 4  ;;  %v1936_v18 = vrot.slane %v5756_v17, 5  ;;  %v4141_v50 = vld [vmem:[%s4204_s17 + $0x90] sm:$0xf] }
 0x147   : > { %v5841_v32 = vpop.permute.xlu0 %2380  ;;  %v3801_v60 = vcombine.low %v1817_v31, %v1827_v62  ;;  %v1630_v52 = vrot.slane %v1629_v24, 4  ;;  %v1939_v27 = vrot.slane %v5792_v19, 5  ;;  %v3673_v4 = vrot.slane %v3657_v15, 9  ;;  %v4144_v15 = vld [vmem:[%s4204_s17 + $0x34] sm:$0xf] }
 0x148   : > { %v1996_v59 = vsel %vm4235_vm2, %v1994_v12, %v1995_v44  ;;  %v1999_v9 = vrot.slane %v5761_v20, 5  ;;  %v1937_v34 = vsel %vm4235_vm2, %v3664_v46, %v1936_v18  ;;  %v1938_v17 = vrot.slane %v1936_v18, 4  ;;  %v4142_v44 = vld [vmem:[%s4204_s17 + $0x94] sm:$0xf]  ;;  %v4143_v46 = vld [vmem:[%s4204_s17 + $0x30] sm:$0xf] }
 0x149   : > { %2658 = vrot.lane.b32.xlu1 %v3801_v60, %s4167_s24  ;;  %v1635_v56 = vsel %vm4293_vm5, %v1630_v52, %v1634_v61  ;;  %v3816_v48 = vcombine.low %v1993_v0, %v1996_v59  ;;  %v2002_v30 = vrot.slane %v5805_v54, 5  ;;  %v3665_v23 = vrot.slane %v3649_v51, 9 }
 0x14a   : > { %v3793_v35 = vcombine.low %v1625_v3, %v1635_v56  ;;  %v2000_v19 = vsel %vm4235_vm2, %v3673_v4, %v1999_v9  ;;  %v2001_v41 = vrot.slane %v1999_v9, 4  ;;  %v1940_v20 = vsel %vm4235_vm2, %v1938_v17, %v1939_v27  ;;  %v4146_v17 = vld [vmem:[%s4204_s17 + $0xa0] sm:$0xf] }
 0x14b   : > { %v1943_v57 = vrot.slane %v5767_v40, 5  ;;  %v1946_v53 = vrot.slane %v5816_v2, 5  ;;  %v3808_v45 = vcombine.low %v1937_v34, %v1940_v20  ;;  %v3686_v62 = vcombine.low %v4141_v50, %v4142_v44  ;;  %v4145_v34 = vld [vmem:[%s4204_s17 + $0x9c] sm:$0xf] }
 0x14c   : > { %v5861_v29 = vpop.permute.xlu1 %2398  ;;  %2642 = vrot.lane.b32.xlu0 %v3793_v35, %s4167_s24  ;;  %v2003_v26 = vsel %vm4235_vm2, %v2001_v41, %v2002_v30  ;;  %v3678_v21 = vcombine.low %v4143_v46, %v4144_v15  ;;  %v4147_v41 = vld [vmem:[%s4204_s17 + $0x3c] sm:$0xf]  ;;  %v4148_v30 = vld [vmem:[%s4204_s17 + $0x40] sm:$0xf] }
 0x14d   : > { %v5866_v33 = vpop.permute.xlu0 %2382  ;;  %2736 = vrot.lane.b32.xlu1 %v3816_v48, %s4168_s25  ;;  %v3817_v36 = vcombine.low %v2000_v19, %v2003_v26  ;;  %v1944_v54 = vsel %vm4235_vm2, %v3665_v23, %v1943_v57  ;;  %v1945_v63 = vrot.slane %v1943_v57, 4  ;;  %v2779_v52 = vsel %vm2740_vm6, %v3686_v62, %v5638_v49 }
 0x14e   : > { %v2815_v0 = vsel %vm2789_vm7, %v2779_v52, %v5718_v16  ;;  %v2755_v12 = vsel %vm2740_vm6, %v3678_v21, %v5649_v43  ;;  %v3679_v23 = vcombine.low %v4147_v41, %v4148_v30 }
 0x14f   : > { %v1947_v40 = vsel %vm4235_vm2, %v1945_v63, %v1946_v53  ;;  %v2848_v18 = vsel %vm2822_vm8, %v2815_v0, %v5794_v39  ;;  %v2799_v51 = vsel %vm2789_vm7, %v2755_v12, %v5741_v55 }
 0x150   : > { %v2477_v47 = vpop.permute.xlu1 %2476  ;;  %2720 = vrot.lane.b32.xlu0 %v3808_v45, %s4168_s25  ;;  %v3809_v2 = vcombine.low %v1944_v54, %v1947_v40  ;;  %v2881_v56 = vsel %vm2855_vm9, %v2848_v18, %v5836_v28  ;;  %v2832_v49 = vsel %vm2822_vm8, %v2799_v51, %v5797_v22  ;;  %v2758_v26 = vsel %vm2740_vm6, %v3679_v23, %v5709_v14 }
 0x151   : > { %v2461_v8 = vpop.permute.xlu0 %2460  ;;  %2738 = vrot.lane.b32.xlu1 %v3817_v36, %s4168_s25  ;;  %v2914_v16 = vsel %vm2888_vm10, %v2881_v56, %v2477_v47  ;;  %v2865_v43 = vsel %vm2855_vm9, %v2832_v49, %v5841_v32  ;;  %v3687_v32 = vcombine.low %v4145_v34, %v4146_v17  ;;  %v2801_v54 = vsel %vm2789_vm7, %v2758_v26, %v5777_v11 }
 0x152   : > { %v2898_v4 = vsel %vm2888_vm10, %v2865_v43, %v2461_v8 }
 0x153   : > { %v2782_v20 = vsel %vm2740_vm6, %v3687_v32, %v5694_v25  ;;  %v2834_v25 = vsel %vm2822_vm8, %v2801_v54, %v5823_v37 }
 0x154   : > { %v2479_v1 = vpop.permute.xlu1 %2478  ;;  %2722 = vrot.lane.b32.xlu0 %v3809_v2, %s4168_s25  ;;  %v2817_v57 = vsel %vm2789_vm7, %v2782_v20, %v5769_v38 }
 0x155   : > { %v2463_v31 = vpop.permute.xlu0 %2462  ;;  %v2850_v53 = vsel %vm2822_vm8, %v2817_v57, %v5819_v13  ;;  %v2867_v13 = vsel %vm2855_vm9, %v2834_v25, %v5866_v33 }
 0x156   : > { %v2883_v36 = vsel %vm2855_vm9, %v2850_v53, %v5861_v29  ;;  %v2900_v40 = vsel %vm2888_vm10, %v2867_v13, %v2463_v31 }
 0x157   : > { %v2916_v63 = vsel %vm2888_vm10, %v2883_v36, %v2479_v1  ;;  %v5968_v36 = vld [vmem:[%s6051_s2] ss:$0 sm:$0xff] }
 0x158   : > { %v2573_v5 = vpop.permute.xlu1 %2572 }
 0x159   : > { %v2557_v7 = vpop.permute.xlu0 %2556  ;;  %v2947_v39 = vsel %vm2921_vm11, %v2914_v16, %v2573_v5  ;;  %v4149_v16 = vld [vmem:[%s4204_s17 + $0xa8] sm:$0xf] }
 0x15a   : > { %v2931_v28 = vsel %vm2921_vm11, %v2898_v4, %v2557_v7  ;;  %v4151_v4 = vld [vmem:[%s4204_s17 + $0x48] sm:$0xf] }
 0x15c   : > { %v2575_v24 = vpop.permute.xlu1 %2574 }
 0x15d   : > { %v2559_v61 = vpop.permute.xlu0 %2558  ;;  %v2949_v38 = vsel %vm2921_vm11, %v2916_v63, %v2575_v24 }
 0x15e   : > { %v2933_v11 = vsel %vm2921_vm11, %v2900_v40, %v2559_v61 }
 0x162   : > { %v2653_v3 = vpop.permute.xlu1 %2652 }
 0x163   : > { %v2980_v55 = vsel %vm2954_vm12, %v2947_v39, %v2653_v3 }
 0x166   : > { %v2637_v60 = vpop.permute.xlu0 %2636 }
 0x167   : > { %v2964_v22 = vsel %vm2954_vm12, %v2931_v28, %v2637_v60 }
 0x169   : > { %v2655_v27 = vpop.permute.xlu1 %2654 }
 0x16a   : > { %v2982_v8 = vsel %vm2954_vm12, %v2949_v38, %v2655_v27 }
 0x16b   : > { %v2639_v59 = vpop.permute.xlu0 %2638 }
 0x16c   : > { %v2966_v2 = vsel %vm2954_vm12, %v2933_v11, %v2639_v59  ;;  %v4150_v59 = vld [vmem:[%s4204_s17 + $0xac] sm:$0xf] }
 0x16d   : > { %v2733_v9 = vpop.permute.xlu1 %2732  ;;  %v3688_v43 = vcombine.low %v4149_v16, %v4150_v59 }
 0x16e   : > { %v3013_v35 = vsel %vm2987_vm13, %v2980_v55, %v2733_v9  ;;  %v4152_v55 = vld [vmem:[%s4204_s17 + $0x4c] sm:$0xf] }
 0x16f   : > { %v2717_v48 = vpop.permute.xlu0 %2716  ;;  %4045 = vmatprep.mubr.msk.bf16.mxu1 %vm3042_vm14, %v3013_v35  ;;  %v3680_v9 = vcombine.low %v4151_v4, %v4152_v55 }
 0x170   : > { %v2997_v19 = vsel %vm2987_vm13, %v2964_v22, %v2717_v48  ;;  %v3689_v22 = vcombine.low %v5448_v42, %v5457_v6 }
 0x171   : > { %4029 = vmatprep.mubr.msk.bf16.mxu0 %vm3042_vm14, %v2997_v19  ;;  %v3681_v19 = vcombine.low %v5476_v58, %v5483_v10 }
 0x175   : > { %v2145_v45 = vpop.permute.xlu1 %2144 }
 0x176   : > { %v2785_v35 = vsel %vm2740_vm6, %v3688_v43, %v2145_v45 }
 0x179   : > { %v2129_v47 = vpop.permute.xlu0 %2128  ;;  %v2735_v14 = vpop.permute.xlu1 %2734 }
 0x17a   : > { %v3015_v29 = vsel %vm2987_vm13, %v2982_v8, %v2735_v14  ;;  %v2761_v32 = vsel %vm2740_vm6, %v3680_v9, %v2129_v47 }
 0x17b   : > { %4046 = vmatmul.mubr.msk.bf16.gmra.mrb[8].mxu1 %vm3042_vm14, %v3015_v29 }
 0x17d   : > { %v2719_v37 = vpop.permute.xlu0 %2718 }
 0x17e   : > { %v2999_v1 = vsel %vm2987_vm13, %v2966_v2, %v2719_v37 }
 0x17f   : > { %4030 = vmatmul.mubr.msk.bf16.gmra.mrb[8].mxu0 %vm3042_vm14, %v2999_v1 }
 0x183   : > { %v2147_v5 = vpop.permute.xlu1 %2146 }
 0x184   : > { %v2788_v30 = vsel %vm2740_vm6, %v3689_v22, %v2147_v5 }
 0x186   : > { %v2131_v33 = vpop.permute.xlu0 %2130 }
 0x187   : > { %v2225_v7 = vpop.permute.xlu1 %2224  ;;  %v2764_v54 = vsel %vm2740_vm6, %v3681_v19, %v2131_v33 }
 0x188   : > { %v2819_v48 = vsel %vm2789_vm7, %v2785_v35, %v2225_v7 }
 0x18a   : > { %v2209_v24 = vpop.permute.xlu0 %2208 }
 0x18b   : > { %v2227_v50 = vpop.permute.xlu1 %2226  ;;  %v2803_v23 = vsel %vm2789_vm7, %v2761_v32, %v2209_v24 }
 0x18c   : > { %v2821_v42 = vsel %vm2789_vm7, %v2788_v30, %v2227_v50 }
 0x18e   : > { %v2211_v44 = vpop.permute.xlu0 %2210 }
 0x18f   : > { %v2321_v31 = vpop.permute.xlu1 %2320  ;;  %v2805_v47 = vsel %vm2789_vm7, %v2764_v54, %v2211_v44 }
 0x190   : > { %v2852_v34 = vsel %vm2822_vm8, %v2819_v48, %v2321_v31 }
 0x192   : > { %v2305_v62 = vpop.permute.xlu0 %2304 }
 0x193   : > { %v2323_v61 = vpop.permute.xlu1 %2322  ;;  %v2836_v6 = vsel %vm2822_vm8, %v2803_v23, %v2305_v62 }
 0x194   : > { %v2854_v45 = vsel %vm2822_vm8, %v2821_v42, %v2323_v61 }
 0x196   : > { %v2307_v3 = vpop.permute.xlu0 %2306 }
 0x197   : > { %v2838_v29 = vsel %vm2822_vm8, %v2805_v47, %v2307_v3 }
 0x19b   : > { %v2401_v46 = vpop.permute.xlu1 %2400 }
 0x19c   : > { %v2385_v15 = vpop.permute.xlu0 %2384  ;;  %v2885_v41 = vsel %vm2855_vm9, %v2852_v34, %v2401_v46 }
 0x19d   : > { %v2869_v26 = vsel %vm2855_vm9, %v2836_v6, %v2385_v15 }
 0x19f   : > { %v2403_v21 = vpop.permute.xlu1 %2402 }
 0x1a0   : > { %v2887_v63 = vsel %vm2855_vm9, %v2854_v45, %v2403_v21 }
 0x1a1   : > { %v2387_v60 = vpop.permute.xlu0 %2386 }
 0x1a2   : > { %v2871_v33 = vsel %vm2855_vm9, %v2838_v29, %v2387_v60 }
 0x1a3   : > { %v2481_v52 = vpop.permute.xlu1 %2480 }
 0x1a4   : > { %v2918_v20 = vsel %vm2888_vm10, %v2885_v41, %v2481_v52 }
 0x1a5   : > { %v2465_v0 = vpop.permute.xlu0 %2464 }
 0x1a6   : > { %v2902_v25 = vsel %vm2888_vm10, %v2869_v26, %v2465_v0 }
 0x1a7   : > { %v2483_v12 = vpop.permute.xlu1 %2482 }
 0x1a8   : > { %v2920_v13 = vsel %vm2888_vm10, %v2887_v63, %v2483_v12 }
 0x1a9   : > { %v2467_v18 = vpop.permute.xlu0 %2466 }
 0x1aa   : > { %v2904_v62 = vsel %vm2888_vm10, %v2871_v33, %v2467_v18 }
 0x1ab   : > { %v2577_v27 = vpop.permute.xlu1 %2576 }
 0x1ac   : > { %v2951_v57 = vsel %vm2921_vm11, %v2918_v20, %v2577_v27 }
 0x1ad   : > { %v2561_v51 = vpop.permute.xlu0 %2560 }
 0x1ae   : > { %v2935_v8 = vsel %vm2921_vm11, %v2902_v25, %v2561_v51 }
 0x1af   : > { %v2579_v56 = vpop.permute.xlu1 %2578 }
 0x1b0   : > { %v2953_v11 = vsel %vm2921_vm11, %v2920_v13, %v2579_v56 }
 0x1b1   : > { %v2563_v49 = vpop.permute.xlu0 %2562 }
 0x1b2   : > { %v2937_v60 = vsel %vm2921_vm11, %v2904_v62, %v2563_v49 }
 0x1b6   : > { %v2657_v39 = vpop.permute.xlu1 %2656 }
 0x1b7   : > { %v2984_v58 = vsel %vm2954_vm12, %v2951_v57, %v2657_v39 }
 0x1b8   : > { %v2641_v28 = vpop.permute.xlu0 %2640 }
 0x1b9   : > { %v2968_v2 = vsel %vm2954_vm12, %v2935_v8, %v2641_v28 }
 0x1bb   : > { %v2659_v17 = vpop.permute.xlu1 %2658 }
 0x1bc   : > { %v2986_v7 = vsel %vm2954_vm12, %v2953_v11, %v2659_v17 }
 0x1be   : > { %v2643_v53 = vpop.permute.xlu0 %2642 }
 0x1bf   : > { %v2737_v10 = vpop.permute.xlu1 %2736  ;;  %v2970_v27 = vsel %vm2954_vm12, %v2937_v60, %v2643_v53 }
 0x1c0   : > { %v3017_v38 = vsel %vm2987_vm13, %v2984_v58, %v2737_v10 }
 0x1c1   : > { %4049 = vmatprep.mubr.msk.bf16.mxu1 %vm3042_vm14, %v3017_v38 }
 0x1c2   : > { %v4023_v14 = vpop.f32.mrb[0].mxu0  ;;  %v2721_v37 = vpop.permute.xlu0 %2720 }
 0x1c3   : > { %v4039_v40 = vpop.f32.mrb[0].mxu1  ;;  %v3125_v1 = vadd.f32 %v4023_v14, %v5968_v36  ;;  %v3116_v5 = vpop.f32.mrb[1].mxu0  ;;  %v3001_v24 = vsel %vm2987_vm13, %v2968_v2, %v2721_v37 }
 0x1c4   : > { %v2739_v50 = vpop.permute.xlu1 %2738  ;;  %v3189_v44 = vadd.f32 %v4039_v40, %v5968_v36  ;;  %v3180_v31 = vpop.f32.mrb[1].mxu1  ;;  %4033 = vmatprep.mubr.msk.bf16.mxu0 %vm3042_vm14, %v3001_v24  ;;  %v3117_v3 = vadd.f32 %v5968_v36, %v3116_v5 }
 0x1c5   : > { %v3019_v61 = vsel %vm2987_vm13, %v2986_v7, %v2739_v50  ;;  %v3181_v46 = vadd.f32 %v5968_v36, %v3180_v31  ;;  %v4024_v15 = vpop.f32.mrb[2].mxu0  ;;  %v4040_v21 = vpop.f32.mrb[2].mxu1  ;;  %v3245_v56 = vmax.f32 %v3125_v1, 0.0 }
 0x1c6   : > { %4050 = vmatmul.mubr.msk.bf16.gmra.mrb[12].mxu1 %vm3042_vm14, %v3019_v61  ;;  %v3128_v52 = vadd.f32 %v4024_v15, %v5968_v36  ;;  %v3192_v0 = vadd.f32 %v4040_v21, %v5968_v36  ;;  %v3119_v12 = vpop.f32.mrb[3].mxu0  ;;  %v3183_v18 = vpop.f32.mrb[3].mxu1  ;;  %v3261_v49 = vmax.f32 %v3189_v44, 0.0  ;;  %v3243_v55 = vmax.f32 %v3117_v3, 0.0 }
 0x1c7   : > { %v2723_v51 = vpop.permute.xlu0 %2722  ;;  %v3120_v16 = vadd.f32 %v5968_v36, %v3119_v12  ;;  %v3184_v59 = vadd.f32 %v5968_v36, %v3183_v18  ;;  %v3259_v9 = vmax.f32 %v3181_v46, 0.0 }
 0x1c8   : > { %v3003_v43 = vsel %vm2987_vm13, %v2970_v27, %v2723_v51  ;;  %v3246_v39 = vmax.f32 %v3128_v52, 0.0  ;;  %v3262_v4 = vmax.f32 %v3192_v0, 0.0 }
 0x1c9   : > { %4034 = vmatmul.mubr.msk.bf16.gmra.mrb[12].mxu0 %vm3042_vm14, %v3003_v43  ;;  %v3244_v28 = vmax.f32 %v3120_v16, 0.0  ;;  %v3260_v35 = vmax.f32 %v3184_v59, 0.0 }
 0x1ca   : > { %v3912_v22 = vpack.c.bf16 %v3246_v39, %v3245_v56  ;;  %v3952_v48 = vpack.c.bf16 %v3262_v4, %v3261_v49 }
 0x1cb   : > { %v3907_v34 = vpack.c.bf16 %v3244_v28, %v3243_v55  ;;  %v3947_v17 = vpack.c.bf16 %v3260_v35, %v3259_v9 }
 0x1cc   : > { %3984 = vst [vmem:[%s6004_s8 + $0x8] sm:$0xff] %v3912_v22   ;;  %3992 = vst [vmem:[%s6004_s8 + $0x48] sm:$0xff] %v3952_v48  }
 0x1cd   : > { %3908 = vst [vmem:[%s6004_s8] sm:$0xff] %v3907_v34   ;;  %3991 = vst [vmem:[%s6004_s8 + $0x40] sm:$0xff] %v3947_v17  }
 0x210   : > { %v4043_v32 = vpop.f32.mrb[4].mxu1 }
 0x211   : > { %v4027_v19 = vpop.f32.mrb[4].mxu0  ;;  %v3205_v41 = vadd.f32 %v4043_v32, %v5968_v36  ;;  %v3196_v30 = vpop.f32.mrb[5].mxu1 }
 0x212   : > { %v3141_v23 = vadd.f32 %v4027_v19, %v5968_v36  ;;  %v3132_v20 = vpop.f32.mrb[5].mxu0  ;;  %v3197_v42 = vadd.f32 %v5968_v36, %v3196_v30  ;;  %v4044_v6 = vpop.f32.mrb[6].mxu1 }
 0x213   : > { %v3133_v57 = vadd.f32 %v5968_v36, %v3132_v20  ;;  %v4028_v53 = vpop.f32.mrb[6].mxu0  ;;  %v3208_v45 = vadd.f32 %v4044_v6, %v5968_v36  ;;  %v3199_v26 = vpop.f32.mrb[7].mxu1  ;;  %v3265_v63 = vmax.f32 %v3205_v41, 0.0 }
 0x214   : > { %v3144_v58 = vadd.f32 %v4028_v53, %v5968_v36  ;;  %v3135_v10 = vpop.f32.mrb[7].mxu0  ;;  %v3200_v54 = vadd.f32 %v5968_v36, %v3199_v26  ;;  %v3249_v47 = vmax.f32 %v3141_v23, 0.0  ;;  %v3263_v13 = vmax.f32 %v3197_v42, 0.0 }
 0x215   : > { %v3266_v25 = vmax.f32 %v3208_v45, 0.0  ;;  %v3136_v38 = vadd.f32 %v5968_v36, %v3135_v10  ;;  %v3247_v40 = vmax.f32 %v3133_v57, 0.0 }
 0x216   : > { %v3250_v8 = vmax.f32 %v3144_v58, 0.0  ;;  %v3264_v14 = vmax.f32 %v3200_v54, 0.0 }
 0x217   : > { %v3962_v29 = vpack.c.bf16 %v3266_v25, %v3265_v63  ;;  %v3248_v11 = vmax.f32 %v3136_v38, 0.0 }
 0x218   : > { %v3922_v2 = vpack.c.bf16 %v3250_v8, %v3249_v47  ;;  %v3957_v37 = vpack.c.bf16 %v3264_v14, %v3263_v13 }
 0x219   : > { %3994 = vst [vmem:[%s6004_s8 + $0x58] sm:$0xff] %v3962_v29   ;;  %v3917_v1 = vpack.c.bf16 %v3248_v11, %v3247_v40 }
 0x21a   : > { %3986 = vst [vmem:[%s6004_s8 + $0x18] sm:$0xff] %v3922_v2   ;;  %3993 = vst [vmem:[%s6004_s8 + $0x50] sm:$0xff] %v3957_v37  }
 0x21b   : > { %3985 = vst [vmem:[%s6004_s8 + $0x10] sm:$0xff] %v3917_v1  }
 0x24e   : > { %v4047_v5 = vpop.f32.mrb[8].mxu1 }
 0x24f   : > { %v3221_v33 = vadd.f32 %v4047_v5, %v5968_v36  ;;  %v3212_v7 = vpop.f32.mrb[9].mxu1 }
 0x250   : > { %v3213_v24 = vadd.f32 %v5968_v36, %v3212_v7  ;;  %v4048_v50 = vpop.f32.mrb[10].mxu1 }
 0x251   : > { %v3224_v31 = vadd.f32 %v4048_v50, %v5968_v36  ;;  %v3215_v62 = vpop.f32.mrb[11].mxu1  ;;  %v3269_v15 = vmax.f32 %v3221_v33, 0.0 }
 0x252   : > { %v4031_v44 = vpop.f32.mrb[8].mxu0  ;;  %v3216_v46 = vadd.f32 %v5968_v36, %v3215_v62  ;;  %v3267_v0 = vmax.f32 %v3213_v24, 0.0 }
 0x253   : > { %v3157_v61 = vadd.f32 %v4031_v44, %v5968_v36  ;;  %v3148_v3 = vpop.f32.mrb[9].mxu0  ;;  %v3270_v52 = vmax.f32 %v3224_v31, 0.0 }
 0x254   : > { %v3149_v21 = vadd.f32 %v5968_v36, %v3148_v3  ;;  %v4032_v60 = vpop.f32.mrb[10].mxu0  ;;  %v3268_v27 = vmax.f32 %v3216_v46, 0.0 }
 0x255   : > { %v3160_v12 = vadd.f32 %v4032_v60, %v5968_v36  ;;  %v3151_v18 = vpop.f32.mrb[11].mxu0  ;;  %v3972_v51 = vpack.c.bf16 %v3270_v52, %v3269_v15  ;;  %v3253_v16 = vmax.f32 %v3157_v61, 0.0 }
 0x256   : > { %v3152_v56 = vadd.f32 %v5968_v36, %v3151_v18  ;;  %v3967_v43 = vpack.c.bf16 %v3268_v27, %v3267_v0  ;;  %v3251_v49 = vmax.f32 %v3149_v21, 0.0 }
 0x257   : > { %v3254_v59 = vmax.f32 %v3160_v12, 0.0  ;;  %3996 = vst [vmem:[%s6004_s8 + $0x68] sm:$0xff] %v3972_v51  }
 0x258   : > { %v3252_v39 = vmax.f32 %v3152_v56, 0.0  ;;  %3995 = vst [vmem:[%s6004_s8 + $0x60] sm:$0xff] %v3967_v43  }
 0x259   : > { %v3932_v4 = vpack.c.bf16 %v3254_v59, %v3253_v16 }
 0x25a   : > { %v3927_v55 = vpack.c.bf16 %v3252_v39, %v3251_v49 }
 0x25b   : > { %3988 = vst [vmem:[%s6004_s8 + $0x28] sm:$0xff] %v3932_v4  }
 0x25c   : > { %3987 = vst [vmem:[%s6004_s8 + $0x20] sm:$0xff] %v3927_v55  }
 0x299   : > { %v4051_v9 = vpop.f32.mrb[12].mxu1 }
 0x29a   : > { %v3237_v28 = vadd.f32 %v4051_v9, %v5968_v36  ;;  %v3228_v35 = vpop.f32.mrb[13].mxu1 }
 0x29b   : > { %v3229_v22 = vadd.f32 %v5968_v36, %v3228_v35  ;;  %v4052_v48 = vpop.f32.mrb[14].mxu1 }
 0x29c   : > { %v4035_v34 = vpop.f32.mrb[12].mxu0  ;;  %v3240_v17 = vadd.f32 %v4052_v48, %v5968_v36  ;;  %v3231_v32 = vpop.f32.mrb[15].mxu1  ;;  %v3273_v23 = vmax.f32 %v3237_v28, 0.0 }
 0x29d   : > { %v3173_v19 = vadd.f32 %v4035_v34, %v5968_v36  ;;  %v3164_v41 = vpop.f32.mrb[13].mxu0  ;;  %v3232_v30 = vadd.f32 %v5968_v36, %v3231_v32  ;;  %v3271_v57 = vmax.f32 %v3229_v22, 0.0 }
 0x29e   : > { %v3165_v20 = vadd.f32 %v5968_v36, %v3164_v41  ;;  %v4036_v42 = vpop.f32.mrb[14].mxu0  ;;  %v3274_v6 = vmax.f32 %v3240_v17, 0.0 }
 0x29f   : > { %v3176_v53 = vadd.f32 %v4036_v42, %v5968_v36  ;;  %v3167_v45 = vpop.f32.mrb[15].mxu0  ;;  %v3272_v26 = vmax.f32 %v3232_v30, 0.0  ;;  %v3257_v54 = vmax.f32 %v3173_v19, 0.0 }
 0x2a0   : > { %v3982_v58 = vpack.c.bf16 %v3274_v6, %v3273_v23  ;;  %v3168_v10 = vadd.f32 %v5968_v36, %v3167_v45  ;;  %v3255_v38 = vmax.f32 %v3165_v20, 0.0 }
 0x2a1   : > { %v3258_v63 = vmax.f32 %v3176_v53, 0.0  ;;  %v3977_v25 = vpack.c.bf16 %v3272_v26, %v3271_v57 }
 0x2a2   : > { %3998 = vst [vmem:[%s6004_s8 + $0x78] sm:$0xff] %v3982_v58   ;;  %v3256_v47 = vmax.f32 %v3168_v10, 0.0 }
 0x2a3   : > { %v3942_v13 = vpack.c.bf16 %v3258_v63, %v3257_v54  ;;  %3997 = vst [vmem:[%s6004_s8 + $0x70] sm:$0xff] %v3977_v25  }
 0x2a4   : > { %v3937_v8 = vpack.c.bf16 %v3256_v47, %v3255_v38 }
 0x2a5   : > { %3990 = vst [vmem:[%s6004_s8 + $0x38] sm:$0xff] %v3942_v13  }
 0x2a6   : > { %3989 = vst [vmem:[%s6004_s8 + $0x30] sm:$0xff] %v3937_v8  }
 0x2a7 PF: > { %s13_s12 = sadd.s32 1, %s4159_s12  }
 0x2a8   : > { %p10_p4 = scmp.ge.s32.totalorder %s13_s12, 4  }
 0x2aa   :  { %12 = sbr.rel (!%p10_p4) target bundleno = 1 (0x1), region = 64 }

// kernel: faster_rcnn_forward.5
= control target key start
LH: loop header
LB: loop body
LE: loop exit
PB: predicated region body
PF: predicated region fallthrough
CT: control target
= control target key end

     0   :  { %s5655_s18 = smov 0   ;;  %s7616_s0 = inlined_call_operand.vmem [shape: bf16[2,18,18,128], index: 0, kind: input, shape index: {}]   ;;  %s7617_s1 = inlined_call_operand.vmem [shape: bf16[1152,128], index: 1, kind: input, shape index: {}]   ;;  %s7618_s2 = inlined_call_operand.vmem [shape: f32[1,128], index: 2, kind: input, shape index: {}]   ;;  %s7619_s3 = inlined_call_operand.vmem [shape: bf16[128,128], index: 3, kind: input, shape index: {}]   ;;  %s7620_s4 = inlined_call_operand.vmem [shape: f32[1,128], index: 4, kind: input, shape index: {}]   ;;  %s7621_s5 = inlined_call_operand.vmem [shape: f32[2,16,16,128], index: 5, kind: output, shape index: {}]  }
   0x1 LB: > { %s4437_s19 = sadd.s32 4294967295, %s5623_s18   ;;  %p4441_p0 = scmp.ge.s32.totalorder %s5623_s18, 1  ;;  %s5623_s18 = sphi %s5655_s18, %s15_s18  }
   0x2   : > { %p187_p1 = scmp.lt.s32.totalorder %s5623_s18, 3 }
   0x4   : > { %p188_p2 = pnand %p4441_p0, %p187_p1 }
   0x6   : > { %191 = sbr.rel (%p188_p2) target bundleno = 824 (0x338), region = 40 }
   0xd   : > { %v5451_v0 = vld [vmem:[%s7617_s1 + $0x40] sm:$0xff]   ;;  %v5455_v4 = vld [vmem:[%s7617_s1 + $0x48] sm:$0xff]   ;;  %v5459_v8 = vld [vmem:[%s7617_s1 + $0x50] sm:$0xff]   ;;  %p215_p3 = scmp.lt.s32.totalorder %s4437_s19, 1  ;;  %vm725_vm0 = vcmask 1042432   ;;  %vm726_vm3 = vcmask 1046532  }
   0xe   : > { %v5452_v1 = vld [vmem:[%s7617_s1] sm:$0xff]   ;;  %4850 = vmatprep.subr.bf16.mxu0 %v5451_v0  ;;  %v5456_v5 = vld [vmem:[%s7617_s1 + $0x8] sm:$0xff]   ;;  %v5460_v9 = vld [vmem:[%s7617_s1 + $0x10] sm:$0xff]   ;;  %vm274_vm1 = vsmask.f32 3328 }
   0xf   : > { %v5453_v2 = vld [vmem:[%s7617_s1 + $0xc0] sm:$0xff]   ;;  %4851 = vmatpush3.bf16.msra.mxu0 %v5452_v1  ;;  %v5457_v6 = vld [vmem:[%s7617_s1 + $0xc8] sm:$0xff]   ;;  %v5461_v10 = vld [vmem:[%s7617_s1 + $0xd0] sm:$0xff]   ;;  %s7686_s19 = smov (!%p215_p3, %s4437_s19), 1  ;;  %vm275_vm2 = vsmask.f32 7440 }
  0x10   : > { %v5454_v3 = vld [vmem:[%s7617_s1 + $0x80] sm:$0xff]   ;;  %4962 = vmatprep.subr.bf16.mxu1 %v5453_v2  ;;  %4852 = vmatprep.subr.bf16.mxu0 %v5455_v4  ;;  %v5458_v7 = vld [vmem:[%s7617_s1 + $0x88] sm:$0xff]   ;;  %v5462_v11 = vld [vmem:[%s7617_s1 + $0x90] sm:$0xff]   ;;  %s5442_s24 = smul.u32 216, %s7686_s19  ;;  %s4849_s30 = sshll.u32 %s7686_s19, 8 }
  0x11   : > { %4963 = vmatpush3.bf16.msra.mxu1 %v5454_v3  ;;  %v5463_v12 = vld [vmem:[%s7617_s1 + $0x58] sm:$0xff]   ;;  %v5467_v16 = vld [vmem:[%s7617_s1 + $0x60] sm:$0xff]   ;;  %v5471_v20 = vld [vmem:[%s7617_s1 + $0x68] sm:$0xff]   ;;  %s7547_s11 = scalar_lea.vmem %s7621_s5, %s4849_s30 }
  0x12   : > { %4964 = vmatprep.subr.bf16.mxu1 %v5457_v6  ;;  %v5464_v13 = vld [vmem:[%s7617_s1 + $0x18] sm:$0xff]   ;;  %v5468_v17 = vld [vmem:[%s7617_s1 + $0x20] sm:$0xff]   ;;  %v5472_v21 = vld [vmem:[%s7617_s1 + $0x28] sm:$0xff]   ;;  %s5760_s10 = scalar_lea.vmem %s7616_s0, %s5442_s24 }
  0x13   : > { %4853 = vmatpush3.bf16.msra.mxu0 %v5456_v5  ;;  %v5465_v14 = vld [vmem:[%s7617_s1 + $0xd8] sm:$0xff]   ;;  %v5469_v18 = vld [vmem:[%s7617_s1 + $0xe0] sm:$0xff]   ;;  %v5473_v22 = vld [vmem:[%s7617_s1 + $0xe8] sm:$0xff]  }
  0x14   : > { %4854 = vmatprep.subr.bf16.mxu0 %v5459_v8  ;;  %v5466_v15 = vld [vmem:[%s7617_s1 + $0x98] sm:$0xff]   ;;  %v5470_v19 = vld [vmem:[%s7617_s1 + $0xa0] sm:$0xff]   ;;  %v5474_v23 = vld [vmem:[%s7617_s1 + $0xa8] sm:$0xff]  }
  0x15   : > { %4965 = vmatpush3.bf16.msra.mxu1 %v5458_v7  ;;  %v5475_v24 = vld [vmem:[%s7617_s1 + $0x70] sm:$0xff]   ;;  %v5479_v28 = vld [vmem:[%s7617_s1 + $0x78] sm:$0xff]   ;;  %v5769_v31 = vld [vmem:[%s5760_s10] sm:$0xf] }
  0x16   : > { %4966 = vmatprep.subr.bf16.mxu1 %v5461_v10  ;;  %v5476_v25 = vld [vmem:[%s7617_s1 + $0x30] sm:$0xff]   ;;  %v5480_v29 = vld [vmem:[%s7617_s1 + $0x38] sm:$0xff]   ;;  %v5772_v32 = vld [vmem:[%s5760_s10 + $0x4] sm:$0xf]  ;;  %v278_v34 = vshrl.u32 %v5769_v31, 16  ;;  %v281_v35 = vshll.u32 %v5769_v31, 16 }
  0x17   : > { %4855 = vmatpush3.bf16.msra.mxu0 %v5460_v9  ;;  %v5477_v26 = vld [vmem:[%s7617_s1 + $0xf0] sm:$0xff]   ;;  %v5481_v30 = vld [vmem:[%s7617_s1 + $0xf8] sm:$0xff]   ;;  %v5775_v33 = vld [vmem:[%s5760_s10 + $0x8] sm:$0x1]  ;;  %v287_v36 = vshll.u32 %v5772_v32, 16  ;;  %v291_v37 = vshrl.u32 %v5772_v32, 16  ;;  %v4621_v48 = vcombine.low %v5769_v31, %v5772_v32 }
  0x18   : > { %4856 = vmatprep.subr.bf16.mxu0 %v5463_v12  ;;  %v5478_v27 = vld [vmem:[%s7617_s1 + $0xb0] sm:$0xff]   ;;  %v297_v38 = vshll.u32 %v5775_v33, 16  ;;  %v280_v39 = vrot.slane %v278_v34, 4  ;;  %v283_v40 = vrot.slane %v281_v35, 5  ;;  %v5482_v41 = vld [vmem:[%s7617_s1 + $0xb8] sm:$0xff]   ;;  %v5484_v42 = vld [vmem:[%s7617_s1 + $0x140] sm:$0xff]  }
  0x19   : > { %4967 = vmatpush3.bf16.msra.mxu1 %v5462_v11  ;;  %v289_v43 = vrot.slane %v287_v36, 5  ;;  %v293_v44 = vrot.slane %v291_v37, 4  ;;  %v733_v46 = vrot.slane %v5775_v33, 5  ;;  %v4461_v49 = vld [vmem:[%s5760_s10 + $0xc] sm:$0xf]  ;;  %vm5797_vm4 = vmor %vm274_vm1, %vm275_vm2  ;;  %v730_v5 = vrot.slane %v5772_v32, 5 }
  0x1a   : > { %4968 = vmatprep.subr.bf16.mxu1 %v5465_v14  ;;  %v299_v45 = vrot.slane %v297_v38, 5  ;;  %v284_v47 = vor.u32 %v283_v40, %v280_v39  ;;  %v5793_v50 = vld [vmem:[%s5760_s10 + $0x10] sm:$0xf]  ;;  %v890_v53 = vshrl.u32 %v4461_v49, 16  ;;  %v893_v54 = vshll.u32 %v4461_v49, 16  ;;  %vm5810_vm5 = vmor %vm725_vm0, %vm726_vm3 }
  0x1b   : > { %4857 = vmatpush3.bf16.msra.mxu0 %v5464_v13  ;;  %v294_v52 = vor.u32 %v293_v44, %v289_v43  ;;  %v899_v55 = vshll.u32 %v5793_v50, 16  ;;  %v903_v57 = vshrl.u32 %v5793_v50, 16  ;;  %v4669_v59 = vcombine.low %v4461_v49, %v5793_v50  ;;  %v661_v0 = vld [vmem:[%s5760_s10] sm:$0xe]  ;;  %v5818_v6 = vld [vmem:[%s5760_s10 + $0xc] sm:$0xf] }
  0x1c   : > { %4858 = vmatprep.subr.bf16.mxu0 %v5467_v16  ;;  %v285_v56 = vrot.slane %v284_v47, 4  ;;  %v892_v61 = vrot.slane %v890_v53, 4  ;;  %v895_v62 = vrot.slane %v893_v54, 5  ;;  %v4445_v4 = vrot.slane %v661_v0, 9  ;;  %v5823_v9 = vld [vmem:[%s5760_s10 + $0x10] sm:$0xf] }
  0x1d   : > { %4969 = vmatpush3.bf16.msra.mxu1 %v5466_v15  ;;  %v295_v60 = vrot.slane %v294_v52, 4  ;;  %v5805_v63 = vrot.slane %v899_v55, 5  ;;  %v905_v3 = vrot.slane %v903_v57, 4  ;;  %3458 = vmatprep.mubr.bf16.mxu1 %v4669_v59  ;;  %v5826_v10 = vld [vmem:[%s5760_s10 + $0x14] sm:$0x1]  ;;  %v302_v11 = vshrl.u32 %v5818_v6, 16 }
  0x1e   : > { %4970 = vmatprep.subr.bf16.mxu1 %v5469_v18  ;;  %v290_v2 = vsel %vm5797_vm4, %v285_v56, %v289_v43  ;;  %v896_v8 = vor.u32 %v895_v62, %v892_v61  ;;  %v305_v12 = vshll.u32 %v5818_v6, 16  ;;  %v5486_v15 = vld [vmem:[%s7617_s1 + $0x100] sm:$0xff]   ;;  %v731_v16 = vsel %vm5810_vm5, %v4445_v4, %v730_v5  ;;  %v5490_v18 = vld [vmem:[%s7617_s1 + $0x148] sm:$0xff]   ;;  %v5861_v35 = vld [vmem:[%s5760_s10 + $0x18] sm:$0xf] }
  0x1f   : > { %4859 = vmatpush3.bf16.msra.mxu0 %v5468_v17  ;;  %v300_v7 = vsel %vm5797_vm4, %v295_v60, %v299_v45  ;;  %v906_v14 = vor.u32 %v905_v3, %v5805_v63  ;;  %v732_v17 = vrot.slane %v730_v5, 4  ;;  %v662_v34 = vld [vmem:[%s5760_s10 + $0xc] sm:$0xe]  ;;  %v5496_v36 = vld [vmem:[%s7617_s1 + $0x150] sm:$0xff]   ;;  %v4622_v39 = vcombine.low %v5818_v6, %v5823_v9  ;;  %v5508_v47 = vld [vmem:[%s7617_s1 + $0x180] sm:$0xff]  }
  0x20   : > { %4860 = vmatprep.subr.bf16.mxu0 %v5471_v20  ;;  %v4637_v13 = vcombine.low %v290_v2, %v300_v7  ;;  %v304_v20 = vrot.slane %v302_v11, 4  ;;  %v4446_v52 = vrot.slane %v662_v34, 9  ;;  %v737_v53 = vrot.slane %v5823_v9, 5  ;;  %v5883_v54 = vld [vmem:[%s5760_s10 + $0x20] sm:$0x1]  ;;  %v5498_v60 = vld [vmem:[%s7617_s1 + $0x110] sm:$0xff]  }
  0x21   : > { %4971 = vmatpush3.bf16.msra.mxu1 %v5470_v19  ;;  %v5839_v19 = vrot.slane %v896_v8, 4  ;;  %v740_v57 = vrot.slane %v5826_v10, 5  ;;  %v326_v59 = vshrl.u32 %v5861_v35, 16  ;;  %v329_v2 = vshll.u32 %v5861_v35, 16  ;;  %v4465_v3 = vld [vmem:[%s5760_s10 + $0x24] sm:$0xf] }
  0x22   : > { %4972 = vmatprep.subr.bf16.mxu1 %v5473_v22  ;;  %v311_v22 = vshll.u32 %v5823_v9, 16  ;;  %3297 = vmatprep.mubr.bf16.mxu0 %v4637_v13  ;;  %v738_v62 = vsel %vm5810_vm5, %v4446_v52, %v737_v53  ;;  %v739_v0 = vrot.slane %v737_v53, 4  ;;  %v5502_v4 = vld [vmem:[%s7617_s1 + $0x158] sm:$0xff]   ;;  %v5515_v5 = vld [vmem:[%s7617_s1 + $0x1c8] sm:$0xff]   ;;  %v345_v11 = vshll.u32 %v5883_v54, 16 }
  0x23   : > { %4861 = vmatpush3.bf16.msra.mxu0 %v5472_v21  ;;  %v307_v21 = vrot.slane %v305_v12, 5  ;;  %v328_v7 = vrot.slane %v326_v59, 4  ;;  %v747_v52 = vrot.slane %v5883_v54, 5  ;;  %v5947_v6 = vld [vmem:[%s5760_s10 + $0x2c] sm:$0x1] }
  0x24   : > { %4862 = vmatprep.subr.bf16.mxu0 %v5475_v24  ;;  %v5843_v24 = vrot.slane %v906_v14, 4  ;;  %v313_v33 = vrot.slane %v311_v22, 5  ;;  %v741_v13 = vsel %vm5810_vm5, %v739_v0, %v740_v57  ;;  %v331_v14 = vrot.slane %v329_v2, 5 }
  0x25   : > { %4973 = vmatpush3.bf16.msra.mxu1 %v5474_v23  ;;  %v4463_v23 = vld [vmem:[%s5760_s10 + $0x18] sm:$0xf]  ;;  %v308_v32 = vor.u32 %v307_v21, %v304_v20  ;;  %v4654_v21 = vcombine.low %v738_v62, %v741_v13 }
  0x26   : > { %4974 = vmatprep.subr.bf16.mxu1 %v5477_v26  ;;  %v315_v26 = vshrl.u32 %v5823_v9, 16  ;;  %v914_v40 = vshrl.u32 %v4463_v23, 16  ;;  %v917_v44 = vshll.u32 %v4463_v23, 16 }
  0x27   : > { %4863 = vmatpush3.bf16.msra.mxu0 %v5476_v25  ;;  %v734_v25 = vsel %vm5810_vm5, %v732_v17, %v733_v46  ;;  %v309_v43 = vrot.slane %v308_v32, 4  ;;  %v663_v17 = vld [vmem:[%s5760_s10 + $0x18] sm:$0xe] }
  0x28   : > { %4864 = vmatprep.subr.bf16.mxu0 %v5479_v28  ;;  %v5850_v28 = vld [vmem:[%s5760_s10 + $0x1c] sm:$0xf]  ;;  %v4653_v31 = vcombine.low %v731_v16, %v734_v25  ;;  %v317_v37 = vrot.slane %v315_v26, 4  ;;  %v5879_v49 = vrot.slane %v914_v40, 4  ;;  %v5887_v56 = vrot.slane %v917_v44, 5  ;;  %v5510_v40 = vld [vmem:[%s7617_s1 + $0x160] sm:$0xff]  }
  0x29   : > { %4975 = vmatpush3.bf16.msra.mxu1 %v5478_v27  ;;  %v321_v27 = vshll.u32 %v5826_v10, 16  ;;  %v4670_v46 = vcombine.low %v4463_v23, %v5850_v28  ;;  %v314_v55 = vsel %vm5797_vm4, %v309_v43, %v313_v33  ;;  %v5914_v16 = vld [vmem:[%s5760_s10 + $0x28] sm:$0xf]  ;;  %v332_v25 = vor.u32 %v331_v14, %v328_v7  ;;  %v5504_v32 = vld [vmem:[%s7617_s1 + $0x118] sm:$0xff]  }
  0x2a   : > { %4976 = vmatprep.subr.bf16.mxu1 %v5481_v30  ;;  %v347_v26 = vrot.slane %v345_v11, 5  ;;  %v5971_v11 = vld [vmem:[%s5760_s10 + $0x30] sm:$0xf] }
  0x2b   : > { %4865 = vmatpush3.bf16.msra.mxu0 %v5480_v29  ;;  %v5492_v29 = vld [vmem:[%s7617_s1 + $0x108] sm:$0xff]   ;;  %v323_v38 = vrot.slane %v321_v27, 5  ;;  %v938_v27 = vshrl.u32 %v4465_v3, 16 }
  0x2c   : > { %5074 = vmatprep.subr.bf16.mxu0 %v5484_v42  ;;  %v5507_v42 = vld [vmem:[%s7617_s1 + $0x1c0] sm:$0xff]  }
  0x2d   : > { %4977 = vmatpush3.bf16.msra.mxu1 %v5482_v41  ;;  %v5869_v41 = vld [vmem:[%s5760_s10 + $0x1c] sm:$0xf]  ;;  %v5937_v43 = vrot.slane %v938_v27, 4 }
  0x2e   : > { %3298 = vmatmul.mubr.bf16.vlgmr.msra.gmra.mrb[0].mxu0 %v4621_v48  ;;  %v318_v48 = vor.u32 %v317_v37, %v313_v33  ;;  %5186 = vmatprep.subr.bf16.mxu1 %v5507_v42  ;;  %v335_v8 = vshll.u32 %v5869_v41, 16  ;;  %v339_v10 = vshrl.u32 %v5869_v41, 16  ;;  %v4447_v37 = vrot.slane %v663_v17, 9 }
  0x2f   : > { %5075 = vmatpush3.bf16.msra.mxu0 %v5486_v15  ;;  %v4623_v15 = vcombine.low %v5861_v35, %v5869_v41  ;;  %v333_v42 = vrot.slane %v332_v25, 4  ;;  %v5520_v25 = vld [vmem:[%s7617_s1 + $0x128] sm:$0xff]   ;;  %v374_v35 = vshrl.u32 %v5971_v11, 16 }
  0x30   : > { %3459 = vmatmul.mubr.bf16.vlgmr.msra.gmra.mrb[0].mxu1 %v4653_v31  ;;  %5076 = vmatprep.subr.bf16.mxu0 %v5490_v18  ;;  %v319_v61 = vrot.slane %v318_v48, 4  ;;  %v5516_v18 = vld [vmem:[%s7617_s1 + $0x188] sm:$0xff]   ;;  %v337_v22 = vrot.slane %v335_v8, 5  ;;  %v341_v23 = vrot.slane %v339_v10, 4  ;;  %v5921_v31 = vld [vmem:[%s5760_s10 + $0x24] sm:$0xf] }
  0x31   : > { %3466 = vmatprep.mubr.bf16.mxu1 %v4670_v46  ;;  %5187 = vmatpush3.bf16.msra.mxu1 %v5508_v47  ;;  %v744_v46 = vrot.slane %v5869_v41, 5  ;;  %v5512_v47 = vld [vmem:[%s7617_s1 + $0x120] sm:$0xff]   ;;  %v350_v9 = vshrl.u32 %v5921_v31, 16  ;;  %v369_v8 = vshll.u32 %v5947_v6, 16  ;;  %v377_v41 = vshll.u32 %v5971_v11, 16 }
  0x32   : > { %v324_v12 = vsel %vm5797_vm4, %v319_v61, %v323_v38  ;;  %5188 = vmatprep.subr.bf16.mxu1 %v5515_v5  ;;  %v342_v33 = vor.u32 %v341_v23, %v337_v22  ;;  %v5929_v38 = vld [vmem:[%s5760_s10 + $0x28] sm:$0xf]  ;;  %v338_v53 = vsel %vm5797_vm4, %v333_v42, %v337_v22  ;;  %v5958_v61 = vld [vmem:[%s5760_s10 + $0x34] sm:$0xf]  ;;  %v664_v10 = vld [vmem:[%s5760_s10 + $0x24] sm:$0xe] }
  0x33   : > { %5077 = vmatpush3.bf16.msra.mxu0 %v5492_v29  ;;  %v4638_v20 = vcombine.low %v314_v55, %v324_v12  ;;  %v941_v29 = vshll.u32 %v4465_v3, 16  ;;  %v745_v55 = vsel %vm5810_vm5, %v4447_v37, %v744_v46  ;;  %v746_v57 = vrot.slane %v744_v46, 4  ;;  %v5996_v46 = vld [vmem:[%s5760_s10 + $0x38] sm:$0x1] }
  0x34   : > { %5078 = vmatprep.subr.bf16.mxu0 %v5496_v36  ;;  %v4671_v36 = vcombine.low %v4465_v3, %v5914_v16  ;;  %v343_v48 = vrot.slane %v342_v33, 4  ;;  %v359_v59 = vshll.u32 %v5929_v38, 16  ;;  %v352_v62 = vrot.slane %v350_v9, 4  ;;  %v5518_v3 = vld [vmem:[%s7617_s1 + $0x168] sm:$0xff]   ;;  %v5984_v33 = vld [vmem:[%s5760_s10 + $0x34] sm:$0xf] }
  0x35   : > { %5189 = vmatpush3.bf16.msra.mxu1 %v5516_v18  ;;  %3305 = vmatprep.mubr.bf16.mxu0 %v4638_v20  ;;  %v5939_v44 = vrot.slane %v941_v29, 5  ;;  %v363_v2 = vshrl.u32 %v5929_v38, 16  ;;  %v748_v5 = vsel %vm5810_vm5, %v746_v57, %v747_v52  ;;  %v4624_v17 = vcombine.low %v5921_v31, %v5929_v38  ;;  %v5523_v18 = vld [vmem:[%s7617_s1 + $0x1d0] sm:$0xff]  }
  0x36   : > { %3306 = vmatmul.mubr.bf16.gmra.mrb[4].mxu0 %v4622_v39  ;;  %v353_v39 = vshll.u32 %v5921_v31, 16  ;;  %v348_v54 = vsel %vm5797_vm4, %v343_v48, %v347_v26  ;;  %v361_v7 = vrot.slane %v359_v59, 5  ;;  %v4655_v12 = vcombine.low %v745_v55, %v748_v5  ;;  %5190 = vmatprep.subr.bf16.mxu1 %v5523_v18  ;;  %v6022_v5 = vld [vmem:[%s5760_s10 + $0x40] sm:$0xf]  ;;  %v5531_v18 = vld [vmem:[%s7617_s1 + $0x1d8] sm:$0xff]  }
  0x37   : > { %5079 = vmatpush3.bf16.msra.mxu0 %v5498_v60  ;;  %v4467_v60 = vld [vmem:[%s5760_s10 + $0x30] sm:$0xf]  ;;  %v365_v14 = vrot.slane %v363_v2, 4  ;;  %v371_v20 = vrot.slane %v369_v8, 5  ;;  %v754_v42 = vrot.slane %v5947_v6, 5  ;;  %v383_v9 = vshll.u32 %v5984_v33, 16 }
  0x38   : > { %3467 = vmatmul.mubr.bf16.gmra.mrb[4].mxu1 %v4654_v21  ;;  %5080 = vmatprep.subr.bf16.mxu0 %v5502_v4  ;;  %v355_v0 = vrot.slane %v353_v39, 5  ;;  %v4639_v4 = vcombine.low %v338_v53, %v348_v54  ;;  %v962_v21 = vshrl.u32 %v4467_v60, 16  ;;  %v965_v22 = vshll.u32 %v4467_v60, 16  ;;  %v5526_v53 = vld [vmem:[%s7617_s1 + $0x170] sm:$0xff]   ;;  %v4469_v54 = vld [vmem:[%s5760_s10 + $0x3c] sm:$0xf] }
  0x39   : > { %3474 = vmatprep.mubr.bf16.mxu1 %v4671_v36  ;;  %v366_v27 = vor.u32 %v365_v14, %v361_v7  ;;  %v4672_v29 = vcombine.low %v4467_v60, %v5958_v61  ;;  %v387_v39 = vshrl.u32 %v5984_v33, 16  ;;  %v376_v57 = vrot.slane %v374_v35, 4  ;;  %v6028_v14 = vld [vmem:[%s5760_s10 + $0x3c] sm:$0xf] }
  0x3a   : > { %v356_v13 = vor.u32 %v355_v0, %v352_v62  ;;  %3313 = vmatprep.mubr.bf16.mxu0 %v4639_v4  ;;  %v5989_v36 = vrot.slane %v962_v21, 4  ;;  %v5991_v37 = vrot.slane %v965_v22, 5  ;;  %v379_v59 = vrot.slane %v377_v41, 5  ;;  %v5528_v62 = vld [vmem:[%s7617_s1 + $0x130] sm:$0xff]  }
  0x3b   : > { %5081 = vmatpush3.bf16.msra.mxu0 %v5504_v32  ;;  %v4448_v32 = vrot.slane %v664_v10, 9  ;;  %v367_v48 = vrot.slane %v366_v27, 4  ;;  %v393_v60 = vshll.u32 %v5996_v46, 16  ;;  %v389_v4 = vrot.slane %v387_v39, 4 }
  0x3c   : > { %5082 = vmatprep.subr.bf16.mxu0 %v5510_v40  ;;  %v357_v26 = vrot.slane %v356_v13, 4  ;;  %v751_v40 = vrot.slane %v5929_v38, 5  ;;  %v380_v10 = vor.u32 %v379_v59, %v376_v57  ;;  %v4625_v13 = vcombine.low %v5971_v11, %v5984_v33  ;;  %v5540_v11 = vld [vmem:[%s7617_s1 + $0x1a8] sm:$0xff]  }
  0x3d   : > { %v372_v55 = vsel %vm5797_vm4, %v367_v48, %v371_v20  ;;  %v986_v21 = vshrl.u32 %v4469_v54, 16  ;;  %v989_v22 = vshll.u32 %v4469_v54, 16 }
  0x3e   : > { %3314 = vmatmul.mubr.bf16.gmra.mrb[8].mxu0 %v4623_v15  ;;  %v5524_v15 = vld [vmem:[%s7617_s1 + $0x190] sm:$0xff]   ;;  %v752_v52 = vsel %vm5810_vm5, %v4448_v32, %v751_v40  ;;  %v753_v6 = vrot.slane %v751_v40, 4  ;;  %v381_v27 = vrot.slane %v380_v10, 4  ;;  %v758_v40 = vrot.slane %v5984_v33, 5  ;;  %v5537_v10 = vld [vmem:[%s7617_s1 + $0x1e0] sm:$0xff]  }
  0x3f   : > { %5083 = vmatpush3.bf16.msra.mxu0 %v5512_v47  ;;  %v362_v47 = vsel %vm5797_vm4, %v357_v26, %v361_v7  ;;  %5191 = vmatpush3.bf16.msra.mxu1 %v5524_v15  ;;  %v665_v7 = vld [vmem:[%s5760_s10 + $0x30] sm:$0xe]  ;;  %v5532_v26 = vld [vmem:[%s7617_s1 + $0x198] sm:$0xff]   ;;  %v6048_v35 = vrot.slane %v986_v21, 4  ;;  %v6050_v41 = vrot.slane %v989_v22, 5  ;;  %v761_v15 = vrot.slane %v5996_v46, 5 }
  0x40   : > { %3475 = vmatmul.mubr.bf16.gmra.mrb[8].mxu1 %v4655_v12  ;;  %5084 = vmatprep.subr.bf16.mxu0 %v5518_v3  ;;  %v4640_v0 = vcombine.low %v362_v47, %v372_v55  ;;  %v755_v2 = vsel %vm5810_vm5, %v753_v6, %v754_v42  ;;  %v385_v3 = vrot.slane %v383_v9, 5  ;;  %v395_v12 = vrot.slane %v393_v60, 5  ;;  %v6040_v42 = vld [vmem:[%s5760_s10 + $0x40] sm:$0xf]  ;;  %v5534_v47 = vld [vmem:[%s7617_s1 + $0x178] sm:$0xff]  }
  0x41   : > { %3482 = vmatprep.mubr.bf16.mxu1 %v4672_v29  ;;  %v4656_v8 = vcombine.low %v752_v52, %v755_v2  ;;  %v4673_v29 = vcombine.low %v4469_v54, %v6022_v5  ;;  %v4449_v32 = vrot.slane %v665_v7, 9  ;;  %5192 = vmatprep.subr.bf16.mxu1 %v5531_v18  ;;  %v6054_v52 = vld [vmem:[%s5760_s10 + $0x44] sm:$0x1]  ;;  %v760_v38 = vrot.slane %v758_v40, 4  ;;  %v5536_v55 = vld [vmem:[%s7617_s1 + $0x138] sm:$0xff]  }
  0x42   : > { %3321 = vmatprep.mubr.bf16.mxu0 %v4640_v0  ;;  %v390_v20 = vor.u32 %v389_v4, %v385_v3  ;;  %v386_v6 = vsel %vm5797_vm4, %v381_v27, %v385_v3  ;;  %v401_v9 = vshll.u32 %v6028_v14, 16  ;;  %v407_v39 = vshll.u32 %v6040_v42, 16  ;;  %v6074_v0 = vld [vmem:[%s5760_s10 + $0x4c] sm:$0xf]  ;;  %v6083_v22 = vld [vmem:[%s5760_s10 + $0x48] sm:$0xf] }
  0x43   : > { %5085 = vmatpush3.bf16.msra.mxu0 %v5520_v25  ;;  %5193 = vmatpush3.bf16.msra.mxu1 %v5532_v26  ;;  %v759_v31 = vsel %vm5810_vm5, %v4449_v32, %v758_v40  ;;  %v762_v59 = vsel %vm5810_vm5, %v760_v38, %v761_v15  ;;  %v417_v54 = vshll.u32 %v6054_v52, 16  ;;  %v4626_v18 = vcombine.low %v6028_v14, %v6040_v42  ;;  %v5538_v26 = vld [vmem:[%s7617_s1 + $0x1a0] sm:$0xff]  }
  0x44   : > { %5086 = vmatprep.subr.bf16.mxu0 %v5526_v53  ;;  %v391_v48 = vrot.slane %v390_v20, 4  ;;  %v411_v53 = vshrl.u32 %v6040_v42, 16  ;;  %v4657_v2 = vcombine.low %v759_v31, %v762_v59  ;;  %v403_v3 = vrot.slane %v401_v9, 5  ;;  %5194 = vmatprep.subr.bf16.mxu1 %v5537_v10  ;;  %v6125_v10 = vld [vmem:[%s5760_s10 + $0x58] sm:$0xf] }
  0x45   : > { %v409_v4 = vrot.slane %v407_v39, 5  ;;  %v765_v38 = vrot.slane %v6040_v42, 5  ;;  %v768_v39 = vrot.slane %v6054_v52, 5  ;;  %v425_v59 = vshll.u32 %v6083_v22, 16 }
  0x46   : > { %3322 = vmatmul.mubr.bf16.gmra.mrb[12].mxu0 %v4624_v17  ;;  %v398_v17 = vshrl.u32 %v6028_v14, 16  ;;  %v396_v46 = vsel %vm5797_vm4, %v391_v48, %v395_v12  ;;  %v413_v7 = vrot.slane %v411_v53, 4  ;;  %v419_v12 = vrot.slane %v417_v54, 5  ;;  %v5539_v48 = vld [vmem:[%s7617_s1 + $0x1e8] sm:$0xff]  }
  0x47   : > { %5087 = vmatpush3.bf16.msra.mxu0 %v5528_v62  ;;  %v4641_v57 = vcombine.low %v386_v6, %v396_v46  ;;  %v4471_v62 = vld [vmem:[%s5760_s10 + $0x48] sm:$0xf]  ;;  %v422_v53 = vshrl.u32 %v6083_v22, 16  ;;  %5195 = vmatpush3.bf16.msra.mxu1 %v5538_v26 }
  0x48   : > { %3483 = vmatmul.mubr.bf16.gmra.mrb[12].mxu1 %v4656_v8  ;;  %5088 = vmatprep.subr.bf16.mxu0 %v5534_v47  ;;  %v400_v60 = vrot.slane %v398_v17, 4  ;;  %v666_v8 = vld [vmem:[%s5760_s10 + $0x3c] sm:$0xe]  ;;  %v1010_v20 = vshrl.u32 %v4471_v62, 16  ;;  %v1013_v21 = vshll.u32 %v4471_v62, 16  ;;  %v4674_v40 = vcombine.low %v4471_v62, %v6074_v0 }
  0x49   : > { %3490 = vmatprep.mubr.bf16.mxu1 %v4673_v29  ;;  %3329 = vmatprep.mubr.bf16.mxu0 %v4641_v57  ;;  %v414_v29 = vor.u32 %v413_v7, %v409_v4  ;;  %v6091_v47 = vld [vmem:[%s5760_s10 + $0x4c] sm:$0xf]  ;;  %v4450_v31 = vrot.slane %v666_v8, 9  ;;  %v6102_v17 = vld [vmem:[%s5760_s10 + $0x50] sm:$0x1]  ;;  %v767_v57 = vrot.slane %v765_v38, 4 }
  0x4a   : > { %v404_v27 = vor.u32 %v403_v3, %v400_v60  ;;  %v6096_v15 = vrot.slane %v1010_v20, 4  ;;  %v6098_v6 = vrot.slane %v1013_v21, 5  ;;  %v431_v60 = vshll.u32 %v6091_v47, 16  ;;  %v4473_v62 = vld [vmem:[%s5760_s10 + $0x54] sm:$0xf]  ;;  %5196 = vmatprep.subr.bf16.mxu1 %v5539_v48 }
  0x4b   : > { %5089 = vmatpush3.bf16.msra.mxu0 %v5536_v55  ;;  %v415_v9 = vrot.slane %v414_v29, 4  ;;  %v766_v55 = vsel %vm5810_vm5, %v4450_v31, %v765_v38  ;;  %v424_v52 = vrot.slane %v422_v53, 4  ;;  %v435_v54 = vshrl.u32 %v6091_v47, 16  ;;  %v667_v20 = vld [vmem:[%s5760_s10 + $0x48] sm:$0xe]  ;;  %5197 = vmatpush3.bf16.msra.mxu1 %v5540_v11  ;;  %v5543_v38 = vld [vmem:[%s7617_s1 + $0x1f0] sm:$0xff]  }
  0x4c   : > { %v405_v46 = vrot.slane %v404_v27, 4  ;;  %v769_v3 = vsel %vm5810_vm5, %v767_v57, %v768_v39  ;;  %v427_v7 = vrot.slane %v425_v59, 5  ;;  %v433_v8 = vrot.slane %v431_v60, 5  ;;  %v6133_v31 = vld [vmem:[%s5760_s10 + $0x54] sm:$0xf]  ;;  %5198 = vmatprep.subr.bf16.mxu1 %v5543_v38 }
  0x4d   : > { %v4658_v21 = vcombine.low %v766_v55, %v769_v3  ;;  %v4627_v26 = vcombine.low %v6083_v22, %v6091_v47  ;;  %v1034_v29 = vshrl.u32 %v4473_v62, 16  ;;  %v4675_v39 = vcombine.low %v4473_v62, %v6125_v10  ;;  %v6140_v55 = vld [vmem:[%s5760_s10 + $0x58] sm:$0xf]  ;;  %v4475_v3 = vld [vmem:[%s5760_s10 + $0x60] sm:$0xf] }
  0x4e   : > { %3330 = vmatmul.mubr.bf16.gmra.mrb[16].mxu0 %v4625_v13  ;;  %v410_v33 = vsel %vm5797_vm4, %v405_v46, %v409_v4  ;;  %v420_v13 = vsel %vm5797_vm4, %v415_v9, %v419_v12  ;;  %v437_v4 = vrot.slane %v435_v54, 4  ;;  %v441_v12 = vshll.u32 %v6102_v17, 16  ;;  %v668_v38 = vld [vmem:[%s5760_s10 + $0x54] sm:$0xe] }
  0x4f   : > { %v428_v27 = vor.u32 %v427_v7, %v424_v52  ;;  %v4451_v53 = vrot.slane %v667_v20, 9  ;;  %v6142_v59 = vrot.slane %v1034_v29, 4  ;;  %v772_v11 = vrot.slane %v6091_v47, 5  ;;  %v6152_v52 = vld [vmem:[%s5760_s10 + $0x5c] sm:$0x1] }
  0x50   : > { %3491 = vmatmul.mubr.bf16.gmra.mrb[16].mxu1 %v4657_v2  ;;  %v4642_v2 = vcombine.low %v410_v33, %v420_v13  ;;  %v438_v46 = vor.u32 %v437_v4, %v433_v8  ;;  %v443_v9 = vrot.slane %v441_v12, 5  ;;  %v775_v13 = vrot.slane %v6102_v17, 5  ;;  %v6166_v4 = vld [vmem:[%s5760_s10 + $0x64] sm:$0xf] }
  0x51   : > { %3498 = vmatprep.mubr.bf16.mxu1 %v4674_v40  ;;  %v1037_v40 = vshll.u32 %v4473_v62, 16  ;;  %v429_v57 = vrot.slane %v428_v27, 4  ;;  %v446_v54 = vshrl.u32 %v6133_v31, 16  ;;  %v449_v62 = vshll.u32 %v6133_v31, 16 }
  0x52   : > { %3337 = vmatprep.mubr.bf16.mxu0 %v4642_v2  ;;  %v439_v33 = vrot.slane %v438_v46, 4  ;;  %v773_v14 = vsel %vm5810_vm5, %v4451_v53, %v772_v11  ;;  %v774_v42 = vrot.slane %v772_v11, 4  ;;  %v6176_v46 = vld [vmem:[%s5760_s10 + $0x60] sm:$0xf]  ;;  %v6181_v11 = vld [vmem:[%s5760_s10 + $0x64] sm:$0xf] }
  0x53   : > { %v6144_v60 = vrot.slane %v1037_v40, 5  ;;  %v434_v2 = vsel %vm5797_vm4, %v429_v57, %v433_v8  ;;  %v448_v7 = vrot.slane %v446_v54, 4  ;;  %v451_v20 = vrot.slane %v449_v62, 5  ;;  %v5544_v8 = vld [vmem:[%s7617_s1 + $0x1b0] sm:$0xff]  }
  0x54   : > { %v444_v17 = vsel %vm5797_vm4, %v439_v33, %v443_v9  ;;  %v776_v27 = vsel %vm5810_vm5, %v774_v42, %v775_v13  ;;  %v465_v40 = vshll.u32 %v6152_v52, 16  ;;  %v4628_v57 = vcombine.low %v6133_v31, %v6140_v55  ;;  %5199 = vmatpush3.bf16.msra.mxu1 %v5544_v8  ;;  %v5545_v33 = vld [vmem:[%s7617_s1 + $0x1f8] sm:$0xff]  }
  0x55   : > { %v4643_v12 = vcombine.low %v434_v2, %v444_v17  ;;  %v4659_v9 = vcombine.low %v773_v14, %v776_v27  ;;  %v1058_v54 = vshrl.u32 %v4475_v3, 16  ;;  %v1061_v62 = vshll.u32 %v4475_v3, 16  ;;  %5200 = vmatprep.subr.bf16.mxu1 %v5545_v33  ;;  %v669_v2 = vld [vmem:[%s5760_s10 + $0x60] sm:$0xe] }
  0x56   : > { %3338 = vmatmul.mubr.bf16.gmra.mrb[20].mxu0 %v4626_v18  ;;  %v455_v18 = vshll.u32 %v6140_v55, 16  ;;  %v467_v13 = vrot.slane %v465_v40, 5  ;;  %v4452_v17 = vrot.slane %v668_v38, 9  ;;  %v782_v8 = vrot.slane %v6152_v52, 5 }
  0x57   : > { %3345 = vmatprep.mubr.bf16.mxu0 %v4643_v12  ;;  %v266_v12 = vld [vmem:[%s5760_s10 + $0x68] sm:$0x1]  ;;  %v470_v40 = vshrl.u32 %v6176_v46, 16  ;;  %v473_v38 = vshll.u32 %v6176_v46, 16  ;;  %v479_v22 = vshll.u32 %v6181_v11, 16  ;;  %v483_v47 = vshrl.u32 %v6181_v11, 16 }
  0x58   : > { %3499 = vmatmul.mubr.bf16.gmra.mrb[20].mxu1 %v4658_v21  ;;  %v459_v21 = vshrl.u32 %v6140_v55, 16  ;;  %v457_v29 = vrot.slane %v455_v18, 5  ;;  %v4676_v18 = vcombine.low %v4475_v3, %v6166_v4 }
  0x59   : > { %3506 = vmatprep.mubr.bf16.mxu1 %v4675_v39  ;;  %v452_v39 = vor.u32 %v451_v20, %v448_v7  ;;  %v6188_v7 = vrot.slane %v1058_v54, 4  ;;  %v6190_v20 = vrot.slane %v1061_v62, 5  ;;  %v472_v54 = vrot.slane %v470_v40, 4 }
  0x5a   : > { %v461_v53 = vrot.slane %v459_v21, 4  ;;  %v779_v21 = vrot.slane %v6140_v55, 5  ;;  %v475_v62 = vrot.slane %v473_v38, 5 }
  0x5b   : > { %v453_v14 = vrot.slane %v452_v39, 4 }
  0x5c   : > { %v462_v42 = vor.u32 %v461_v53, %v457_v29  ;;  %v780_v52 = vsel %vm5810_vm5, %v4452_v17, %v779_v21  ;;  %v781_v39 = vrot.slane %v779_v21, 4  ;;  %v6216_v53 = vld [vmem:[%s7617_s1 + $0x200] sm:$0xff]   ;;  %v481_v17 = vrot.slane %v479_v22, 5 }
  0x5d   : > { %v458_v3 = vsel %vm5797_vm4, %v453_v14, %v457_v29  ;;  %v6211_v29 = vld [vmem:[%s5760_s10 + $0x70] sm:$0xf]  ;;  %v489_v14 = vshll.u32 %v266_v12, 16  ;;  %v485_v21 = vrot.slane %v483_v47, 4  ;;  %5346 = vmatprep.subr.bf16.mxu0 %v6216_v53  ;;  %v476_v32 = vor.u32 %v475_v62, %v472_v54 }
  0x5e   : > { %3346 = vmatmul.mubr.bf16.gmra.mrb[24].mxu0 %v4627_v26  ;;  %v463_v27 = vrot.slane %v462_v42, 4  ;;  %v4477_v26 = vld [vmem:[%s5760_s10 + $0x6c] sm:$0xf]  ;;  %v4453_v22 = vrot.slane %v669_v2, 9  ;;  %v6233_v47 = vld [vmem:[%s5760_s10 + $0x70] sm:$0xf] }
  0x5f   : > { %v491_v25 = vrot.slane %v489_v14, 5  ;;  %v1082_v40 = vshrl.u32 %v4477_v26, 16  ;;  %v1085_v38 = vshll.u32 %v4477_v26, 16  ;;  %v789_v62 = vrot.slane %v266_v12, 5  ;;  %v267_v14 = vld [vmem:[%s5760_s10 + $0x74] sm:$0x1] }
  0x60   : > { %3507 = vmatmul.mubr.bf16.gmra.mrb[24].mxu1 %v4659_v9  ;;  %v5546_v9 = vld [vmem:[%s7617_s1 + $0x1b8] sm:$0xff]   ;;  %v468_v33 = vsel %vm5797_vm4, %v463_v27, %v467_v13  ;;  %v4629_v13 = vcombine.low %v6176_v46, %v6181_v11  ;;  %v6227_v27 = vld [vmem:[%s5760_s10 + $0x6c] sm:$0xf]  ;;  %v503_v55 = vshll.u32 %v6233_v47, 16 }
  0x61   : > { %3514 = vmatprep.mubr.bf16.mxu1 %v4676_v18  ;;  %5201 = vmatpush3.bf16.msra.mxu1 %v5546_v9  ;;  %v4644_v42 = vcombine.low %v458_v3, %v468_v33  ;;  %v783_v18 = vsel %vm5810_vm5, %v781_v39, %v782_v8  ;;  %v486_v3 = vor.u32 %v485_v21, %v481_v17  ;;  %v477_v9 = vrot.slane %v476_v32, 4 }
  0x62   : > { %v4660_v48 = vcombine.low %v780_v52, %v783_v18  ;;  %v4677_v39 = vcombine.low %v4477_v26, %v6211_v29  ;;  %v786_v52 = vrot.slane %v6181_v11, 5  ;;  %v6235_v33 = vrot.slane %v1082_v40, 4  ;;  %v4479_v26 = vld [vmem:[%s5760_s10 + $0x78] sm:$0xf]  ;;  %v670_v40 = vld [vmem:[%s5760_s10 + $0x6c] sm:$0xe] }
  0x63   : > { %3353 = vmatprep.mubr.bf16.mxu0 %v4644_v42  ;;  %v487_v46 = vrot.slane %v486_v3, 4  ;;  %v6237_v54 = vrot.slane %v1085_v38, 5  ;;  %v482_v32 = vsel %vm5797_vm4, %v477_v9, %v481_v17  ;;  %v494_v2 = vshrl.u32 %v6227_v27, 16  ;;  %v6255_v42 = vld [vmem:[%s5760_s10 + $0x7c] sm:$0xf] }
  0x64   : > { %v788_v11 = vrot.slane %v786_v52, 4  ;;  %v497_v31 = vshll.u32 %v6227_v27, 16  ;;  %7632 = vst [vmem:[#allocation2_spill] sm:$0xff] %v6255_v42  ;;  %v513_v3 = vshll.u32 %v267_v14, 16  ;;  %v6261_v38 = vld [vmem:[%s5760_s10 + $0x78] sm:$0xf]  ;;  %v4678_v23 = vcombine.low %v4479_v26, %v6255_v42 }
  0x65   : > { %v492_v12 = vsel %vm5797_vm4, %v487_v46, %v491_v25  ;;  %v496_v21 = vrot.slane %v494_v2, 4  ;;  %v505_v25 = vrot.slane %v503_v55, 5  ;;  %v1109_v8 = vshll.u32 %v4479_v26, 16 }
  0x66   : > { %3354 = vmatmul.mubr.bf16.gmra.mrb[28].mxu0 %v4628_v57  ;;  %v507_v57 = vshrl.u32 %v6233_v47, 16  ;;  %v4645_v18 = vcombine.low %v482_v32, %v492_v12  ;;  %v790_v17 = vsel %vm5810_vm5, %v788_v11, %v789_v62  ;;  %v515_v46 = vrot.slane %v513_v3, 5  ;;  %v268_v3 = vld [vmem:[%s5760_s10 + $0x80] sm:$0x1] }
  0x67   : > { %v4630_v32 = vcombine.low %v6227_v27, %v6233_v47  ;;  %v1106_v12 = vshrl.u32 %v4479_v26, 16  ;;  %v4454_v55 = vrot.slane %v670_v40, 9  ;;  %v796_v27 = vrot.slane %v267_v14, 5 }
  0x68   : > { %3515 = vmatmul.mubr.bf16.gmra.mrb[28].mxu1 %v4660_v48  ;;  %v787_v48 = vsel %vm5810_vm5, %v4453_v22, %v786_v52  ;;  %v509_v22 = vrot.slane %v507_v57, 4  ;;  %v6264_v52 = vld [vmem:[%s5760_s10 + $0x7c] sm:$0xf]  ;;  %3361 = vmatprep.mubr.bf16.mxu0 %v4645_v18  ;;  %v793_v57 = vrot.slane %v6233_v47, 5  ;;  %v4481_v47 = vld [vmem:[%s5760_s10 + $0x84] sm:$0xf] }
  0x69   : > { %3522 = vmatprep.mubr.bf16.mxu1 %v4677_v39  ;;  %v4661_v9 = vcombine.low %v787_v48, %v790_v17  ;;  %v499_v39 = vrot.slane %v497_v31, 5  ;;  %v6270_v48 = vrot.slane %v1106_v12, 4  ;;  %v6272_v31 = vrot.slane %v1109_v8, 5 }
  0x6a   : > { %v510_v11 = vor.u32 %v509_v22, %v505_v25  ;;  %v794_v26 = vsel %vm5810_vm5, %v4454_v55, %v793_v57  ;;  %v521_v8 = vshll.u32 %v6261_v38, 16  ;;  %v527_v40 = vshll.u32 %v6264_v52, 16  ;;  %v6290_v55 = vld [vmem:[%s5760_s10 + $0x88] sm:$0xf] }
  0x6b   : > { %v500_v62 = vor.u32 %v499_v39, %v496_v21  ;;  %v518_v21 = vshrl.u32 %v6261_v38, 16  ;;  %v795_v39 = vrot.slane %v793_v57, 4  ;;  %7633 = vst [vmem:[#allocation3_spill] sm:$0xff] %v6290_v55  ;;  %v671_v57 = vld [vmem:[%s5760_s10 + $0x78] sm:$0xe] }
  0x6c   : > { %v511_v17 = vrot.slane %v510_v11, 4  ;;  %v529_v11 = vrot.slane %v527_v40, 5  ;;  %v4679_v40 = vcombine.low %v4481_v47, %v6290_v55 }
  0x6d   : > { %v501_v18 = vrot.slane %v500_v62, 4  ;;  %v520_v22 = vrot.slane %v518_v21, 4  ;;  %v797_v12 = vsel %vm5810_vm5, %v795_v39, %v796_v27  ;;  %v523_v62 = vrot.slane %v521_v8, 5  ;;  %v6297_v27 = vld [vmem:[%s5760_s10 + $0x84] sm:$0xf] }
  0x6e   : > { %3362 = vmatmul.mubr.bf16.gmra.mrb[32].mxu0 %v4629_v13  ;;  %v516_v14 = vsel %vm5797_vm4, %v511_v17, %v515_v46  ;;  %v531_v13 = vshrl.u32 %v6264_v52, 16  ;;  %v4662_v2 = vcombine.low %v794_v26, %v797_v12  ;;  %v1130_v17 = vshrl.u32 %v4481_v47, 16  ;;  %v6301_v26 = vld [vmem:[%s5760_s10 + $0x88] sm:$0xf] }
  0x6f   : > { %v1133_v21 = vshll.u32 %v4481_v47, 16  ;;  %v545_v47 = vshll.u32 %v6297_v27, 16 }
  0x70   : > { %3523 = vmatmul.mubr.bf16.gmra.mrb[32].mxu1 %v4661_v9  ;;  %v506_v9 = vsel %vm5797_vm4, %v501_v18, %v505_v25  ;;  %v533_v34 = vrot.slane %v531_v13, 4  ;;  %v537_v25 = vshll.u32 %v268_v3, 16  ;;  %v524_v18 = vor.u32 %v523_v62, %v520_v22 }
  0x71   : > { %3530 = vmatprep.mubr.bf16.mxu1 %v4678_v23  ;;  %v4646_v23 = vcombine.low %v506_v9, %v516_v14  ;;  %v4455_v14 = vrot.slane %v671_v57, 9  ;;  %v6303_v12 = vrot.slane %v1130_v17, 4  ;;  %v6305_v22 = vrot.slane %v1133_v21, 5 }
  0x72   : > { %v534_v39 = vor.u32 %v533_v34, %v529_v11  ;;  %v539_v8 = vrot.slane %v537_v25, 5  ;;  %v525_v13 = vrot.slane %v524_v18, 4  ;;  %v803_v9 = vrot.slane %v268_v3, 5  ;;  %v269_v34 = vld [vmem:[%s5760_s10 + $0x8c] sm:$0x1] }
  0x73   : > { %3369 = vmatprep.mubr.bf16.mxu0 %v4646_v23  ;;  %7634 = vst [vmem:[#allocation4_spill] sm:$0xff] %v6303_v12  ;;  %7635 = vst [vmem:[#allocation5_spill] sm:$0xff] %v6305_v22  ;;  %v800_v23 = vrot.slane %v6264_v52, 5  ;;  %v542_v25 = vshrl.u32 %v6297_v27, 16  ;;  %v551_v21 = vshll.u32 %v6301_v26, 16 }
  0x74   : > { %v535_v62 = vrot.slane %v534_v39, 4  ;;  %v530_v57 = vsel %vm5797_vm4, %v525_v13, %v529_v11  ;;  %v6318_v39 = vld [vmem:[%s5760_s10 + $0x94] sm:$0xf]  ;;  %v672_v3 = vld [vmem:[%s5760_s10 + $0x84] sm:$0xe]  ;;  %v555_v11 = vshrl.u32 %v6301_v26, 16 }
  0x75   : > { %v801_v18 = vsel %vm5810_vm5, %v4455_v14, %v800_v23  ;;  %v802_v17 = vrot.slane %v800_v23, 4  ;;  %7636 = vst [vmem:[#allocation6_spill] sm:$0xff] %v6318_v39  ;;  %v544_v30 = vrot.slane %v542_v25, 4  ;;  %v553_v13 = vrot.slane %v551_v21, 5  ;;  %v6329_v12 = vld [vmem:[%s5760_s10 + $0x90] sm:$0xf] }
  0x76   : > { %3370 = vmatmul.mubr.bf16.gmra.mrb[36].mxu0 %v4630_v32  ;;  %v540_v45 = vsel %vm5797_vm4, %v535_v62, %v539_v8  ;;  %v547_v32 = vrot.slane %v545_v47, 5  ;;  %v561_v23 = vshll.u32 %v269_v34, 16  ;;  %v557_v55 = vrot.slane %v555_v11, 4  ;;  %v6333_v47 = vld [vmem:[%s5760_s10 + $0x94] sm:$0xf] }
  0x77   : > { %v804_v14 = vsel %vm5810_vm5, %v802_v17, %v803_v9  ;;  %v807_v11 = vrot.slane %v6301_v26, 5  ;;  %v6366_v22 = vld [vmem:[%s5760_s10 + $0x9c] sm:$0xf] }
  0x78   : > { %3531 = vmatmul.mubr.bf16.gmra.mrb[36].mxu1 %v4662_v2  ;;  %v4483_v2 = vld [vmem:[%s5760_s10 + $0x90] sm:$0xf]  ;;  %v4663_v58 = vcombine.low %v801_v18, %v804_v14  ;;  %v548_v46 = vor.u32 %v547_v32, %v544_v30  ;;  %v563_v8 = vrot.slane %v561_v23, 5  ;;  %v4456_v18 = vrot.slane %v672_v3, 9  ;;  %v6337_v30 = vld [vmem:[%s5760_s10 + $0x98] sm:$0x1] }
  0x79   : > { %3538 = vmatprep.mubr.bf16.mxu1 %v4679_v40  ;;  %v4647_v40 = vcombine.low %v530_v57, %v540_v45  ;;  %v1154_v62 = vshrl.u32 %v4483_v2, 16  ;;  %v1157_v25 = vshll.u32 %v4483_v2, 16  ;;  %v558_v57 = vor.u32 %v557_v55, %v553_v13 }
  0x7a   : > { %v549_v9 = vrot.slane %v548_v46, 4  ;;  %v4680_v17 = vcombine.low %v4483_v2, %v6318_v39  ;;  %v566_v2 = vshrl.u32 %v6329_v12, 16  ;;  %v569_v3 = vshll.u32 %v6329_v12, 16 }
  0x7b   : > { %3377 = vmatprep.mubr.bf16.mxu0 %v4647_v40  ;;  %v6339_v21 = vrot.slane %v1154_v62, 4  ;;  %v6341_v32 = vrot.slane %v1157_v25, 5  ;;  %v810_v40 = vrot.slane %v269_v34, 5  ;;  %v559_v55 = vrot.slane %v558_v57, 4  ;;  %v6357_v25 = vld [vmem:[%s5760_s10 + $0xa0] sm:$0xf] }
  0x7c   : > { %v554_v46 = vsel %vm5797_vm4, %v549_v9, %v553_v13  ;;  %v7639_v14 = vcombine.low %v6261_v38, %v6264_v52  ;;  %v808_v23 = vsel %vm5810_vm5, %v4456_v18, %v807_v11  ;;  %v809_v62 = vrot.slane %v807_v11, 4  ;;  %v4485_v13 = vld [vmem:[%s5760_s10 + $0x9c] sm:$0xf]  ;;  %7640 = vst [vmem:[#allocation9_spill] sm:$0xff] %v6357_v25  ;;  %v673_v9 = vld [vmem:[%s5760_s10 + $0x90] sm:$0xe] }
  0x7d   : > { %7637 = vst [vmem:[#allocation7_spill] sm:$0xff] %v6339_v21  ;;  %7638 = vst [vmem:[#allocation8_spill] sm:$0xff] %v6341_v32  ;;  %v579_v34 = vshrl.u32 %v6333_v47, 16  ;;  %v564_v57 = vsel %vm5797_vm4, %v559_v55, %v563_v8  ;;  %v568_v38 = vrot.slane %v566_v2, 4  ;;  %v571_v52 = vrot.slane %v569_v3, 5 }
  0x7e   : > { %3378 = vmatmul.mubr.bf16.gmra.mrb[40].mxu0 %v7639_v14  ;;  %v4648_v14 = vcombine.low %v554_v46, %v564_v57  ;;  %v811_v18 = vsel %vm5810_vm5, %v809_v62, %v810_v40  ;;  %v6371_v8 = vld [vmem:[%s5760_s10 + $0xa0] sm:$0xf]  ;;  %v1178_v2 = vshrl.u32 %v4485_v13, 16  ;;  %v1181_v3 = vshll.u32 %v4485_v13, 16  ;;  %v6375_v40 = vld [vmem:[%s5760_s10 + $0xa4] sm:$0x1] }
  0x7f   : > { %v581_v45 = vrot.slane %v579_v34, 4  ;;  %v4664_v39 = vcombine.low %v808_v23, %v811_v18  ;;  %v572_v32 = vor.u32 %v571_v52, %v568_v38  ;;  %v4457_v23 = vrot.slane %v673_v9, 9  ;;  %v6429_v46 = vld [vmem:[%s5760_s10 + $0xb8] sm:$0xf] }
  0x80   : > { %3539 = vmatmul.mubr.bf16.gmra.mrb[40].mxu1 %v4663_v58  ;;  %v575_v58 = vshll.u32 %v6333_v47, 16  ;;  %3385 = vmatprep.mubr.bf16.mxu0 %v4648_v14  ;;  %v814_v34 = vrot.slane %v6333_v47, 5  ;;  %v6379_v38 = vrot.slane %v1178_v2, 4  ;;  %v6381_v52 = vrot.slane %v1181_v3, 5  ;;  %v4487_v14 = vld [vmem:[%s5760_s10 + $0xa8] sm:$0xf] }
  0x81   : > { %3546 = vmatprep.mubr.bf16.mxu1 %v4680_v17  ;;  %v585_v17 = vshll.u32 %v6337_v30, 16  ;;  %v573_v62 = vrot.slane %v572_v32, 4  ;;  %v590_v9 = vshrl.u32 %v6366_v22, 16  ;;  %v7643_v18 = vcombine.low %v6297_v27, %v6301_v26  ;;  %v6399_v2 = vld [vmem:[%s5760_s10 + $0xac] sm:$0xf]  ;;  %7647 = vst [vmem:[#allocation15_spill] sm:$0xff] %v6429_v46 }
  0x82   : > { %v577_v11 = vrot.slane %v575_v58, 5  ;;  %v4681_v58 = vcombine.low %v4485_v13, %v6357_v25  ;;  %7641 = vst [vmem:[#allocation10_spill] sm:$0xff] %v6379_v38  ;;  %7642 = vst [vmem:[#allocation11_spill] sm:$0xff] %v6381_v52  ;;  %v815_v32 = vsel %vm5810_vm5, %v4457_v23, %v814_v34  ;;  %v816_v13 = vrot.slane %v814_v34, 4  ;;  %v674_v26 = vld [vmem:[%s5760_s10 + $0x9c] sm:$0xe] }
  0x83   : > { %v587_v21 = vrot.slane %v585_v17, 5  ;;  %7644 = vst [vmem:[#allocation12_spill] sm:$0xff] %v6399_v2  ;;  %v592_v23 = vrot.slane %v590_v9, 4  ;;  %v609_v27 = vshll.u32 %v6375_v40, 16  ;;  %v1202_v42 = vshrl.u32 %v4487_v14, 16 }
  0x84   : > { %v582_v55 = vor.u32 %v581_v45, %v577_v11  ;;  %v817_v45 = vrot.slane %v6337_v30, 5  ;;  %v578_v17 = vsel %vm5797_vm4, %v573_v62, %v577_v11  ;;  %v599_v30 = vshll.u32 %v6371_v8, 16  ;;  %v6443_v38 = vld [vmem:[%s5760_s10 + $0xb4] sm:$0xf] }
  0x85   : > { %v603_v11 = vshrl.u32 %v6371_v8, 16  ;;  %v4682_v25 = vcombine.low %v4487_v14, %v6399_v2  ;;  %v675_v2 = vld [vmem:[%s5760_s10 + $0xa8] sm:$0xe] }
  0x86   : > { %v583_v57 = vrot.slane %v582_v55, 4  ;;  %3386 = vmatmul.mubr.bf16.gmra.mrb[44].mxu0 %v7643_v18  ;;  %v818_v62 = vsel %vm5810_vm5, %v816_v13, %v817_v45  ;;  %v601_v34 = vrot.slane %v599_v30, 5  ;;  %v611_v18 = vrot.slane %v609_v27, 5 }
  0x88   : > { %3547 = vmatmul.mubr.bf16.gmra.mrb[44].mxu1 %v4664_v39  ;;  %v588_v55 = vsel %vm5797_vm4, %v583_v57, %v587_v21  ;;  %v593_v39 = vshll.u32 %v6366_v22, 16  ;;  %v4665_v21 = vcombine.low %v815_v32, %v818_v62  ;;  %v605_v57 = vrot.slane %v603_v11, 4  ;;  %v6413_v32 = vld [vmem:[%s5760_s10 + $0xac] sm:$0xf]  ;;  %v272_v62 = vld [vmem:[%s5760_s10 + $0xb0] sm:$0x1] }
  0x89   : > { %3554 = vmatprep.mubr.bf16.mxu1 %v4681_v58  ;;  %v4649_v3 = vcombine.low %v578_v17, %v588_v55  ;;  %v1205_v17 = vshll.u32 %v4487_v14, 16  ;;  %v6408_v55 = vld [vmem:[%s5760_s10 + $0xa8] sm:$0xf]  ;;  %v4458_v11 = vrot.slane %v674_v26, 9  ;;  %v4489_v26 = vld [vmem:[%s5760_s10 + $0xb4] sm:$0xf] }
  0x8a   : > { %v595_v58 = vrot.slane %v593_v39, 5  ;;  %v606_v13 = vor.u32 %v605_v57, %v601_v34  ;;  %v6415_v39 = vrot.slane %v1202_v42, 4  ;;  %v614_v57 = vshrl.u32 %v6408_v55, 16 }
  0x8b   : > { %3393 = vmatprep.mubr.bf16.mxu0 %v4649_v3  ;;  %v6417_v30 = vrot.slane %v1205_v17, 5  ;;  %v821_v3 = vrot.slane %v6371_v8, 5  ;;  %v617_v42 = vshll.u32 %v6408_v55, 16  ;;  %v623_v17 = vshll.u32 %v6413_v32, 16 }
  0x8c   : > { %v596_v45 = vor.u32 %v595_v58, %v592_v23  ;;  %7645 = vst [vmem:[#allocation13_spill] sm:$0xff] %v6415_v39  ;;  %v607_v23 = vrot.slane %v606_v13, 4  ;;  %v824_v58 = vrot.slane %v6375_v40, 5  ;;  %v616_v13 = vrot.slane %v614_v57, 4 }
  0x8d   : > { %7646 = vst [vmem:[#allocation14_spill] sm:$0xff] %v6417_v30  ;;  %v822_v14 = vsel %vm5810_vm5, %v4458_v11, %v821_v3  ;;  %v823_v9 = vrot.slane %v821_v3, 4  ;;  %v627_v11 = vshrl.u32 %v6413_v32, 16  ;;  %v619_v39 = vrot.slane %v617_v42, 5 }
  0x8e   : > { %v597_v27 = vrot.slane %v596_v45, 4  ;;  %v7648_v45 = vcombine.low %v6329_v12, %v6333_v47  ;;  %v625_v52 = vrot.slane %v623_v17, 5  ;;  %v4683_v42 = vcombine.low %v4489_v26, %v6429_v46 }
  0x8f   : > { %v825_v30 = vsel %vm5810_vm5, %v823_v9, %v824_v58  ;;  %v629_v47 = vrot.slane %v627_v11, 4  ;;  %v4459_v17 = vrot.slane %v675_v2, 9  ;;  %v641_v57 = vshll.u32 %v6443_v38, 16 }
  0x90   : > { %3555 = vmatmul.mubr.bf16.gmra.mrb[48].mxu1 %v4665_v21  ;;  %3394 = vmatmul.mubr.bf16.gmra.mrb[48].mxu0 %v7648_v45  ;;  %v602_v40 = vsel %vm5797_vm4, %v597_v27, %v601_v34  ;;  %v612_v21 = vsel %vm5797_vm4, %v607_v23, %v611_v18  ;;  %v4666_v12 = vcombine.low %v822_v14, %v825_v30  ;;  %v633_v45 = vshll.u32 %v272_v62, 16  ;;  %v6448_v27 = vld [vmem:[%s5760_s10 + $0xb8] sm:$0xf]  ;;  %v6475_v34 = vld [vmem:[%s5760_s10 + $0xc4] sm:$0xf] }
  0x91   : > { %3562 = vmatprep.mubr.bf16.mxu1 %v4682_v25  ;;  %v4650_v3 = vcombine.low %v602_v40, %v612_v21  ;;  %v620_v25 = vor.u32 %v619_v39, %v616_v13  ;;  %v1226_v18 = vshrl.u32 %v4489_v26, 16  ;;  %v1229_v23 = vshll.u32 %v4489_v26, 16  ;;  %v273_v39 = vld [vmem:[%s5760_s10 + $0xbc] sm:$0x1] }
  0x92   : > { %v630_v9 = vor.u32 %v629_v47, %v625_v52  ;;  %v635_v58 = vrot.slane %v633_v45, 5  ;;  %v828_v21 = vrot.slane %v6413_v32, 5  ;;  %v638_v13 = vshrl.u32 %v6443_v38, 16 }
  0x93   : > { %3401 = vmatprep.mubr.bf16.mxu0 %v4650_v3  ;;  %v621_v30 = vrot.slane %v620_v25, 4  ;;  %v6452_v14 = vrot.slane %v1226_v18, 4  ;;  %v6454_v40 = vrot.slane %v1229_v23, 5  ;;  %v831_v3 = vrot.slane %v272_v62, 5  ;;  %v4491_v23 = vld [vmem:[%s5760_s10 + $0xc0] sm:$0xf] }
  0x94   : > { %v631_v11 = vrot.slane %v630_v9, 4  ;;  %v829_v26 = vsel %vm5810_vm5, %v4459_v17, %v828_v21  ;;  %v830_v47 = vrot.slane %v828_v21, 4  ;;  %v647_v45 = vshll.u32 %v6448_v27, 16 }
  0x95   : > { %7649 = vst [vmem:[#allocation16_spill] sm:$0xff] %v6454_v40  ;;  %v626_v2 = vsel %vm5797_vm4, %v621_v30, %v625_v52  ;;  %v7650_v62 = vcombine.low %v6366_v22, %v6371_v8  ;;  %v643_v18 = vrot.slane %v641_v57, 5  ;;  %v651_v52 = vshrl.u32 %v6448_v27, 16  ;;  %v676_v22 = vld [vmem:[%s5760_s10 + $0xb4] sm:$0xe] }
  0x96   : > { %v636_v25 = vsel %vm5797_vm4, %v631_v11, %v635_v58  ;;  %v832_v17 = vsel %vm5810_vm5, %v830_v47, %v831_v3  ;;  %v649_v30 = vrot.slane %v647_v45, 5  ;;  %v657_v21 = vshll.u32 %v273_v39, 16  ;;  %v4493_v57 = vld [vmem:[%s5760_s10 + $0x14] sm:$0x1]  ;;  %v4509_v3 = vld [vmem:[%s5760_s10 + $0xc] sm:$0xe] }
  0x97   : > { %v4651_v9 = vcombine.low %v626_v2, %v636_v25  ;;  %v4667_v8 = vcombine.low %v829_v26, %v832_v17  ;;  %v653_v58 = vrot.slane %v651_v52, 4  ;;  %v1253_v2 = vshll.u32 %v4491_v23, 16 }
  0x98   : > { %3563 = vmatmul.mubr.bf16.gmra.mrb[52].mxu1 %v4666_v12  ;;  %3402 = vmatmul.mubr.bf16.gmra.mrb[52].mxu0 %v7650_v62  ;;  %v640_v12 = vrot.slane %v638_v13, 4  ;;  %v659_v11 = vrot.slane %v657_v21, 5  ;;  %v1250_v13 = vshrl.u32 %v4491_v23, 16  ;;  %v4684_v46 = vcombine.low %v4491_v23, %v6475_v34 }
  0x99   : > { %3570 = vmatprep.mubr.bf16.mxu1 %v4683_v42  ;;  %v4636_v42 = vcombine.low %v6443_v38, %v6448_v27  ;;  %3409 = vmatprep.mubr.bf16.mxu0 %v4651_v9  ;;  %v654_v45 = vor.u32 %v653_v58, %v649_v30  ;;  %v4460_v40 = vrot.slane %v676_v22, 9  ;;  %v838_v52 = vrot.slane %v273_v39, 5  ;;  %v6490_v9 = vld [vmem:[%s5760_s10 + $0x18] sm:$0xf] }
  0x9a   : > { %v644_v62 = vor.u32 %v643_v18, %v640_v12  ;;  %v6484_v26 = vrot.slane %v1250_v13, 4  ;;  %v6486_v12 = vrot.slane %v1253_v2, 5  ;;  %v835_v18 = vrot.slane %v6448_v27, 5 }
  0x9b   : > { %v655_v21 = vrot.slane %v654_v45, 4  ;;  %v909_v25 = vshll.u32 %v4493_v57, 16  ;;  %v7651_v58 = vrot.slane %v5793_v50, 5  ;;  %v1342_v39 = vrot.slane %v4493_v57, 5  ;;  %v4510_v50 = vld [vmem:[%s5760_s10 + $0x18] sm:$0xe] }
  0x9c   : > { %v645_v47 = vrot.slane %v644_v62, 4  ;;  %v4525_v62 = vrot.slane %v4509_v3, 9  ;;  %v836_v23 = vsel %vm5810_vm5, %v4460_v40, %v835_v18  ;;  %v837_v22 = vrot.slane %v835_v18, 4 }
  0x9d   : > { %v1341_v13 = vrot.slane %v7651_v58, 4  ;;  %v7652_v2 = vcombine.low %v6408_v55, %v6413_v32  ;;  %v911_v3 = vrot.slane %v909_v25, 5  ;;  %v1499_v45 = vshrl.u32 %v6490_v9, 16 }
  0x9e   : > { %v650_v17 = vsel %vm5797_vm4, %v645_v47, %v649_v30  ;;  %v660_v30 = vsel %vm5797_vm4, %v655_v21, %v659_v11  ;;  %v6508_v47 = vld [vmem:[%s5760_s10 + $0x1c] sm:$0xf]  ;;  %v839_v55 = vsel %vm5810_vm5, %v837_v22, %v838_v52  ;;  %v4573_v11 = vld [vmem:[%s5760_s10 + $0x20] sm:$0x1]  ;;  %v7654_v52 = vsel %vm5797_vm4, %v5839_v19, %v5805_v63 }
  0x9f   : > { %v4652_v57 = vcombine.low %v650_v17, %v660_v30  ;;  %v1343_v32 = vsel %vm5810_vm5, %v1341_v13, %v1342_v39  ;;  %v4668_v25 = vcombine.low %v836_v23, %v839_v55  ;;  %v912_v21 = vsel %vm5797_vm4, %v5843_v24, %v911_v3  ;;  %v4494_v17 = vld [vmem:[%s5760_s10 + $0x20] sm:$0x1]  ;;  %v6532_v39 = vld [vmem:[%s5760_s10 + $0x24] sm:$0xf]  ;;  %v5579_v3 = vld [vmem:[%s5760_s10 + $0x1c] sm:$0xf] }
  0xa0   : > { %3571 = vmatmul.mubr.bf16.gmra.mrb[56].mxu1 %v4667_v8  ;;  %3410 = vmatmul.mubr.bf16.gmra.mrb[56].mxu0 %v7652_v2  ;;  %v7653_v8 = vmov %v7651_v58  ;;  %v6527_v22 = vcombine.low %v7654_v52, %v912_v21  ;;  %v1508_v13 = vshll.u32 %v6508_v47, 16  ;;  %v1512_v23 = vshrl.u32 %v6508_v47, 16 }
  0xa1   : > { %3578 = vmatprep.mubr.bf16.mxu1 %v4684_v46  ;;  %v1340_v40 = vsel %vm5810_vm5, %v4525_v62, %v7653_v8  ;;  %v1502_v46 = vshll.u32 %v6490_v9, 16  ;;  %v1501_v62 = vrot.slane %v1499_v45, 4  ;;  %3417 = vmatprep.mubr.bf16.mxu0 %v4652_v57  ;;  %v1518_v2 = vshll.u32 %v4573_v11, 16 }
  0xa2   : > { %v4701_v18 = vcombine.low %v1340_v40, %v1343_v32  ;;  %v4717_v24 = vcombine.low %v6490_v9, %v6508_v47  ;;  %v4526_v30 = vrot.slane %v4510_v50, 9  ;;  %v1346_v8 = vrot.slane %v5579_v3, 5 }
  0xa3   : > { %v1504_v58 = vrot.slane %v1502_v46, 5  ;;  %v1510_v45 = vrot.slane %v1508_v13, 5  ;;  %v1514_v63 = vrot.slane %v1512_v23, 4  ;;  %v1349_v19 = vrot.slane %v4494_v17, 5 }
  0xa4   : > { %v1520_v57 = vrot.slane %v1518_v2, 5  ;;  %v1347_v55 = vsel %vm5810_vm5, %v4526_v30, %v1346_v8  ;;  %v1348_v32 = vrot.slane %v1346_v8, 4  ;;  %v920_v46 = vor.u32 %v5887_v56, %v5879_v49  ;;  %v6555_v2 = vld [vmem:[%s5760_s10 + $0x2c] sm:$0x1] }
  0xa5   : > { %v1505_v40 = vor.u32 %v1504_v58, %v1501_v62  ;;  %v1515_v9 = vor.u32 %v1514_v63, %v1510_v45  ;;  %v923_v47 = vshll.u32 %v5579_v3, 16  ;;  %v7655_v50 = vshrl.u32 %v5850_v28, 16  ;;  %v6544_v62 = vld [vmem:[%s5760_s10 + $0x28] sm:$0xf] }
  0xa6   : > { %v1350_v52 = vsel %vm5810_vm5, %v1348_v32, %v1349_v19  ;;  %v921_v58 = vrot.slane %v920_v46, 4  ;;  %v933_v13 = vshll.u32 %v4494_v17, 16  ;;  %v1523_v49 = vshrl.u32 %v6532_v39, 16  ;;  %v4495_v32 = vld [vmem:[%s5760_s10 + $0x2c] sm:$0x1] }
  0xa7   : > { %v1506_v11 = vrot.slane %v1505_v40, 4  ;;  %v929_v21 = vrot.slane %v7655_v50, 4  ;;  %v1516_v28 = vrot.slane %v1515_v9, 4  ;;  %v925_v23 = vrot.slane %v923_v47, 5  ;;  %v4511_v40 = vld [vmem:[%s5760_s10 + $0x24] sm:$0xe] }
  0xa8   : > { %3579 = vmatmul.mubr.bf16.gmra.mrb[60].mxu1 %v4668_v25  ;;  %3418 = vmatmul.mubr.bf16.gmra.mrb[60].mxu0 %v4636_v42  ;;  %v4702_v25 = vcombine.low %v1347_v55, %v1350_v52  ;;  %v935_v38 = vrot.slane %v933_v13, 5  ;;  %v1525_v27 = vrot.slane %v1523_v49, 4  ;;  %v1526_v42 = vshll.u32 %v6532_v39, 16  ;;  %v5580_v52 = vld [vmem:[%s5760_s10 + $0x28] sm:$0xf] }
  0xa9   : > { %3619 = vmatprep.mubr.bf16.mxu0 %v4701_v18  ;;  %v1511_v56 = vsel %vm5797_vm4, %v1506_v11, %v1510_v45  ;;  %v1532_v30 = vshll.u32 %v6544_v62, 16  ;;  %v1521_v17 = vsel %vm5797_vm4, %v1516_v28, %v1520_v57  ;;  %v926_v18 = vsel %vm5797_vm4, %v921_v58, %v925_v23  ;;  %v5550_v13 = vld [vmem:[%s7617_s1 + $0x208] sm:$0xff]  }
  0xaa   : > { %v930_v3 = vor.u32 %v929_v21, %v925_v23  ;;  %v1536_v8 = vshrl.u32 %v6544_v62, 16  ;;  %v4733_v45 = vcombine.low %v1511_v56, %v1521_v17  ;;  %v1528_v63 = vrot.slane %v1526_v42, 5 }
  0xab   : > { %v1534_v19 = vrot.slane %v1532_v30, 5  ;;  %v1542_v55 = vshll.u32 %v6555_v2, 16  ;;  %v1958_v9 = vrot.slane %v6555_v2, 5  ;;  %v4718_v57 = vcombine.low %v6532_v39, %v6544_v62  ;;  %v6579_v62 = vld [vmem:[%s5760_s10 + $0x30] sm:$0xf] }
  0xac   : > { %v931_v46 = vrot.slane %v930_v3, 4  ;;  %v1538_v11 = vrot.slane %v1536_v8, 4  ;;  %3780 = vmatprep.mubr.bf16.mxu1 %v4733_v45  ;;  %v1529_v47 = vor.u32 %v1528_v63, %v1525_v27  ;;  %v4527_v21 = vrot.slane %v4511_v40, 9  ;;  %v6588_v3 = vld [vmem:[%s5760_s10 + $0x34] sm:$0xf] }
  0xad   : > { %v1544_v50 = vrot.slane %v1542_v55, 5  ;;  %v1353_v58 = vrot.slane %v5580_v52, 5  ;;  %v1356_v28 = vrot.slane %v4495_v32, 5  ;;  %v944_v39 = vor.u32 %v5939_v44, %v5937_v43  ;;  %v4575_v63 = vld [vmem:[%s5760_s10 + $0x38] sm:$0x1] }
  0xae   : > { %v936_v49 = vsel %vm5797_vm4, %v931_v46, %v935_v38  ;;  %v1539_v56 = vor.u32 %v1538_v11, %v1534_v19  ;;  %v1530_v27 = vrot.slane %v1529_v47, 4  ;;  %v947_v17 = vshll.u32 %v5580_v52, 16  ;;  %v4512_v55 = vld [vmem:[%s5760_s10 + $0x30] sm:$0xe] }
  0xaf   : > { %v4686_v23 = vcombine.low %v926_v18, %v936_v49  ;;  %v1354_v42 = vsel %vm5810_vm5, %v4527_v21, %v1353_v58  ;;  %v1355_v30 = vrot.slane %v1353_v58, 4  ;;  %v945_v38 = vrot.slane %v944_v39, 4  ;;  %v4496_v21 = vld [vmem:[%s5760_s10 + $0x38] sm:$0x1] }
  0xb0   : > { %3781 = vmatmul.mubr.bf16.vlgmr.msra.gmra.mrb[64].mxu1 %v4717_v24  ;;  %3620 = vmatmul.mubr.bf16.vlgmr.msra.gmra.mrb[64].mxu0 %v6527_v22  ;;  %v1540_v24 = vrot.slane %v1539_v56, 4  ;;  %v7656_v43 = vshrl.u32 %v5914_v16, 16  ;;  %v1535_v22 = vsel %vm5797_vm4, %v1530_v27, %v1534_v19  ;;  %v957_v8 = vshll.u32 %v4495_v32, 16 }
  0xb1   : > { %5347 = vmatpush3.bf16.msra.mxu0 %v6216_v53  ;;  %3627 = vmatprep.mubr.bf16.mxu0 %v4702_v25  ;;  %v1357_v18 = vsel %vm5810_vm5, %v1355_v30, %v1356_v28  ;;  %v1547_v53 = vshrl.u32 %v6579_v62, 16  ;;  %v5553_v25 = vld [vmem:[%s7617_s1 + $0x210] sm:$0xff]   ;;  %v949_v45 = vrot.slane %v947_v17, 5  ;;  %v1550_v19 = vshll.u32 %v6579_v62, 16 }
  0xb2   : > { %v953_v44 = vrot.slane %v7656_v43, 4  ;;  %5348 = vmatprep.subr.bf16.mxu0 %v5550_v13  ;;  %v1545_v16 = vsel %vm5797_vm4, %v1540_v24, %v1544_v50  ;;  %v4703_v40 = vcombine.low %v1354_v42, %v1357_v18  ;;  %v959_v11 = vrot.slane %v957_v8, 5  ;;  %v5556_v42 = vld [vmem:[%s7617_s1 + $0x218] sm:$0xff]   ;;  %v5581_v17 = vld [vmem:[%s5760_s10 + $0x34] sm:$0xf] }
  0xb3   : > { %v4734_v46 = vcombine.low %v1535_v22, %v1545_v16  ;;  %v1549_v47 = vrot.slane %v1547_v53, 4  ;;  %v1556_v32 = vshll.u32 %v6588_v3, 16  ;;  %v950_v52 = vsel %vm5797_vm4, %v945_v38, %v949_v45  ;;  %v6621_v53 = vld [vmem:[%s5760_s10 + $0x3c] sm:$0xf] }
  0xb4   : > { %v954_v58 = vor.u32 %v953_v44, %v949_v45  ;;  %v1552_v49 = vrot.slane %v1550_v19, 5  ;;  %v1560_v50 = vshrl.u32 %v6588_v3, 16  ;;  %v1566_v28 = vshll.u32 %v4575_v63, 16 }
  0xb5   : > { %5349 = vmatpush3.bf16.msra.mxu0 %v5550_v13  ;;  %3788 = vmatprep.mubr.bf16.mxu1 %v4734_v46  ;;  %v1558_v56 = vrot.slane %v1556_v32, 5  ;;  %v4719_v39 = vcombine.low %v6579_v62, %v6588_v3  ;;  %v4528_v27 = vrot.slane %v4512_v55, 9  ;;  %v1360_v43 = vrot.slane %v5581_v17, 5  ;;  %v4576_v32 = vld [vmem:[%s5760_s10 + $0x44] sm:$0x1] }
  0xb6   : > { %5350 = vmatprep.subr.bf16.mxu0 %v5553_v25  ;;  %v955_v30 = vrot.slane %v954_v58, 4  ;;  %v1553_v24 = vor.u32 %v1552_v49, %v1549_v47  ;;  %v1562_v38 = vrot.slane %v1560_v50, 4  ;;  %v1568_v13 = vrot.slane %v1566_v28, 5  ;;  %v4497_v49 = vld [vmem:[%s5760_s10 + $0x44] sm:$0x1] }
  0xb7   : > { %v1363_v44 = vrot.slane %v4496_v21, 5  ;;  %v968_v22 = vor.u32 %v5991_v37, %v5989_v36  ;;  %v971_v62 = vshll.u32 %v5581_v17, 16  ;;  %v1361_v8 = vsel %vm5810_vm5, %v4528_v27, %v1360_v43  ;;  %v5559_v37 = vld [vmem:[%s7617_s1 + $0x220] sm:$0xff]   ;;  %v4513_v28 = vld [vmem:[%s5760_s10 + $0x3c] sm:$0xe] }
  0xb8   : > { %3789 = vmatmul.mubr.bf16.gmra.mrb[68].mxu1 %v4718_v57  ;;  %3628 = vmatmul.mubr.bf16.gmra.mrb[68].mxu0 %v4686_v23  ;;  %v960_v3 = vsel %vm5797_vm4, %v955_v30, %v959_v11  ;;  %v1554_v18 = vrot.slane %v1553_v24, 4  ;;  %v1563_v57 = vor.u32 %v1562_v38, %v1558_v56  ;;  %v1362_v16 = vrot.slane %v1360_v43, 4 }
  0xb9   : > { %3635 = vmatprep.mubr.bf16.mxu0 %v4703_v40  ;;  %5351 = vmatpush3.bf16.msra.mxu0 %v5553_v25  ;;  %v4687_v23 = vcombine.low %v950_v52, %v960_v3  ;;  %v969_v45 = vrot.slane %v968_v22, 4  ;;  %v973_v36 = vrot.slane %v971_v62, 5  ;;  %v7657_v19 = vshrl.u32 %v5958_v61, 16  ;;  %v6631_v25 = vld [vmem:[%s5760_s10 + $0x40] sm:$0xf]  ;;  %v5562_v22 = vld [vmem:[%s7617_s1 + $0x228] sm:$0xff]  }
  0xba   : > { %5352 = vmatprep.subr.bf16.mxu0 %v5556_v42  ;;  %v1559_v40 = vsel %vm5797_vm4, %v1554_v18, %v1558_v56  ;;  %v1564_v63 = vrot.slane %v1563_v57, 4  ;;  %v981_v46 = vshll.u32 %v4496_v21, 16  ;;  %v1364_v11 = vsel %vm5810_vm5, %v1362_v16, %v1363_v44  ;;  %v5582_v18 = vld [vmem:[%s5760_s10 + $0x40] sm:$0xf] }
  0xbb   : > { %v977_v55 = vrot.slane %v7657_v19, 4  ;;  %v974_v47 = vsel %vm5797_vm4, %v969_v45, %v973_v36  ;;  %v1571_v52 = vshrl.u32 %v6621_v53, 16  ;;  %v1574_v58 = vshll.u32 %v6621_v53, 16 }
  0xbc   : > { %v1569_v50 = vsel %vm5797_vm4, %v1564_v63, %v1568_v13  ;;  %v4704_v61 = vcombine.low %v1361_v8, %v1364_v11  ;;  %v983_v21 = vrot.slane %v981_v46, 5  ;;  %v1580_v38 = vshll.u32 %v6631_v25, 16 }
  0xbd   : > { %v978_v56 = vor.u32 %v977_v55, %v973_v36  ;;  %5353 = vmatpush3.bf16.msra.mxu0 %v5556_v42  ;;  %v4735_v27 = vcombine.low %v1559_v40, %v1569_v50  ;;  %v1573_v30 = vrot.slane %v1571_v52, 4  ;;  %v1576_v24 = vrot.slane %v1574_v58, 5  ;;  %v6655_v40 = vld [vmem:[%s5760_s10 + $0x48] sm:$0xf]  ;;  %v6664_v58 = vld [vmem:[%s5760_s10 + $0x4c] sm:$0xf] }
  0xbe   : > { %5354 = vmatprep.subr.bf16.mxu0 %v5559_v37  ;;  %v1584_v43 = vshrl.u32 %v6631_v25, 16  ;;  %v1590_v44 = vshll.u32 %v4576_v32, 16  ;;  %v4720_v13 = vcombine.low %v6621_v53, %v6631_v25  ;;  %v1582_v62 = vrot.slane %v1580_v38, 5 }
  0xbf   : > { %v979_v17 = vrot.slane %v978_v56, 4  ;;  %3796 = vmatprep.mubr.bf16.mxu1 %v4735_v27  ;;  %v1577_v42 = vor.u32 %v1576_v24, %v1573_v30  ;;  %v4529_v3 = vrot.slane %v4513_v28, 9  ;;  %v1367_v57 = vrot.slane %v5582_v18, 5  ;;  %v4498_v27 = vld [vmem:[%s5760_s10 + $0x50] sm:$0x1] }
  0xc0   : > { %3636 = vmatmul.mubr.bf16.gmra.mrb[72].mxu0 %v4687_v23  ;;  %3797 = vmatmul.mubr.bf16.gmra.mrb[72].mxu1 %v4719_v39  ;;  %v1586_v16 = vrot.slane %v1584_v43, 4  ;;  %v1592_v45 = vrot.slane %v1590_v44, 5  ;;  %v1370_v36 = vrot.slane %v4497_v49, 5  ;;  %v992_v39 = vor.u32 %v6050_v41, %v6048_v35  ;;  %v4577_v35 = vld [vmem:[%s5760_s10 + $0x50] sm:$0x1] }
  0xc1   : > { %3643 = vmatprep.mubr.bf16.mxu0 %v4704_v61  ;;  %v984_v8 = vsel %vm5797_vm4, %v979_v17, %v983_v21  ;;  %v1578_v23 = vrot.slane %v1577_v42, 4  ;;  %v1368_v19 = vsel %vm5810_vm5, %v4529_v3, %v1367_v57  ;;  %v1369_v55 = vrot.slane %v1367_v57, 4  ;;  %5355 = vmatpush3.bf16.msra.mxu0 %v5559_v37  ;;  %v4514_v43 = vld [vmem:[%s5760_s10 + $0x48] sm:$0xe]  ;;  %v5568_v3 = vld [vmem:[%s7617_s1 + $0x238] sm:$0xff]  }
  0xc2   : > { %v4688_v63 = vcombine.low %v974_v47, %v984_v8  ;;  %v1587_v46 = vor.u32 %v1586_v16, %v1582_v62  ;;  %v995_v11 = vshll.u32 %v5582_v18, 16  ;;  %v7658_v32 = vshrl.u32 %v6022_v5, 16  ;;  %5356 = vmatprep.subr.bf16.mxu0 %v5562_v22  ;;  %v5565_v47 = vld [vmem:[%s7617_s1 + $0x230] sm:$0xff]  }
  0xc3   : > { %v1583_v37 = vsel %vm5797_vm4, %v1578_v23, %v1582_v62  ;;  %v1371_v50 = vsel %vm5810_vm5, %v1369_v55, %v1370_v36  ;;  %v1005_v61 = vshll.u32 %v4497_v49, 16  ;;  %v1595_v41 = vshrl.u32 %v6655_v40, 16 }
  0xc4   : > { %v1001_v52 = vrot.slane %v7658_v32, 4  ;;  %v1588_v5 = vrot.slane %v1587_v46, 4  ;;  %v4705_v56 = vcombine.low %v1368_v19, %v1371_v50  ;;  %v993_v21 = vrot.slane %v992_v39, 4  ;;  %v5583_v46 = vld [vmem:[%s5760_s10 + $0x4c] sm:$0xf] }
  0xc5   : > { %v997_v28 = vrot.slane %v995_v11, 5  ;;  %v1007_v30 = vrot.slane %v1005_v61, 5  ;;  %v1597_v24 = vrot.slane %v1595_v41, 4  ;;  %v1598_v38 = vshll.u32 %v6655_v40, 16  ;;  %5357 = vmatpush3.bf16.msra.mxu0 %v5562_v22 }
  0xc6   : > { %v1604_v17 = vshll.u32 %v6664_v58, 16  ;;  %v1593_v44 = vsel %vm5797_vm4, %v1588_v5, %v1592_v45  ;;  %v1608_v62 = vshrl.u32 %v6664_v58, 16  ;;  %5358 = vmatprep.subr.bf16.mxu0 %v5565_v47  ;;  %v1614_v22 = vshll.u32 %v4577_v35, 16 }
  0xc7   : > { %v998_v49 = vsel %vm5797_vm4, %v993_v21, %v997_v28  ;;  %v1002_v42 = vor.u32 %v1001_v52, %v997_v28  ;;  %v4736_v18 = vcombine.low %v1583_v37, %v1593_v44  ;;  %v1600_v57 = vrot.slane %v1598_v38, 5  ;;  %v4578_v21 = vld [vmem:[%s5760_s10 + $0x5c] sm:$0x1] }
  0xc8   : > { %3644 = vmatmul.mubr.bf16.gmra.mrb[76].mxu0 %v4688_v63  ;;  %v1606_v8 = vrot.slane %v1604_v17, 5  ;;  %v1610_v45 = vrot.slane %v1608_v62, 4  ;;  %v4721_v36 = vcombine.low %v6655_v40, %v6664_v58  ;;  %v4530_v23 = vrot.slane %v4514_v43, 9  ;;  %v6698_v58 = vld [vmem:[%s5760_s10 + $0x54] sm:$0xf] }
  0xc9   : > { %3651 = vmatprep.mubr.bf16.mxu0 %v4705_v56  ;;  %v1003_v16 = vrot.slane %v1002_v42, 4  ;;  %3804 = vmatprep.mubr.bf16.mxu1 %v4736_v18  ;;  %v1601_v19 = vor.u32 %v1600_v57, %v1597_v24  ;;  %v1616_v55 = vrot.slane %v1614_v22, 5  ;;  %v1374_v39 = vrot.slane %v5583_v46, 5  ;;  %v6709_v56 = vld [vmem:[%s5760_s10 + $0x58] sm:$0xf] }
  0xca   : > { %v1377_v11 = vrot.slane %v4498_v27, 5  ;;  %5359 = vmatpush3.bf16.msra.mxu0 %v5565_v47  ;;  %3805 = vmatmul.mubr.bf16.gmra.mrb[76].mxu1 %v4720_v13  ;;  %v1611_v32 = vor.u32 %v1610_v45, %v1606_v8  ;;  %v1016_v40 = vor.u32 %v6098_v6, %v6096_v15  ;;  %v1019_v52 = vshll.u32 %v5583_v46, 16  ;;  %v4515_v17 = vld [vmem:[%s5760_s10 + $0x54] sm:$0xe]  ;;  %v4499_v22 = vld [vmem:[%s5760_s10 + $0x5c] sm:$0x1] }
  0xcb   : > { %v1008_v63 = vsel %vm5797_vm4, %v1003_v16, %v1007_v30  ;;  %5360 = vmatprep.subr.bf16.mxu0 %v5568_v3  ;;  %v1602_v50 = vrot.slane %v1601_v19, 4  ;;  %v1375_v47 = vsel %vm5810_vm5, %v4530_v23, %v1374_v39  ;;  %v1376_v53 = vrot.slane %v1374_v39, 4  ;;  %v5584_v45 = vld [vmem:[%s5760_s10 + $0x58] sm:$0xf] }
  0xcc   : > { %v4689_v37 = vcombine.low %v998_v49, %v1008_v63  ;;  %v1612_v25 = vrot.slane %v1611_v32, 4  ;;  %v1017_v13 = vrot.slane %v1016_v40, 4  ;;  %v1021_v61 = vrot.slane %v1019_v52, 5 }
  0xcd   : > { %v7659_v35 = vshrl.u32 %v6074_v0, 16  ;;  %v1607_v15 = vsel %vm5797_vm4, %v1602_v50, %v1606_v8  ;;  %v1378_v6 = vsel %vm5810_vm5, %v1376_v53, %v1377_v11  ;;  %v1029_v5 = vshll.u32 %v4498_v27, 16  ;;  %v6728_v11 = vld [vmem:[%s5760_s10 + $0x60] sm:$0xf] }
  0xce   : > { %v1619_v28 = vshrl.u32 %v6698_v58, 16  ;;  %5361 = vmatpush3.bf16.msra.mxu0 %v5568_v3  ;;  %v1617_v30 = vsel %vm5797_vm4, %v1612_v25, %v1616_v55  ;;  %v4706_v24 = vcombine.low %v1375_v47, %v1378_v6  ;;  %v1022_v0 = vsel %vm5797_vm4, %v1017_v13, %v1021_v61 }
  0xcf   : > { %v1025_v41 = vrot.slane %v7659_v35, 4  ;;  %v4737_v43 = vcombine.low %v1607_v15, %v1617_v30  ;;  %v1031_v27 = vrot.slane %v1029_v5, 5  ;;  %v1622_v49 = vshll.u32 %v6698_v58, 16 }
  0xd0   : > { %3652 = vmatmul.mubr.bf16.gmra.mrb[80].mxu0 %v4689_v37  ;;  %v1621_v44 = vrot.slane %v1619_v28, 4  ;;  %v1628_v62 = vshll.u32 %v6709_v56, 16  ;;  %v1632_v3 = vshrl.u32 %v6709_v56, 16  ;;  %v1638_v18 = vshll.u32 %v4578_v21, 16  ;;  %v4516_v28 = vld [vmem:[%s5760_s10 + $0x60] sm:$0xe] }
  0xd1   : > { %v1026_v38 = vor.u32 %v1025_v41, %v1021_v61  ;;  %3659 = vmatprep.mubr.bf16.mxu0 %v4706_v24  ;;  %3812 = vmatprep.mubr.bf16.mxu1 %v4737_v43  ;;  %v1624_v57 = vrot.slane %v1622_v49, 5  ;;  %v4722_v8 = vcombine.low %v6698_v58, %v6709_v56  ;;  %v4531_v16 = vrot.slane %v4515_v17, 9  ;;  %v6737_v61 = vld [vmem:[%s5760_s10 + $0x64] sm:$0xf]  ;;  %v4579_v56 = vld [vmem:[%s5760_s10 + $0x68] sm:$0x1] }
  0xd2   : > { %v1381_v23 = vrot.slane %v5584_v45, 5  ;;  %3813 = vmatmul.mubr.bf16.gmra.mrb[80].mxu1 %v4721_v36  ;;  %v1630_v55 = vrot.slane %v1628_v62, 5  ;;  %v1634_v46 = vrot.slane %v1632_v3, 4  ;;  %v1640_v39 = vrot.slane %v1638_v18, 5  ;;  %v4500_v49 = vld [vmem:[%s5760_s10 + $0x68] sm:$0x1] }
  0xd3   : > { %v1027_v42 = vrot.slane %v1026_v38, 4  ;;  %v1625_v32 = vor.u32 %v1624_v57, %v1621_v44  ;;  %v1384_v37 = vrot.slane %v4499_v22, 5  ;;  %v1040_v36 = vor.u32 %v6144_v60, %v6142_v59  ;;  %v6757_v57 = vld [vmem:[%s5760_s10 + $0x6c] sm:$0xf] }
  0xd4   : > { %v1382_v40 = vsel %vm5810_vm5, %v4531_v16, %v1381_v23  ;;  %v1383_v52 = vrot.slane %v1381_v23, 4  ;;  %v1635_v58 = vor.u32 %v1634_v46, %v1630_v55  ;;  %v1043_v50 = vshll.u32 %v5584_v45, 16  ;;  %v5585_v23 = vld [vmem:[%s5760_s10 + $0x64] sm:$0xf] }
  0xd5   : > { %v1032_v19 = vsel %vm5797_vm4, %v1027_v42, %v1031_v27  ;;  %v1626_v47 = vrot.slane %v1625_v32, 4  ;;  %v7660_v53 = vshrl.u32 %v6125_v10, 16  ;;  %v1053_v13 = vshll.u32 %v4499_v22, 16 }
  0xd6   : > { %v4690_v63 = vcombine.low %v1022_v0, %v1032_v19  ;;  %v1643_v35 = vshrl.u32 %v6728_v11, 16  ;;  %v1636_v41 = vrot.slane %v1635_v58, 4  ;;  %v1385_v15 = vsel %vm5810_vm5, %v1383_v52, %v1384_v37  ;;  %v6767_v58 = vld [vmem:[%s5760_s10 + $0x70] sm:$0xf] }
  0xd7   : > { %v1049_v25 = vrot.slane %v7660_v53, 4  ;;  %v1041_v6 = vrot.slane %v1040_v36, 4  ;;  %v1045_v5 = vrot.slane %v1043_v50, 5  ;;  %v1631_v59 = vsel %vm5797_vm4, %v1626_v47, %v1630_v55  ;;  %v4580_v53 = vld [vmem:[%s5760_s10 + $0x74] sm:$0x1] }
  0xd8   : > { %3660 = vmatmul.mubr.bf16.gmra.mrb[84].mxu0 %v4690_v63  ;;  %v4707_v60 = vcombine.low %v1382_v40, %v1385_v15  ;;  %v1055_v10 = vrot.slane %v1053_v13, 5  ;;  %v1645_v21 = vrot.slane %v1643_v35, 4  ;;  %v1641_v30 = vsel %vm5797_vm4, %v1636_v41, %v1640_v39 }
  0xd9   : > { %v1046_v24 = vsel %vm5797_vm4, %v1041_v6, %v1045_v5  ;;  %v1050_v0 = vor.u32 %v1049_v25, %v1045_v5  ;;  %v1646_v38 = vshll.u32 %v6728_v11, 16  ;;  %v4738_v17 = vcombine.low %v1631_v59, %v1641_v30  ;;  %v4501_v5 = vld [vmem:[%s5760_s10 + $0x74] sm:$0x1] }
  0xda   : > { %3667 = vmatprep.mubr.bf16.mxu0 %v4707_v60  ;;  %v1652_v43 = vshll.u32 %v6737_v61, 16  ;;  %v1656_v27 = vshrl.u32 %v6737_v61, 16  ;;  %v1662_v44 = vshll.u32 %v4579_v56, 16  ;;  %v4723_v3 = vcombine.low %v6728_v11, %v6737_v61  ;;  %v4517_v61 = vld [vmem:[%s5760_s10 + $0x6c] sm:$0xe] }
  0xdb   : > { %v1051_v42 = vrot.slane %v1050_v0, 4  ;;  %v1648_v62 = vrot.slane %v1646_v38, 5  ;;  %v4532_v18 = vrot.slane %v4516_v28, 9  ;;  %3820 = vmatprep.mubr.bf16.mxu1 %v4738_v17  ;;  %v1388_v19 = vrot.slane %v5585_v23, 5 }
  0xdc   : > { %v1654_v22 = vrot.slane %v1652_v43, 5  ;;  %v1658_v16 = vrot.slane %v1656_v27, 4  ;;  %v1664_v45 = vrot.slane %v1662_v44, 5  ;;  %3821 = vmatmul.mubr.bf16.gmra.mrb[84].mxu1 %v4722_v8  ;;  %v1391_v39 = vrot.slane %v4500_v49, 5 }
  0xdd   : > { %v1056_v55 = vsel %vm5797_vm4, %v1051_v42, %v1055_v10  ;;  %v1649_v46 = vor.u32 %v1648_v62, %v1645_v21  ;;  %v1064_v11 = vor.u32 %v6190_v20, %v6188_v7  ;;  %v1389_v40 = vsel %vm5810_vm5, %v4532_v18, %v1388_v19 }
  0xde   : > { %v4691_v63 = vcombine.low %v1046_v24, %v1056_v55  ;;  %v1659_v32 = vor.u32 %v1658_v16, %v1654_v22  ;;  %v1390_v52 = vrot.slane %v1388_v19, 4  ;;  %v1067_v36 = vshll.u32 %v5585_v23, 16 }
  0xdf   : > { %v1650_v37 = vrot.slane %v1649_v46, 4  ;;  %v1065_v8 = vrot.slane %v1064_v11, 4  ;;  %v7661_v50 = vshrl.u32 %v6166_v4, 16  ;;  %v1077_v20 = vshll.u32 %v4500_v49, 16  ;;  %v5586_v49 = vld [vmem:[%s5760_s10 + $0x70] sm:$0xf] }
  0xe0   : > { %3668 = vmatmul.mubr.bf16.gmra.mrb[88].mxu0 %v4691_v63  ;;  %v1660_v25 = vrot.slane %v1659_v32, 4  ;;  %v1392_v7 = vsel %vm5810_vm5, %v1390_v52, %v1391_v39  ;;  %v1667_v13 = vshrl.u32 %v6757_v57, 16  ;;  %v1069_v15 = vrot.slane %v1067_v36, 5  ;;  %v6799_v46 = vld [vmem:[%s5760_s10 + $0x7c] sm:$0xf] }
  0xe1   : > { %v1073_v47 = vrot.slane %v7661_v50, 4  ;;  %v1655_v35 = vsel %vm5797_vm4, %v1650_v37, %v1654_v22  ;;  %v4708_v41 = vcombine.low %v1389_v40, %v1392_v7  ;;  %v1670_v6 = vshll.u32 %v6757_v57, 16  ;;  %v4581_v36 = vld [vmem:[%s5760_s10 + $0x80] sm:$0x1] }
  0xe2   : > { %v1665_v4 = vsel %vm5797_vm4, %v1660_v25, %v1664_v45  ;;  %v1079_v56 = vrot.slane %v1077_v20, 5  ;;  %v1669_v59 = vrot.slane %v1667_v13, 4  ;;  %v1676_v60 = vshll.u32 %v6767_v58, 16  ;;  %v6792_v45 = vld [vmem:[%s5760_s10 + $0x78] sm:$0xf] }
  0xe3   : > { %v4739_v10 = vcombine.low %v1655_v35, %v1665_v4  ;;  %3675 = vmatprep.mubr.bf16.mxu0 %v4708_v41  ;;  %v1070_v21 = vsel %vm5797_vm4, %v1065_v8, %v1069_v15  ;;  %v1074_v28 = vor.u32 %v1073_v47, %v1069_v15  ;;  %v1672_v30 = vrot.slane %v1670_v6, 5  ;;  %v4518_v20 = vld [vmem:[%s5760_s10 + $0x78] sm:$0xe]  ;;  %v4502_v41 = vld [vmem:[%s5760_s10 + $0x80] sm:$0x1] }
  0xe4   : > { %v1678_v24 = vrot.slane %v1676_v60, 5  ;;  %v1680_v0 = vshrl.u32 %v6767_v58, 16  ;;  %v1686_v38 = vshll.u32 %v4580_v53, 16  ;;  %v4724_v17 = vcombine.low %v6757_v57, %v6767_v58 }
  0xe5   : > { %3828 = vmatprep.mubr.bf16.mxu1 %v4739_v10  ;;  %v1075_v43 = vrot.slane %v1074_v28, 4  ;;  %v1673_v27 = vor.u32 %v1672_v30, %v1669_v59  ;;  %v4533_v44 = vrot.slane %v4517_v61, 9  ;;  %v1395_v42 = vrot.slane %v5586_v49, 5  ;;  %v5587_v30 = vld [vmem:[%s5760_s10 + $0x7c] sm:$0xf] }
  0xe6   : > { %3829 = vmatmul.mubr.bf16.gmra.mrb[88].mxu1 %v4723_v3  ;;  %v1682_v62 = vrot.slane %v1680_v0, 4  ;;  %v1688_v18 = vrot.slane %v1686_v38, 5  ;;  %v1398_v22 = vrot.slane %v4501_v5, 5  ;;  %v1088_v16 = vor.u32 %v6237_v54, %v6235_v33 }
  0xe7   : > { %v1080_v23 = vsel %vm5797_vm4, %v1075_v43, %v1079_v56  ;;  %v1674_v57 = vrot.slane %v1673_v27, 4  ;;  %v1396_v19 = vsel %vm5810_vm5, %v4533_v44, %v1395_v42  ;;  %v1397_v55 = vrot.slane %v1395_v42, 4 }
  0xe8   : > { %v4692_v3 = vcombine.low %v1070_v21, %v1080_v23  ;;  %v1683_v39 = vor.u32 %v1682_v62, %v1678_v24  ;;  %v1089_v11 = vrot.slane %v1088_v16, 4  ;;  %v1091_v63 = vshll.u32 %v5586_v49, 16  ;;  %v6826_v49 = vld [vmem:[%s5760_s10 + $0x84] sm:$0xf] }
  0xe9   : > { %v1679_v33 = vsel %vm5797_vm4, %v1674_v57, %v1678_v24  ;;  %v1399_v54 = vsel %vm5810_vm5, %v1397_v55, %v1398_v22  ;;  %v7662_v32 = vshrl.u32 %v6211_v29, 16  ;;  %v1101_v52 = vshll.u32 %v4501_v5, 16  ;;  %v7663_v23 = vld [vmem:[#allocation2_spill] sm:$0xff] }
  0xea   : > { %3676 = vmatmul.mubr.bf16.gmra.mrb[92].mxu0 %v4692_v3  ;;  %v1684_v58 = vrot.slane %v1683_v39, 4  ;;  %v4709_v37 = vcombine.low %v1396_v19, %v1399_v54  ;;  %v1093_v8 = vrot.slane %v1091_v63, 5  ;;  %v1691_v50 = vshrl.u32 %v6792_v45, 16  ;;  %v4582_v3 = vld [vmem:[%s5760_s10 + $0x8c] sm:$0x1] }
  0xeb   : > { %v1097_v40 = vrot.slane %v7662_v32, 4  ;;  %v1103_v47 = vrot.slane %v1101_v52, 5  ;;  %v1694_v53 = vshll.u32 %v6792_v45, 16  ;;  %v1700_v25 = vshll.u32 %v6799_v46, 16  ;;  %v4519_v32 = vld [vmem:[%s5760_s10 + $0x84] sm:$0xe] }
  0xec   : > { %v1704_v7 = vshrl.u32 %v6799_v46, 16  ;;  %v1689_v29 = vsel %vm5797_vm4, %v1684_v58, %v1688_v18  ;;  %3683 = vmatprep.mubr.bf16.mxu0 %v4709_v37  ;;  %v1094_v13 = vsel %vm5797_vm4, %v1089_v11, %v1093_v8  ;;  %v1693_v35 = vrot.slane %v1691_v50, 4 }
  0xed   : > { %v1098_v61 = vor.u32 %v1097_v40, %v1093_v8  ;;  %v4740_v15 = vcombine.low %v1679_v33, %v1689_v29  ;;  %v1696_v6 = vrot.slane %v1694_v53, 5  ;;  %v1702_v5 = vrot.slane %v1700_v25, 5  ;;  %v5588_v29 = vld [vmem:[%s5760_s10 + $0x88] sm:$0xf] }
  0xee   : > { %v1706_v4 = vrot.slane %v1704_v7, 4  ;;  %v1710_v59 = vshll.u32 %v4581_v36, 16  ;;  %v4725_v60 = vcombine.low %v6792_v45, %v6799_v46  ;;  %v4534_v10 = vrot.slane %v4518_v20, 9  ;;  %v6837_v46 = vld [vmem:[%s5760_s10 + $0x88] sm:$0xf] }
  0xef   : > { %v1099_v56 = vrot.slane %v1098_v61, 4  ;;  %3836 = vmatprep.mubr.bf16.mxu1 %v4740_v15  ;;  %v1697_v21 = vor.u32 %v1696_v6, %v1693_v35  ;;  %v1402_v24 = vrot.slane %v5587_v30, 5  ;;  %v1405_v0 = vrot.slane %v4502_v41, 5  ;;  %v4503_v7 = vld [vmem:[%s5760_s10 + $0x8c] sm:$0x1] }
  0xf0   : > { %v1707_v28 = vor.u32 %v1706_v4, %v1702_v5  ;;  %3837 = vmatmul.mubr.bf16.gmra.mrb[92].mxu1 %v4724_v17  ;;  %v1712_v43 = vrot.slane %v1710_v59, 5  ;;  %v1112_v27 = vor.u32 %v6272_v31, %v6270_v48  ;;  %v1115_v44 = vshll.u32 %v5587_v30, 16  ;;  %v6856_v6 = vld [vmem:[%s5760_s10 + $0x90] sm:$0xf] }
  0xf1   : > { %v1104_v38 = vsel %vm5797_vm4, %v1099_v56, %v1103_v47  ;;  %v1698_v62 = vrot.slane %v1697_v21, 4  ;;  %v1403_v22 = vsel %vm5810_vm5, %v4534_v10, %v1402_v24  ;;  %v1404_v17 = vrot.slane %v1402_v24, 4 }
  0xf2   : > { %v4693_v42 = vcombine.low %v1094_v13, %v1104_v38  ;;  %v1708_v18 = vrot.slane %v1707_v28, 4  ;;  %v1113_v16 = vrot.slane %v1112_v27, 4  ;;  %v1117_v45 = vrot.slane %v1115_v44, 5  ;;  %v7665_v28 = vld [vmem:[#allocation4_spill] sm:$0xff]  ;;  %v7667_v38 = vld [vmem:[#allocation3_spill] sm:$0xff] }
  0xf3   : > { %v7664_v57 = vshrl.u32 %v7663_v23, 16  ;;  %v1703_v48 = vsel %vm5797_vm4, %v1698_v62, %v1702_v5  ;;  %v1125_v55 = vshll.u32 %v4502_v41, 16  ;;  %v1715_v39 = vshrl.u32 %v6826_v49, 16 }
  0xf4   : > { %3684 = vmatmul.mubr.bf16.gmra.mrb[96].mxu0 %v4693_v42  ;;  %v1713_v31 = vsel %vm5797_vm4, %v1708_v18, %v1712_v43  ;;  %v1406_v63 = vsel %vm5810_vm5, %v1404_v17, %v1405_v0  ;;  %v1118_v33 = vsel %vm5797_vm4, %v1113_v16, %v1117_v45  ;;  %v1718_v37 = vshll.u32 %v6826_v49, 16  ;;  %v4583_v16 = vld [vmem:[%s5760_s10 + $0x98] sm:$0x1] }
  0xf5   : > { %v1121_v19 = vrot.slane %v7664_v57, 4  ;;  %v4741_v11 = vcombine.low %v1703_v48, %v1713_v31  ;;  %v4710_v40 = vcombine.low %v1403_v22, %v1406_v63  ;;  %v1127_v52 = vrot.slane %v1125_v55, 5  ;;  %v4520_v48 = vld [vmem:[%s5760_s10 + $0x90] sm:$0xe] }
  0xf6   : > { %v1717_v58 = vrot.slane %v1715_v39, 4  ;;  %v1724_v36 = vshll.u32 %v6837_v46, 16  ;;  %v1728_v50 = vshrl.u32 %v6837_v46, 16  ;;  %v1734_v47 = vshll.u32 %v4582_v3, 16 }
  0xf7   : > { %v1122_v54 = vor.u32 %v1121_v19, %v1117_v45  ;;  %3844 = vmatprep.mubr.bf16.mxu1 %v4741_v11  ;;  %3691 = vmatprep.mubr.bf16.mxu0 %v4710_v40  ;;  %v1720_v53 = vrot.slane %v1718_v37, 5  ;;  %v4726_v25 = vcombine.low %v6826_v49, %v6837_v46  ;;  %v4535_v20 = vrot.slane %v4519_v32, 9  ;;  %v6865_v49 = vld [vmem:[%s5760_s10 + $0x94] sm:$0xf]  ;;  %v6887_v37 = vld [vmem:[%s7618_s2] ss:$0 sm:$0xff] }
  0xf8   : > { %v1409_v13 = vrot.slane %v5588_v29, 5  ;;  %3845 = vmatmul.mubr.bf16.gmra.mrb[96].mxu1 %v4725_v60  ;;  %v1726_v35 = vrot.slane %v1724_v36, 5  ;;  %v1730_v41 = vrot.slane %v1728_v50, 4  ;;  %v1736_v15 = vrot.slane %v1734_v47, 5  ;;  %v7666_v60 = vld [vmem:[#allocation5_spill] sm:$0xff] }
  0xf9   : > { %v1123_v8 = vrot.slane %v1122_v54, 4  ;;  %v1721_v4 = vor.u32 %v1720_v53, %v1717_v58  ;;  %v1412_v21 = vrot.slane %v4503_v7, 5  ;;  %v1136_v30 = vor.u32 %v7666_v60, %v7665_v28  ;;  %v4504_v54 = vld [vmem:[%s5760_s10 + $0x98] sm:$0x1] }
  0xfa   : > { %v1410_v56 = vsel %vm5810_vm5, %v4535_v20, %v1409_v13  ;;  %v1411_v59 = vrot.slane %v1409_v13, 4  ;;  %v1731_v10 = vor.u32 %v1730_v41, %v1726_v35  ;;  %v1139_v24 = vshll.u32 %v5588_v29, 16 }
  0xfb   : > { %v1128_v61 = vsel %vm5797_vm4, %v1123_v8, %v1127_v52  ;;  %v1722_v0 = vrot.slane %v1721_v4, 4  ;;  %v7668_v43 = vshrl.u32 %v7667_v38, 16  ;;  %v1149_v44 = vshll.u32 %v4503_v7, 16  ;;  %v5589_v7 = vld [vmem:[%s5760_s10 + $0x94] sm:$0xf] }
  0xfc   : > { %v4694_v5 = vcombine.low %v1118_v33, %v1128_v61  ;;  %v1739_v42 = vshrl.u32 %v6856_v6, 16  ;;  %v1732_v62 = vrot.slane %v1731_v10, 4  ;;  %v1413_v18 = vsel %vm5810_vm5, %v1411_v59, %v1412_v21 }
  0xfd   : > { %v1145_v27 = vrot.slane %v7668_v43, 4  ;;  %v1137_v22 = vrot.slane %v1136_v30, 4  ;;  %v1141_v17 = vrot.slane %v1139_v24, 5  ;;  %v1727_v45 = vsel %vm5797_vm4, %v1722_v0, %v1726_v35  ;;  %v7669_v43 = vld [vmem:[#allocation7_spill] sm:$0xff] }
  0xfe   : > { %3692 = vmatmul.mubr.bf16.gmra.mrb[100].mxu0 %v4694_v5  ;;  %v4711_v23 = vcombine.low %v1410_v56, %v1413_v18  ;;  %v1151_v57 = vrot.slane %v1149_v44, 5  ;;  %v1741_v19 = vrot.slane %v1739_v42, 4  ;;  %v1737_v31 = vsel %vm5797_vm4, %v1732_v62, %v1736_v15  ;;  %v6900_v42 = vld [vmem:[%s5760_s10 + $0x9c] sm:$0xf] }
  0xff   : > { %v1142_v55 = vsel %vm5797_vm4, %v1137_v22, %v1141_v17  ;;  %v1146_v46 = vor.u32 %v1145_v27, %v1141_v17  ;;  %v1742_v3 = vshll.u32 %v6856_v6, 16  ;;  %v4742_v39 = vcombine.low %v1727_v45, %v1737_v31  ;;  %v7670_v27 = vld [vmem:[#allocation8_spill] sm:$0xff]  ;;  %v7671_v31 = vld [vmem:[#allocation6_spill] sm:$0xff] }
 0x100   : > { %3699 = vmatprep.mubr.bf16.mxu0 %v4711_v23  ;;  %v1748_v11 = vshll.u32 %v6865_v49, 16  ;;  %v1752_v63 = vshrl.u32 %v6865_v49, 16  ;;  %v1758_v33 = vshll.u32 %v4583_v16, 16  ;;  %v4727_v52 = vcombine.low %v6856_v6, %v6865_v49  ;;  %v6908_v16 = vld [vmem:[%s5760_s10 + $0xa0] sm:$0xf] }
 0x101   : > { %v1147_v32 = vrot.slane %v1146_v46, 4  ;;  %v1744_v40 = vrot.slane %v1742_v3, 5  ;;  %v4866_v58 = vpop.f32.mrb[0].mxu0  ;;  %v4536_v8 = vrot.slane %v4520_v48, 9  ;;  %3852 = vmatprep.mubr.bf16.mxu1 %v4742_v39  ;;  %v1416_v20 = vrot.slane %v5589_v7, 5 }
 0x102   : > { %v1750_v36 = vrot.slane %v1748_v11, 5  ;;  %v1754_v50 = vrot.slane %v1752_v63, 4  ;;  %v1760_v47 = vrot.slane %v1758_v33, 5  ;;  %v4867_v53 = vpop.f32.mrb[1].mxu0  ;;  %3853 = vmatmul.mubr.bf16.gmra.mrb[100].mxu1 %v4726_v25  ;;  %v1419_v15 = vrot.slane %v4504_v54, 5 }
 0x103   : > { %v1152_v29 = vsel %vm5797_vm4, %v1147_v32, %v1151_v57  ;;  %v1745_v13 = vor.u32 %v1744_v40, %v1741_v19  ;;  %v4868_v61 = vadd.f32 %v4867_v53, %v4866_v58  ;;  %v4869_v35 = vpop.f32.mrb[2].mxu0  ;;  %v4978_v41 = vpop.f32.mrb[0].mxu1  ;;  %v1417_v59 = vsel %vm5810_vm5, %v4536_v8, %v1416_v20  ;;  %v4584_v39 = vld [vmem:[%s5760_s10 + $0xa4] sm:$0x1]  ;;  %v4521_v58 = vld [vmem:[%s5760_s10 + $0x9c] sm:$0xe] }
 0x104   : > { %v4695_v6 = vcombine.low %v1142_v55, %v1152_v29  ;;  %v1755_v5 = vor.u32 %v1754_v50, %v1750_v36  ;;  %v4870_v4 = vpop.f32.mrb[3].mxu0  ;;  %v4979_v56 = vpop.f32.mrb[1].mxu1  ;;  %v1418_v10 = vrot.slane %v1416_v20, 4  ;;  %v1160_v44 = vor.u32 %v7670_v27, %v7669_v43  ;;  %v6925_v53 = vld [vmem:[%s5760_s10 + $0xa4] sm:$0x1] }
 0x105   : > { %v1746_v21 = vrot.slane %v1745_v13, 4  ;;  %v3300_v25 = vadd.f32 %v4868_v61, %v6887_v37  ;;  %v4871_v28 = vadd.f32 %v4870_v4, %v4869_v35  ;;  %v4980_v60 = vadd.f32 %v4979_v56, %v4978_v41  ;;  %v4981_v30 = vpop.f32.mrb[2].mxu1 }
 0x106   : > { %3700 = vmatmul.mubr.bf16.gmra.mrb[104].mxu0 %v4695_v6  ;;  %v1756_v24 = vrot.slane %v1755_v5, 4  ;;  %v1420_v0 = vsel %vm5810_vm5, %v1418_v10, %v1419_v15  ;;  %v4982_v38 = vpop.f32.mrb[3].mxu1  ;;  %v1163_v49 = vshll.u32 %v5589_v7, 16  ;;  %v1161_v57 = vrot.slane %v1160_v44, 4 }
 0x107   : > { %v1751_v62 = vsel %vm5797_vm4, %v1746_v21, %v1750_v36  ;;  %v3303_v18 = vadd.f32 %v4871_v28, %v6887_v37  ;;  %v6905_v22 = vadd.f32 %v4980_v60, %v3300_v25  ;;  %v4712_v17 = vcombine.low %v1417_v59, %v1420_v0 }
 0x108   : > { %v1761_v45 = vsel %vm5797_vm4, %v1756_v24, %v1760_v47  ;;  %v4983_v23 = vadd.f32 %v4982_v38, %v4981_v30  ;;  %v1165_v19 = vrot.slane %v1163_v49, 5  ;;  %v7672_v55 = vshrl.u32 %v7671_v31, 16 }
 0x109   : > { %v4743_v48 = vcombine.low %v1751_v62, %v1761_v45  ;;  %3707 = vmatprep.mubr.bf16.mxu0 %v4712_v17  ;;  %v1173_v3 = vshll.u32 %v4504_v54, 16  ;;  %v1763_v11 = vshrl.u32 %v6900_v42, 16  ;;  %v1766_v32 = vshll.u32 %v6900_v42, 16  ;;  %v4872_v61 = vpop.f32.mrb[4].mxu0 }
 0x10a   : > { %v1169_v46 = vrot.slane %v7672_v55, 4  ;;  %v6916_v63 = vadd.f32 %v4983_v23, %v3303_v18  ;;  %v1166_v33 = vsel %vm5797_vm4, %v1161_v57, %v1165_v19  ;;  %v1772_v40 = vshll.u32 %v6908_v16, 16  ;;  %v4873_v6 = vpop.f32.mrb[5].mxu0  ;;  %v7673_v23 = vld [vmem:[#allocation10_spill] sm:$0xff]  ;;  %v7674_v57 = vld [vmem:[#allocation11_spill] sm:$0xff] }
 0x10b   : > { %3860 = vmatprep.mubr.bf16.mxu1 %v4743_v48  ;;  %v1175_v36 = vrot.slane %v1173_v3, 5  ;;  %v1765_v50 = vrot.slane %v1763_v11, 4  ;;  %v1776_v47 = vshrl.u32 %v6908_v16, 16  ;;  %v4984_v54 = vpop.f32.mrb[4].mxu1  ;;  %v1768_v7 = vrot.slane %v1766_v32, 5  ;;  %v4875_v25 = vpop.f32.mrb[6].mxu0 }
 0x10c   : > { %v1170_v8 = vor.u32 %v1169_v46, %v1165_v19  ;;  %3861 = vmatmul.mubr.bf16.gmra.mrb[104].mxu1 %v4727_v52  ;;  %v1774_v20 = vrot.slane %v1772_v40, 5  ;;  %v1782_v29 = vshll.u32 %v4584_v39, 16  ;;  %v4728_v13 = vcombine.low %v6900_v42, %v6908_v16  ;;  %v4985_v35 = vpop.f32.mrb[5].mxu1  ;;  %v5590_v52 = vld [vmem:[%s5760_s10 + $0xa0] sm:$0xf]  ;;  %v4876_v0 = vpop.f32.mrb[7].mxu0 }
 0x10d   : > { %v1778_v15 = vrot.slane %v1776_v47, 4  ;;  %v4986_v5 = vadd.f32 %v4985_v35, %v4984_v54  ;;  %v4987_v4 = vpop.f32.mrb[6].mxu1  ;;  %v4537_v56 = vrot.slane %v4521_v58, 9  ;;  %v1769_v59 = vor.u32 %v1768_v7, %v1765_v50  ;;  %v6944_v3 = vld [vmem:[%s5760_s10 + $0xa8] sm:$0xf]  ;;  %v5571_v11 = vld [vmem:[%s7619_s3] sm:$0xff]  }
 0x10e   : > { %v1171_v41 = vrot.slane %v1170_v8, 4  ;;  %v1784_v10 = vrot.slane %v1782_v29, 5  ;;  %v4874_v21 = vadd.f32 %v4873_v6, %v4872_v61  ;;  %v1423_v28 = vrot.slane %v5590_v52, 5  ;;  %v4988_v60 = vpop.f32.mrb[7].mxu1  ;;  %v6947_v39 = vld [vmem:[%s5760_s10 + $0xac] sm:$0xf]  ;;  %5394 = vmatprep.subr.bf16.mxu1 %v5571_v11 }
 0x10f   : > { %v1779_v24 = vor.u32 %v1778_v15, %v1774_v20  ;;  %v1426_v38 = vrot.slane %v6925_v53, 5  ;;  %v4989_v43 = vadd.f32 %v4988_v60, %v4987_v4  ;;  %v1770_v44 = vrot.slane %v1769_v59, 4  ;;  %v7675_v58 = vld [vmem:[#allocation9_spill] sm:$0xff]  ;;  %v6959_v50 = vld [vmem:[%s5760_s10 + $0xb0] sm:$0x1]  ;;  %5395 = vmatpush3.bf16.msra.mxu1 %v5571_v11 }
 0x110   : > { %v1176_v30 = vsel %vm5797_vm4, %v1171_v41, %v1175_v36  ;;  %v3308_v49 = vadd.f32 %v4874_v21, %v6887_v37  ;;  %v4877_v62 = vadd.f32 %v4876_v0, %v4875_v25  ;;  %v1424_v17 = vsel %vm5810_vm5, %v4537_v56, %v1423_v28 }
 0x111   : > { %v4696_v27 = vcombine.low %v1166_v33, %v1176_v30  ;;  %v1780_v18 = vrot.slane %v1779_v24, 4  ;;  %v1425_v45 = vrot.slane %v1423_v28, 4  ;;  %v1184_v19 = vor.u32 %v7674_v57, %v7673_v23  ;;  %v4878_v61 = vpop.f32.mrb[8].mxu0  ;;  %v4506_v23 = vld [vmem:[%s5760_s10 + $0xb0] sm:$0x1] }
 0x112   : > { %v1775_v48 = vsel %vm5797_vm4, %v1770_v44, %v1774_v20  ;;  %v3311_v31 = vadd.f32 %v4877_v62, %v6887_v37  ;;  %v6941_v55 = vadd.f32 %v4986_v5, %v3308_v49  ;;  %v1187_v46 = vshll.u32 %v5590_v52, 16  ;;  %v4879_v4 = vpop.f32.mrb[9].mxu0  ;;  %v4522_v52 = vld [vmem:[%s5760_s10 + $0xa8] sm:$0xe] }
 0x113   : > { %3708 = vmatmul.mubr.bf16.gmra.mrb[108].mxu0 %v4696_v27  ;;  %v1785_v33 = vsel %vm5797_vm4, %v1780_v18, %v1784_v10  ;;  %v1427_v32 = vsel %vm5810_vm5, %v1425_v45, %v1426_v38  ;;  %v1185_v40 = vrot.slane %v1184_v19, 4  ;;  %v7676_v8 = vshrl.u32 %v7675_v58, 16  ;;  %v4990_v47 = vpop.f32.mrb[8].mxu1  ;;  %v5591_v19 = vld [vmem:[%s5760_s10 + $0xac] sm:$0xf] }
 0x114   : > { %v4744_v54 = vcombine.low %v1775_v48, %v1785_v33  ;;  %v4713_v7 = vcombine.low %v1424_v17, %v1427_v32  ;;  %v6961_v20 = vadd.f32 %v4989_v43, %v3311_v31  ;;  %v1189_v29 = vrot.slane %v1187_v46, 5  ;;  %v4991_v35 = vpop.f32.mrb[9].mxu1 }
 0x115   : > { %v1193_v36 = vrot.slane %v7676_v8, 4  ;;  %v1197_v41 = vshll.u32 %v6925_v53, 16  ;;  %v1787_v15 = vshrl.u32 %v6944_v3, 16  ;;  %v1790_v6 = vshll.u32 %v6944_v3, 16  ;;  %v4993_v56 = vpop.f32.mrb[10].mxu1  ;;  %v4881_v53 = vpop.f32.mrb[10].mxu0 }
 0x116   : > { %v1796_v5 = vshll.u32 %v6947_v39, 16  ;;  %3868 = vmatprep.mubr.bf16.mxu1 %v4744_v54  ;;  %3715 = vmatprep.mubr.bf16.mxu0 %v4713_v7  ;;  %v1190_v59 = vsel %vm5797_vm4, %v1185_v40, %v1189_v29  ;;  %v1800_v21 = vshrl.u32 %v6947_v39, 16  ;;  %v1806_v25 = vshll.u32 %v6959_v50, 16  ;;  %v4994_v28 = vpop.f32.mrb[11].mxu1  ;;  %v4882_v38 = vpop.f32.mrb[11].mxu0 }
 0x117   : > { %v1194_v10 = vor.u32 %v1193_v36, %v1189_v29  ;;  %3869 = vmatmul.mubr.bf16.gmra.mrb[108].mxu1 %v4728_v13  ;;  %v1199_v60 = vrot.slane %v1197_v41, 5  ;;  %v1789_v30 = vrot.slane %v1787_v15, 4  ;;  %v1792_v24 = vrot.slane %v1790_v6, 5  ;;  %v6992_v15 = vld [vmem:[%s5760_s10 + $0xb4] sm:$0xf] }
 0x118   : > { %v1798_v0 = vrot.slane %v1796_v5, 5  ;;  %v1802_v27 = vrot.slane %v1800_v21, 4  ;;  %v1808_v44 = vrot.slane %v1806_v25, 5  ;;  %v4729_v49 = vcombine.low %v6944_v3, %v6947_v39  ;;  %v6995_v6 = vld [vmem:[%s5760_s10 + $0xb8] sm:$0xf]  ;;  %v7679_v25 = vld [vmem:[#allocation12_spill] sm:$0xff] }
 0x119   : > { %v1195_v43 = vrot.slane %v1194_v10, 4  ;;  %v1793_v62 = vor.u32 %v1792_v24, %v1789_v30  ;;  %v4880_v18 = vadd.f32 %v4879_v4, %v4878_v61  ;;  %v4883_v17 = vadd.f32 %v4882_v38, %v4881_v53  ;;  %v4884_v36 = vpop.f32.mrb[12].mxu0  ;;  %v7677_v61 = vld [vmem:[#allocation13_spill] sm:$0xff] }
 0x11a   : > { %v4992_v45 = vadd.f32 %v4991_v35, %v4990_v47  ;;  %v1803_v13 = vor.u32 %v1802_v27, %v1798_v0  ;;  %v4538_v57 = vrot.slane %v4522_v52, 9  ;;  %v1430_v48 = vrot.slane %v5591_v19, 5  ;;  %v7678_v35 = vld [vmem:[#allocation14_spill] sm:$0xff]  ;;  %v4885_v5 = vpop.f32.mrb[13].mxu0  ;;  %v7006_v52 = vld [vmem:[%s5760_s10 + $0xbc] sm:$0x1] }
 0x11b   : > { %v1200_v42 = vsel %vm5797_vm4, %v1195_v43, %v1199_v60  ;;  %v1794_v46 = vrot.slane %v1793_v62, 4  ;;  %v3316_v11 = vadd.f32 %v4880_v18, %v6887_v37  ;;  %v3319_v3 = vadd.f32 %v4883_v17, %v6887_v37  ;;  %v4996_v33 = vpop.f32.mrb[12].mxu1 }
 0x11c   : > { %v4697_v31 = vcombine.low %v1190_v59, %v1200_v42  ;;  %v1804_v32 = vrot.slane %v1803_v13, 4  ;;  %v1431_v40 = vsel %vm5810_vm5, %v4538_v57, %v1430_v48  ;;  %v1432_v58 = vrot.slane %v1430_v48, 4  ;;  %v4997_v47 = vpop.f32.mrb[13].mxu1  ;;  %v7018_v57 = vld [vmem:[%s5760_s10 + $0xbc] sm:$0x1] }
 0x11d   : > { %v1433_v8 = vrot.slane %v4506_v23, 5  ;;  %v1799_v54 = vsel %vm5797_vm4, %v1794_v46, %v1798_v0  ;;  %v6987_v7 = vadd.f32 %v4992_v45, %v3316_v11  ;;  %v4995_v29 = vadd.f32 %v4994_v28, %v4993_v56  ;;  %v6997_v4 = vpop.f32.mrb[14].mxu1  ;;  %v4887_v28 = vpop.f32.mrb[14].mxu0  ;;  %v4523_v46 = vld [vmem:[%s5760_s10 + $0xb4] sm:$0xe]  ;;  %v5572_v11 = vld [vmem:[%s7619_s3 + $0x8] sm:$0xff]  }
 0x11e   : > { %3716 = vmatmul.mubr.bf16.gmra.mrb[112].mxu0 %v4697_v31  ;;  %v1208_v41 = vor.u32 %v7678_v35, %v7677_v61  ;;  %v1809_v59 = vsel %vm5797_vm4, %v1804_v32, %v1808_v44  ;;  %v1211_v21 = vshll.u32 %v5591_v19, 16  ;;  %v7680_v53 = vshrl.u32 %v7679_v25, 16  ;;  %v5000_v60 = vpop.f32.mrb[15].mxu1  ;;  %v4888_v43 = vpop.f32.mrb[15].mxu0  ;;  %5396 = vmatprep.subr.bf16.mxu1 %v5572_v11  ;;  %v5592_v25 = vld [vmem:[%s5760_s10 + $0xb8] sm:$0xf] }
 0x11f   : > { %v1434_v10 = vsel %vm5810_vm5, %v1432_v58, %v1433_v8  ;;  %v4745_v30 = vcombine.low %v1799_v54, %v1809_v59  ;;  %v7008_v0 = vadd.f32 %v4995_v29, %v3319_v3  ;;  %v1221_v44 = vshll.u32 %v4506_v23, 16  ;;  %5397 = vmatpush3.bf16.msra.mxu1 %v5572_v11  ;;  %v7682_v11 = vld [vmem:[#allocation15_spill] sm:$0xff] }
 0x120   : > { %v1217_v56 = vrot.slane %v7680_v53, 4  ;;  %v4714_v24 = vcombine.low %v1431_v40, %v1434_v10  ;;  %v1209_v38 = vrot.slane %v1208_v41, 4  ;;  %v1213_v27 = vrot.slane %v1211_v21, 5 }
 0x121   : > { %v1811_v62 = vshrl.u32 %v6992_v15, 16  ;;  %v1814_v18 = vshll.u32 %v6992_v15, 16  ;;  %3876 = vmatprep.mubr.bf16.mxu1 %v4745_v30  ;;  %v1820_v17 = vshll.u32 %v6995_v6, 16  ;;  %v1824_v45 = vshrl.u32 %v6995_v6, 16  ;;  %v7028_v35 = vpop.f32.mrb[16].mxu0 }
 0x122   : > { %3723 = vmatprep.mubr.bf16.mxu0 %v4714_v24  ;;  %v1830_v42 = vshll.u32 %v7006_v52, 16  ;;  %v4730_v13 = vcombine.low %v6992_v15, %v6995_v6  ;;  %3877 = vmatmul.mubr.bf16.gmra.mrb[112].mxu1 %v4729_v49  ;;  %v1214_v23 = vsel %vm5797_vm4, %v1209_v38, %v1213_v27  ;;  %v1218_v19 = vor.u32 %v1217_v56, %v1213_v27  ;;  %v4891_v56 = vpop.f32.mrb[17].mxu0 }
 0x123   : > { %v1223_v48 = vrot.slane %v1221_v44, 5  ;;  %v1813_v31 = vrot.slane %v1811_v62, 4  ;;  %v1816_v3 = vrot.slane %v1814_v18, 5  ;;  %v1822_v32 = vrot.slane %v1820_v17, 5  ;;  %v7026_v8 = vpop.f32.mrb[16].mxu1 }
 0x124   : > { %v1826_v40 = vrot.slane %v1824_v45, 4  ;;  %v1832_v58 = vrot.slane %v1830_v42, 5  ;;  %v1219_v54 = vrot.slane %v1218_v19, 4  ;;  %v4886_v49 = vadd.f32 %v4885_v5, %v4884_v36  ;;  %v7030_v41 = vpop.f32.mrb[17].mxu1  ;;  %v7681_v42 = vld [vmem:[#allocation16_spill] sm:$0xff] }
 0x125   : > { %v4889_v29 = vadd.f32 %v4888_v43, %v4887_v28  ;;  %v4998_v61 = vadd.f32 %v4997_v47, %v4996_v33  ;;  %v1817_v59 = vor.u32 %v1816_v3, %v1813_v31  ;;  %v4539_v21 = vrot.slane %v4523_v46, 9  ;;  %v7033_v30 = vpop.f32.mrb[18].mxu1  ;;  %v4893_v28 = vpop.f32.mrb[18].mxu0 }
 0x126   : > { %v1827_v10 = vor.u32 %v1826_v40, %v1822_v32  ;;  %v1437_v53 = vrot.slane %v5592_v25, 5  ;;  %v1224_v36 = vsel %vm5797_vm4, %v1219_v54, %v1223_v48  ;;  %v3324_v33 = vadd.f32 %v4886_v49, %v6887_v37  ;;  %v7040_v24 = vpop.f32.mrb[19].mxu1  ;;  %v4894_v62 = vpop.f32.mrb[19].mxu0  ;;  %v7050_v48 = vld [vmem:[%s5760_s10 + $0xc0] sm:$0xf] }
 0x127   : > { %v3327_v47 = vadd.f32 %v4889_v29, %v6887_v37  ;;  %v1440_v5 = vrot.slane %v7018_v57, 5  ;;  %v4698_v38 = vcombine.low %v1214_v23, %v1224_v36  ;;  %v1818_v43 = vrot.slane %v1817_v59, 4  ;;  %v7059_v54 = vld [vmem:[%s5760_s10 + $0xc4] sm:$0xf]  ;;  %v7062_v49 = vld [vmem:[%s5760_s10 + $0xc8] sm:$0x1] }
 0x128   : > { %v1828_v27 = vrot.slane %v1827_v10, 4  ;;  %v1438_v44 = vsel %vm5810_vm5, %v4539_v21, %v1437_v53  ;;  %v7044_v18 = vadd.f32 %v4998_v61, %v3324_v33  ;;  %v1439_v17 = vrot.slane %v1437_v53, 4 }
 0x129   : > { %v5001_v45 = vadd.f32 %v5000_v60, %v6997_v4  ;;  %v1232_v19 = vor.u32 %v7681_v42, %v6452_v14  ;;  %3724 = vmatmul.mubr.bf16.gmra.mrb[116].mxu0 %v4698_v38  ;;  %v1823_v23 = vsel %vm5797_vm4, %v1818_v43, %v1822_v32  ;;  %v1235_v46 = vshll.u32 %v5592_v25, 16  ;;  %v7076_v33 = vpop.f32.mrb[20].mxu0 }
 0x12a   : > { %v1833_v31 = vsel %vm5797_vm4, %v1828_v27, %v1832_v58  ;;  %v7683_v3 = vshrl.u32 %v7682_v11, 16  ;;  %v1441_v14 = vsel %vm5810_vm5, %v1439_v17, %v1440_v5  ;;  %v1245_v59 = vshll.u32 %v7018_v57, 16  ;;  %v4524_v27 = vld [vmem:[%s5760_s10 + $0xc0] sm:$0xe] }
 0x12b   : > { %v4746_v4 = vcombine.low %v1823_v23, %v1833_v31  ;;  %v7066_v60 = vadd.f32 %v5001_v45, %v3327_v47  ;;  %v1233_v29 = vrot.slane %v1232_v19, 4  ;;  %v4715_v61 = vcombine.low %v1438_v44, %v1441_v14  ;;  %v7070_v10 = vpop.f32.mrb[20].mxu1  ;;  %v7086_v44 = vpop.f32.mrb[21].mxu0 }
 0x12c   : > { %v1241_v40 = vrot.slane %v7683_v3, 4  ;;  %v1237_v32 = vrot.slane %v1235_v46, 5  ;;  %v1835_v58 = vshrl.u32 %v7050_v48, 16  ;;  %v1838_v21 = vshll.u32 %v7050_v48, 16  ;;  %v7078_v47 = vpop.f32.mrb[21].mxu1  ;;  %v7090_v15 = vpop.f32.mrb[22].mxu0 }
 0x12d   : > { %3884 = vmatprep.mubr.bf16.mxu1 %v4746_v4  ;;  %v1844_v25 = vshll.u32 %v7059_v54, 16  ;;  %v1848_v53 = vshrl.u32 %v7059_v54, 16  ;;  %v1854_v36 = vshll.u32 %v7062_v49, 16  ;;  %3731 = vmatprep.mubr.bf16.mxu0 %v4715_v61  ;;  %v1247_v38 = vrot.slane %v1245_v59, 5  ;;  %v7088_v17 = vpop.f32.mrb[22].mxu1  ;;  %v7098_v4 = vpop.f32.mrb[23].mxu0 }
 0x12e   : > { %3885 = vmatmul.mubr.bf16.gmra.mrb[116].mxu1 %v4730_v13  ;;  %v1238_v57 = vsel %vm5797_vm4, %v1233_v29, %v1237_v32  ;;  %v1242_v5 = vor.u32 %v1241_v40, %v1237_v32  ;;  %v1837_v43 = vrot.slane %v1835_v58, 4  ;;  %v1840_v45 = vrot.slane %v1838_v21, 5  ;;  %v7092_v13 = vpop.f32.mrb[23].mxu1  ;;  %v4508_v40 = vld [vmem:[%s5760_s10 + $0xc8] sm:$0x1] }
 0x12f   : > { %v1846_v42 = vrot.slane %v1844_v25, 5  ;;  %v1850_v19 = vrot.slane %v1848_v53, 4  ;;  %v1856_v23 = vrot.slane %v1854_v36, 5  ;;  %v4731_v46 = vcombine.low %v7050_v48, %v7059_v54  ;;  %v5593_v21 = vld [vmem:[%s5760_s10 + $0xc4] sm:$0xf] }
 0x130   : > { %v1243_v31 = vrot.slane %v1242_v5, 4  ;;  %v4892_v11 = vadd.f32 %v4891_v56, %v7028_v35  ;;  %v4895_v3 = vadd.f32 %v4894_v62, %v4893_v28  ;;  %v1841_v14 = vor.u32 %v1840_v45, %v1837_v43  ;;  %v7114_v5 = vld [vmem:[%s5760_s10 + $0xcc] sm:$0xf] }
 0x131   : > { %v1851_v29 = vor.u32 %v1850_v19, %v1846_v42  ;;  %v5004_v61 = vadd.f32 %v7030_v41, %v7026_v8  ;;  %v4540_v32 = vrot.slane %v4524_v27, 9  ;;  %v1444_v35 = vrot.slane %v5593_v21, 5  ;;  %v7130_v19 = vpop.f32.mrb[24].mxu0 }
 0x132   : > { %v1248_v59 = vsel %vm5797_vm4, %v1243_v31, %v1247_v38  ;;  %v3332_v58 = vadd.f32 %v4892_v11, %v6887_v37  ;;  %v3335_v48 = vadd.f32 %v4895_v3, %v6887_v37  ;;  %v1842_v28 = vrot.slane %v1841_v14, 4 }
 0x133   : > { %v4699_v56 = vcombine.low %v1238_v57, %v1248_v59  ;;  %v1852_v62 = vrot.slane %v1851_v29, 4  ;;  %v1447_v25 = vrot.slane %v4508_v40, 5  ;;  %v1445_v8 = vsel %vm5810_vm5, %v4540_v32, %v1444_v35  ;;  %v7116_v38 = vpop.f32.mrb[24].mxu1  ;;  %v5573_v57 = vld [vmem:[%s7619_s3 + $0x10] sm:$0xff]  }
 0x134   : > { %v7107_v53 = vadd.f32 %v5004_v61, %v3332_v58  ;;  %v1446_v41 = vrot.slane %v1444_v35, 4  ;;  %v5007_v36 = vadd.f32 %v7040_v24, %v7033_v30  ;;  %v1847_v43 = vsel %vm5797_vm4, %v1842_v28, %v1846_v42  ;;  %v7128_v24 = vld [vmem:[%s5760_s10 + $0xd0] sm:$0xf]  ;;  %v7132_v31 = vpop.f32.mrb[25].mxu1  ;;  %v7143_v61 = vpop.f32.mrb[25].mxu0  ;;  %5398 = vmatprep.subr.bf16.mxu1 %v5573_v57 }
 0x135   : > { %3732 = vmatmul.mubr.bf16.gmra.mrb[120].mxu0 %v4699_v56  ;;  %v1857_v27 = vsel %vm5797_vm4, %v1852_v62, %v1856_v23  ;;  %v1256_v45 = vor.u32 %v6486_v12, %v6484_v26  ;;  %v1259_v30 = vshll.u32 %v5593_v21, 16  ;;  %v7684_v42 = vshrl.u32 %v6475_v34, 16  ;;  %v7141_v23 = vld [vmem:[%s5760_s10 + $0xd4] sm:$0x1]  ;;  %v7145_v26 = vpop.f32.mrb[26].mxu1  ;;  %v7147_v21 = vpop.f32.mrb[26].mxu0  ;;  %5399 = vmatpush3.bf16.msra.mxu1 %v5573_v57 }
 0x136   : > { %v4747_v11 = vcombine.low %v1847_v43, %v1857_v27  ;;  %v1448_v3 = vsel %vm5810_vm5, %v1446_v41, %v1447_v25  ;;  %v7136_v14 = vadd.f32 %v5007_v36, %v3335_v48  ;;  %v1269_v58 = vshll.u32 %v4508_v40, 16  ;;  %v7149_v35 = vpop.f32.mrb[27].mxu1  ;;  %v4906_v62 = vpop.f32.mrb[27].mxu0 }
 0x137   : > { %v1265_v29 = vrot.slane %v7684_v42, 4  ;;  %v4716_v12 = vcombine.low %v1445_v8, %v1448_v3  ;;  %v1257_v32 = vrot.slane %v1256_v45, 4  ;;  %v1261_v59 = vrot.slane %v1259_v30, 5  ;;  %v4589_v45 = vld [vmem:[%s5760_s10 + $0x18] sm:$0xe] }
 0x138   : > { %3892 = vmatprep.mubr.bf16.mxu1 %v4747_v11  ;;  %v1859_v34 = vshrl.u32 %v7114_v5, 16  ;;  %v1862_v48 = vshll.u32 %v7114_v5, 16  ;;  %v1868_v56 = vshll.u32 %v7128_v24, 16  ;;  %v1872_v28 = vshrl.u32 %v7128_v24, 16 }
 0x139   : > { %3893 = vmatmul.mubr.bf16.gmra.mrb[120].mxu1 %v4731_v46  ;;  %3739 = vmatprep.mubr.bf16.mxu0 %v4716_v12  ;;  %v1262_v40 = vsel %vm5797_vm4, %v1257_v32, %v1261_v59  ;;  %v1266_v25 = vor.u32 %v1265_v29, %v1261_v59  ;;  %v1271_v8 = vrot.slane %v1269_v58, 5  ;;  %v1878_v41 = vshll.u32 %v7141_v23, 16 }
 0x13a   : > { %v1861_v36 = vrot.slane %v1859_v34, 4  ;;  %v1864_v57 = vrot.slane %v1862_v48, 5  ;;  %v1870_v43 = vrot.slane %v1868_v56, 5  ;;  %v1874_v27 = vrot.slane %v1872_v28, 4  ;;  %v5594_v48 = vld [vmem:[%s5760_s10 + $0x1c] sm:$0xf] }
 0x13b   : > { %v1267_v30 = vrot.slane %v1266_v25, 4  ;;  %v1880_v11 = vrot.slane %v1878_v41, 5  ;;  %v4732_v46 = vcombine.low %v7114_v5, %v7128_v24  ;;  %v4898_v3 = vadd.f32 %v7086_v44, %v7076_v33  ;;  %v7167_v59 = vpop.f32.mrb[28].mxu1  ;;  %v4590_v33 = vld [vmem:[%s5760_s10 + $0x24] sm:$0xe]  ;;  %v7174_v44 = vpop.f32.mrb[28].mxu0 }
 0x13c   : > { %v1865_v42 = vor.u32 %v1864_v57, %v1861_v36  ;;  %v1875_v29 = vor.u32 %v1874_v27, %v1870_v43  ;;  %v4901_v12 = vadd.f32 %v7098_v4, %v7090_v15  ;;  %v5010_v32 = vadd.f32 %v7078_v47, %v7070_v10  ;;  %v7176_v28 = vpop.f32.mrb[29].mxu1  ;;  %v4909_v47 = vpop.f32.mrb[29].mxu0  ;;  %v5595_v27 = vld [vmem:[%s5760_s10 + $0x20] sm:$0x1] }
 0x13d   : > { %v1272_v58 = vsel %vm5797_vm4, %v1267_v30, %v1271_v8  ;;  %v3340_v34 = vadd.f32 %v4898_v3, %v6887_v37  ;;  %v4605_v5 = vrot.slane %v4589_v45, 9  ;;  %v1948_v56 = vrot.slane %v5594_v48, 5  ;;  %v7179_v41 = vpop.f32.mrb[30].mxu1  ;;  %v4911_v30 = vpop.f32.mrb[30].mxu0  ;;  %v5596_v48 = vld [vmem:[%s5760_s10 + $0x28] sm:$0xf] }
 0x13e   : > { %v4700_v15 = vcombine.low %v1262_v40, %v1272_v58  ;;  %v1866_v4 = vrot.slane %v1865_v42, 4  ;;  %v1876_v25 = vrot.slane %v1875_v29, 4  ;;  %v3343_v10 = vadd.f32 %v4901_v12, %v6887_v37  ;;  %v7186_v3 = vpop.f32.mrb[31].mxu1  ;;  %v4912_v58 = vpop.f32.mrb[31].mxu0 }
 0x13f   : > { %v7181_v8 = vadd.f32 %v5010_v32, %v3340_v34  ;;  %v1949_v36 = vsel %vm5810_vm5, %v4605_v5, %v1948_v56  ;;  %v1950_v57 = vrot.slane %v1948_v56, 4  ;;  %v1951_v45 = vrot.slane %v5595_v27, 5  ;;  %v4591_v32 = vld [vmem:[%s5760_s10 + $0x30] sm:$0xe] }
 0x140   : > { %3740 = vmatmul.mubr.bf16.gmra.mrb[124].mxu0 %v4700_v15  ;;  %v1871_v40 = vsel %vm5797_vm4, %v1866_v4, %v1870_v43  ;;  %v1881_v42 = vsel %vm5797_vm4, %v1876_v25, %v1880_v11  ;;  %v5013_v29 = vadd.f32 %v7092_v13, %v7088_v17  ;;  %v4606_v12 = vrot.slane %v4590_v33, 9  ;;  %v4592_v13 = vld [vmem:[%s5760_s10 + $0x3c] sm:$0xe] }
 0x141   : > { %v4748_v34 = vcombine.low %v1871_v40, %v1881_v42  ;;  %v1952_v5 = vsel %vm5810_vm5, %v1950_v57, %v1951_v45  ;;  %v1955_v56 = vrot.slane %v5596_v48, 5  ;;  %v4904_v15 = vadd.f32 %v7143_v61, %v7130_v19  ;;  %v5599_v45 = vld [vmem:[%s5760_s10 + $0x40] sm:$0xf]  ;;  %v4593_v42 = vld [vmem:[%s5760_s10 + $0x48] sm:$0xe] }
 0x142   : > { %v4749_v43 = vcombine.low %v1949_v36, %v1952_v5  ;;  %v7200_v51 = vadd.f32 %v5013_v29, %v3343_v10  ;;  %v4907_v11 = vadd.f32 %v4906_v62, %v7147_v21  ;;  %v5016_v17 = vadd.f32 %v7132_v31, %v7116_v38  ;;  %v5597_v10 = vld [vmem:[%s5760_s10 + $0x34] sm:$0xf]  ;;  %v5598_v62 = vld [vmem:[%s5760_s10 + $0x38] sm:$0x1]  ;;  %v4914_v29 = vpop.f32.mrb[32].mxu0 }
 0x143   : > { %3900 = vmatprep.mubr.bf16.mxu1 %v4748_v34  ;;  %v1956_v33 = vsel %vm5810_vm5, %v4606_v12, %v1955_v56  ;;  %v1957_v4 = vrot.slane %v1955_v56, 4  ;;  %v3348_v25 = vadd.f32 %v4904_v15, %v6887_v37  ;;  %v4607_v19 = vrot.slane %v4591_v32, 9  ;;  %v5026_v31 = vpop.f32.mrb[32].mxu1  ;;  %v4915_v2 = vpop.f32.mrb[33].mxu0  ;;  %v5600_v56 = vld [vmem:[%s5760_s10 + $0x44] sm:$0x1] }
 0x144   : > { %3901 = vmatmul.mubr.bf16.gmra.mrb[124].mxu1 %v4732_v46  ;;  %5362 = vmatprep.mubr.bf16.mxu0 %v4749_v43  ;;  %v3351_v61 = vadd.f32 %v4907_v11, %v6887_v37  ;;  %v1962_v21 = vrot.slane %v5597_v10, 5  ;;  %v1965_v36 = vrot.slane %v5598_v62, 5  ;;  %v5019_v38 = vadd.f32 %v7149_v35, %v7145_v26  ;;  %v5027_v12 = vpop.f32.mrb[33].mxu1  ;;  %v4917_v11 = vpop.f32.mrb[34].mxu0 }
 0x145   : > { %v1959_v57 = vsel %vm5810_vm5, %v1957_v4, %v1958_v9  ;;  %v7218_v27 = vadd.f32 %v5016_v17, %v3348_v25  ;;  %v4608_v46 = vrot.slane %v4592_v13, 9  ;;  %v1969_v40 = vrot.slane %v5599_v45, 5  ;;  %v5029_v5 = vpop.f32.mrb[34].mxu1  ;;  %v5574_v13 = vld [vmem:[%s7619_s3 + $0x18] sm:$0xff]  }
 0x146   : > { %v4750_v32 = vcombine.low %v1956_v33, %v1959_v57  ;;  %v1963_v34 = vsel %vm5810_vm5, %v4607_v19, %v1962_v21  ;;  %v1964_v26 = vrot.slane %v1962_v21, 4  ;;  %v7224_v35 = vadd.f32 %v5019_v38, %v3351_v61  ;;  %v5030_v17 = vpop.f32.mrb[35].mxu1  ;;  %v4918_v61 = vpop.f32.mrb[35].mxu0  ;;  %v5601_v21 = vld [vmem:[%s5760_s10 + $0x4c] sm:$0xf]  ;;  %5400 = vmatprep.subr.bf16.mxu1 %v5574_v13 }
 0x147   : > { %v1970_v9 = vsel %vm5810_vm5, %v4608_v46, %v1969_v40  ;;  %v1971_v48 = vrot.slane %v1969_v40, 4  ;;  %v1972_v15 = vrot.slane %v5600_v56, 5  ;;  %v4910_v43 = vadd.f32 %v4909_v47, %v7174_v44  ;;  %v4594_v38 = vld [vmem:[%s5760_s10 + $0x54] sm:$0xe]  ;;  %5401 = vmatpush3.bf16.msra.mxu1 %v5574_v13  ;;  %v4595_v40 = vld [vmem:[%s5760_s10 + $0x60] sm:$0xe] }
 0x148   : > { %5363 = vmatmul.mubr.bf16.vlgmr.msra.gmra.mrb[128].mxu0 %v4750_v32  ;;  %v1966_v33 = vsel %vm5810_vm5, %v1964_v26, %v1965_v36  ;;  %v4913_v4 = vadd.f32 %v4912_v58, %v4911_v30  ;;  %v5022_v25 = vadd.f32 %v7176_v28, %v7167_v59  ;;  %v4609_v19 = vrot.slane %v4593_v42, 9  ;;  %v5602_v30 = vld [vmem:[%s5760_s10 + $0x50] sm:$0x1] }
 0x149   : > { %v4751_v10 = vcombine.low %v1963_v34, %v1966_v33  ;;  %v1973_v44 = vsel %vm5810_vm5, %v1971_v48, %v1972_v15  ;;  %v3356_v47 = vadd.f32 %v4910_v43, %v6887_v37  ;;  %v1976_v62 = vrot.slane %v5601_v21, 5  ;;  %v5603_v34 = vld [vmem:[%s5760_s10 + $0x58] sm:$0xf]  ;;  %v4920_v13 = vpop.f32.mrb[36].mxu0 }
 0x14a   : > { %v3359_v36 = vadd.f32 %v4913_v4, %v6887_v37  ;;  %v1979_v58 = vrot.slane %v5602_v30, 5  ;;  %v5025_v59 = vadd.f32 %v7186_v3, %v7179_v41  ;;  %v4752_v28 = vcombine.low %v1970_v9, %v1973_v44  ;;  %v5604_v3 = vld [vmem:[%s5760_s10 + $0x5c] sm:$0x1]  ;;  %v5607_v30 = vld [vmem:[%s5760_s10 + $0x70] sm:$0xf] }
 0x14b   : > { %5366 = vmatprep.mubr.bf16.mxu0 %v4751_v10  ;;  %v7246_v57 = vadd.f32 %v5022_v25, %v3356_v47  ;;  %v1977_v46 = vsel %vm5810_vm5, %v4609_v19, %v1976_v62  ;;  %v1978_v45 = vrot.slane %v1976_v62, 4  ;;  %v4610_v32 = vrot.slane %v4594_v38, 9  ;;  %v5032_v56 = vpop.f32.mrb[36].mxu1  ;;  %v5605_v47 = vld [vmem:[%s5760_s10 + $0x64] sm:$0xf] }
 0x14c   : > { %v7251_v42 = vadd.f32 %v5025_v59, %v3359_v36  ;;  %v1983_v26 = vrot.slane %v5603_v34, 5  ;;  %v4916_v48 = vadd.f32 %v4915_v2, %v4914_v29  ;;  %v1986_v9 = vrot.slane %v5604_v3, 5  ;;  %v5033_v33 = vpop.f32.mrb[37].mxu1  ;;  %v4921_v29 = vpop.f32.mrb[37].mxu0  ;;  %v5606_v62 = vld [vmem:[%s5760_s10 + $0x68] sm:$0x1] }
 0x14d   : > { %v1980_v41 = vsel %vm5810_vm5, %v1978_v45, %v1979_v58  ;;  %v4919_v15 = vadd.f32 %v4918_v61, %v4917_v11  ;;  %v5028_v43 = vadd.f32 %v5027_v12, %v5026_v31  ;;  %v4611_v10 = vrot.slane %v4595_v40, 9  ;;  %v5035_v2 = vpop.f32.mrb[38].mxu1  ;;  %v4596_v61 = vld [vmem:[%s5760_s10 + $0x6c] sm:$0xe]  ;;  %v4923_v31 = vpop.f32.mrb[38].mxu0 }
 0x14e   : > { %v4753_v4 = vcombine.low %v1977_v46, %v1980_v41  ;;  %v1985_v25 = vrot.slane %v1983_v26, 4  ;;  %v3364_v19 = vadd.f32 %v4916_v48, %v6887_v37  ;;  %v1990_v21 = vrot.slane %v5605_v47, 5  ;;  %v5036_v12 = vpop.f32.mrb[39].mxu1  ;;  %v4924_v59 = vpop.f32.mrb[39].mxu0 }
 0x14f   : > { %v3367_v44 = vadd.f32 %v4919_v15, %v6887_v37  ;;  %v1993_v38 = vrot.slane %v5606_v62, 5  ;;  %v5031_v11 = vadd.f32 %v5030_v17, %v5029_v5  ;;  %v1997_v58 = vrot.slane %v5607_v30, 5  ;;  %v4597_v17 = vld [vmem:[%s5760_s10 + $0x78] sm:$0xe] }
 0x150   : > { %5367 = vmatmul.mubr.bf16.gmra.mrb[132].mxu0 %v4752_v28  ;;  %v7262_v36 = vadd.f32 %v5028_v43, %v3364_v19  ;;  %v1984_v46 = vsel %vm5810_vm5, %v4610_v32, %v1983_v26  ;;  %v1987_v45 = vsel %vm5810_vm5, %v1985_v25, %v1986_v9  ;;  %v1992_v40 = vrot.slane %v1990_v21, 4  ;;  %v5608_v32 = vld [vmem:[%s5760_s10 + $0x74] sm:$0x1]  ;;  %v5609_v19 = vld [vmem:[%s5760_s10 + $0x7c] sm:$0xf] }
 0x151   : > { %5370 = vmatprep.mubr.bf16.mxu0 %v4753_v4  ;;  %v7269_v5 = vadd.f32 %v5031_v11, %v3367_v44  ;;  %v1991_v28 = vsel %vm5810_vm5, %v4611_v10, %v1990_v21  ;;  %v4612_v34 = vrot.slane %v4596_v61, 9  ;;  %v1999_v48 = vrot.slane %v1997_v58, 4  ;;  %v4926_v11 = vpop.f32.mrb[40].mxu0 }
 0x152   : > { %v4922_v41 = vadd.f32 %v4921_v29, %v4920_v13  ;;  %v1994_v3 = vsel %vm5810_vm5, %v1992_v40, %v1993_v38  ;;  %v2000_v26 = vrot.slane %v5608_v32, 5  ;;  %v4925_v15 = vadd.f32 %v4924_v59, %v4923_v31  ;;  %v5610_v29 = vld [vmem:[%s5760_s10 + $0x80] sm:$0x1]  ;;  %v4598_v38 = vld [vmem:[%s5760_s10 + $0x84] sm:$0xe]  ;;  %v4927_v30 = vpop.f32.mrb[41].mxu0 }
 0x153   : > { %v5034_v9 = vadd.f32 %v5033_v33, %v5032_v56  ;;  %v4754_v43 = vcombine.low %v1984_v46, %v1987_v45  ;;  %v4613_v25 = vrot.slane %v4597_v17, 9  ;;  %v2004_v44 = vrot.slane %v5609_v19, 5  ;;  %v5038_v10 = vpop.f32.mrb[40].mxu1  ;;  %v4599_v46 = vld [vmem:[%s5760_s10 + $0x90] sm:$0xe] }
 0x154   : > { %v3372_v4 = vadd.f32 %v4922_v41, %v6887_v37  ;;  %v4755_v47 = vcombine.low %v1991_v28, %v1994_v3  ;;  %v3375_v13 = vadd.f32 %v4925_v15, %v6887_v37  ;;  %v2007_v21 = vrot.slane %v5610_v29, 5  ;;  %v5039_v61 = vpop.f32.mrb[41].mxu1  ;;  %v4929_v28 = vpop.f32.mrb[42].mxu0  ;;  %v5612_v15 = vld [vmem:[%s5760_s10 + $0x94] sm:$0xf] }
 0x155   : > { %v5037_v62 = vadd.f32 %v5036_v12, %v5035_v2  ;;  %v1998_v56 = vsel %vm5810_vm5, %v4612_v34, %v1997_v58  ;;  %v2006_v31 = vrot.slane %v2004_v44, 4  ;;  %v5041_v59 = vpop.f32.mrb[42].mxu1  ;;  %v2001_v45 = vsel %vm5810_vm5, %v1999_v48, %v2000_v26  ;;  %v5611_v2 = vld [vmem:[%s5760_s10 + $0x88] sm:$0xf]  ;;  %v4930_v3 = vpop.f32.mrb[43].mxu0 }
 0x156   : > { %v7284_v33 = vadd.f32 %v5034_v9, %v3372_v4  ;;  %v2011_v12 = vrot.slane %v5611_v2, 5  ;;  %v4928_v17 = vadd.f32 %v4927_v30, %v4926_v11  ;;  %v5042_v41 = vpop.f32.mrb[43].mxu1  ;;  %v2005_v58 = vsel %vm5810_vm5, %v4613_v25, %v2004_v44  ;;  %v5613_v26 = vld [vmem:[%s5760_s10 + $0x8c] sm:$0x1] }
 0x157   : > { %v7289_v40 = vadd.f32 %v5037_v62, %v3375_v13  ;;  %v4614_v34 = vrot.slane %v4598_v38, 9  ;;  %v5040_v32 = vadd.f32 %v5039_v61, %v5038_v10  ;;  %v2018_v9 = vrot.slane %v5612_v15, 5  ;;  %v5614_v10 = vld [vmem:[%s5760_s10 + $0x98] sm:$0x1]  ;;  %v7312_v61 = vld [vmem:[%s5760_s10 + $0x9c] sm:$0xe] }
 0x158   : > { %5371 = vmatmul.mubr.bf16.gmra.mrb[136].mxu0 %v4754_v43  ;;  %v2008_v48 = vsel %vm5810_vm5, %v2006_v31, %v2007_v21  ;;  %v2014_v4 = vrot.slane %v5613_v26, 5  ;;  %v3380_v19 = vadd.f32 %v4928_v17, %v6887_v37  ;;  %v4615_v13 = vrot.slane %v4599_v46, 9  ;;  %v5575_v43 = vld [vmem:[%s7619_s3 + $0x20] sm:$0xff]  }
 0x159   : > { %5374 = vmatprep.mubr.bf16.mxu0 %v4755_v47  ;;  %v2013_v25 = vrot.slane %v2011_v12, 4  ;;  %v4931_v44 = vadd.f32 %v4930_v3, %v4929_v28  ;;  %v2020_v29 = vrot.slane %v2018_v9, 4  ;;  %v2021_v62 = vrot.slane %v5614_v10, 5  ;;  %5402 = vmatprep.subr.bf16.mxu1 %v5575_v43  ;;  %v7308_v37 = vld [vmem:[%s7618_s2] ss:$0 sm:$0xff]  ;;  %v4932_v2 = vpop.f32.mrb[44].mxu0 }
 0x15a   : > { %v7303_v47 = vadd.f32 %v5040_v32, %v3380_v19  ;;  %v5043_v38 = vadd.f32 %v5042_v41, %v5041_v59  ;;  %v4756_v21 = vcombine.low %v1998_v56, %v2001_v45  ;;  %5403 = vmatpush3.bf16.msra.mxu1 %v5575_v43  ;;  %v4757_v30 = vcombine.low %v2005_v58, %v2008_v48  ;;  %v4602_v45 = vld [vmem:[%s5760_s10 + $0xb4] sm:$0xe]  ;;  %v4933_v3 = vpop.f32.mrb[45].mxu0  ;;  %v4603_v43 = vld [vmem:[%s5760_s10 + $0xc0] sm:$0xe] }
 0x15b   : > { %v3383_v11 = vadd.f32 %v7308_v37, %v4931_v44  ;;  %v5044_v31 = vpop.f32.mrb[44].mxu1  ;;  %v2012_v46 = vsel %vm5810_vm5, %v4614_v34, %v2011_v12  ;;  %v2019_v59 = vsel %vm5810_vm5, %v4615_v13, %v2018_v9  ;;  %v2015_v17 = vsel %vm5810_vm5, %v2013_v25, %v2014_v4  ;;  %v4935_v15 = vpop.f32.mrb[46].mxu0 }
 0x15c   : > { %v5045_v56 = vpop.f32.mrb[45].mxu1  ;;  %v2022_v28 = vsel %vm5810_vm5, %v2020_v29, %v2021_v62  ;;  %v4616_v12 = vrot.slane %v7312_v61, 9  ;;  %v4934_v34 = vadd.f32 %v4933_v3, %v4932_v2  ;;  %v2025_v48 = vrot.slane %v6908_v16, 5  ;;  %v4936_v26 = vpop.f32.mrb[47].mxu0  ;;  %v4601_v61 = vld [vmem:[%s5760_s10 + $0xa8] sm:$0xe] }
 0x15d   : > { %v7323_v41 = vadd.f32 %v5043_v38, %v3383_v11  ;;  %v5046_v58 = vadd.f32 %v5045_v56, %v5044_v31  ;;  %v5047_v32 = vpop.f32.mrb[46].mxu1  ;;  %v4618_v19 = vrot.slane %v4602_v45, 9  ;;  %v2039_v13 = vrot.slane %v6995_v6, 5 }
 0x15e   : > { %v5048_v9 = vpop.f32.mrb[47].mxu1  ;;  %v4758_v25 = vcombine.low %v2012_v46, %v2015_v17  ;;  %v4759_v44 = vcombine.low %v2019_v59, %v2022_v28  ;;  %v3388_v29 = vadd.f32 %v7308_v37, %v4934_v34  ;;  %v4937_v10 = vadd.f32 %v4936_v26, %v4935_v15  ;;  %v5616_v59 = vld [vmem:[%s5760_s10 + $0xa4] sm:$0x1] }
 0x15f   : > { %v5049_v4 = vadd.f32 %v5048_v9, %v5047_v32  ;;  %v2032_v62 = vrot.slane %v6947_v39, 5  ;;  %v7333_v38 = vsel %vm5810_vm5, %v4618_v19, %v2039_v13  ;;  %v2041_v16 = vrot.slane %v2039_v13, 4 }
 0x160   : > { %5375 = vmatmul.mubr.bf16.gmra.mrb[140].mxu0 %v4756_v21  ;;  %v2042_v21 = vrot.slane %v7006_v52, 5  ;;  %v3391_v11 = vadd.f32 %v7308_v37, %v4937_v10  ;;  %v7337_v6 = vadd.f32 %v5046_v58, %v3388_v29  ;;  %v4619_v31 = vrot.slane %v4603_v43, 9 }
 0x161   : > { %5378 = vmatprep.mubr.bf16.mxu0 %v4757_v30  ;;  %v2046_v30 = vrot.slane %v7059_v54, 5  ;;  %v2027_v46 = vrot.slane %v2025_v48, 4  ;;  %v2028_v2 = vrot.slane %v5616_v59, 5  ;;  %v2049_v45 = vrot.slane %v7062_v49, 5 }
 0x162   : > { %v7344_v39 = vsel %vm5810_vm5, %v2041_v16, %v2042_v21  ;;  %v7347_v17 = vadd.f32 %v5049_v4, %v3391_v11  ;;  %v4617_v32 = vrot.slane %v4601_v61, 9  ;;  %v2034_v34 = vrot.slane %v2032_v62, 4 }
 0x163   : > { %v5050_v56 = vpop.f32.mrb[48].mxu1  ;;  %v4762_v52 = vcombine.low %v7333_v38, %v7344_v39  ;;  %v4938_v28 = vpop.f32.mrb[48].mxu0  ;;  %v7353_v54 = vsel %vm5810_vm5, %v4619_v31, %v2046_v30  ;;  %v2048_v58 = vrot.slane %v2046_v30, 4  ;;  %v2035_v15 = vrot.slane %v6959_v50, 5 }
 0x164   : > { %v5051_v3 = vpop.f32.mrb[49].mxu1  ;;  %v4939_v9 = vpop.f32.mrb[49].mxu0  ;;  %v2026_v21 = vsel %vm5810_vm5, %v4616_v12, %v2025_v48  ;;  %v2029_v50 = vsel %vm5810_vm5, %v2027_v46, %v2028_v2  ;;  %v2033_v31 = vsel %vm5810_vm5, %v4617_v32, %v2032_v62  ;;  %v5576_v2 = vld [vmem:[%s7619_s3 + $0x28] sm:$0xff]  }
 0x165   : > { %v5052_v26 = vadd.f32 %v5051_v3, %v5050_v56  ;;  %v5053_v19 = vpop.f32.mrb[50].mxu1  ;;  %v4940_v49 = vadd.f32 %v4939_v9, %v4938_v28  ;;  %v4941_v4 = vpop.f32.mrb[50].mxu0  ;;  %v2050_v13 = vsel %vm5810_vm5, %v2048_v58, %v2049_v45  ;;  %5404 = vmatprep.subr.bf16.mxu1 %v5576_v2  ;;  %v2053_v9 = vrot.slane %v7128_v24, 5 }
 0x166   : > { %v5054_v43 = vpop.f32.mrb[51].mxu1  ;;  %v4942_v29 = vpop.f32.mrb[51].mxu0  ;;  %v4763_v10 = vcombine.low %v7353_v54, %v2050_v13  ;;  %5405 = vmatpush3.bf16.msra.mxu1 %v5576_v2 }
 0x167   : > { %v5055_v16 = vadd.f32 %v5054_v43, %v5053_v19  ;;  %v3396_v11 = vadd.f32 %v7308_v37, %v4940_v49  ;;  %v4943_v61 = vadd.f32 %v4942_v29, %v4941_v4  ;;  %v4604_v49 = vld [vmem:[%s5760_s10 + $0xcc] sm:$0xe] }
 0x168   : > { %5379 = vmatmul.mubr.bf16.gmra.mrb[144].mxu0 %v4758_v25  ;;  %v2036_v25 = vsel %vm5810_vm5, %v2034_v34, %v2035_v15  ;;  %v4620_v29 = vrot.slane %v4604_v49, 9 }
 0x169   : > { %5382 = vmatprep.mubr.bf16.mxu0 %v4759_v44  ;;  %v3399_v30 = vadd.f32 %v7308_v37, %v4943_v61  ;;  %v7369_v59 = vadd.f32 %v5052_v26, %v3396_v11  ;;  %v4760_v44 = vcombine.low %v2026_v21, %v2029_v50  ;;  %v4761_v45 = vcombine.low %v2033_v31, %v2036_v25 }
 0x16a   : > { %v2056_v21 = vrot.slane %v7141_v23, 5  ;;  %v2054_v23 = vsel %vm5810_vm5, %v4620_v29, %v2053_v9 }
 0x16b   : > { %v5056_v56 = vpop.f32.mrb[52].mxu1  ;;  %v7371_v12 = vadd.f32 %v5055_v16, %v3399_v30  ;;  %v4944_v48 = vpop.f32.mrb[52].mxu0  ;;  %v2055_v16 = vrot.slane %v2053_v9, 4 }
 0x16c   : > { %v5057_v46 = vpop.f32.mrb[53].mxu1  ;;  %v4945_v62 = vpop.f32.mrb[53].mxu0 }
 0x16d   : > { %v5058_v28 = vadd.f32 %v5057_v46, %v5056_v56  ;;  %v5059_v3 = vpop.f32.mrb[54].mxu1  ;;  %v4946_v54 = vadd.f32 %v4945_v62, %v4944_v48  ;;  %v4947_v58 = vpop.f32.mrb[54].mxu0  ;;  %v2057_v46 = vsel %vm5810_vm5, %v2055_v16, %v2056_v21  ;;  %v5577_v16 = vld [vmem:[%s7619_s3 + $0x30] sm:$0xff]  }
 0x16e   : > { %v5060_v32 = vpop.f32.mrb[55].mxu1  ;;  %v4948_v34 = vpop.f32.mrb[55].mxu0  ;;  %5406 = vmatprep.subr.bf16.mxu1 %v5577_v16 }
 0x16f   : > { %v5061_v15 = vadd.f32 %v5060_v32, %v5059_v3  ;;  %v3404_v26 = vadd.f32 %v7308_v37, %v4946_v54  ;;  %v4949_v19 = vadd.f32 %v4948_v34, %v4947_v58  ;;  %v4764_v54 = vcombine.low %v2054_v23, %v2057_v46  ;;  %5407 = vmatpush3.bf16.msra.mxu1 %v5577_v16 }
 0x170   : > { %5383 = vmatmul.mubr.bf16.gmra.mrb[148].mxu0 %v4760_v44 }
 0x171   : > { %5386 = vmatprep.mubr.bf16.mxu0 %v4761_v45  ;;  %v3407_v4 = vadd.f32 %v7308_v37, %v4949_v19  ;;  %v7380_v13 = vadd.f32 %v5058_v28, %v3404_v26 }
 0x173   : > { %v5062_v43 = vpop.f32.mrb[56].mxu1  ;;  %v7383_v50 = vadd.f32 %v5061_v15, %v3407_v4  ;;  %v4950_v11 = vpop.f32.mrb[56].mxu0 }
 0x174   : > { %v5063_v61 = vpop.f32.mrb[57].mxu1  ;;  %v4951_v31 = vpop.f32.mrb[57].mxu0 }
 0x175   : > { %v5064_v25 = vadd.f32 %v5063_v61, %v5062_v43  ;;  %v5065_v24 = vpop.f32.mrb[58].mxu1  ;;  %v4952_v30 = vadd.f32 %v4951_v31, %v4950_v11  ;;  %v4953_v44 = vpop.f32.mrb[58].mxu0 }
 0x176   : > { %v5066_v56 = vpop.f32.mrb[59].mxu1  ;;  %v4954_v45 = vpop.f32.mrb[59].mxu0 }
 0x177   : > { %v5067_v48 = vadd.f32 %v5066_v56, %v5065_v24  ;;  %v3412_v2 = vadd.f32 %v7308_v37, %v4952_v30  ;;  %v4955_v62 = vadd.f32 %v4954_v45, %v4953_v44 }
 0x178   : > { %5387 = vmatmul.mubr.bf16.gmra.mrb[152].mxu0 %v4762_v52 }
 0x179   : > { %5390 = vmatprep.mubr.bf16.mxu0 %v4763_v10  ;;  %v3415_v28 = vadd.f32 %v7308_v37, %v4955_v62  ;;  %v7394_v3 = vadd.f32 %v5064_v25, %v3412_v2 }
 0x17b   : > { %v5068_v58 = vpop.f32.mrb[60].mxu1  ;;  %v7396_v38 = vadd.f32 %v5067_v48, %v3415_v28  ;;  %v4956_v39 = vpop.f32.mrb[60].mxu0 }
 0x17c   : > { %v5069_v52 = vpop.f32.mrb[61].mxu1  ;;  %v4957_v10 = vpop.f32.mrb[61].mxu0 }
 0x17d   : > { %v5070_v32 = vadd.f32 %v5069_v52, %v5068_v58  ;;  %v5071_v34 = vpop.f32.mrb[62].mxu1  ;;  %v4958_v15 = vadd.f32 %v4957_v10, %v4956_v39  ;;  %v4959_v9 = vpop.f32.mrb[62].mxu0 }
 0x17e   : > { %v5072_v1 = vpop.f32.mrb[63].mxu1  ;;  %v4960_v26 = vpop.f32.mrb[63].mxu0 }
 0x17f   : > { %v5073_v19 = vadd.f32 %v5072_v1, %v5071_v34  ;;  %v3420_v49 = vadd.f32 %v7308_v37, %v4958_v15  ;;  %v4961_v4 = vadd.f32 %v4960_v26, %v4959_v9 }
 0x180   : > { %5391 = vmatmul.mubr.bf16.gmra.mrb[156].mxu0 %v4764_v54 }
 0x181   : > { %v3423_v43 = vadd.f32 %v7308_v37, %v4961_v4  ;;  %v7400_v29 = vadd.f32 %v5070_v32, %v3420_v49 }
 0x183   : > { %v5202_v21 = vpop.f32.mrb[64].mxu1  ;;  %v7405_v11 = vadd.f32 %v5073_v19, %v3423_v43  ;;  %v5090_v61 = vpop.f32.mrb[64].mxu0 }
 0x184   : > { %v5203_v31 = vpop.f32.mrb[65].mxu1  ;;  %v5091_v25 = vpop.f32.mrb[65].mxu0 }
 0x185   : > { %v5204_v24 = vadd.f32 %v5203_v31, %v5202_v21  ;;  %v5205_v30 = vpop.f32.mrb[66].mxu1  ;;  %v5092_v44 = vadd.f32 %v5091_v25, %v5090_v61  ;;  %v5093_v56 = vpop.f32.mrb[66].mxu0 }
 0x186   : > { %v5206_v45 = vpop.f32.mrb[67].mxu1  ;;  %v5094_v37 = vpop.f32.mrb[67].mxu0 }
 0x187   : > { %v5207_v48 = vadd.f32 %v5206_v45, %v5205_v30  ;;  %v3622_v23 = vadd.f32 %v5092_v44, %v6905_v22  ;;  %v5095_v46 = vadd.f32 %v5094_v37, %v5093_v56 }
 0x189   : > { %v3625_v2 = vadd.f32 %v5095_v46, %v6916_v63  ;;  %v7409_v62 = vadd.f32 %v5204_v24, %v3622_v23 }
 0x18b   : > { %v5208_v28 = vpop.f32.mrb[68].mxu1  ;;  %v5096_v54 = vpop.f32.mrb[68].mxu0  ;;  %v7411_v39 = vadd.f32 %v5207_v48, %v3625_v2 }
 0x18c   : > { %v5209_v58 = vpop.f32.mrb[69].mxu1  ;;  %v5097_v52 = vpop.f32.mrb[69].mxu0 }
 0x18d   : > { %v5210_v10 = vadd.f32 %v5209_v58, %v5208_v28  ;;  %v5211_v32 = vpop.f32.mrb[70].mxu1  ;;  %v5098_v34 = vadd.f32 %v5097_v52, %v5096_v54  ;;  %v5099_v15 = vpop.f32.mrb[70].mxu0 }
 0x18e   : > { %v5212_v9 = vpop.f32.mrb[71].mxu1  ;;  %v5100_v1 = vpop.f32.mrb[71].mxu0 }
 0x18f   : > { %v5213_v26 = vadd.f32 %v5212_v9, %v5211_v32  ;;  %v3630_v22 = vadd.f32 %v5098_v34, %v6941_v55  ;;  %v5101_v19 = vadd.f32 %v5100_v1, %v5099_v15 }
 0x191   : > { %v3633_v63 = vadd.f32 %v5101_v19, %v6961_v20  ;;  %v7415_v49 = vadd.f32 %v5210_v10, %v3630_v22  ;;  %v5578_v20 = vld [vmem:[%s7619_s3 + $0x38] sm:$0xff]  }
 0x192   : > { %5408 = vmatprep.subr.bf16.mxu1 %v5578_v20 }
 0x193   : > { %v5102_v4 = vpop.f32.mrb[72].mxu0  ;;  %v7417_v43 = vadd.f32 %v5213_v26, %v3633_v63  ;;  %v5214_v21 = vpop.f32.mrb[72].mxu1  ;;  %5409 = vmatpush3.bf16.msra.mxu1 %v5578_v20 }
 0x194   : > { %v5103_v16 = vpop.f32.mrb[73].mxu0  ;;  %v5215_v25 = vpop.f32.mrb[73].mxu1 }
 0x195   : > { %v5104_v61 = vadd.f32 %v5103_v16, %v5102_v4  ;;  %v5105_v31 = vpop.f32.mrb[74].mxu0  ;;  %v5216_v30 = vadd.f32 %v5215_v25, %v5214_v21  ;;  %v5217_v44 = vpop.f32.mrb[74].mxu1 }
 0x196   : > { %v5106_v24 = vpop.f32.mrb[75].mxu0  ;;  %v5218_v55 = vpop.f32.mrb[75].mxu1 }
 0x197   : > { %v3638_v56 = vadd.f32 %v5104_v61, %v6987_v7  ;;  %v5107_v45 = vadd.f32 %v5106_v24, %v5105_v31  ;;  %v5219_v37 = vadd.f32 %v5218_v55, %v5217_v44 }
 0x199   : > { %v3641_v48 = vadd.f32 %v5107_v45, %v7008_v0  ;;  %v7424_v23 = vadd.f32 %v5216_v30, %v3638_v56 }
 0x19b   : > { %v5108_v46 = vpop.f32.mrb[76].mxu0  ;;  %v7426_v2 = vadd.f32 %v5219_v37, %v3641_v48 }
 0x19c   : > { %v5109_v28 = vpop.f32.mrb[77].mxu0 }
 0x19d   : > { %v5110_v54 = vadd.f32 %v5109_v28, %v5108_v46  ;;  %v5111_v58 = vpop.f32.mrb[78].mxu0  ;;  %v5220_v7 = vpop.f32.mrb[76].mxu1 }
 0x19e   : > { %v5112_v52 = vpop.f32.mrb[79].mxu0  ;;  %v5221_v34 = vpop.f32.mrb[77].mxu1 }
 0x19f   : > { %v3646_v10 = vadd.f32 %v5110_v54, %v7044_v18  ;;  %v5113_v32 = vadd.f32 %v5112_v52, %v5111_v58  ;;  %v5222_v15 = vadd.f32 %v5221_v34, %v5220_v7  ;;  %v5223_v9 = vpop.f32.mrb[78].mxu1 }
 0x1a0   : > { %v5224_v1 = vpop.f32.mrb[79].mxu1 }
 0x1a1   : > { %v3649_v0 = vadd.f32 %v5113_v32, %v7066_v60  ;;  %v5225_v26 = vadd.f32 %v5224_v1, %v5223_v9  ;;  %v7430_v22 = vadd.f32 %v5222_v15, %v3646_v10 }
 0x1a3   : > { %v5114_v19 = vpop.f32.mrb[80].mxu0  ;;  %v7432_v4 = vadd.f32 %v5225_v26, %v3649_v0 }
 0x1a4   : > { %v5115_v63 = vpop.f32.mrb[81].mxu0 }
 0x1a5   : > { %v5116_v16 = vadd.f32 %v5115_v63, %v5114_v19  ;;  %v5117_v21 = vpop.f32.mrb[82].mxu0  ;;  %v5226_v61 = vpop.f32.mrb[80].mxu1 }
 0x1a6   : > { %v5118_v31 = vpop.f32.mrb[83].mxu0  ;;  %v5227_v24 = vpop.f32.mrb[81].mxu1 }
 0x1a7   : > { %v3654_v18 = vadd.f32 %v5116_v16, %v7107_v53  ;;  %v5119_v25 = vadd.f32 %v5118_v31, %v5117_v21  ;;  %v5228_v30 = vadd.f32 %v5227_v24, %v5226_v61  ;;  %v5229_v44 = vpop.f32.mrb[82].mxu1 }
 0x1a8   : > { %v5230_v56 = vpop.f32.mrb[83].mxu1 }
 0x1a9   : > { %v3657_v60 = vadd.f32 %v5119_v25, %v7136_v14  ;;  %v5231_v45 = vadd.f32 %v5230_v56, %v5229_v44  ;;  %v7436_v55 = vadd.f32 %v5228_v30, %v3654_v18 }
 0x1ab   : > { %v5120_v20 = vpop.f32.mrb[84].mxu0  ;;  %v7438_v48 = vadd.f32 %v5231_v45, %v3657_v60 }
 0x1ac   : > { %v5121_v37 = vpop.f32.mrb[85].mxu0 }
 0x1ad   : > { %v5122_v46 = vadd.f32 %v5121_v37, %v5120_v20  ;;  %v5123_v28 = vpop.f32.mrb[86].mxu0 }
 0x1ae   : > { %v5124_v54 = vpop.f32.mrb[87].mxu0 }
 0x1af   : > { %v3662_v58 = vadd.f32 %v5122_v46, %v7181_v8  ;;  %v5125_v53 = vadd.f32 %v5124_v54, %v5123_v28  ;;  %v5232_v7 = vpop.f32.mrb[84].mxu1 }
 0x1b0   : > { %v5233_v10 = vpop.f32.mrb[85].mxu1 }
 0x1b1   : > { %v3665_v52 = vadd.f32 %v5125_v53, %v7200_v51  ;;  %v5234_v32 = vadd.f32 %v5233_v10, %v5232_v7  ;;  %v5235_v14 = vpop.f32.mrb[86].mxu1 }
 0x1b2   : > { %v5236_v34 = vpop.f32.mrb[87].mxu1 }
 0x1b3   : > { %v5126_v15 = vpop.f32.mrb[88].mxu0  ;;  %v5237_v9 = vadd.f32 %v5236_v34, %v5235_v14  ;;  %v7442_v1 = vadd.f32 %v5234_v32, %v3662_v58 }
 0x1b4   : > { %v5127_v0 = vpop.f32.mrb[89].mxu0 }
 0x1b5   : > { %v5128_v26 = vadd.f32 %v5127_v0, %v5126_v15  ;;  %v5129_v19 = vpop.f32.mrb[90].mxu0  ;;  %v7444_v16 = vadd.f32 %v5237_v9, %v3665_v52 }
 0x1b6   : > { %v5130_v63 = vpop.f32.mrb[91].mxu0 }
 0x1b7   : > { %v3670_v8 = vadd.f32 %v5128_v26, %v7218_v27  ;;  %v5131_v21 = vadd.f32 %v5130_v63, %v5129_v19 }
 0x1b9   : > { %v5238_v61 = vpop.f32.mrb[88].mxu1  ;;  %v3673_v51 = vadd.f32 %v5131_v21, %v7224_v35 }
 0x1ba   : > { %v5239_v31 = vpop.f32.mrb[89].mxu1 }
 0x1bb   : > { %v5240_v18 = vadd.f32 %v5239_v31, %v5238_v61  ;;  %v5241_v25 = vpop.f32.mrb[90].mxu1 }
 0x1bc   : > { %v5242_v24 = vpop.f32.mrb[91].mxu1 }
 0x1bd   : > { %v5243_v30 = vadd.f32 %v5242_v24, %v5241_v25  ;;  %v5132_v44 = vpop.f32.mrb[92].mxu0  ;;  %v7448_v60 = vadd.f32 %v5240_v18, %v3670_v8 }
 0x1be   : > { %v5133_v56 = vpop.f32.mrb[93].mxu0 }
 0x1bf   : > { %v5134_v45 = vadd.f32 %v5133_v56, %v5132_v44  ;;  %v5135_v20 = vpop.f32.mrb[94].mxu0  ;;  %v7450_v37 = vadd.f32 %v5243_v30, %v3673_v51 }
 0x1c0   : > { %v5136_v46 = vpop.f32.mrb[95].mxu0 }
 0x1c1   : > { %v3678_v27 = vadd.f32 %v5134_v45, %v7246_v57  ;;  %v5137_v28 = vadd.f32 %v5136_v46, %v5135_v20 }
 0x1c3   : > { %v5244_v54 = vpop.f32.mrb[92].mxu1  ;;  %v3681_v35 = vadd.f32 %v5137_v28, %v7251_v42 }
 0x1c4   : > { %v5245_v58 = vpop.f32.mrb[93].mxu1 }
 0x1c5   : > { %v5246_v53 = vadd.f32 %v5245_v58, %v5244_v54  ;;  %v5247_v7 = vpop.f32.mrb[94].mxu1 }
 0x1c6   : > { %v5248_v52 = vpop.f32.mrb[95].mxu1 }
 0x1c7   : > { %v5138_v10 = vpop.f32.mrb[96].mxu0  ;;  %v5249_v32 = vadd.f32 %v5248_v52, %v5247_v7  ;;  %v7454_v34 = vadd.f32 %v5246_v53, %v3678_v27 }
 0x1c8   : > { %v5139_v14 = vpop.f32.mrb[97].mxu0 }
 0x1c9   : > { %v5140_v15 = vadd.f32 %v5139_v14, %v5138_v10  ;;  %v5141_v9 = vpop.f32.mrb[98].mxu0  ;;  %v7456_v26 = vadd.f32 %v5249_v32, %v3681_v35 }
 0x1ca   : > { %v5142_v0 = vpop.f32.mrb[99].mxu0 }
 0x1cb   : > { %v3686_v57 = vadd.f32 %v5140_v15, %v7262_v36  ;;  %v5143_v19 = vadd.f32 %v5142_v0, %v5141_v9  ;;  %v5250_v63 = vpop.f32.mrb[96].mxu1 }
 0x1cc   : > { %v5251_v8 = vpop.f32.mrb[97].mxu1 }
 0x1cd   : > { %v3689_v42 = vadd.f32 %v5143_v19, %v7269_v5  ;;  %v5252_v21 = vadd.f32 %v5251_v8, %v5250_v63  ;;  %v5253_v61 = vpop.f32.mrb[98].mxu1 }
 0x1ce   : > { %v5254_v51 = vpop.f32.mrb[99].mxu1 }
 0x1cf   : > { %v5255_v18 = vadd.f32 %v5254_v51, %v5253_v61  ;;  %v7460_v24 = vadd.f32 %v5252_v21, %v3686_v57 }
 0x1d1   : > { %v5144_v31 = vpop.f32.mrb[100].mxu0  ;;  %v7462_v45 = vadd.f32 %v5255_v18, %v3689_v42 }
 0x1d2   : > { %v5145_v25 = vpop.f32.mrb[101].mxu0 }
 0x1d3   : > { %v5146_v30 = vadd.f32 %v5145_v25, %v5144_v31  ;;  %v5147_v44 = vpop.f32.mrb[102].mxu0 }
 0x1d4   : > { %v5148_v56 = vpop.f32.mrb[103].mxu0 }
 0x1d5   : > { %v3694_v36 = vadd.f32 %v5146_v30, %v7284_v33  ;;  %v5149_v20 = vadd.f32 %v5148_v56, %v5147_v44  ;;  %v5256_v5 = vpop.f32.mrb[100].mxu1 }
 0x1d6   : > { %v5257_v27 = vpop.f32.mrb[101].mxu1 }
 0x1d7   : > { %v3697_v46 = vadd.f32 %v5149_v20, %v7289_v40  ;;  %v5258_v28 = vadd.f32 %v5257_v27, %v5256_v5  ;;  %v5259_v54 = vpop.f32.mrb[102].mxu1 }
 0x1d8   : > { %v5260_v35 = vpop.f32.mrb[103].mxu1 }
 0x1d9   : > { %v5150_v58 = vpop.f32.mrb[104].mxu0  ;;  %v5261_v53 = vadd.f32 %v5260_v35, %v5259_v54  ;;  %v7466_v52 = vadd.f32 %v5258_v28, %v3694_v36 }
 0x1da   : > { %v5151_v7 = vpop.f32.mrb[105].mxu0 }
 0x1db   : > { %v5152_v10 = vadd.f32 %v5151_v7, %v5150_v58  ;;  %v5153_v32 = vpop.f32.mrb[106].mxu0  ;;  %v7468_v15 = vadd.f32 %v5261_v53, %v3697_v46 }
 0x1dc   : > { %v5154_v14 = vpop.f32.mrb[107].mxu0 }
 0x1dd   : > { %v3702_v33 = vadd.f32 %v5152_v10, %v7303_v47  ;;  %v5155_v9 = vadd.f32 %v5154_v14, %v5153_v32 }
 0x1df   : > { %v5262_v0 = vpop.f32.mrb[104].mxu1  ;;  %v3705_v40 = vadd.f32 %v5155_v9, %v7323_v41 }
 0x1e0   : > { %v5263_v57 = vpop.f32.mrb[105].mxu1 }
 0x1e1   : > { %v5264_v19 = vadd.f32 %v5263_v57, %v5262_v0  ;;  %v5265_v63 = vpop.f32.mrb[106].mxu1 }
 0x1e2   : > { %v5266_v42 = vpop.f32.mrb[107].mxu1 }
 0x1e3   : > { %v5267_v8 = vadd.f32 %v5266_v42, %v5265_v63  ;;  %v7472_v21 = vadd.f32 %v5264_v19, %v3702_v33 }
 0x1e5   : > { %v7474_v51 = vadd.f32 %v5267_v8, %v3705_v40 }
 0x1e6   : > { %v5156_v61 = vpop.f32.mrb[108].mxu0 }
 0x1e7   : > { %v5157_v31 = vpop.f32.mrb[109].mxu0 }
 0x1e8   : > { %v5158_v18 = vadd.f32 %v5157_v31, %v5156_v61  ;;  %v5159_v25 = vpop.f32.mrb[110].mxu0 }
 0x1e9   : > { %v5160_v30 = vpop.f32.mrb[111].mxu0 }
 0x1ea   : > { %v3710_v47 = vadd.f32 %v5158_v18, %v7337_v6  ;;  %v5161_v44 = vadd.f32 %v5160_v30, %v5159_v25  ;;  %v5268_v56 = vpop.f32.mrb[108].mxu1 }
 0x1eb   : > { %v5269_v36 = vpop.f32.mrb[109].mxu1 }
 0x1ec   : > { %v3713_v41 = vadd.f32 %v5161_v44, %v7347_v17  ;;  %v5270_v20 = vadd.f32 %v5269_v36, %v5268_v56  ;;  %v5271_v46 = vpop.f32.mrb[110].mxu1 }
 0x1ed   : > { %v5272_v5 = vpop.f32.mrb[111].mxu1 }
 0x1ee   : > { %v5273_v27 = vadd.f32 %v5272_v5, %v5271_v46  ;;  %v7478_v28 = vadd.f32 %v5270_v20, %v3710_v47 }
 0x1f0   : > { %v7480_v35 = vadd.f32 %v5273_v27, %v3713_v41 }
 0x1f1   : > { %v5162_v54 = vpop.f32.mrb[112].mxu0 }
 0x1f2   : > { %v5163_v58 = vpop.f32.mrb[113].mxu0 }
 0x1f3   : > { %v5164_v53 = vadd.f32 %v5163_v58, %v5162_v54  ;;  %v5165_v7 = vpop.f32.mrb[114].mxu0 }
 0x1f4   : > { %v5166_v10 = vpop.f32.mrb[115].mxu0 }
 0x1f5   : > { %v3718_v6 = vadd.f32 %v5164_v53, %v7369_v59  ;;  %v5167_v32 = vadd.f32 %v5166_v10, %v5165_v7  ;;  %v5274_v14 = vpop.f32.mrb[112].mxu1 }
 0x1f6   : > { %v5275_v33 = vpop.f32.mrb[113].mxu1 }
 0x1f7   : > { %v3721_v17 = vadd.f32 %v5167_v32, %v7371_v12  ;;  %v5276_v9 = vadd.f32 %v5275_v33, %v5274_v14  ;;  %v5277_v0 = vpop.f32.mrb[114].mxu1 }
 0x1f8   : > { %v5278_v40 = vpop.f32.mrb[115].mxu1 }
 0x1f9   : > { %v5279_v57 = vadd.f32 %v5278_v40, %v5277_v0  ;;  %v7484_v19 = vadd.f32 %v5276_v9, %v3718_v6 }
 0x1fb   : > { %v7486_v63 = vadd.f32 %v5279_v57, %v3721_v17 }
 0x1fc   : > { %v5168_v42 = vpop.f32.mrb[116].mxu0 }
 0x1fd   : > { %v5169_v8 = vpop.f32.mrb[117].mxu0 }
 0x1fe   : > { %v5170_v61 = vadd.f32 %v5169_v8, %v5168_v42  ;;  %v5171_v31 = vpop.f32.mrb[118].mxu0 }
 0x1ff   : > { %v5172_v18 = vpop.f32.mrb[119].mxu0 }
 0x200   : > { %v3726_v59 = vadd.f32 %v5170_v61, %v7380_v13  ;;  %v5173_v30 = vadd.f32 %v5172_v18, %v5171_v31 }
 0x201   : > { %v5280_v25 = vpop.f32.mrb[116].mxu1 }
 0x202   : > { %v5281_v47 = vpop.f32.mrb[117].mxu1  ;;  %v3729_v12 = vadd.f32 %v5173_v30, %v7383_v50 }
 0x203   : > { %v5282_v44 = vadd.f32 %v5281_v47, %v5280_v25  ;;  %v5283_v56 = vpop.f32.mrb[118].mxu1 }
 0x204   : > { %v5284_v41 = vpop.f32.mrb[119].mxu1 }
 0x205   : > { %v5285_v36 = vadd.f32 %v5284_v41, %v5283_v56  ;;  %v7490_v20 = vadd.f32 %v5282_v44, %v3726_v59 }
 0x207   : > { %v7492_v46 = vadd.f32 %v5285_v36, %v3729_v12 }
 0x208   : > { %v5174_v5 = vpop.f32.mrb[120].mxu0 }
 0x209   : > { %v5175_v27 = vpop.f32.mrb[121].mxu0 }
 0x20a   : > { %v5176_v54 = vadd.f32 %v5175_v27, %v5174_v5  ;;  %v5177_v58 = vpop.f32.mrb[122].mxu0 }
 0x20b   : > { %v5178_v53 = vpop.f32.mrb[123].mxu0 }
 0x20c   : > { %v3734_v13 = vadd.f32 %v5176_v54, %v7394_v3  ;;  %v5286_v7 = vpop.f32.mrb[120].mxu1  ;;  %v5179_v10 = vadd.f32 %v5178_v53, %v5177_v58 }
 0x20d   : > { %v5287_v6 = vpop.f32.mrb[121].mxu1 }
 0x20e   : > { %v3737_v50 = vadd.f32 %v5179_v10, %v7396_v38  ;;  %v5288_v32 = vadd.f32 %v5287_v6, %v5286_v7  ;;  %v5289_v14 = vpop.f32.mrb[122].mxu1 }
 0x20f   : > { %v5290_v17 = vpop.f32.mrb[123].mxu1 }
 0x210   : > { %v5291_v33 = vadd.f32 %v5290_v17, %v5289_v14  ;;  %v7496_v9 = vadd.f32 %v5288_v32, %v3734_v13 }
 0x212   : > { %v7498_v0 = vadd.f32 %v5291_v33, %v3737_v50 }
 0x213   : > { %v5180_v40 = vpop.f32.mrb[124].mxu0 }
 0x214   : > { %v5181_v57 = vpop.f32.mrb[125].mxu0 }
 0x215   : > { %v5182_v42 = vadd.f32 %v5181_v57, %v5180_v40  ;;  %v5183_v8 = vpop.f32.mrb[126].mxu0 }
 0x216   : > { %v5184_v61 = vpop.f32.mrb[127].mxu0 }
 0x217   : > { %v3742_v3 = vadd.f32 %v5182_v42, %v7400_v29  ;;  %v5292_v31 = vpop.f32.mrb[124].mxu1  ;;  %v5185_v18 = vadd.f32 %v5184_v61, %v5183_v8 }
 0x218   : > { %v5293_v59 = vpop.f32.mrb[125].mxu1 }
 0x219   : > { %v3745_v38 = vadd.f32 %v5185_v18, %v7405_v11  ;;  %v5294_v25 = vadd.f32 %v5293_v59, %v5292_v31  ;;  %v5295_v30 = vpop.f32.mrb[126].mxu1 }
 0x21a   : > { %v5296_v47 = vpop.f32.mrb[127].mxu1 }
 0x21b   : > { %v5297_v12 = vadd.f32 %v5296_v47, %v5295_v30  ;;  %v5364_v44 = vpop.f32.mrb[128].mxu0  ;;  %v7502_v56 = vadd.f32 %v5294_v25, %v3742_v3 }
 0x21c   : > { %v3952_v41 = vadd.f32 %v5364_v44, %v7415_v49  ;;  %v3943_v36 = vpop.f32.mrb[129].mxu0 }
 0x21d   : > { %v3944_v5 = vadd.f32 %v3943_v36, %v7409_v62  ;;  %v5365_v27 = vpop.f32.mrb[130].mxu0  ;;  %v7506_v54 = vadd.f32 %v5297_v12, %v3745_v38 }
 0x21e   : > { %v3955_v29 = vadd.f32 %v5365_v27, %v7417_v43  ;;  %v3946_v58 = vpop.f32.mrb[131].mxu0  ;;  %v4072_v53 = vmax.f32 %v3952_v41, 0.0 }
 0x21f   : > { %v3947_v11 = vadd.f32 %v3946_v58, %v7411_v39  ;;  %v4070_v7 = vmax.f32 %v3944_v5, 0.0 }
 0x220   : > { %v4073_v13 = vmax.f32 %v3955_v29, 0.0 }
 0x221   : > { %v4071_v10 = vmax.f32 %v3947_v11, 0.0 }
 0x222   : > { %v4103_v6 = vpack.c.bf16 %v4073_v13, %v4072_v53 }
 0x223   : > { %v4102_v50 = vpack.c.bf16 %v4071_v10, %v4070_v7  ;;  %v5368_v32 = vpop.f32.mrb[132].mxu0 }
 0x224   : > { %v3968_v49 = vadd.f32 %v5368_v32, %v7430_v22  ;;  %v3959_v14 = vpop.f32.mrb[133].mxu0 }
 0x225   : > { %v3960_v62 = vadd.f32 %v3959_v14, %v7424_v23  ;;  %v5369_v17 = vpop.f32.mrb[134].mxu0  ;;  %5410 = vmatprep.mubr.bf16.mxu1 %v4102_v50 }
 0x226   : > { %v3971_v33 = vadd.f32 %v5369_v17, %v7432_v4  ;;  %v3962_v43 = vpop.f32.mrb[135].mxu0  ;;  %5411 = vmatmul.mubr.bf16.vlgmr.msra.gmra.mrb[128].mxu1 %v4103_v6  ;;  %v4076_v40 = vmax.f32 %v3968_v49, 0.0 }
 0x227   : > { %v3963_v39 = vadd.f32 %v3962_v43, %v7426_v2  ;;  %v4074_v42 = vmax.f32 %v3960_v62, 0.0 }
 0x228   : > { %v4077_v57 = vmax.f32 %v3971_v33, 0.0 }
 0x229   : > { %v4075_v8 = vmax.f32 %v3963_v39, 0.0 }
 0x22a   : > { %v4105_v61 = vpack.c.bf16 %v4077_v57, %v4076_v40 }
 0x22b   : > { %v4104_v3 = vpack.c.bf16 %v4075_v8, %v4074_v42  ;;  %v5372_v31 = vpop.f32.mrb[136].mxu0 }
 0x22c   : > { %v3984_v22 = vadd.f32 %v5372_v31, %v7442_v1  ;;  %v3975_v18 = vpop.f32.mrb[137].mxu0 }
 0x22d   : > { %v3976_v23 = vadd.f32 %v3975_v18, %v7436_v55  ;;  %v5373_v59 = vpop.f32.mrb[138].mxu0  ;;  %5414 = vmatprep.mubr.bf16.mxu1 %v4104_v3 }
 0x22e   : > { %v3987_v4 = vadd.f32 %v5373_v59, %v7444_v16  ;;  %v3978_v38 = vpop.f32.mrb[139].mxu0  ;;  %5415 = vmatmul.mubr.bf16.gmra.mrb[132].mxu1 %v4105_v61  ;;  %v4080_v25 = vmax.f32 %v3984_v22, 0.0 }
 0x22f   : > { %v3979_v2 = vadd.f32 %v3978_v38, %v7438_v48  ;;  %v4078_v47 = vmax.f32 %v3976_v23, 0.0 }
 0x230   : > { %v4081_v30 = vmax.f32 %v3987_v4, 0.0 }
 0x231   : > { %v4079_v12 = vmax.f32 %v3979_v2, 0.0 }
 0x232   : > { %v4107_v44 = vpack.c.bf16 %v4081_v30, %v4080_v25 }
 0x233   : > { %v4106_v41 = vpack.c.bf16 %v4079_v12, %v4078_v47  ;;  %v5376_v36 = vpop.f32.mrb[140].mxu0 }
 0x234   : > { %v4000_v1 = vadd.f32 %v5376_v36, %v7454_v34  ;;  %v3991_v5 = vpop.f32.mrb[141].mxu0 }
 0x235   : > { %v3992_v55 = vadd.f32 %v3991_v5, %v7448_v60  ;;  %v5377_v27 = vpop.f32.mrb[142].mxu0  ;;  %5418 = vmatprep.mubr.bf16.mxu1 %v4106_v41 }
 0x236   : > { %v4003_v16 = vadd.f32 %v5377_v27, %v7456_v26  ;;  %v3994_v29 = vpop.f32.mrb[143].mxu0  ;;  %5419 = vmatmul.mubr.bf16.gmra.mrb[136].mxu1 %v4107_v44  ;;  %v4084_v58 = vmax.f32 %v4000_v1, 0.0 }
 0x237   : > { %v3995_v48 = vadd.f32 %v3994_v29, %v7450_v37  ;;  %v4082_v53 = vmax.f32 %v3992_v55, 0.0 }
 0x238   : > { %v4085_v11 = vmax.f32 %v4003_v16, 0.0 }
 0x239   : > { %v4083_v13 = vmax.f32 %v3995_v48, 0.0 }
 0x23a   : > { %v4109_v7 = vpack.c.bf16 %v4085_v11, %v4084_v58 }
 0x23b   : > { %v4108_v10 = vpack.c.bf16 %v4083_v13, %v4082_v53  ;;  %v5380_v6 = vpop.f32.mrb[144].mxu0 }
 0x23c   : > { %v4016_v34 = vadd.f32 %v5380_v6, %v7466_v52  ;;  %v4007_v50 = vpop.f32.mrb[145].mxu0 }
 0x23d   : > { %v4008_v60 = vadd.f32 %v4007_v50, %v7460_v24  ;;  %v5381_v32 = vpop.f32.mrb[146].mxu0  ;;  %5422 = vmatprep.mubr.bf16.mxu1 %v4108_v10 }
 0x23e   : > { %v4019_v26 = vadd.f32 %v5381_v32, %v7468_v15  ;;  %v4010_v49 = vpop.f32.mrb[147].mxu0  ;;  %5423 = vmatmul.mubr.bf16.gmra.mrb[140].mxu1 %v4109_v7  ;;  %v4088_v14 = vmax.f32 %v4016_v34, 0.0 }
 0x23f   : > { %v4011_v37 = vadd.f32 %v4010_v49, %v7462_v45  ;;  %v4086_v17 = vmax.f32 %v4008_v60, 0.0 }
 0x240   : > { %v4089_v62 = vmax.f32 %v4019_v26, 0.0 }
 0x241   : > { %v4087_v33 = vmax.f32 %v4011_v37, 0.0 }
 0x242   : > { %v4111_v43 = vpack.c.bf16 %v4089_v62, %v4088_v14 }
 0x243   : > { %v4110_v39 = vpack.c.bf16 %v4087_v33, %v4086_v17  ;;  %v5384_v40 = vpop.f32.mrb[148].mxu0 }
 0x244   : > { %v4032_v52 = vadd.f32 %v5384_v40, %v7478_v28  ;;  %v4023_v57 = vpop.f32.mrb[149].mxu0 }
 0x245   : > { %v4024_v24 = vadd.f32 %v4023_v57, %v7472_v21  ;;  %v5385_v42 = vpop.f32.mrb[150].mxu0  ;;  %5426 = vmatprep.mubr.bf16.mxu1 %v4110_v39 }
 0x246   : > { %v4035_v15 = vadd.f32 %v5385_v42, %v7480_v35  ;;  %v4026_v8 = vpop.f32.mrb[151].mxu0  ;;  %5427 = vmatmul.mubr.bf16.gmra.mrb[144].mxu1 %v4111_v43  ;;  %v4092_v61 = vmax.f32 %v4032_v52, 0.0 }
 0x247   : > { %v4027_v45 = vadd.f32 %v4026_v8, %v7474_v51  ;;  %v4090_v31 = vmax.f32 %v4024_v24, 0.0 }
 0x248   : > { %v4093_v3 = vmax.f32 %v4035_v15, 0.0 }
 0x249   : > { %v4091_v22 = vmax.f32 %v4027_v45, 0.0 }
 0x24a   : > { %v4113_v18 = vpack.c.bf16 %v4093_v3, %v4092_v61 }
 0x24b   : > { %v4112_v23 = vpack.c.bf16 %v4091_v22, %v4090_v31  ;;  %v5388_v59 = vpop.f32.mrb[152].mxu0 }
 0x24c   : > { %v4048_v28 = vadd.f32 %v5388_v59, %v7490_v20  ;;  %v4039_v4 = vpop.f32.mrb[153].mxu0 }
 0x24d   : > { %v4040_v21 = vadd.f32 %v4039_v4, %v7484_v19  ;;  %v5389_v38 = vpop.f32.mrb[154].mxu0  ;;  %5430 = vmatprep.mubr.bf16.mxu1 %v4112_v23 }
 0x24e   : > { %v4051_v35 = vadd.f32 %v5389_v38, %v7492_v46  ;;  %v4042_v2 = vpop.f32.mrb[155].mxu0  ;;  %5431 = vmatmul.mubr.bf16.gmra.mrb[148].mxu1 %v4113_v18  ;;  %v4096_v25 = vmax.f32 %v4048_v28, 0.0 }
 0x24f   : > { %v4043_v51 = vadd.f32 %v4042_v2, %v7486_v63  ;;  %v4094_v47 = vmax.f32 %v4040_v21, 0.0 }
 0x250   : > { %v4097_v30 = vmax.f32 %v4051_v35, 0.0 }
 0x251   : > { %v4095_v12 = vmax.f32 %v4043_v51, 0.0 }
 0x252   : > { %v4115_v44 = vpack.c.bf16 %v4097_v30, %v4096_v25 }
 0x253   : > { %v4114_v41 = vpack.c.bf16 %v4095_v12, %v4094_v47  ;;  %v5392_v36 = vpop.f32.mrb[156].mxu0 }
 0x254   : > { %v4064_v20 = vadd.f32 %v5392_v36, %v7502_v56  ;;  %v4055_v1 = vpop.f32.mrb[157].mxu0 }
 0x255   : > { %v4056_v19 = vadd.f32 %v4055_v1, %v7496_v9  ;;  %v5393_v5 = vpop.f32.mrb[158].mxu0  ;;  %5434 = vmatprep.mubr.bf16.mxu1 %v4114_v41  ;;  %v7542_v9 = vld [vmem:[%s7620_s4] ss:$0 sm:$0xff] }
 0x256   : > { %v4067_v46 = vadd.f32 %v5393_v5, %v7506_v54  ;;  %v4058_v55 = vpop.f32.mrb[159].mxu0  ;;  %5435 = vmatmul.mubr.bf16.gmra.mrb[152].mxu1 %v4115_v44  ;;  %v4100_v27 = vmax.f32 %v4064_v20, 0.0 }
 0x257   : > { %v4059_v63 = vadd.f32 %v4058_v55, %v7498_v0  ;;  %v4098_v29 = vmax.f32 %v4056_v19, 0.0 }
 0x258   : > { %v4101_v16 = vmax.f32 %v4067_v46, 0.0 }
 0x259   : > { %v4099_v48 = vmax.f32 %v4059_v63, 0.0 }
 0x25a   : > { %v4117_v58 = vpack.c.bf16 %v4101_v16, %v4100_v27 }
 0x25b   : > { %v4116_v11 = vpack.c.bf16 %v4099_v48, %v4098_v29 }
 0x25d   : > { %5438 = vmatprep.mubr.bf16.mxu1 %v4116_v11 }
 0x25e   : > { %5439 = vmatmul.mubr.bf16.gmra.mrb[156].mxu1 %v4117_v58 }
 0x2f9   : > { %v5412_v0 = vpop.f32.mrb[128].mxu1 }
 0x2fa   : > { %v4232_v56 = vadd.f32 %v5412_v0, %v7542_v9  ;;  %v4223_v54 = vpop.f32.mrb[129].mxu1 }
 0x2fb   : > { %v4224_v53 = vadd.f32 %v7542_v9, %v4223_v54  ;;  %v5413_v13 = vpop.f32.mrb[130].mxu1 }
 0x2fc   : > { %4352 = vst [vmem:[%s7547_s11 + $0x10] sm:$0xff] %v4232_v56  ;;  %v4235_v7 = vadd.f32 %v5413_v13, %v7542_v9  ;;  %v4226_v10 = vpop.f32.mrb[131].mxu1 }
 0x2fd   : > { %4350 = vst [vmem:[%s7547_s11] sm:$0xff] %v4224_v53  ;;  %v4227_v6 = vadd.f32 %v7542_v9, %v4226_v10 }
 0x2fe   : > { %4353 = vst [vmem:[%s7547_s11 + $0x18] sm:$0xff] %v4235_v7 }
 0x2ff   : > { %4351 = vst [vmem:[%s7547_s11 + $0x8] sm:$0xff] %v4227_v6 }
 0x301   : > { %v5416_v34 = vpop.f32.mrb[132].mxu1 }
 0x302   : > { %v4248_v50 = vadd.f32 %v5416_v34, %v7542_v9  ;;  %v4239_v60 = vpop.f32.mrb[133].mxu1 }
 0x303   : > { %v4240_v32 = vadd.f32 %v7542_v9, %v4239_v60  ;;  %v5417_v26 = vpop.f32.mrb[134].mxu1 }
 0x304   : > { %4356 = vst [vmem:[%s7547_s11 + $0x30] sm:$0xff] %v4248_v50  ;;  %v4251_v49 = vadd.f32 %v5417_v26, %v7542_v9  ;;  %v4242_v37 = vpop.f32.mrb[135].mxu1 }
 0x305   : > { %4354 = vst [vmem:[%s7547_s11 + $0x20] sm:$0xff] %v4240_v32  ;;  %v4243_v14 = vadd.f32 %v7542_v9, %v4242_v37 }
 0x306   : > { %4357 = vst [vmem:[%s7547_s11 + $0x38] sm:$0xff] %v4251_v49 }
 0x307   : > { %4355 = vst [vmem:[%s7547_s11 + $0x28] sm:$0xff] %v4243_v14 }
 0x309   : > { %v5420_v62 = vpop.f32.mrb[136].mxu1 }
 0x30a   : > { %v4264_v17 = vadd.f32 %v5420_v62, %v7542_v9  ;;  %v4255_v33 = vpop.f32.mrb[137].mxu1 }
 0x30b   : > { %v4256_v43 = vadd.f32 %v7542_v9, %v4255_v33  ;;  %v5421_v39 = vpop.f32.mrb[138].mxu1 }
 0x30c   : > { %4360 = vst [vmem:[%s7547_s11 + $0x50] sm:$0xff] %v4264_v17  ;;  %v4267_v40 = vadd.f32 %v5421_v39, %v7542_v9  ;;  %v4258_v52 = vpop.f32.mrb[139].mxu1 }
 0x30d   : > { %4358 = vst [vmem:[%s7547_s11 + $0x40] sm:$0xff] %v4256_v43  ;;  %v4259_v57 = vadd.f32 %v7542_v9, %v4258_v52 }
 0x30e   : > { %4361 = vst [vmem:[%s7547_s11 + $0x58] sm:$0xff] %v4267_v40 }
 0x30f   : > { %4359 = vst [vmem:[%s7547_s11 + $0x48] sm:$0xff] %v4259_v57 }
 0x311   : > { %v5424_v24 = vpop.f32.mrb[140].mxu1 }
 0x312   : > { %v4280_v42 = vadd.f32 %v5424_v24, %v7542_v9  ;;  %v4271_v15 = vpop.f32.mrb[141].mxu1 }
 0x313   : > { %v4272_v8 = vadd.f32 %v7542_v9, %v4271_v15  ;;  %v5425_v45 = vpop.f32.mrb[142].mxu1 }
 0x314   : > { %4364 = vst [vmem:[%s7547_s11 + $0x70] sm:$0xff] %v4280_v42  ;;  %v4283_v61 = vadd.f32 %v5425_v45, %v7542_v9  ;;  %v4274_v3 = vpop.f32.mrb[143].mxu1 }
 0x315   : > { %4362 = vst [vmem:[%s7547_s11 + $0x60] sm:$0xff] %v4272_v8  ;;  %v4275_v31 = vadd.f32 %v7542_v9, %v4274_v3 }
 0x316   : > { %4365 = vst [vmem:[%s7547_s11 + $0x78] sm:$0xff] %v4283_v61 }
 0x317   : > { %4363 = vst [vmem:[%s7547_s11 + $0x68] sm:$0xff] %v4275_v31 }
 0x319   : > { %v5428_v22 = vpop.f32.mrb[144].mxu1 }
 0x31a   : > { %v4296_v18 = vadd.f32 %v5428_v22, %v7542_v9  ;;  %v4287_v23 = vpop.f32.mrb[145].mxu1 }
 0x31b   : > { %v4288_v59 = vadd.f32 %v7542_v9, %v4287_v23  ;;  %v5429_v28 = vpop.f32.mrb[146].mxu1 }
 0x31c   : > { %4368 = vst [vmem:[%s7547_s11 + $0x90] sm:$0xff] %v4296_v18  ;;  %v4299_v4 = vadd.f32 %v5429_v28, %v7542_v9  ;;  %v4290_v21 = vpop.f32.mrb[147].mxu1 }
 0x31d   : > { %4366 = vst [vmem:[%s7547_s11 + $0x80] sm:$0xff] %v4288_v59  ;;  %v4291_v38 = vadd.f32 %v7542_v9, %v4290_v21 }
 0x31e   : > { %4369 = vst [vmem:[%s7547_s11 + $0x98] sm:$0xff] %v4299_v4 }
 0x31f   : > { %4367 = vst [vmem:[%s7547_s11 + $0x88] sm:$0xff] %v4291_v38 }
 0x321   : > { %v5432_v35 = vpop.f32.mrb[148].mxu1 }
 0x322   : > { %v4312_v2 = vadd.f32 %v5432_v35, %v7542_v9  ;;  %v4303_v51 = vpop.f32.mrb[149].mxu1 }
 0x323   : > { %v4304_v25 = vadd.f32 %v7542_v9, %v4303_v51  ;;  %v5433_v30 = vpop.f32.mrb[150].mxu1 }
 0x324   : > { %4372 = vst [vmem:[%s7547_s11 + $0xb0] sm:$0xff] %v4312_v2  ;;  %v4315_v47 = vadd.f32 %v5433_v30, %v7542_v9  ;;  %v4306_v12 = vpop.f32.mrb[151].mxu1 }
 0x325   : > { %4370 = vst [vmem:[%s7547_s11 + $0xa0] sm:$0xff] %v4304_v25  ;;  %v4307_v44 = vadd.f32 %v7542_v9, %v4306_v12 }
 0x326   : > { %4373 = vst [vmem:[%s7547_s11 + $0xb8] sm:$0xff] %v4315_v47 }
 0x327   : > { %4371 = vst [vmem:[%s7547_s11 + $0xa8] sm:$0xff] %v4307_v44 }
 0x329   : > { %v5436_v41 = vpop.f32.mrb[152].mxu1 }
 0x32a   : > { %v4328_v36 = vadd.f32 %v5436_v41, %v7542_v9  ;;  %v4319_v20 = vpop.f32.mrb[153].mxu1 }
 0x32b   : > { %v4320_v1 = vadd.f32 %v7542_v9, %v4319_v20  ;;  %v5437_v19 = vpop.f32.mrb[154].mxu1 }
 0x32c   : > { %4376 = vst [vmem:[%s7547_s11 + $0xd0] sm:$0xff] %v4328_v36  ;;  %v4331_v5 = vadd.f32 %v5437_v19, %v7542_v9  ;;  %v4322_v46 = vpop.f32.mrb[155].mxu1 }
 0x32d   : > { %4374 = vst [vmem:[%s7547_s11 + $0xc0] sm:$0xff] %v4320_v1  ;;  %v4323_v55 = vadd.f32 %v7542_v9, %v4322_v46 }
 0x32e   : > { %4377 = vst [vmem:[%s7547_s11 + $0xd8] sm:$0xff] %v4331_v5 }
 0x32f   : > { %4375 = vst [vmem:[%s7547_s11 + $0xc8] sm:$0xff] %v4323_v55 }
 0x331   : > { %v5440_v63 = vpop.f32.mrb[156].mxu1 }
 0x332   : > { %v4344_v27 = vadd.f32 %v5440_v63, %v7542_v9  ;;  %v4335_v16 = vpop.f32.mrb[157].mxu1 }
 0x333   : > { %v4336_v29 = vadd.f32 %v7542_v9, %v4335_v16  ;;  %v5441_v48 = vpop.f32.mrb[158].mxu1 }
 0x334   : > { %4380 = vst [vmem:[%s7547_s11 + $0xf0] sm:$0xff] %v4344_v27  ;;  %v4347_v58 = vadd.f32 %v5441_v48, %v7542_v9  ;;  %v4338_v11 = vpop.f32.mrb[159].mxu1 }
 0x335   : > { %4378 = vst [vmem:[%s7547_s11 + $0xe0] sm:$0xff] %v4336_v29  ;;  %v4339_v0 = vadd.f32 %v7542_v9, %v4338_v11 }
 0x336   : > { %4381 = vst [vmem:[%s7547_s11 + $0xf8] sm:$0xff] %v4347_v58 }
 0x337   : > { %4379 = vst [vmem:[%s7547_s11 + $0xe8] sm:$0xff] %v4339_v0 }
 0x338 PF: > { %s15_s18 = sadd.s32 1, %s5623_s18  }
 0x339   : > { %p12_p4 = scmp.ge.s32.totalorder %s15_s18, 4  }
 0x33b   :  { %14 = sbr.rel (!%p12_p4) target bundleno = 1 (0x1), region = 72 }

// kernel: custom-call
= control target key start
LH: loop header
LB: loop body
LE: loop exit
PB: predicated region body
PF: predicated region fallthrough
CT: control target
= control target key end

     0   :  { %5 = vsyncpa [#allocation9], 0  ;;  %v1086_v0 = vmov 2147483648   ;;  %v1087_v1 = vmov 2147483647   ;;  %s1221_s0 = inlined_call_operand.vmem [shape: f32[2,768], index: 0, kind: input, shape index: {}]   ;;  %s1222_s1 = inlined_call_operand.hbm [shape: f32[2,8], index: 1, kind: output, shape index: {0}]   ;;  %s1223_s2 = inlined_call_operand.vmem [shape: s32[2,8], index: 2, kind: output, shape index: {1}]  }
   0x1   :  { %7 = vst [vmem:[#allocation12] sm:$0xff] %v1086_v0  ;;  %8 = vst [vmem:[#allocation14] sm:$0xff] %v1087_v1 }
   0x2   :  { %v1022_v2 = vld [vmem:[%s1221_s0 + $0x8] sm:$0xf]  ;;  %v43_v3 = vlaneseq  ;;  %v27_v4 = vld [vmem:[%s1221_s0] sm:$0xff]  ;;  %v1088_v5 = vmov 2147483648   ;;  %v1089_v6 = vmov 2147483647  }
   0x3   :  { %39 = vst [vmem:[#allocation16 + $0x8] sm:$0xf] %v1022_v2  ;;  %84 = vst [vmem:[#allocation13] sm:$0xff] %v1088_v5  ;;  %v54_v10 = vsub.s32 2147483647, %v27_v4  ;;  %vm53_vm0 = vcmp.lt.s32.totalorder %v27_v4, 0 }
   0x4   :  { %85 = vst [vmem:[#allocation15] sm:$0xff] %v1089_v6  ;;  %v1118_v7 = vshrl.u32 %v43_v3, 7  ;;  %v44_v8 = vand.u32 127, %v43_v3  ;;  %s1122_s0 = smov 0  }
   0x5   :  { %v55_v13 = vsel %vm53_vm0, %v54_v10, %v27_v4 }
   0x6   :  { %v47_v9 = vshrl.u32 %v1118_v7, 1 }
   0x8   :  { %v49_v11 = vmul.u32 128, %v47_v9 }
   0xa   :  { %v50_v12 = vadd.s32 %v49_v11, %v44_v8  ;;  %v61_v14 = vld [vmem:[#allocation16 + $0x8] sm:$0xff] }
   0xb   :  { %vm62_vm1 = vcmp.lt.s32.totalorder %v61_v14, 0  ;;  %v63_v15 = vsub.s32 2147483647, %v61_v14 }
   0xc   :  { %vm57_vm2 = vcmp.lt.s32.totalorder %v50_v12, 768  ;;  %v65_v16 = vadd.s32 512, %v50_v12  ;;  %79 = vst [vmem:[#allocation17] sm:$0xff] %v50_v12 }
   0xd   :  { %v58_v17 = vsel %vm57_vm2, %v55_v13, 2147483648  ;;  %v64_v18 = vsel %vm62_vm1, %v63_v15, %v61_v14 }
   0xe   :  { %59 = vst [vmem:[#allocation16] sm:$0xff] %v58_v17  ;;  %vm66_vm3 = vcmp.lt.s32.totalorder %v65_v16, 768  ;;  %82 = vst [vmem:[#allocation17 + $0x8] sm:$0xff] %v65_v16 }
   0xf   :  { %v67_v19 = vsel %vm66_vm3, %v64_v18, 2147483648 }
  0x10   :  { %68 = vst [vmem:[#allocation16 + $0x8] sm:$0xff] %v67_v19 }
  0x11 LB: > { %s419_s13 = scalar_lea.vmem [#allocation13], %s1084_s0  ;;  %s421_s14 = scalar_lea.vmem [#allocation15], %s1084_s0  ;;  %s1084_s0 = sphi %s1122_s0, %s92_s0  }
  0x12   : > { %s92_s0 = sadd.s32 1, %s1084_s0  }
  0x13   : > { %v94_v21 = vld [vmem:[#allocation17] sm:$0xff]  ;;  %p89_p2 = scmp.ge.s32.totalorder %s92_s0, 8  }
  0x14   :  { %s1095_s0 = smov (%p89_p2), [#allocation8]  }
  0x15   : > { %v93_v20 = vld [vmem:[#allocation16] sm:$0xff]  ;;  %v99_v23 = vld [vmem:[#allocation17 + $0x8] sm:$0xff] }
  0x16   : > { %vm103_vm6 = vcmp.lt.s32.totalorder %v99_v23, %v94_v21 }
  0x17   : > { %v97_v22 = vld [vmem:[#allocation16 + $0x8] sm:$0xff] }
  0x18   : > { %vm101_vm4 = vcmp.gt.s32.totalorder %v97_v22, %v93_v20  ;;  %vm102_vm5 = vcmp.eq.s32.totalorder %v97_v22, %v93_v20 }
  0x19   : > { %vm104_vm7 = vmand %vm102_vm5, %vm103_vm6 }
  0x1a   : > { %vm105_vm8 = vmor %vm101_vm4, %vm104_vm7 }
  0x1b   : > { %v106_v24 = vsel %vm105_vm8, %v97_v22, %v93_v20  ;;  %v107_v25 = vsel %vm105_vm8, %v99_v23, %v94_v21 }
  0x1c   : > { %v109_v26 = vrot.slane %v106_v24, 2  ;;  %v110_v27 = vrot.slane %v107_v25, 2 }
  0x1e   : > { %vm112_vm9 = vcmp.gt.s32.totalorder %v109_v26, %v106_v24  ;;  %vm113_vm10 = vcmp.eq.s32.totalorder %v109_v26, %v106_v24  ;;  %vm114_vm11 = vcmp.lt.s32.totalorder %v110_v27, %v107_v25 }
  0x1f   : > { %vm115_vm12 = vmand %vm113_vm10, %vm114_vm11 }
  0x20   : > { %vm116_vm13 = vmor %vm112_vm9, %vm115_vm12 }
  0x21   : > { %v117_v28 = vsel %vm116_vm13, %v109_v26, %v106_v24  ;;  %v118_v29 = vsel %vm116_vm13, %v110_v27, %v107_v25 }
  0x22   : > { %v120_v30 = vrot.slane %v117_v28, 2  ;;  %v121_v31 = vrot.slane %v118_v29, 2 }
  0x24   : > { %vm123_vm14 = vcmp.gt.s32.totalorder %v120_v30, %v117_v28  ;;  %vm124_vm15 = vcmp.eq.s32.totalorder %v120_v30, %v117_v28  ;;  %vm125_vm0 = vcmp.lt.s32.totalorder %v121_v31, %v118_v29 }
  0x25   : > { %vm126_vm1 = vmand %vm124_vm15, %vm125_vm0 }
  0x26   : > { %vm127_vm2 = vmor %vm123_vm14, %vm126_vm1 }
  0x27   : > { %v128_v32 = vsel %vm127_vm2, %v120_v30, %v117_v28  ;;  %v129_v33 = vsel %vm127_vm2, %v121_v31, %v118_v29 }
  0x28   : > { %v131_v34 = vrot.slane %v128_v32, 2  ;;  %v132_v35 = vrot.slane %v129_v33, 2 }
  0x2a   : > { %vm134_vm3 = vcmp.gt.s32.totalorder %v131_v34, %v128_v32  ;;  %vm135_vm4 = vcmp.eq.s32.totalorder %v131_v34, %v128_v32  ;;  %vm136_vm5 = vcmp.lt.s32.totalorder %v132_v35, %v129_v33 }
  0x2b   : > { %vm137_vm6 = vmand %vm135_vm4, %vm136_vm5 }
  0x2c   : > { %vm138_vm7 = vmor %vm134_vm3, %vm137_vm6 }
  0x2d   : > { %v140_v36 = vsel %vm138_vm7, %v132_v35, %v129_v33  ;;  %v139_v37 = vsel %vm138_vm7, %v131_v34, %v128_v32 }
  0x2e   : > { %174 = vxpose.xlu1.b32.start [1/16] %v140_v36, 128  ;;  %142 = vxpose.xlu0.b32.start [1/16] %v139_v37, 128 }
  0x32   : > { %175 = vxpose.xlu1.b32.cont [2/16] %v140_v36, 128  ;;  %143 = vxpose.xlu0.b32.cont [2/16] %v139_v37, 128 }
  0x36   : > { %176 = vxpose.xlu1.b32.cont [3/16] %v140_v36, 128  ;;  %144 = vxpose.xlu0.b32.cont [3/16] %v139_v37, 128 }
  0x3a   : > { %177 = vxpose.xlu1.b32.cont [4/16] %v140_v36, 128  ;;  %145 = vxpose.xlu0.b32.cont [4/16] %v139_v37, 128 }
  0x3e   : > { %178 = vxpose.xlu1.b32.cont [5/16] %v140_v36, 128  ;;  %146 = vxpose.xlu0.b32.cont [5/16] %v139_v37, 128 }
  0x42   : > { %179 = vxpose.xlu1.b32.cont [6/16] %v140_v36, 128  ;;  %147 = vxpose.xlu0.b32.cont [6/16] %v139_v37, 128 }
  0x46   : > { %180 = vxpose.xlu1.b32.cont [7/16] %v140_v36, 128  ;;  %148 = vxpose.xlu0.b32.cont [7/16] %v139_v37, 128 }
  0x4a   : > { %181 = vxpose.xlu1.b32.cont [8/16] %v140_v36, 128  ;;  %149 = vxpose.xlu0.b32.cont [8/16] %v139_v37, 128 }
  0x4e   : > { %182 = vxpose.xlu1.b32.cont [9/16] %v140_v36, 128  ;;  %150 = vxpose.xlu0.b32.cont [9/16] %v139_v37, 128 }
  0x52   : > { %183 = vxpose.xlu1.b32.cont [10/16] %v140_v36, 128  ;;  %151 = vxpose.xlu0.b32.cont [10/16] %v139_v37, 128 }
  0x56   : > { %184 = vxpose.xlu1.b32.cont [11/16] %v140_v36, 128  ;;  %152 = vxpose.xlu0.b32.cont [11/16] %v139_v37, 128 }
  0x5a   : > { %185 = vxpose.xlu1.b32.cont [12/16] %v140_v36, 128  ;;  %153 = vxpose.xlu0.b32.cont [12/16] %v139_v37, 128 }
  0x5e   : > { %186 = vxpose.xlu1.b32.cont [13/16] %v140_v36, 128  ;;  %154 = vxpose.xlu0.b32.cont [13/16] %v139_v37, 128 }
  0x62   : > { %187 = vxpose.xlu1.b32.cont [14/16] %v140_v36, 128  ;;  %155 = vxpose.xlu0.b32.cont [14/16] %v139_v37, 128 }
  0x66   : > { %188 = vxpose.xlu1.b32.cont [15/16] %v140_v36, 128  ;;  %156 = vxpose.xlu0.b32.cont [15/16] %v139_v37, 128 }
  0x6a   : > { %189 = vxpose.xlu1.b32.end [16/16] %v140_v36, 128  ;;  %157 = vxpose.xlu0.b32.end [16/16] %v139_v37, 128 }
  0xae   : > { %v190_v38 = vpop.trf.xlu1  ;;  %v158_v39 = vpop.trf.xlu0 }
  0xb2   : > { %v191_v40 = vpop.trf.xlu1  ;;  %v159_v41 = vpop.trf.xlu0 }
  0xb3   : > { %vm210_vm8 = vcmp.lt.s32.totalorder %v191_v40, %v190_v38  ;;  %vm208_vm9 = vcmp.gt.s32.totalorder %v159_v41, %v158_v39  ;;  %vm209_vm10 = vcmp.eq.s32.totalorder %v159_v41, %v158_v39 }
  0xb4   : > { %vm211_vm11 = vmand %vm209_vm10, %vm210_vm8 }
  0xb5   : > { %vm212_vm12 = vmor %vm208_vm9, %vm211_vm11 }
  0xb6   : > { %v213_v42 = vsel %vm212_vm12, %v159_v41, %v158_v39  ;;  %v192_v43 = vpop.trf.xlu1  ;;  %v214_v44 = vsel %vm212_vm12, %v191_v40, %v190_v38  ;;  %v160_v45 = vpop.trf.xlu0 }
  0xb7   : > { %vm219_vm13 = vcmp.lt.s32.totalorder %v192_v43, %v214_v44  ;;  %vm217_vm14 = vcmp.gt.s32.totalorder %v160_v45, %v213_v42  ;;  %vm218_vm15 = vcmp.eq.s32.totalorder %v160_v45, %v213_v42 }
  0xb8   : > { %vm220_vm0 = vmand %vm218_vm15, %vm219_vm13 }
  0xb9   : > { %vm221_vm1 = vmor %vm217_vm14, %vm220_vm0 }
  0xba   : > { %v222_v46 = vsel %vm221_vm1, %v160_v45, %v213_v42  ;;  %v193_v47 = vpop.trf.xlu1  ;;  %v223_v48 = vsel %vm221_vm1, %v192_v43, %v214_v44  ;;  %v161_v49 = vpop.trf.xlu0 }
  0xbb   : > { %vm228_vm2 = vcmp.lt.s32.totalorder %v193_v47, %v223_v48  ;;  %vm226_vm3 = vcmp.gt.s32.totalorder %v161_v49, %v222_v46  ;;  %vm227_vm4 = vcmp.eq.s32.totalorder %v161_v49, %v222_v46 }
  0xbc   : > { %vm229_vm5 = vmand %vm227_vm4, %vm228_vm2 }
  0xbd   : > { %vm230_vm6 = vmor %vm226_vm3, %vm229_vm5 }
  0xbe   : > { %v231_v50 = vsel %vm230_vm6, %v161_v49, %v222_v46  ;;  %v194_v51 = vpop.trf.xlu1  ;;  %v232_v52 = vsel %vm230_vm6, %v193_v47, %v223_v48  ;;  %v162_v53 = vpop.trf.xlu0 }
  0xbf   : > { %vm237_vm7 = vcmp.lt.s32.totalorder %v194_v51, %v232_v52  ;;  %vm235_vm8 = vcmp.gt.s32.totalorder %v162_v53, %v231_v50  ;;  %vm236_vm9 = vcmp.eq.s32.totalorder %v162_v53, %v231_v50 }
  0xc0   : > { %vm238_vm10 = vmand %vm236_vm9, %vm237_vm7 }
  0xc1   : > { %vm239_vm11 = vmor %vm235_vm8, %vm238_vm10 }
  0xc2   : > { %v240_v54 = vsel %vm239_vm11, %v162_v53, %v231_v50  ;;  %v195_v55 = vpop.trf.xlu1  ;;  %v241_v56 = vsel %vm239_vm11, %v194_v51, %v232_v52  ;;  %v163_v57 = vpop.trf.xlu0 }
  0xc3   : > { %vm246_vm12 = vcmp.lt.s32.totalorder %v195_v55, %v241_v56  ;;  %vm244_vm13 = vcmp.gt.s32.totalorder %v163_v57, %v240_v54  ;;  %vm245_vm14 = vcmp.eq.s32.totalorder %v163_v57, %v240_v54 }
  0xc4   : > { %vm247_vm15 = vmand %vm245_vm14, %vm246_vm12 }
  0xc5   : > { %vm248_vm0 = vmor %vm244_vm13, %vm247_vm15 }
  0xc6   : > { %v249_v58 = vsel %vm248_vm0, %v163_v57, %v240_v54  ;;  %v196_v59 = vpop.trf.xlu1  ;;  %v250_v60 = vsel %vm248_vm0, %v195_v55, %v241_v56  ;;  %v164_v61 = vpop.trf.xlu0 }
  0xc7   : > { %vm255_vm1 = vcmp.lt.s32.totalorder %v196_v59, %v250_v60  ;;  %vm253_vm2 = vcmp.gt.s32.totalorder %v164_v61, %v249_v58  ;;  %vm254_vm3 = vcmp.eq.s32.totalorder %v164_v61, %v249_v58 }
  0xc8   : > { %vm256_vm4 = vmand %vm254_vm3, %vm255_vm1 }
  0xc9   : > { %vm257_vm5 = vmor %vm253_vm2, %vm256_vm4 }
  0xca   : > { %v258_v62 = vsel %vm257_vm5, %v164_v61, %v249_v58  ;;  %v197_v63 = vpop.trf.xlu1  ;;  %v259_v0 = vsel %vm257_vm5, %v196_v59, %v250_v60  ;;  %v165_v1 = vpop.trf.xlu0 }
  0xcb   : > { %vm264_vm6 = vcmp.lt.s32.totalorder %v197_v63, %v259_v0  ;;  %vm262_vm7 = vcmp.gt.s32.totalorder %v165_v1, %v258_v62  ;;  %vm263_vm8 = vcmp.eq.s32.totalorder %v165_v1, %v258_v62 }
  0xcc   : > { %vm265_vm9 = vmand %vm263_vm8, %vm264_vm6 }
  0xcd   : > { %vm266_vm10 = vmor %vm262_vm7, %vm265_vm9 }
  0xce   : > { %v267_v2 = vsel %vm266_vm10, %v165_v1, %v258_v62  ;;  %v198_v4 = vpop.trf.xlu1  ;;  %v268_v5 = vsel %vm266_vm10, %v197_v63, %v259_v0  ;;  %v166_v6 = vpop.trf.xlu0 }
  0xcf   : > { %vm273_vm11 = vcmp.lt.s32.totalorder %v198_v4, %v268_v5  ;;  %vm271_vm12 = vcmp.gt.s32.totalorder %v166_v6, %v267_v2  ;;  %vm272_vm13 = vcmp.eq.s32.totalorder %v166_v6, %v267_v2 }
  0xd0   : > { %vm274_vm14 = vmand %vm272_vm13, %vm273_vm11 }
  0xd1   : > { %vm275_vm15 = vmor %vm271_vm12, %vm274_vm14 }
  0xd2   : > { %v276_v8 = vsel %vm275_vm15, %v166_v6, %v267_v2  ;;  %v199_v9 = vpop.trf.xlu1  ;;  %v277_v10 = vsel %vm275_vm15, %v198_v4, %v268_v5  ;;  %v167_v11 = vpop.trf.xlu0  ;;  %v1090_v6 = vmov 2147483648  }
  0xd3   : > { %vm282_vm0 = vcmp.lt.s32.totalorder %v199_v9, %v277_v10  ;;  %vm280_vm1 = vcmp.gt.s32.totalorder %v167_v11, %v276_v8  ;;  %vm281_vm2 = vcmp.eq.s32.totalorder %v167_v11, %v276_v8 }
  0xd4   : > { %vm283_vm3 = vmand %vm281_vm2, %vm282_vm0 }
  0xd5   : > { %vm284_vm4 = vmor %vm280_vm1, %vm283_vm3 }
  0xd6   : > { %v285_v12 = vsel %vm284_vm4, %v167_v11, %v276_v8  ;;  %v200_v13 = vpop.trf.xlu1  ;;  %v286_v14 = vsel %vm284_vm4, %v199_v9, %v277_v10  ;;  %v168_v15 = vpop.trf.xlu0  ;;  %v1091_v8 = vmov 2147483647  }
  0xd7   : > { %vm291_vm5 = vcmp.lt.s32.totalorder %v200_v13, %v286_v14  ;;  %vm289_vm6 = vcmp.gt.s32.totalorder %v168_v15, %v285_v12  ;;  %vm290_vm7 = vcmp.eq.s32.totalorder %v168_v15, %v285_v12 }
  0xd8   : > { %vm292_vm8 = vmand %vm290_vm7, %vm291_vm5 }
  0xd9   : > { %vm293_vm9 = vmor %vm289_vm6, %vm292_vm8 }
  0xda   : > { %v294_v16 = vsel %vm293_vm9, %v168_v15, %v285_v12  ;;  %v201_v17 = vpop.trf.xlu1  ;;  %v295_v18 = vsel %vm293_vm9, %v200_v13, %v286_v14  ;;  %v169_v19 = vpop.trf.xlu0  ;;  %v517_v13 = vld [vmem:[#allocation12] sm:$0xff] (%p89_p2)  ;;  %v518_v14 = vld [vmem:[#allocation14] sm:$0xff] (%p89_p2)  ;;  %v1092_v15 = vmov (%p89_p2), 839939668  }
  0xdb   : > { %vm300_vm10 = vcmp.lt.s32.totalorder %v201_v17, %v295_v18  ;;  %vm298_vm11 = vcmp.gt.s32.totalorder %v169_v19, %v294_v16  ;;  %vm299_vm12 = vcmp.eq.s32.totalorder %v169_v19, %v294_v16 }
  0xdc   : > { %vm301_vm13 = vmand %vm299_vm12, %vm300_vm10 }
  0xdd   : > { %vm302_vm14 = vmor %vm298_vm11, %vm301_vm13 }
  0xde   : > { %v303_v20 = vsel %vm302_vm14, %v169_v19, %v294_v16  ;;  %v202_v21 = vpop.trf.xlu1  ;;  %v304_v22 = vsel %vm302_vm14, %v201_v17, %v295_v18  ;;  %v170_v23 = vpop.trf.xlu0  ;;  %v542_v16 = vunpack.c.l.s4 (%p89_p2), %v1092_v15  ;;  %v1093_v17 = vmov (%p89_p2), 1417023538  }
  0xdf   : > { %vm309_vm15 = vcmp.lt.s32.totalorder %v202_v21, %v304_v22  ;;  %vm307_vm0 = vcmp.gt.s32.totalorder %v170_v23, %v303_v20  ;;  %vm308_vm1 = vcmp.eq.s32.totalorder %v170_v23, %v303_v20  ;;  %v570_v18 = vunpack.c.l.s4 (%p89_p2), %v1093_v17 }
  0xe0   : > { %vm310_vm2 = vmand %vm308_vm1, %vm309_vm15  ;;  %v543_v19 = vunpack.c.0.s8 (%p89_p2), %v542_v16 }
  0xe1   : > { %vm311_vm3 = vmor %vm307_vm0, %vm310_vm2 }
  0xe2   : > { %v312_v24 = vsel %vm311_vm3, %v170_v23, %v303_v20  ;;  %v203_v25 = vpop.trf.xlu1  ;;  %v313_v26 = vsel %vm311_vm3, %v202_v21, %v304_v22  ;;  %v171_v27 = vpop.trf.xlu0  ;;  %v563_v23 = vand.u32 (%p89_p2), 4, %v1118_v7 }
  0xe3   : > { %vm318_vm4 = vcmp.lt.s32.totalorder %v203_v25, %v313_v26  ;;  %vm316_vm5 = vcmp.gt.s32.totalorder %v171_v27, %v312_v24  ;;  %vm317_vm6 = vcmp.eq.s32.totalorder %v171_v27, %v312_v24 }
  0xe4   : > { %vm319_vm7 = vmand %vm317_vm6, %vm318_vm4 }
  0xe5   : > { %vm320_vm8 = vmor %vm316_vm5, %vm319_vm7 }
  0xe6   : > { %v321_v28 = vsel %vm320_vm8, %v171_v27, %v312_v24  ;;  %v204_v29 = vpop.trf.xlu1  ;;  %v322_v30 = vsel %vm320_vm8, %v203_v25, %v313_v26  ;;  %v172_v31 = vpop.trf.xlu0  ;;  %v571_v25 = vunpack.c.0.s8 (%p89_p2), %v570_v18 }
  0xe7   : > { %vm327_vm9 = vcmp.lt.s32.totalorder %v204_v29, %v322_v30  ;;  %vm325_vm10 = vcmp.gt.s32.totalorder %v172_v31, %v321_v28  ;;  %vm326_vm11 = vcmp.eq.s32.totalorder %v172_v31, %v321_v28 }
  0xe8   : > { %vm328_vm12 = vmand %vm326_vm11, %vm327_vm9 }
  0xe9   : > { %vm329_vm13 = vmor %vm325_vm10, %vm328_vm12 }
  0xea   : > { %v330_v32 = vsel %vm329_vm13, %v172_v31, %v321_v28  ;;  %v205_v33 = vpop.trf.xlu1  ;;  %v331_v34 = vsel %vm329_vm13, %v204_v29, %v322_v30  ;;  %v173_v35 = vpop.trf.xlu0  ;;  %v1094_v31 = vmov (%p89_p2), 1732584193  }
  0xeb   : > { %vm336_vm14 = vcmp.lt.s32.totalorder %v205_v33, %v331_v34  ;;  %vm334_vm15 = vcmp.gt.s32.totalorder %v173_v35, %v330_v32  ;;  %vm335_vm0 = vcmp.eq.s32.totalorder %v173_v35, %v330_v32 }
  0xec   : > { %vm337_vm1 = vmand %vm335_vm0, %vm336_vm14 }
  0xed   : > { %vm338_vm2 = vmor %vm334_vm15, %vm337_vm1 }
  0xee   : > { %v339_v36 = vsel %vm338_vm2, %v173_v35, %v330_v32  ;;  %v340_v37 = vsel %vm338_vm2, %v205_v33, %v331_v34  ;;  %v598_v32 = vunpack.c.l.s4 (%p89_p2), %v1094_v31  ;;  %v1147_v33 = vsub.s32 (%p89_p2), %v571_v25, %v1118_v7 }
  0xef   : > { %v342_v38 = vrot.slane %v339_v36, 1  ;;  %v343_v39 = vrot.slane %v340_v37, 1  ;;  %v591_v34 = vand.u32 (%p89_p2), 2, %v1118_v7 }
  0xf1   : > { %vm345_vm3 = vcmp.gt.s32.totalorder %v342_v38, %v339_v36  ;;  %vm346_vm4 = vcmp.eq.s32.totalorder %v342_v38, %v339_v36  ;;  %vm347_vm5 = vcmp.lt.s32.totalorder %v343_v39, %v340_v37 }
  0xf2   : > { %vm348_vm6 = vmand %vm346_vm4, %vm347_vm5 }
  0xf3   : > { %vm349_vm7 = vmor %vm345_vm3, %vm348_vm6 }
  0xf4   : > { %v350_v40 = vsel %vm349_vm7, %v342_v38, %v339_v36  ;;  %v351_v41 = vsel %vm349_vm7, %v343_v39, %v340_v37  ;;  %v599_v37 = vunpack.c.0.s8 (%p89_p2), %v598_v32 }
  0xf5   : > { %v353_v42 = vrot.slane %v350_v40, 1  ;;  %v354_v43 = vrot.slane %v351_v41, 1 }
  0xf7   : > { %vm356_vm8 = vcmp.gt.s32.totalorder %v353_v42, %v350_v40  ;;  %vm357_vm9 = vcmp.eq.s32.totalorder %v353_v42, %v350_v40  ;;  %vm358_vm10 = vcmp.lt.s32.totalorder %v354_v43, %v351_v41 }
  0xf8   : > { %vm359_vm11 = vmand %vm357_vm9, %vm358_vm10 }
  0xf9   : > { %vm360_vm12 = vmor %vm356_vm8, %vm359_vm11 }
  0xfa   : > { %v361_v44 = vsel %vm360_vm12, %v353_v42, %v350_v40  ;;  %v362_v45 = vsel %vm360_vm12, %v354_v43, %v351_v41  ;;  %v1161_v42 = vsub.s32 (%p89_p2), %v599_v37, %v1118_v7 }
  0xfb   : > { %v364_v46 = vrot.slane %v361_v44, 1  ;;  %v365_v47 = vrot.slane %v362_v45, 1 }
  0xfd   : > { %vm369_vm13 = vcmp.lt.s32.totalorder %v365_v47, %v362_v45  ;;  %vm367_vm14 = vcmp.gt.s32.totalorder %v364_v46, %v361_v44  ;;  %vm368_vm15 = vcmp.eq.s32.totalorder %v364_v46, %v361_v44 }
  0xfe   : > { %vm370_vm0 = vmand %vm368_vm15, %vm369_vm13 }
  0xff   : > { %vm371_vm1 = vmor %vm367_vm14, %vm370_vm0 }
 0x100   : > { %v372_v48 = vsel %vm371_vm1, %v364_v46, %v361_v44  ;;  %v373_v49 = vsel %vm371_vm1, %v365_v47, %v362_v45  ;;  %v619_v46 = vand.u32 (%p89_p2), 1, %v1118_v7 }
 0x101   : > { %v375_v50 = vrot.slane %v372_v48, 1  ;;  %v376_v51 = vrot.slane %v373_v49, 1 }
 0x103   : > { %vm378_vm2 = vcmp.gt.s32.totalorder %v375_v50, %v372_v48  ;;  %vm379_vm3 = vcmp.eq.s32.totalorder %v375_v50, %v372_v48  ;;  %vm380_vm4 = vcmp.lt.s32.totalorder %v376_v51, %v373_v49 }
 0x104   : > { %vm381_vm5 = vmand %vm379_vm3, %vm380_vm4 }
 0x105   : > { %vm382_vm6 = vmor %vm378_vm2, %vm381_vm5 }
 0x106   : > { %v383_v52 = vsel %vm382_vm6, %v375_v50, %v372_v48  ;;  %v384_v53 = vsel %vm382_vm6, %v376_v51, %v373_v49 }
 0x107   : > { %v386_v54 = vrot.slane %v383_v52, 1  ;;  %v387_v55 = vrot.slane %v384_v53, 1 }
 0x109   : > { %vm389_vm7 = vcmp.gt.s32.totalorder %v386_v54, %v383_v52  ;;  %vm390_vm8 = vcmp.eq.s32.totalorder %v386_v54, %v383_v52  ;;  %vm391_vm9 = vcmp.lt.s32.totalorder %v387_v55, %v384_v53 }
 0x10a   : > { %vm392_vm10 = vmand %vm390_vm8, %vm391_vm9 }
 0x10b   : > { %vm393_vm11 = vmor %vm389_vm7, %vm392_vm10 }
 0x10c   : > { %v394_v56 = vsel %vm393_vm11, %v386_v54, %v383_v52  ;;  %v395_v57 = vsel %vm393_vm11, %v387_v55, %v384_v53 }
 0x10d   : > { %v397_v58 = vrot.slane %v394_v56, 1  ;;  %v398_v59 = vrot.slane %v395_v57, 1 }
 0x10f   : > { %vm400_vm12 = vcmp.gt.s32.totalorder %v397_v58, %v394_v56  ;;  %vm401_vm13 = vcmp.eq.s32.totalorder %v397_v58, %v394_v56  ;;  %vm402_vm14 = vcmp.lt.s32.totalorder %v398_v59, %v395_v57 }
 0x110   : > { %vm403_vm15 = vmand %vm401_vm13, %vm402_vm14  ;;  %vm1141_vm13 = vcmp.ne.s32.totalorder (%p89_p2), %v563_v23, 0 }
 0x111   : > { %vm404_vm0 = vmor %vm400_vm12, %vm403_vm15 }
 0x112   : > { %v405_v60 = vsel %vm404_vm0, %v397_v58, %v394_v56  ;;  %v406_v61 = vsel %vm404_vm0, %v398_v59, %v395_v57 }
 0x113   : > { %v408_v62 = vrot.slane %v405_v60, 1  ;;  %v409_v63 = vrot.slane %v406_v61, 1 }
 0x115   : > { %vm411_vm1 = vcmp.gt.s32.totalorder %v408_v62, %v405_v60  ;;  %vm412_vm2 = vcmp.eq.s32.totalorder %v408_v62, %v405_v60  ;;  %vm413_vm3 = vcmp.lt.s32.totalorder %v409_v63, %v406_v61 }
 0x116   : > { %vm414_vm4 = vmand %vm412_vm2, %vm413_vm3 }
 0x117   : > { %vm415_vm5 = vmor %vm411_vm1, %vm414_vm4 }
 0x118   : > { %v417_v0 = vsel %vm415_vm5, %v409_v63, %v406_v61  ;;  %v416_v1 = vsel %vm415_vm5, %v408_v62, %v405_v60 }
 0x119   : > { %424 = vxpose.xlu0.b32.start.end [1/1] (short) (narrow) %v417_v0, 8  ;;  %420 = vst [vmem:[%s419_s13] sm:$0x1] %v416_v1  ;;  %422 = vst [vmem:[%s421_s14] sm:$0x1] %v417_v0  ;;  %s958_s13 = sshll.u32 (%p89_p2), %s1095_s0, 4  ;;  %s959_s13 = int_to_ptr.vmem [resolvable:$true] %s958_s13 }
 0x11a   :  { %s1054_s14 = scalar_lea.vmem (%p89_p2), %s959_s13, 32  ;;  %p1059_p4 = scmp.lt.s32.totalorder (%p89_p2), %s959_s13, %s959_s13 }
 0x11b   :  { %p1055_p3 = scmp.ne.s32.totalorder (%p89_p2), %s959_s13, %s1054_s14  ;;  %p1060_p5 = scmp.lt.s32.totalorder (%p89_p2), %s1054_s14, %s1054_s14 }
 0x11d   :  { %p1061_p6 = por (%p89_p2), %p1060_p5, %p1059_p4 }
 0x11f   :  { %p1062_p7 = pnand (%p89_p2), %p1061_p6, %p1055_p3 }
 0x120   :  { %v505_v11 = vld [vmem:[#allocation13 + $0x7] ss:$-1 sm:$0xff] (%p89_p2)  ;;  %v511_v12 = vld [vmem:[#allocation15 + $0x7] ss:$-1 sm:$0xff] (%p89_p2) }
 0x121   :  { %vm523_vm8 = vcmp.gt.s32.totalorder (%p89_p2), %v517_v13, %v505_v11  ;;  %vm524_vm9 = vcmp.eq.s32.totalorder (%p89_p2), %v517_v13, %v505_v11  ;;  %vm525_vm10 = vcmp.lt.s32.totalorder (%p89_p2), %v518_v14, %v511_v12 }
 0x122   :  { %vm526_vm11 = vmand (%p89_p2), %vm524_vm9, %vm525_vm10  ;;  %vm1154_vm9 = vcmp.ne.s32.totalorder (%p89_p2), %v591_v34, 0 }
 0x123   :  { %vm527_vm12 = vmor (%p89_p2), %vm523_vm8, %vm526_vm11 }
 0x124   :  { %v528_v20 = vsel (%p89_p2), %vm527_vm12, %v517_v13, %v505_v11  ;;  %v530_v21 = vsel (%p89_p2), %vm527_vm12, %v505_v11, %v517_v13  ;;  %v532_v22 = vsel (%p89_p2), %vm527_vm12, %v518_v14, %v511_v12  ;;  %v534_v24 = vsel (%p89_p2), %vm527_vm12, %v511_v12, %v518_v14 }
 0x199   : > { %v440_v2 = vpop.trf.xlu0 }
 0x19a   : > { %v479_v4 = vrot.slane %v440_v2, 1  ;;  %1031 = vpush %v440_v2 }
 0x19c   : > { %1033 = vpush %v479_v4 }
 0x1cb   : > { %s1032_s15 = spop %1031 }
 0x1cc   : > { %s457_s16 = sshrl.u32 %s1032_s15, 9  ;;  %s459_s17 = ssub.s32 0, %s1032_s15 }
 0x1cd   : > { %p458_p0 = scmp.lt.s32.totalorder %s1032_s15, 0  ;;  %s1023_s18 = smin.u32 %s1032_s15, %s459_s17 }
 0x1ce   : > { %s461_s19 = sand.u32 511, %s1023_s18   ;;  %s1025_s20 = sshll.u32 %s457_s16, 3 }
 0x1cf   : > { %s462_s21 = ssub.s32 0, %s461_s19  ;;  %s1034_s22 = spop %1033 }
 0x1d0   : > { %s1231_s21 = smov (!%p458_p0, %s462_s21), %s461_s19  ;;  %s483_s26 = ssub.s32 0, %s1034_s22 }
 0x1d1   : > { %s464_s23 = sshrl.u32 %s1231_s21, 7  ;;  %s466_s24 = sand.u32 127, %s1231_s21  }
 0x1d2   : > { %s1024_s25 = sshll.u32 %s464_s23, 8  ;;  %s1027_s28 = smin.u32 %s1034_s22, %s483_s26 }
 0x1d3   : > { %s467_s27 = sadd.s32 %s1024_s25, %s466_s24  ;;  %p482_p1 = scmp.lt.s32.totalorder %s1034_s22, 0 }
 0x1d4   : > { %v469_v5 = vstv %s467_s27  ;;  %s485_s29 = sand.u32 511, %s1027_s28   ;;  %s473_s3 = scalar_lea.vmem [#allocation16], %s1025_s20 }
 0x1d5   : > { %vm471_vm6 = vcmp.eq.s32.totalorder %v43_v3, %v469_v5  ;;  %s486_s30 = ssub.s32 0, %s485_s29  ;;  %s476_s4 = scalar_lea.vmem [#allocation17], %s1025_s20 }
 0x1d6   : > { %474 = vst.msk [vmem:[%s473_s3] sm:$0xff] %vm471_vm6, %v1090_v6  ;;  %477 = vst.msk [vmem:[%s476_s4] sm:$0xff] %vm471_vm6, %v1091_v8  ;;  %s1233_s30 = smov (!%p482_p1, %s486_s30), %s485_s29  ;;  %s481_s5 = sshrl.u32 %s1034_s22, 9 }
 0x1d7   : > { %s488_s6 = sshrl.u32 %s1233_s30, 7  ;;  %s490_s7 = sand.u32 127, %s1233_s30  }
 0x1d8   : > { %s1028_s8 = sshll.u32 %s488_s6, 8  ;;  %s1029_s10 = sshll.u32 %s481_s5, 3 }
 0x1d9   : > { %s491_s9 = sadd.s32 %s1028_s8, %s490_s7  ;;  %s497_s11 = scalar_lea.vmem [#allocation16], %s1029_s10 }
 0x1da   : > { %v493_v9 = vstv %s491_s9  ;;  %s500_s12 = scalar_lea.vmem [#allocation17], %s1029_s10  ;;  %91 = sbr.rel (!%p89_p2) target bundleno = 17 (0x11), region = 107 }
 0x1db   : > { %v494_v10 = vadd.s32 128, %v493_v9 }
 0x1dd   : > { %vm495_vm7 = vcmp.eq.s32.totalorder %v43_v3, %v494_v10  ;;  %v1136_v3 = vsub.s32 (%p89_p2), %v543_v19, %v1118_v7 }
 0x1de   : > { %498 = vst.msk [vmem:[%s497_s11] sm:$0xff] %vm495_vm7, %v1090_v6  ;;  %501 = vst.msk [vmem:[%s500_s12] sm:$0xff] %vm495_vm7, %v1091_v8 }
 0x1df   :  { %v547_v26 = vrot.slane (%p89_p2), %v528_v20, %v1136_v3  ;;  %v554_v27 = vrot.slane (%p89_p2), %v532_v22, %v1136_v3  ;;  %v728_v28 = vrot.slane (%p89_p2), %v530_v21, %v1136_v3  ;;  %v735_v30 = vrot.slane (%p89_p2), %v534_v24, %v1136_v3 }
 0x1e1   :  { %vm556_vm14 = vcmp.gt.s32.totalorder %v528_v20, %v547_v26  ;;  %vm557_vm15 = vcmp.eq.s32.totalorder %v528_v20, %v547_v26  ;;  %vm558_vm0 = vcmp.lt.s32.totalorder %v532_v22, %v554_v27  ;;  %vm738_vm2 = vcmp.eq.s32.totalorder %v530_v21, %v728_v28 }
 0x1e2   :  { %vm559_vm1 = vmand %vm557_vm15, %vm558_vm0  ;;  %vm739_vm3 = vcmp.lt.s32.totalorder %v534_v24, %v735_v30  ;;  %vm737_vm5 = vcmp.gt.s32.totalorder %v530_v21, %v728_v28 }
 0x1e3   :  { %vm560_vm4 = vmor %vm556_vm14, %vm559_vm1 }
 0x1e4   :  { %vm565_vm6 = vmxor %vm560_vm4, %vm1141_vm13 }
 0x1e5   :  { %v566_v35 = vsel %vm565_vm6, %v528_v20, %v547_v26  ;;  %v567_v36 = vsel %vm565_vm6, %v532_v22, %v554_v27  ;;  %vm740_vm7 = vmand %vm738_vm2, %vm739_vm3 }
 0x1e6   :  { %v575_v38 = vrot.slane %v566_v35, %v1147_v33  ;;  %v582_v39 = vrot.slane %v567_v36, %v1147_v33  ;;  %vm741_vm8 = vmor %vm737_vm5, %vm740_vm7 }
 0x1e7   :  { %vm746_vm10 = vmxor %vm741_vm8, %vm1141_vm13 }
 0x1e8   :  { %vm584_vm11 = vcmp.gt.s32.totalorder %v566_v35, %v575_v38  ;;  %vm585_vm12 = vcmp.eq.s32.totalorder %v566_v35, %v575_v38  ;;  %vm586_vm14 = vcmp.lt.s32.totalorder %v567_v36, %v582_v39  ;;  %v747_v41 = vsel %vm746_vm10, %v530_v21, %v728_v28 }
 0x1e9   :  { %vm587_vm15 = vmand %vm585_vm12, %vm586_vm14  ;;  %v748_v43 = vsel %vm746_vm10, %v534_v24, %v735_v30  ;;  %v756_v44 = vrot.slane %v747_v41, %v1147_v33 }
 0x1ea   :  { %vm588_vm0 = vmor %vm584_vm11, %vm587_vm15  ;;  %v763_v45 = vrot.slane %v748_v43, %v1147_v33  ;;  %vm1170_vm11 = vcmp.ne.s32.totalorder %v619_v46, 0 }
 0x1eb   :  { %vm593_vm1 = vmxor %vm588_vm0, %vm1154_vm9  ;;  %vm765_vm2 = vcmp.gt.s32.totalorder %v747_v41, %v756_v44  ;;  %vm766_vm3 = vcmp.eq.s32.totalorder %v747_v41, %v756_v44 }
 0x1ec   :  { %v594_v47 = vsel %vm593_vm1, %v566_v35, %v575_v38  ;;  %v595_v48 = vsel %vm593_vm1, %v567_v36, %v582_v39  ;;  %vm767_vm4 = vcmp.lt.s32.totalorder %v748_v43, %v763_v45 }
 0x1ed   :  { %v603_v49 = vrot.slane %v594_v47, %v1161_v42  ;;  %v610_v50 = vrot.slane %v595_v48, %v1161_v42  ;;  %vm768_vm5 = vmand %vm766_vm3, %vm767_vm4 }
 0x1ee   :  { %vm769_vm6 = vmor %vm765_vm2, %vm768_vm5 }
 0x1ef   :  { %vm612_vm7 = vcmp.gt.s32.totalorder %v594_v47, %v603_v49  ;;  %vm613_vm8 = vcmp.eq.s32.totalorder %v594_v47, %v603_v49  ;;  %vm614_vm10 = vcmp.lt.s32.totalorder %v595_v48, %v610_v50  ;;  %vm774_vm12 = vmxor %vm769_vm6, %vm1154_vm9 }
 0x1f0   :  { %vm615_vm14 = vmand %vm613_vm8, %vm614_vm10  ;;  %v775_v7 = vsel %vm774_vm12, %v747_v41, %v756_v44  ;;  %v776_v52 = vsel %vm774_vm12, %v748_v43, %v763_v45 }
 0x1f1   :  { %vm616_vm15 = vmor %vm612_vm7, %vm615_vm14  ;;  %v784_v53 = vrot.slane %v775_v7, %v1161_v42  ;;  %v791_v54 = vrot.slane %v776_v52, %v1161_v42 }
 0x1f2   :  { %vm621_vm0 = vmxor %vm616_vm15, %vm1170_vm11 }
 0x1f3   :  { %v622_v55 = vsel %vm621_vm0, %v594_v47, %v603_v49  ;;  %v623_v56 = vsel %vm621_vm0, %v595_v48, %v610_v50  ;;  %vm793_vm1 = vcmp.gt.s32.totalorder %v775_v7, %v784_v53  ;;  %vm794_vm2 = vcmp.eq.s32.totalorder %v775_v7, %v784_v53 }
 0x1f4   :  { %v637_v57 = vrot.slane %v622_v55, %v1136_v3  ;;  %v644_v58 = vrot.slane %v623_v56, %v1136_v3  ;;  %vm795_vm3 = vcmp.lt.s32.totalorder %v776_v52, %v791_v54 }
 0x1f5   :  { %vm796_vm4 = vmand %vm794_vm2, %vm795_vm3 }
 0x1f6   :  { %vm646_vm5 = vcmp.gt.s32.totalorder %v622_v55, %v637_v57  ;;  %vm647_vm6 = vcmp.eq.s32.totalorder %v622_v55, %v637_v57  ;;  %vm648_vm7 = vcmp.lt.s32.totalorder %v623_v56, %v644_v58  ;;  %vm797_vm8 = vmor %vm793_vm1, %vm796_vm4 }
 0x1f7   :  { %vm649_vm10 = vmand %vm647_vm6, %vm648_vm7 }
 0x1f8   :  { %vm650_vm12 = vmor %vm646_vm5, %vm649_vm10 }
 0x1f9   :  { %vm655_vm14 = vmxor %vm650_vm12, %vm1141_vm13 }
 0x1fa   :  { %v656_v59 = vsel %vm655_vm14, %v622_v55, %v637_v57  ;;  %v657_v60 = vsel %vm655_vm14, %v623_v56, %v644_v58  ;;  %vm802_vm15 = vmxor %vm797_vm8, %vm1170_vm11 }
 0x1fb   :  { %v665_v61 = vrot.slane %v656_v59, %v1147_v33  ;;  %v672_v62 = vrot.slane %v657_v60, %v1147_v33  ;;  %v803_v63 = vsel %vm802_vm15, %v775_v7, %v784_v53  ;;  %v804_v0 = vsel %vm802_vm15, %v776_v52, %v791_v54 }
 0x1fc   :  { %v818_v1 = vrot.slane %v803_v63, %v1136_v3  ;;  %v825_v2 = vrot.slane %v804_v0, %v1136_v3 }
 0x1fd   :  { %vm674_vm0 = vcmp.gt.s32.totalorder %v656_v59, %v665_v61  ;;  %vm675_vm1 = vcmp.eq.s32.totalorder %v656_v59, %v665_v61  ;;  %vm676_vm2 = vcmp.lt.s32.totalorder %v657_v60, %v672_v62 }
 0x1fe   :  { %vm677_vm3 = vmand %vm675_vm1, %vm676_vm2  ;;  %vm828_vm4 = vcmp.eq.s32.totalorder %v803_v63, %v818_v1  ;;  %vm829_vm5 = vcmp.lt.s32.totalorder %v804_v0, %v825_v2  ;;  %vm827_vm7 = vcmp.gt.s32.totalorder %v803_v63, %v818_v1 }
 0x1ff   :  { %vm678_vm6 = vmor %vm674_vm0, %vm677_vm3 }
 0x200   :  { %vm683_vm8 = vmxor %vm678_vm6, %vm1154_vm9 }
 0x201   :  { %v684_v4 = vsel %vm683_vm8, %v656_v59, %v665_v61  ;;  %v685_v5 = vsel %vm683_vm8, %v657_v60, %v672_v62  ;;  %vm830_vm10 = vmand %vm828_vm4, %vm829_vm5 }
 0x202   :  { %v693_v6 = vrot.slane %v684_v4, %v1161_v42  ;;  %v700_v8 = vrot.slane %v685_v5, %v1161_v42  ;;  %vm831_vm12 = vmor %vm827_vm7, %vm830_vm10 }
 0x203   :  { %vm836_vm14 = vmxor %vm831_vm12, %vm1141_vm13 }
 0x204   :  { %vm702_vm15 = vcmp.gt.s32.totalorder %v684_v4, %v693_v6  ;;  %vm703_vm1 = vcmp.eq.s32.totalorder %v684_v4, %v693_v6  ;;  %vm704_vm2 = vcmp.lt.s32.totalorder %v685_v5, %v700_v8  ;;  %v837_v9 = vsel %vm836_vm14, %v803_v63, %v818_v1 }
 0x205   :  { %vm705_vm0 = vmand %vm703_vm1, %vm704_vm2  ;;  %v838_v10 = vsel %vm836_vm14, %v804_v0, %v825_v2  ;;  %v846_v11 = vrot.slane %v837_v9, %v1147_v33 }
 0x206   :  { %vm706_vm3 = vmor %vm702_vm15, %vm705_vm0  ;;  %v853_v12 = vrot.slane %v838_v10, %v1147_v33 }
 0x207   :  { %vm711_vm4 = vmxor %vm706_vm3, %vm1170_vm11  ;;  %vm855_vm5 = vcmp.gt.s32.totalorder %v837_v9, %v846_v11  ;;  %vm856_vm6 = vcmp.eq.s32.totalorder %v837_v9, %v846_v11 }
 0x208   :  { %v712_v13 = vsel %vm711_vm4, %v684_v4, %v693_v6  ;;  %v713_v14 = vsel %vm711_vm4, %v685_v5, %v700_v8  ;;  %vm857_vm7 = vcmp.lt.s32.totalorder %v838_v10, %v853_v12 }
 0x209   :  { %715 = vst [vmem:[#allocation12] sm:$0xff] %v712_v13  ;;  %716 = vst [vmem:[#allocation14] sm:$0xff] %v713_v14 }
 0x20a   :  { %vm858_vm13 = vmand %vm856_vm6, %vm857_vm7 }
 0x20b   :  { %vm859_vm8 = vmor %vm855_vm5, %vm858_vm13 }
 0x20c   :  { %vm864_vm10 = vmxor %vm859_vm8, %vm1154_vm9 }
 0x20d   :  { %v865_v15 = vsel %vm864_vm10, %v837_v9, %v846_v11  ;;  %v866_v16 = vsel %vm864_vm10, %v838_v10, %v853_v12 }
 0x20e   :  { %v874_v17 = vrot.slane %v865_v15, %v1161_v42  ;;  %v881_v18 = vrot.slane %v866_v16, %v1161_v42 }
 0x210   :  { %vm883_vm12 = vcmp.gt.s32.totalorder %v865_v15, %v874_v17  ;;  %vm884_vm14 = vcmp.eq.s32.totalorder %v865_v15, %v874_v17  ;;  %vm885_vm15 = vcmp.lt.s32.totalorder %v866_v16, %v881_v18  ;;  %v923_v21 = vld [vmem:[#allocation14] sm:$0xff]  ;;  %v899_v22 = vld [vmem:[#allocation12] sm:$0xff] }
 0x211   :  { %vm886_vm1 = vmand %vm884_vm14, %vm885_vm15  ;;  %924 = vxpose.xlu0.b32.start.end [1/1] (short) (narrow) %v923_v21, 8  ;;  %vm900_vm9 = vcmp.lt.s32.totalorder %v899_v22, 0  ;;  %v901_v23 = vsub.s32 2147483647, %v899_v22 }
 0x212   :  { %vm887_vm2 = vmor %vm883_vm12, %vm886_vm1 }
 0x213   :  { %vm892_vm0 = vmxor %vm887_vm2, %vm1170_vm11  ;;  %v902_v24 = vsel %vm900_vm9, %v901_v23, %v899_v22 }
 0x214   :  { %v893_v19 = vsel %vm892_vm0, %v865_v15, %v874_v17  ;;  %v894_v20 = vsel %vm892_vm0, %v866_v16, %v881_v18  ;;  %903 = vst [vmem:[#allocation12] sm:$0xff] %v902_v24 }
 0x215   :  { %896 = vst [vmem:[#allocation13] sm:$0xff] %v893_v19  ;;  %897 = vst [vmem:[#allocation15] sm:$0xff] %v894_v20  ;;  %905 = vxpose.xlu0.b32.start.end [1/1] (short) (narrow) %v902_v24, 8 }
 0x291   :  { %v925_v3 = vpop.trf.xlu0 }
 0x292   :  { %941 = vst [vmem:[#allocation10] sm:$0xff] %v925_v3 }
 0x295   :  { %v906_v25 = vpop.trf.xlu0 }
 0x296   :  { %922 = vst [vmem:[#allocation7] sm:$0xff] %v906_v25 }
 0x299   :  { %v951_v26 = vld [vmem:[#allocation10] sm:$0x3] }
 0x29a   :  { %953 = vst [vmem:[#allocation11] sm:$0x3] %v951_v26 }
 0x29d   :  { %v945_v27 = vld [vmem:[#allocation7] sm:$0x3] }
 0x29e   :  { %947 = vst [vmem:[#allocation8] sm:$0x3] %v945_v27 }
 0x29f   :  { %1065 = shalt.err (!%p1062_p7)
}
 0x2a0   :  { %s1066_s17 = scalar_lea.hbm %s1222_s1, 32 }
 0x2a1   :  { %p1067_p8 = scmp.ne.s32.totalorder %s1222_s1, %s1066_s17  ;;  %p1070_p9 = scmp.lt.u32.totalorder %s1066_s17, %s1222_s1 }
 0x2a3   :  { %p1072_p10 = pnand %p1070_p9, %p1067_p8 }
 0x2a5   :  { %1075 = shalt.err (!%p1072_p10)
}
 0x2a6   :  { %961 = dma.vmem_to_hbm [thread:$0]  %s959_s13, 32, %s1222_s1, [#allocation9]   ;;  %v977_v28 = vld [vmem:[#allocation11] sm:$0x3] }
 0x2a7   :  { %978 = vst [vmem:[%s1223_s2] sm:$0x3] %v977_v28 }
 0x2a8   :  { %1080 = dma.done.wait [#allocation9], 32  }
 0x2a9   :  { %1081 = vsyncadd [#allocation9], 4294967264 }
 0x2aa   :  { %994 = vsyncpa [#allocation9], 1 }

// kernel: faster_rcnn_forward.6
= control target key start
LH: loop header
LB: loop body
LE: loop exit
PB: predicated region body
PF: predicated region fallthrough
CT: control target
= control target key end

     0   :  { %s1497_s9 = smov 0   ;;  %s1499_s10 = smov 0   ;;  %s1621_s0 = inlined_call_operand.vmem [shape: bf16[2,416,256], index: 0, kind: input, shape index: {}]   ;;  %s1622_s1 = inlined_call_operand.vmem [shape: bf16[2,256,128], index: 1, kind: input, shape index: {}]   ;;  %s1623_s2 = inlined_call_operand.vmem [shape: bf16[2,416,128], index: 2, kind: output, shape index: {}]  }
   0x1   :  { %s1501_s11 = smov 0   ;;  %s1503_s12 = smov 0  }
   0x2   :  { %s1505_s13 = smov 0  }
   0x3 LB: > { %s27_s14 = sadd.s32 1, %s1472_s11  ;;  %s31_s15 = sadd.s32 1, %s1476_s12  ;;  %s1480_s13 = sphi %s1505_s13, %s12_s13   ;;  %s1476_s12 = sphi %s1503_s12, %s1627_s12   ;;  %s1472_s11 = sphi %s1501_s11, %s1626_s11   ;;  %s1468_s10 = sphi %s1499_s10, %s1625_s10   ;;  %s1464_s9 = sphi %s1497_s9, %s1624_s9  }
   0x4   : > { %p29_p0 = scmp.ge.s32.totalorder %s27_s14, 2  ;;  %p1055_p1 = scmp.ge.s32.totalorder %s1480_s13, 1 }
   0x5   : > { %p165_p2 = scmp.lt.s32.totalorder %s1480_s13, 5 }
   0x6   : > { %s1629_s14 = smov (%p29_p0, %s27_s14), 0  ;;  %s1631_s15 = smov (!%p29_p0, %s31_s15), %s1476_s12 }
   0x7   : > { %p166_p3 = pnand %p1055_p1, %p165_p2  ;;  %p33_p4 = scmp.ge.s32.totalorder %s1631_s15, 2 }
   0x8   : > { %p211_p5 = scmp.lt.s32.totalorder (!%p166_p3), %s1468_s10, 1  ;;  %s209_s16 = smul.u32 (!%p166_p3), 26, %s1464_s9 }
   0x9   : > { %s1633_s15 = smov (%p33_p4, %s1631_s15), 0  ;;  %169 = sbr.rel (%p166_p3) target bundleno = 320 (0x140), region = 28 }
   0xa   : > { %p213_p6 = scmp.lt.s32.totalorder (!%p166_p3), %s209_s16, 51 }
  0x10   : > { %s1635_s10 = smov (!%p211_p5, %s1468_s10), 1  ;;  %s1637_s16 = smov (!%p213_p6, %s209_s16), 51 }
  0x11   : > { %s1131_s17 = sshll.u32 %s1635_s10, 7  ;;  %s1345_s21 = smul.u32 104, %s1635_s10 }
  0x12   : > { %s1533_s20 = scalar_lea.vmem %s1622_s1, %s1131_s17  ;;  %s1056_s22 = sshll.u32 %s1637_s16, 1 }
  0x13   : > { %v1387_v0 = vld [vmem:[%s1533_s20 + $0x40] sm:$0xff]   ;;  %v1389_v2 = vld [vmem:[%s1533_s20 + $0x48] sm:$0xff]   ;;  %v1391_v4 = vld [vmem:[%s1533_s20 + $0x50] sm:$0xff]   ;;  %s220_s23 = sadd.s32 %s1345_s21, %s1056_s22  ;;  %s1346_s28 = smul.u32 52, %s1635_s10 }
  0x14   : > { %v1388_v1 = vld [vmem:[%s1533_s20] sm:$0xff]   ;;  %1235 = vmatprep.subr.bf16.mxu0 %v1387_v0  ;;  %1329 = vmatprep.subr.bf16.mxu1 %v1387_v0  ;;  %v1390_v3 = vld [vmem:[%s1533_s20 + $0x8] sm:$0xff]   ;;  %v1392_v5 = vld [vmem:[%s1533_s20 + $0x10] sm:$0xff]   ;;  %s1057_s24 = sshll.u32 %s220_s23, 2 }
  0x15   : > { %1236 = vmatpush3.bf16.msra.mxu0 %v1388_v1  ;;  %1337 = vmatpush3.bf16.msra.mxu1 %v1388_v1  ;;  %v1393_v6 = vld [vmem:[%s1533_s20 + $0x58] sm:$0xff]   ;;  %v1395_v8 = vld [vmem:[%s1533_s20 + $0x60] sm:$0xff]   ;;  %s1551_s27 = scalar_lea.vmem %s1621_s0, %s1057_s24  ;;  %v1397_v10 = vld [vmem:[%s1533_s20 + $0x68] sm:$0xff]   ;;  %s241_s29 = sadd.s32 %s1346_s28, %s1637_s16 }
  0x16   : > { %1237 = vmatprep.subr.bf16.mxu0 %v1389_v2  ;;  %1330 = vmatprep.subr.bf16.mxu1 %v1389_v2  ;;  %v1394_v7 = vld [vmem:[%s1533_s20 + $0x18] sm:$0xff]   ;;  %v1396_v9 = vld [vmem:[%s1533_s20 + $0x20] sm:$0xff]   ;;  %v1398_v13 = vld [vmem:[%s1533_s20 + $0x28] sm:$0xff]   ;;  %s1060_s30 = sshll.u32 %s241_s29, 2 }
  0x17   : > { %v1405_v11 = vld [vmem:[%s1551_s27 + $0x4] ss:$8 sps:$4 sm:$0xff]   ;;  %v1408_v12 = vld [vmem:[%s1551_s27 + $0x74] ss:$8 sps:$4 sm:$0xff]   ;;  %v1403_v18 = vld [vmem:[%s1551_s27] ss:$8 sps:$4 sm:$0xff]   ;;  %s1591_s5 = scalar_lea.vmem %s1623_s2, %s1060_s30 }
  0x18   : > { %v1399_v14 = vld [vmem:[%s1533_s20 + $0x70] sm:$0xff]   ;;  %618 = vmatprep.mubr.bf16.mxu0 %v1405_v11  ;;  %674 = vmatprep.mubr.bf16.mxu1 %v1408_v12  ;;  %v1401_v16 = vld [vmem:[%s1533_s20 + $0x78] sm:$0xff]   ;;  %v1412_v21 = vld [vmem:[%s1551_s27 + $0x84] ss:$8 sps:$4 sm:$0xff]  }
  0x19   : > { %1238 = vmatpush3.bf16.msra.mxu0 %v1390_v3  ;;  %1338 = vmatpush3.bf16.msra.mxu1 %v1390_v3  ;;  %v1400_v15 = vld [vmem:[%s1533_s20 + $0x30] sm:$0xff]   ;;  %v1402_v17 = vld [vmem:[%s1533_s20 + $0x38] sm:$0xff]   ;;  %v1414_v23 = vld [vmem:[%s1551_s27 + $0x80] ss:$8 sps:$4 sm:$0xff]  }
  0x1a   : > { %1239 = vmatprep.subr.bf16.mxu0 %v1391_v4  ;;  %1331 = vmatprep.subr.bf16.mxu1 %v1391_v4  ;;  %v1406_v19 = vld [vmem:[%s1551_s27 + $0x70] ss:$8 sps:$4 sm:$0xff]   ;;  %v1409_v20 = vld [vmem:[%s1551_s27 + $0x14] ss:$8 sps:$4 sm:$0xff]   ;;  %v1415_v24 = vld [vmem:[%s1551_s27 + $0x24] ss:$8 sps:$4 sm:$0xff]  }
  0x1b   : > { %v1411_v22 = vld [vmem:[%s1551_s27 + $0x10] ss:$8 sps:$4 sm:$0xff]   ;;  %v1418_v25 = vld [vmem:[%s1551_s27 + $0x94] ss:$8 sps:$4 sm:$0xff]   ;;  %v1417_v26 = vld [vmem:[%s1551_s27 + $0x20] ss:$8 sps:$4 sm:$0xff]  }
  0x1c   : > { %v1420_v27 = vld [vmem:[%s1551_s27 + $0x90] ss:$8 sps:$4 sm:$0xff]   ;;  %v1421_v28 = vld [vmem:[%s1551_s27 + $0x34] ss:$8 sps:$4 sm:$0xff]   ;;  %v1424_v29 = vld [vmem:[%s1551_s27 + $0xa4] ss:$8 sps:$4 sm:$0xff]  }
  0x1d   : > { %1240 = vmatpush3.bf16.msra.mxu0 %v1392_v5  ;;  %1339 = vmatpush3.bf16.msra.mxu1 %v1392_v5  ;;  %v1423_v30 = vld [vmem:[%s1551_s27 + $0x30] ss:$8 sps:$4 sm:$0xff]   ;;  %v1426_v31 = vld [vmem:[%s1551_s27 + $0xa0] ss:$8 sps:$4 sm:$0xff]   ;;  %v1427_v32 = vld [vmem:[%s1551_s27 + $0x44] ss:$8 sps:$4 sm:$0xff]  }
  0x1e   : > { %1241 = vmatprep.subr.bf16.mxu0 %v1393_v6  ;;  %1332 = vmatprep.subr.bf16.mxu1 %v1393_v6  ;;  %v1430_v33 = vld [vmem:[%s1551_s27 + $0xb4] ss:$8 sps:$4 sm:$0xff]   ;;  %v1429_v34 = vld [vmem:[%s1551_s27 + $0x40] ss:$8 sps:$4 sm:$0xff]   ;;  %v1432_v35 = vld [vmem:[%s1551_s27 + $0xb0] ss:$8 sps:$4 sm:$0xff]  }
  0x1f   : > { %v1433_v36 = vld [vmem:[%s1551_s27 + $0x54] ss:$8 sps:$4 sm:$0xff]   ;;  %v1436_v37 = vld [vmem:[%s1551_s27 + $0xc4] ss:$8 sps:$4 sm:$0xff]   ;;  %v1435_v38 = vld [vmem:[%s1551_s27 + $0x50] ss:$8 sps:$4 sm:$0xff]  }
  0x20   : > { %v1438_v39 = vld [vmem:[%s1551_s27 + $0xc0] ss:$8 sps:$4 sm:$0xff]   ;;  %v1439_v40 = vld [vmem:[%s1551_s27 + $0x64] ss:$8 sps:$4 sm:$0xff]  }
  0x21   : > { %1242 = vmatpush3.bf16.msra.mxu0 %v1394_v7  ;;  %1340 = vmatpush3.bf16.msra.mxu1 %v1394_v7  ;;  %v1441_v41 = vld [vmem:[%s1551_s27 + $0x60] ss:$8 sps:$4 sm:$0xff]  }
  0x22   : > { %1243 = vmatprep.subr.bf16.mxu0 %v1395_v8  ;;  %1333 = vmatprep.subr.bf16.mxu1 %v1395_v8 }
  0x25   : > { %1244 = vmatpush3.bf16.msra.mxu0 %v1396_v9  ;;  %1341 = vmatpush3.bf16.msra.mxu1 %v1396_v9 }
  0x26   : > { %1245 = vmatprep.subr.bf16.mxu0 %v1397_v10  ;;  %1334 = vmatprep.subr.bf16.mxu1 %v1397_v10 }
  0x29   : > { %1246 = vmatpush3.bf16.msra.mxu0 %v1398_v13  ;;  %1342 = vmatpush3.bf16.msra.mxu1 %v1398_v13 }
  0x2a   : > { %1247 = vmatprep.subr.bf16.mxu0 %v1399_v14  ;;  %1335 = vmatprep.subr.bf16.mxu1 %v1399_v14 }
  0x2d   : > { %1248 = vmatpush3.bf16.msra.mxu0 %v1400_v15  ;;  %1343 = vmatpush3.bf16.msra.mxu1 %v1400_v15 }
  0x2e   : > { %1249 = vmatprep.subr.bf16.mxu0 %v1401_v16  ;;  %1336 = vmatprep.subr.bf16.mxu1 %v1401_v16 }
  0x31   : > { %1250 = vmatpush3.bf16.msra.mxu0 %v1402_v17  ;;  %1344 = vmatpush3.bf16.msra.mxu1 %v1402_v17 }
  0x34   : > { %619 = vmatmul.mubr.bf16.vlgmr.msra.gmra.mrb[0].mxu0 %v1403_v18  ;;  %675 = vmatmul.mubr.bf16.vlgmr.msra.gmra.mrb[0].mxu1 %v1406_v19 }
  0x35   : > { %626 = vmatprep.mubr.bf16.mxu0 %v1409_v20  ;;  %682 = vmatprep.mubr.bf16.mxu1 %v1412_v21 }
  0x3c   : > { %627 = vmatmul.mubr.bf16.gmra.mrb[4].mxu0 %v1411_v22  ;;  %683 = vmatmul.mubr.bf16.gmra.mrb[4].mxu1 %v1414_v23 }
  0x3d   : > { %634 = vmatprep.mubr.bf16.mxu0 %v1415_v24  ;;  %690 = vmatprep.mubr.bf16.mxu1 %v1418_v25 }
  0x44   : > { %635 = vmatmul.mubr.bf16.gmra.mrb[8].mxu0 %v1417_v26  ;;  %691 = vmatmul.mubr.bf16.gmra.mrb[8].mxu1 %v1420_v27 }
  0x45   : > { %642 = vmatprep.mubr.bf16.mxu0 %v1421_v28  ;;  %698 = vmatprep.mubr.bf16.mxu1 %v1424_v29 }
  0x4c   : > { %643 = vmatmul.mubr.bf16.gmra.mrb[12].mxu0 %v1423_v30  ;;  %699 = vmatmul.mubr.bf16.gmra.mrb[12].mxu1 %v1426_v31 }
  0x4d   : > { %650 = vmatprep.mubr.bf16.mxu0 %v1427_v32  ;;  %706 = vmatprep.mubr.bf16.mxu1 %v1430_v33 }
  0x54   : > { %651 = vmatmul.mubr.bf16.gmra.mrb[16].mxu0 %v1429_v34  ;;  %707 = vmatmul.mubr.bf16.gmra.mrb[16].mxu1 %v1432_v35 }
  0x55   : > { %658 = vmatprep.mubr.bf16.mxu0 %v1433_v36  ;;  %714 = vmatprep.mubr.bf16.mxu1 %v1436_v37 }
  0x5c   : > { %659 = vmatmul.mubr.bf16.gmra.mrb[20].mxu0 %v1435_v38  ;;  %715 = vmatmul.mubr.bf16.gmra.mrb[20].mxu1 %v1438_v39 }
  0x5d   : > { %666 = vmatprep.mubr.bf16.mxu0 %v1439_v40 }
  0x64   : > { %667 = vmatmul.mubr.bf16.gmra.mrb[24].mxu0 %v1441_v41 }
 0x107   : > { %v1251_v42 = vpop.f32.mrb[0].mxu0  ;;  %v1293_v43 = vpop.f32.mrb[0].mxu1 }
 0x108   : > { %v1252_v44 = vpop.f32.mrb[1].mxu0  ;;  %v1294_v45 = vpop.f32.mrb[1].mxu1 }
 0x109   : > { %v1253_v46 = vadd.f32 %v1252_v44, %v1251_v42  ;;  %v1254_v47 = vpop.f32.mrb[2].mxu0  ;;  %v1295_v48 = vadd.f32 %v1294_v45, %v1293_v43  ;;  %v1296_v49 = vpop.f32.mrb[2].mxu1 }
 0x10a   : > { %v1255_v50 = vpop.f32.mrb[3].mxu0  ;;  %v1297_v51 = vpop.f32.mrb[3].mxu1 }
 0x10b   : > { %v1256_v52 = vadd.f32 %v1255_v50, %v1254_v47  ;;  %v1298_v53 = vadd.f32 %v1297_v51, %v1296_v49 }
 0x10d   : > { %v1161_v54 = vpack.c.bf16 %v1256_v52, %v1253_v46  ;;  %v1196_v55 = vpack.c.bf16 %v1298_v53, %v1295_v48 }
 0x10f   : > { %1162 = vst [vmem:[%s1591_s5] sm:$0xff] %v1161_v54   ;;  %v1257_v56 = vpop.f32.mrb[4].mxu0  ;;  %1229 = vst [vmem:[%s1591_s5 + $0x38] sm:$0xff] %v1196_v55   ;;  %v1299_v57 = vpop.f32.mrb[4].mxu1 }
 0x110   : > { %v1258_v58 = vpop.f32.mrb[5].mxu0  ;;  %v1300_v59 = vpop.f32.mrb[5].mxu1 }
 0x111   : > { %v1259_v60 = vadd.f32 %v1258_v58, %v1257_v56  ;;  %v1260_v61 = vpop.f32.mrb[6].mxu0  ;;  %v1301_v62 = vadd.f32 %v1300_v59, %v1299_v57  ;;  %v1302_v63 = vpop.f32.mrb[6].mxu1 }
 0x112   : > { %v1261_v0 = vpop.f32.mrb[7].mxu0  ;;  %v1303_v1 = vpop.f32.mrb[7].mxu1 }
 0x113   : > { %v1262_v2 = vadd.f32 %v1261_v0, %v1260_v61  ;;  %v1304_v3 = vadd.f32 %v1303_v1, %v1302_v63 }
 0x115   : > { %v1166_v4 = vpack.c.bf16 %v1262_v2, %v1259_v60  ;;  %v1201_v5 = vpack.c.bf16 %v1304_v3, %v1301_v62 }
 0x117   : > { %1223 = vst [vmem:[%s1591_s5 + $0x8] sm:$0xff] %v1166_v4   ;;  %v1263_v6 = vpop.f32.mrb[8].mxu0  ;;  %1230 = vst [vmem:[%s1591_s5 + $0x40] sm:$0xff] %v1201_v5   ;;  %v1305_v7 = vpop.f32.mrb[8].mxu1 }
 0x118   : > { %v1264_v8 = vpop.f32.mrb[9].mxu0  ;;  %v1306_v9 = vpop.f32.mrb[9].mxu1 }
 0x119   : > { %v1265_v10 = vadd.f32 %v1264_v8, %v1263_v6  ;;  %v1266_v11 = vpop.f32.mrb[10].mxu0  ;;  %v1307_v12 = vadd.f32 %v1306_v9, %v1305_v7  ;;  %v1308_v13 = vpop.f32.mrb[10].mxu1 }
 0x11a   : > { %v1267_v14 = vpop.f32.mrb[11].mxu0  ;;  %v1309_v15 = vpop.f32.mrb[11].mxu1 }
 0x11b   : > { %v1268_v16 = vadd.f32 %v1267_v14, %v1266_v11  ;;  %v1310_v17 = vadd.f32 %v1309_v15, %v1308_v13 }
 0x11d   : > { %v1171_v18 = vpack.c.bf16 %v1268_v16, %v1265_v10  ;;  %v1206_v19 = vpack.c.bf16 %v1310_v17, %v1307_v12 }
 0x11f   : > { %1224 = vst [vmem:[%s1591_s5 + $0x10] sm:$0xff] %v1171_v18   ;;  %v1269_v20 = vpop.f32.mrb[12].mxu0  ;;  %1231 = vst [vmem:[%s1591_s5 + $0x48] sm:$0xff] %v1206_v19   ;;  %v1311_v21 = vpop.f32.mrb[12].mxu1 }
 0x120   : > { %v1270_v22 = vpop.f32.mrb[13].mxu0  ;;  %v1312_v23 = vpop.f32.mrb[13].mxu1 }
 0x121   : > { %v1271_v24 = vadd.f32 %v1270_v22, %v1269_v20  ;;  %v1272_v25 = vpop.f32.mrb[14].mxu0  ;;  %v1313_v26 = vadd.f32 %v1312_v23, %v1311_v21  ;;  %v1314_v27 = vpop.f32.mrb[14].mxu1 }
 0x122   : > { %v1273_v28 = vpop.f32.mrb[15].mxu0  ;;  %v1315_v29 = vpop.f32.mrb[15].mxu1 }
 0x123   : > { %v1274_v30 = vadd.f32 %v1273_v28, %v1272_v25  ;;  %v1316_v31 = vadd.f32 %v1315_v29, %v1314_v27 }
 0x125   : > { %v1176_v32 = vpack.c.bf16 %v1274_v30, %v1271_v24  ;;  %v1211_v33 = vpack.c.bf16 %v1316_v31, %v1313_v26 }
 0x127   : > { %1225 = vst [vmem:[%s1591_s5 + $0x18] sm:$0xff] %v1176_v32   ;;  %v1275_v34 = vpop.f32.mrb[16].mxu0  ;;  %1232 = vst [vmem:[%s1591_s5 + $0x50] sm:$0xff] %v1211_v33   ;;  %v1317_v35 = vpop.f32.mrb[16].mxu1 }
 0x128   : > { %v1276_v36 = vpop.f32.mrb[17].mxu0  ;;  %v1318_v37 = vpop.f32.mrb[17].mxu1 }
 0x129   : > { %v1277_v38 = vadd.f32 %v1276_v36, %v1275_v34  ;;  %v1278_v39 = vpop.f32.mrb[18].mxu0  ;;  %v1319_v40 = vadd.f32 %v1318_v37, %v1317_v35  ;;  %v1320_v41 = vpop.f32.mrb[18].mxu1 }
 0x12a   : > { %v1279_v42 = vpop.f32.mrb[19].mxu0  ;;  %v1321_v43 = vpop.f32.mrb[19].mxu1 }
 0x12b   : > { %v1280_v44 = vadd.f32 %v1279_v42, %v1278_v39  ;;  %v1322_v45 = vadd.f32 %v1321_v43, %v1320_v41 }
 0x12d   : > { %v1181_v46 = vpack.c.bf16 %v1280_v44, %v1277_v38  ;;  %v1216_v47 = vpack.c.bf16 %v1322_v45, %v1319_v40 }
 0x12f   : > { %1226 = vst [vmem:[%s1591_s5 + $0x20] sm:$0xff] %v1181_v46   ;;  %v1281_v48 = vpop.f32.mrb[20].mxu0  ;;  %1233 = vst [vmem:[%s1591_s5 + $0x58] sm:$0xff] %v1216_v47   ;;  %v1323_v49 = vpop.f32.mrb[20].mxu1 }
 0x130   : > { %v1282_v50 = vpop.f32.mrb[21].mxu0  ;;  %v1324_v51 = vpop.f32.mrb[21].mxu1 }
 0x131   : > { %v1283_v52 = vadd.f32 %v1282_v50, %v1281_v48  ;;  %v1284_v53 = vpop.f32.mrb[22].mxu0  ;;  %v1325_v54 = vadd.f32 %v1324_v51, %v1323_v49  ;;  %v1326_v55 = vpop.f32.mrb[22].mxu1 }
 0x132   : > { %v1285_v56 = vpop.f32.mrb[23].mxu0  ;;  %v1327_v57 = vpop.f32.mrb[23].mxu1 }
 0x133   : > { %v1286_v58 = vadd.f32 %v1285_v56, %v1284_v53  ;;  %v1328_v59 = vadd.f32 %v1327_v57, %v1326_v55 }
 0x135   : > { %v1186_v60 = vpack.c.bf16 %v1286_v58, %v1283_v52  ;;  %v1221_v61 = vpack.c.bf16 %v1328_v59, %v1325_v54 }
 0x137   : > { %1227 = vst [vmem:[%s1591_s5 + $0x28] sm:$0xff] %v1186_v60   ;;  %v1287_v62 = vpop.f32.mrb[24].mxu0  ;;  %1234 = vst [vmem:[%s1591_s5 + $0x60] sm:$0xff] %v1221_v61  }
 0x138   : > { %v1288_v63 = vpop.f32.mrb[25].mxu0 }
 0x139   : > { %v1289_v0 = vadd.f32 %v1288_v63, %v1287_v62  ;;  %v1290_v1 = vpop.f32.mrb[26].mxu0 }
 0x13a   : > { %v1291_v2 = vpop.f32.mrb[27].mxu0 }
 0x13b   : > { %v1292_v3 = vadd.f32 %v1291_v2, %v1290_v1 }
 0x13d   : > { %v1191_v4 = vpack.c.bf16 %v1292_v3, %v1289_v0 }
 0x13f   : > { %1228 = vst [vmem:[%s1591_s5 + $0x30] sm:$0xff] %v1191_v4  }
 0x140 PF: > { %s12_s13 = sadd.s32 1, %s1480_s13   ;;  %s1624_s9 = smov %s1472_s11 }
 0x141   : > { %p9_p7 = scmp.ge.s32.totalorder %s12_s13, 6   ;;  %s1625_s10 = smov %s1476_s12 }
 0x142   : > { %s1626_s11 = smov %s1629_s14  ;;  %s1627_s12 = smov %s1633_s15 }
 0x143   :  { %11 = sbr.rel (!%p9_p7) target bundleno = 3 (0x3), region = 69 }

// kernel: faster_rcnn_forward.7
= control target key start
LH: loop header
LB: loop body
LE: loop exit
PB: predicated region body
PF: predicated region fallthrough
CT: control target
= control target key end

     0   :  { %s2373_s18 = smov 0   ;;  %s2375_s19 = smov 0   ;;  %s2601_s0 = inlined_call_operand.vmem [shape: bf16[16,6656], index: 0, kind: input, shape index: {}]   ;;  %s2602_s1 = inlined_call_operand.vmem [shape: bf16[6656,128], index: 1, kind: input, shape index: {}]   ;;  %s2603_s2 = inlined_call_operand.vmem [shape: f32[1,128], index: 2, kind: input, shape index: {}]   ;;  %s2604_s3 = inlined_call_operand.vmem [shape: bf16[128,128], index: 3, kind: input, shape index: {}]   ;;  %s2605_s4 = inlined_call_operand.vmem [shape: f32[1,128], index: 4, kind: input, shape index: {}]   ;;  %s2606_s5 = inlined_call_operand.vmem [shape: f32[16,128], index: 5, kind: output, shape index: {}]  }
   0x1   :  { %s2377_s20 = smov 0   ;;  %s2379_s21 = smov 0  }
   0x2   :  { %s2381_s22 = smov 0  }
   0x3 LB: > { %s24_s23 = sadd.s32 1, %s2332_s21  ;;  %p43_p1 = scmp.ne.s32.totalorder %s2324_s19, %s2320_s18  ;;  %s2336_s22 = sphi %s2381_s22, %s15_s22   ;;  %s2332_s21 = sphi %s2379_s21, %s2610_s21   ;;  %s2328_s20 = sphi %s2377_s20, %s2609_s20   ;;  %s2324_s19 = sphi %s2375_s19, %s2608_s19   ;;  %s2320_s18 = sphi %s2373_s18, %s2607_s18  }
   0x4   : > { %p25_p0 = scmp.ge.s32.totalorder %s24_s23, 4  ;;  %p44_p2 = scmp.eq.s32.totalorder %s2336_s22, 0 }
   0x5   : > { %s36_s25 = sadd.s32 1, %s2324_s19  ;;  %p1780_p5 = scmp.ge.s32.totalorder %s2336_s22, 4 }
   0x6   : > { %s2612_s23 = smov (%p25_p0, %s24_s23), 0  ;;  %p45_p3 = por %p44_p2, %p43_p1 }
   0x7   : > { %s32_s24 = ssub.s32 %s2332_s21, %s2612_s23  ;;  %193 = sbr.rel (%p1780_p5) target bundleno = 26 (0x1a), region = 28 }
   0x8   : > { %p34_p4 = scmp.eq.s32.totalorder %s32_s24, 0 }
   0xa   : > { %s2408_s26 = scalar_select %p34_p4, %s2324_s19, %s36_s25  }
   0xe   : > { %196 = sbr.rel (!%p45_p3) target bundleno = 26 (0x1a), region = 32  ;;  %s198_s27 = sand.u32 (%p45_p3), 1, %s2324_s19  }
   0xf   : > { %s1921_s28 = smul.u32 (%p45_p3), 52, %s2332_s21 }
  0x10   : > { %s2112_s29 = smul.u32 (%p45_p3), 104, %s198_s27 }
  0x11   : > { %s206_s7 = scalar_lea.vmem (%p45_p3), %s2601_s0, %s1921_s28 }
  0x12   : > { %v221_v0 = vld [vmem:[%s206_s7] sm:$0xff] (%p45_p3)  ;;  %v223_v1 = vld [vmem:[%s206_s7 + $0x8] sm:$0xff] (%p45_p3)  ;;  %v225_v2 = vld [vmem:[%s206_s7 + $0x10] sm:$0xff] (%p45_p3)  ;;  %s200_s8 = scalar_lea.vmem (%p45_p3), [#allocation3], %s2112_s29 }
  0x13   : > { %222 = vst [vmem:[%s200_s8] sm:$0xff] (%p45_p3), %v221_v0  ;;  %224 = vst [vmem:[%s200_s8 + $0x8] sm:$0xff] (%p45_p3), %v223_v1  ;;  %v227_v3 = vld [vmem:[%s206_s7 + $0x18] sm:$0xff] (%p45_p3)  ;;  %v229_v4 = vld [vmem:[%s206_s7 + $0x20] sm:$0xff] (%p45_p3) }
  0x14   : > { %226 = vst [vmem:[%s200_s8 + $0x10] sm:$0xff] (%p45_p3), %v225_v2  ;;  %v231_v5 = vld [vmem:[%s206_s7 + $0x28] sm:$0xff] (%p45_p3)  ;;  %228 = vst [vmem:[%s200_s8 + $0x18] sm:$0xff] (%p45_p3), %v227_v3  ;;  %v233_v6 = vld [vmem:[%s206_s7 + $0xd0] sm:$0xff] (%p45_p3) }
  0x15   : > { %230 = vst [vmem:[%s200_s8 + $0x20] sm:$0xff] %v229_v4  ;;  %232 = vst [vmem:[%s200_s8 + $0x28] sm:$0xff] %v231_v5  ;;  %v235_v7 = vld [vmem:[%s206_s7 + $0xd8] sm:$0xff]  ;;  %v237_v8 = vld [vmem:[%s206_s7 + $0xe0] sm:$0xff] }
  0x16   : > { %234 = vst [vmem:[%s200_s8 + $0x34] sm:$0xff] %v233_v6  ;;  %236 = vst [vmem:[%s200_s8 + $0x3c] sm:$0xff] %v235_v7  ;;  %v239_v9 = vld [vmem:[%s206_s7 + $0xe8] sm:$0xff]  ;;  %v241_v10 = vld [vmem:[%s206_s7 + $0xf0] sm:$0xff] }
  0x17   : > { %238 = vst [vmem:[%s200_s8 + $0x44] sm:$0xff] %v237_v8  ;;  %v243_v11 = vld [vmem:[%s206_s7 + $0xf8] sm:$0xff]  ;;  %240 = vst [vmem:[%s200_s8 + $0x4c] sm:$0xff] %v239_v9  ;;  %v1782_v12 = vld [vmem:[%s206_s7 + $0x30] sm:$0xf] }
  0x18   : > { %242 = vst [vmem:[%s200_s8 + $0x54] sm:$0xff] %v241_v10  ;;  %244 = vst [vmem:[%s200_s8 + $0x5c] sm:$0xff] %v243_v11  ;;  %v1784_v13 = vld [vmem:[%s206_s7 + $0x100] sm:$0xf] }
  0x19   : > { %1783 = vst [vmem:[%s200_s8 + $0x30] sm:$0xf] %v1782_v12  ;;  %1785 = vst [vmem:[%s200_s8 + $0x64] sm:$0xf] %v1784_v13 }
  0x1a PF: > { %p1786_p6 = scmp.ge.s32.totalorder %s2336_s22, 1  ;;  %p269_p7 = scmp.lt.s32.totalorder %s2336_s22, 5 }
  0x1c   : > { %p270_p8 = pnand %p1786_p6, %p269_p7 }
  0x1d   : > { %s276_s9 = sand.u32 (!%p270_p8), 1, %s2320_s18   ;;  %s310_s10 = smul.u32 (!%p270_p8), 208, %s2328_s20 }
  0x1e   : > { %273 = sbr.rel (%p270_p8) target bundleno = 939 (0x3ab), region = 62  ;;  %p1788_p10 = scmp.ne.s32.totalorder (!%p270_p8), %s2328_s20, 0 }
  0x1f   : > { %s2113_s11 = smul.u32 (!%p270_p8), 104, %s276_s9  ;;  %p311_p9 = scmp.lt.s32.totalorder (!%p270_p8), %s310_s10, 831 }
  0x21   : > { %s2425_s16 = scalar_lea.vmem (!%p270_p8), [#allocation3], %s2113_s11 }
  0x25   : > { %s2614_s10 = smov (!%p311_p9, %s310_s10), 831  ;;  %326 = sbr.rel (%p1788_p10) target bundleno = 44 (0x2c), region = 70 }
  0x26   : > { %s1787_s12 = sshll.u32 %s2614_s10, 2  ;;  %v2338_v14 = vmov (!%p1788_p10), 0.0  }
  0x27   : > { %s2423_s15 = scalar_lea.vmem %s2602_s1, %s1787_s12  ;;  %327 = vst [vmem:[#allocation2] sm:$0xff] (!%p1788_p10), %v2338_v14  ;;  %328 = vst [vmem:[#allocation2 + $0x8] sm:$0xff] (!%p1788_p10), %v2338_v14 }
  0x2c PF: > { %v2159_v15 = vld [vmem:[%s2423_s15 + $0x40] sm:$0xff]   ;;  %v2163_v19 = vld [vmem:[%s2423_s15 + $0x48] sm:$0xff]   ;;  %v2167_v23 = vld [vmem:[%s2423_s15 + $0x50] sm:$0xff]   ;;  %vm2340_vm0 = vmmov 0   ;;  %p1906_p11 = scmp.ne.s32.totalorder %s2328_s20, 3 }
  0x2d   : > { %v2160_v16 = vld [vmem:[%s2423_s15 + $0xc0] sm:$0xff]   ;;  %1922 = vmatprep.subr.bf16.mxu0 %v2159_v15  ;;  %v2164_v20 = vld [vmem:[%s2423_s15 + $0xc8] sm:$0xff]   ;;  %v2168_v24 = vld [vmem:[%s2423_s15 + $0xd0] sm:$0xff]   ;;  %vm2342_vm1 = vmmov (!%p1906_p11), 0  }
  0x2e   : > { %v2161_v17 = vld [vmem:[%s2423_s15] sm:$0xff]   ;;  %1944 = vmatprep.subr.bf16.mxu1 %v2160_v16  ;;  %v2165_v21 = vld [vmem:[%s2423_s15 + $0x8] sm:$0xff]   ;;  %v2169_v25 = vld [vmem:[%s2423_s15 + $0x10] sm:$0xff]  }
  0x2f   : > { %v2162_v18 = vld [vmem:[%s2423_s15 + $0x80] sm:$0xff]   ;;  %1923 = vmatpush3.bf16.msra.mxu0 %v2161_v17  ;;  %v2166_v22 = vld [vmem:[%s2423_s15 + $0x88] sm:$0xff]   ;;  %v2170_v26 = vld [vmem:[%s2423_s15 + $0x90] sm:$0xff]  }
  0x30   : > { %1945 = vmatpush3.bf16.msra.mxu1 %v2162_v18  ;;  %1924 = vmatprep.subr.bf16.mxu0 %v2163_v19  ;;  %v2171_v27 = vld [vmem:[%s2423_s15 + $0x58] sm:$0xff]   ;;  %v2175_v31 = vld [vmem:[%s2423_s15 + $0x60] sm:$0xff]   ;;  %v2179_v35 = vld [vmem:[%s2423_s15 + $0x68] sm:$0xff]  }
  0x31   : > { %1946 = vmatprep.subr.bf16.mxu1 %v2164_v20  ;;  %v2172_v28 = vld [vmem:[%s2423_s15 + $0xd8] sm:$0xff]   ;;  %v2176_v32 = vld [vmem:[%s2423_s15 + $0xe0] sm:$0xff]   ;;  %v2180_v36 = vld [vmem:[%s2423_s15 + $0xe8] sm:$0xff]  }
  0x32   : > { %v2173_v29 = vld [vmem:[%s2423_s15 + $0x18] sm:$0xff]   ;;  %v2177_v33 = vld [vmem:[%s2423_s15 + $0x20] sm:$0xff]   ;;  %v2181_v37 = vld [vmem:[%s2423_s15 + $0x28] sm:$0xff]  }
  0x33   : > { %1925 = vmatpush3.bf16.msra.mxu0 %v2165_v21  ;;  %v2174_v30 = vld [vmem:[%s2423_s15 + $0x98] sm:$0xff]   ;;  %v2178_v34 = vld [vmem:[%s2423_s15 + $0xa0] sm:$0xff]   ;;  %v2182_v38 = vld [vmem:[%s2423_s15 + $0xa8] sm:$0xff]  }
  0x34   : > { %1947 = vmatpush3.bf16.msra.mxu1 %v2166_v22  ;;  %1926 = vmatprep.subr.bf16.mxu0 %v2167_v23  ;;  %v2183_v39 = vld [vmem:[%s2423_s15 + $0x70] sm:$0xff]   ;;  %v2187_v43 = vld [vmem:[%s2423_s15 + $0x78] sm:$0xff]   ;;  %v2197_v51 = vld [vmem:[%s2423_s15 + $0x140] sm:$0xff]  }
  0x35   : > { %1948 = vmatprep.subr.bf16.mxu1 %v2168_v24  ;;  %v2184_v40 = vld [vmem:[%s2423_s15 + $0xf0] sm:$0xff]   ;;  %v2188_v44 = vld [vmem:[%s2423_s15 + $0xf8] sm:$0xff]   ;;  %v2198_v52 = vld [vmem:[%s2423_s15 + $0x100] sm:$0xff]  }
  0x36   : > { %v2185_v41 = vld [vmem:[%s2423_s15 + $0x30] sm:$0xff]   ;;  %v2189_v45 = vld [vmem:[%s2423_s15 + $0x38] sm:$0xff]   ;;  %v2199_v53 = vld [vmem:[%s2423_s15 + $0x1c0] sm:$0xff]  }
  0x37   : > { %1927 = vmatpush3.bf16.msra.mxu0 %v2169_v25  ;;  %v2186_v42 = vld [vmem:[%s2423_s15 + $0xb0] sm:$0xff]   ;;  %v2190_v46 = vld [vmem:[%s2423_s15 + $0xb8] sm:$0xff]   ;;  %v2200_v54 = vld [vmem:[%s2423_s15 + $0x180] sm:$0xff]  }
  0x38   : > { %1949 = vmatpush3.bf16.msra.mxu1 %v2170_v26  ;;  %1928 = vmatprep.subr.bf16.mxu0 %v2171_v27  ;;  %v2191_v47 = vld [vmem:[%s2425_s16] ss:$52 sps:$4 sm:$0xff]   ;;  %v2193_v48 = vld [vmem:[%s2425_s16 + $0x4] ss:$52 sps:$4 sm:$0xff]   ;;  %v2194_v49 = vld [vmem:[%s2425_s16 + $0x8] ss:$52 sps:$4 sm:$0xff]  }
  0x39   : > { %1950 = vmatprep.subr.bf16.mxu1 %v2172_v28  ;;  %v2196_v50 = vld [vmem:[%s2425_s16 + $0xc] ss:$52 sps:$4 sm:$0xff]   ;;  %1275 = vmatprep.mubr.bf16.mxu0 %v2193_v48  ;;  %v2201_v55 = vld [vmem:[%s2423_s15 + $0x148] sm:$0xff]  }
  0x3a   : > { %1316 = vmatprep.mubr.bf16.mxu1 %v2196_v50  ;;  %v2202_v56 = vld [vmem:[%s2423_s15 + $0x108] sm:$0xff]   ;;  %v2205_v59 = vld [vmem:[%s2423_s15 + $0x150] sm:$0xff]   ;;  %v2209_v63 = vld [vmem:[%s2423_s15 + $0x158] sm:$0xff]  }
  0x3b   : > { %1929 = vmatpush3.bf16.msra.mxu0 %v2173_v29  ;;  %v2203_v57 = vld [vmem:[%s2423_s15 + $0x1c8] sm:$0xff]   ;;  %v2206_v60 = vld [vmem:[%s2423_s15 + $0x110] sm:$0xff]   ;;  %v2210_v0 = vld [vmem:[%s2423_s15 + $0x118] sm:$0xff]  }
  0x3c   : > { %1951 = vmatpush3.bf16.msra.mxu1 %v2174_v30  ;;  %1930 = vmatprep.subr.bf16.mxu0 %v2175_v31  ;;  %v2204_v58 = vld [vmem:[%s2423_s15 + $0x188] sm:$0xff]   ;;  %v2207_v61 = vld [vmem:[%s2423_s15 + $0x1d0] sm:$0xff]   ;;  %v2211_v1 = vld [vmem:[%s2423_s15 + $0x1d8] sm:$0xff]  }
  0x3d   : > { %1952 = vmatprep.subr.bf16.mxu1 %v2176_v32  ;;  %v2208_v62 = vld [vmem:[%s2423_s15 + $0x190] sm:$0xff]   ;;  %v2212_v2 = vld [vmem:[%s2423_s15 + $0x198] sm:$0xff]   ;;  %v2213_v3 = vld [vmem:[%s2423_s15 + $0x160] sm:$0xff]  }
  0x3e   : > { %v2214_v4 = vld [vmem:[%s2423_s15 + $0x120] sm:$0xff]   ;;  %v2217_v7 = vld [vmem:[%s2423_s15 + $0x168] sm:$0xff]   ;;  %v2221_v11 = vld [vmem:[%s2423_s15 + $0x170] sm:$0xff]  }
  0x3f   : > { %1931 = vmatpush3.bf16.msra.mxu0 %v2177_v33  ;;  %v2215_v5 = vld [vmem:[%s2423_s15 + $0x1e0] sm:$0xff]   ;;  %v2218_v8 = vld [vmem:[%s2423_s15 + $0x128] sm:$0xff]   ;;  %v2222_v12 = vld [vmem:[%s2423_s15 + $0x130] sm:$0xff]  }
  0x40   : > { %1953 = vmatpush3.bf16.msra.mxu1 %v2178_v34  ;;  %1932 = vmatprep.subr.bf16.mxu0 %v2179_v35  ;;  %v2216_v6 = vld [vmem:[%s2423_s15 + $0x1a0] sm:$0xff]   ;;  %v2219_v9 = vld [vmem:[%s2423_s15 + $0x1e8] sm:$0xff]   ;;  %v2223_v13 = vld [vmem:[%s2423_s15 + $0x1f0] sm:$0xff]  }
  0x41   : > { %1954 = vmatprep.subr.bf16.mxu1 %v2180_v36  ;;  %v2220_v10 = vld [vmem:[%s2423_s15 + $0x1a8] sm:$0xff]   ;;  %v2224_v14 = vld [vmem:[%s2423_s15 + $0x1b0] sm:$0xff]   ;;  %v2225_v15 = vld [vmem:[%s2423_s15 + $0x178] sm:$0xff]  }
  0x42   : > { %v2226_v16 = vld [vmem:[%s2423_s15 + $0x138] sm:$0xff]   ;;  %v2232_v21 = vld [vmem:[%s2423_s15 + $0x240] sm:$0xff]   ;;  %v2239_v27 = vld [vmem:[%s2423_s15 + $0x248] sm:$0xff]  }
  0x43   : > { %1933 = vmatpush3.bf16.msra.mxu0 %v2181_v37  ;;  %v2227_v17 = vld [vmem:[%s2423_s15 + $0x1f8] sm:$0xff]   ;;  %v2235_v23 = vld [vmem:[%s2425_s16 + $0x1c] ss:$52 sps:$4 sm:$0xff]  }
  0x44   : > { %1955 = vmatpush3.bf16.msra.mxu1 %v2182_v38  ;;  %1934 = vmatprep.subr.bf16.mxu0 %v2183_v39  ;;  %v2228_v18 = vld [vmem:[%s2425_s16 + $0x10] ss:$52 sps:$4 sm:$0xff]   ;;  %v2230_v19 = vld [vmem:[%s2425_s16 + $0x14] ss:$52 sps:$4 sm:$0xff]   ;;  %v2233_v22 = vld [vmem:[%s2425_s16 + $0x18] ss:$52 sps:$4 sm:$0xff]  }
  0x45   : > { %1956 = vmatprep.subr.bf16.mxu1 %v2184_v40  ;;  %v2231_v20 = vld [vmem:[%s2423_s15 + $0x1b8] sm:$0xff]   ;;  %v2236_v24 = vld [vmem:[%s2423_s15 + $0x200] sm:$0xff]   ;;  %v2240_v28 = vld [vmem:[%s2423_s15 + $0x208] sm:$0xff]  }
  0x46   : > { %v2237_v25 = vld [vmem:[%s2423_s15 + $0x2c0] sm:$0xff]   ;;  %v2241_v29 = vld [vmem:[%s2423_s15 + $0x2c8] sm:$0xff]   ;;  %v2243_v31 = vld [vmem:[%s2423_s15 + $0x250] sm:$0xff]  }
  0x47   : > { %1935 = vmatpush3.bf16.msra.mxu0 %v2185_v41  ;;  %v2238_v26 = vld [vmem:[%s2423_s15 + $0x280] sm:$0xff]   ;;  %v2242_v30 = vld [vmem:[%s2423_s15 + $0x288] sm:$0xff]   ;;  %v2244_v32 = vld [vmem:[%s2423_s15 + $0x210] sm:$0xff]  }
  0x48   : > { %1957 = vmatpush3.bf16.msra.mxu1 %v2186_v42  ;;  %1936 = vmatprep.subr.bf16.mxu0 %v2187_v43  ;;  %v2245_v33 = vld [vmem:[%s2423_s15 + $0x2d0] sm:$0xff]   ;;  %v2247_v35 = vld [vmem:[%s2423_s15 + $0x258] sm:$0xff]   ;;  %v2251_v39 = vld [vmem:[%s2423_s15 + $0x260] sm:$0xff]  }
  0x49   : > { %1958 = vmatprep.subr.bf16.mxu1 %v2188_v44  ;;  %v2246_v34 = vld [vmem:[%s2423_s15 + $0x290] sm:$0xff]   ;;  %v2248_v36 = vld [vmem:[%s2423_s15 + $0x218] sm:$0xff]   ;;  %v2252_v40 = vld [vmem:[%s2423_s15 + $0x220] sm:$0xff]  }
  0x4a   : > { %v2249_v37 = vld [vmem:[%s2423_s15 + $0x2d8] sm:$0xff]   ;;  %v2253_v41 = vld [vmem:[%s2423_s15 + $0x2e0] sm:$0xff]   ;;  %v2255_v43 = vld [vmem:[%s2423_s15 + $0x268] sm:$0xff]  }
  0x4b   : > { %1937 = vmatpush3.bf16.msra.mxu0 %v2189_v45  ;;  %v2250_v38 = vld [vmem:[%s2423_s15 + $0x298] sm:$0xff]   ;;  %v2254_v42 = vld [vmem:[%s2423_s15 + $0x2a0] sm:$0xff]   ;;  %v2256_v44 = vld [vmem:[%s2423_s15 + $0x228] sm:$0xff]  }
  0x4c   : > { %1959 = vmatpush3.bf16.msra.mxu1 %v2190_v46  ;;  %1966 = vmatprep.subr.bf16.mxu0 %v2197_v51  ;;  %v2257_v45 = vld [vmem:[%s2423_s15 + $0x2e8] sm:$0xff]   ;;  %v2260_v48 = vld [vmem:[%s2423_s15 + $0x230] sm:$0xff]   ;;  %v2263_v51 = vld [vmem:[%s2423_s15 + $0x278] sm:$0xff]  }
  0x4d   : > { %1988 = vmatprep.subr.bf16.mxu1 %v2199_v53  ;;  %v2258_v46 = vld [vmem:[%s2423_s15 + $0x2a8] sm:$0xff]   ;;  %v2262_v50 = vld [vmem:[%s2423_s15 + $0x2b0] sm:$0xff]   ;;  %v2265_v53 = vld [vmem:[%s2423_s15 + $0x2f8] sm:$0xff]  }
  0x4e   : > { %1276 = vmatmul.mubr.bf16.vlgmr.msra.gmra.mrb[0].mxu0 %v2191_v47  ;;  %v2259_v47 = vld [vmem:[%s2423_s15 + $0x270] sm:$0xff]  }
  0x4f   : > { %1317 = vmatmul.mubr.bf16.vlgmr.msra.gmra.mrb[0].mxu1 %v2194_v49  ;;  %1967 = vmatpush3.bf16.msra.mxu0 %v2198_v52  ;;  %v2261_v49 = vld [vmem:[%s2423_s15 + $0x2f0] sm:$0xff]   ;;  %v2264_v52 = vld [vmem:[%s2423_s15 + $0x238] sm:$0xff]  }
  0x50   : > { %1989 = vmatpush3.bf16.msra.mxu1 %v2200_v54  ;;  %1968 = vmatprep.subr.bf16.mxu0 %v2201_v55  ;;  %v2266_v54 = vld [vmem:[%s2425_s16 + $0x20] ss:$52 sps:$4 sm:$0xff]   ;;  %v2268_v55 = vld [vmem:[%s2425_s16 + $0x24] ss:$52 sps:$4 sm:$0xff]  }
  0x51   : > { %1990 = vmatprep.subr.bf16.mxu1 %v2203_v57  ;;  %1357 = vmatprep.mubr.bf16.mxu0 %v2230_v19  ;;  %v2339_v57 = vmov 0.0  }
  0x52   : > { %1398 = vmatprep.mubr.bf16.mxu1 %v2235_v23 }
  0x53   : > { %1969 = vmatpush3.bf16.msra.mxu0 %v2202_v56  ;;  %v2269_v56 = vld [vmem:[%s2423_s15 + $0x2b8] sm:$0xff]  }
  0x54   : > { %1991 = vmatpush3.bf16.msra.mxu1 %v2204_v58  ;;  %1970 = vmatprep.subr.bf16.mxu0 %v2205_v59  ;;  %v2270_v58 = vld [vmem:[%s2425_s16 + $0x28] ss:$52 sps:$4 sm:$0xff]   ;;  %v2272_v59 = vld [vmem:[%s2425_s16 + $0x2c] ss:$52 sps:$4 sm:$0xff]  }
  0x55   : > { %1992 = vmatprep.subr.bf16.mxu1 %v2207_v61  ;;  %v2274_v61 = vld [vmem:[%s2423_s15 + $0x308] sm:$0xff]  }
  0x57   : > { %1971 = vmatpush3.bf16.msra.mxu0 %v2206_v60  ;;  %v2273_v60 = vld [vmem:[%s2423_s15 + $0x300] sm:$0xff]  }
  0x58   : > { %1993 = vmatpush3.bf16.msra.mxu1 %v2208_v62  ;;  %1972 = vmatprep.subr.bf16.mxu0 %v2209_v63  ;;  %v2275_v62 = vld [vmem:[%s2423_s15 + $0x310] sm:$0xff]   ;;  %v2276_v63 = vld [vmem:[%s2423_s15 + $0x318] sm:$0xff]  }
  0x59   : > { %1994 = vmatprep.subr.bf16.mxu1 %v2211_v1  ;;  %v2278_v1 = vld [vmem:[%s2423_s15 + $0x328] sm:$0xff]  }
  0x5b   : > { %1973 = vmatpush3.bf16.msra.mxu0 %v2210_v0  ;;  %v2277_v0 = vld [vmem:[%s2423_s15 + $0x320] sm:$0xff]  }
  0x5c   : > { %1995 = vmatpush3.bf16.msra.mxu1 %v2212_v2  ;;  %1974 = vmatprep.subr.bf16.mxu0 %v2213_v3  ;;  %v2279_v2 = vld [vmem:[%s2423_s15 + $0x330] sm:$0xff]   ;;  %v2280_v3 = vld [vmem:[%s2423_s15 + $0x338] sm:$0xff]  }
  0x5d   : > { %1996 = vmatprep.subr.bf16.mxu1 %v2215_v5 }
  0x5f   : > { %1975 = vmatpush3.bf16.msra.mxu0 %v2214_v4  ;;  %v2281_v4 = vld [vmem:[%s2425_s16 + $0x30] ss:$52 sps:$4 sm:$0xff]  }
  0x60   : > { %1997 = vmatpush3.bf16.msra.mxu1 %v2216_v6  ;;  %1976 = vmatprep.subr.bf16.mxu0 %v2217_v7 }
  0x61   : > { %1998 = vmatprep.subr.bf16.mxu1 %v2219_v9 }
  0x63   : > { %1977 = vmatpush3.bf16.msra.mxu0 %v2218_v8 }
  0x64   : > { %1999 = vmatpush3.bf16.msra.mxu1 %v2220_v10  ;;  %1978 = vmatprep.subr.bf16.mxu0 %v2221_v11 }
  0x65   : > { %2000 = vmatprep.subr.bf16.mxu1 %v2223_v13 }
  0x67   : > { %1979 = vmatpush3.bf16.msra.mxu0 %v2222_v12 }
  0x68   : > { %2001 = vmatpush3.bf16.msra.mxu1 %v2224_v14  ;;  %1980 = vmatprep.subr.bf16.mxu0 %v2225_v15 }
  0x69   : > { %2002 = vmatprep.subr.bf16.mxu1 %v2227_v17 }
  0x6b   : > { %1981 = vmatpush3.bf16.msra.mxu0 %v2226_v16 }
  0x6c   : > { %2003 = vmatpush3.bf16.msra.mxu1 %v2231_v20  ;;  %2010 = vmatprep.subr.bf16.mxu0 %v2232_v21 }
  0x6d   : > { %2032 = vmatprep.subr.bf16.mxu1 %v2237_v25 }
  0x6e   : > { %1358 = vmatmul.mubr.bf16.vlgmr.msra.gmra.mrb[4].mxu0 %v2228_v18 }
  0x6f   : > { %2011 = vmatpush3.bf16.msra.mxu0 %v2236_v24  ;;  %1399 = vmatmul.mubr.bf16.vlgmr.msra.gmra.mrb[4].mxu1 %v2233_v22 }
  0x70   : > { %2033 = vmatpush3.bf16.msra.mxu1 %v2238_v26  ;;  %2012 = vmatprep.subr.bf16.mxu0 %v2239_v27 }
  0x71   : > { %2034 = vmatprep.subr.bf16.mxu1 %v2241_v29  ;;  %1439 = vmatprep.mubr.bf16.mxu0 %v2268_v55  ;;  %v330_v55 = vld [vmem:[#allocation2 + $0x8] sm:$0xff] }
  0x72   : > { %1480 = vmatprep.mubr.bf16.mxu1 %v2272_v59 }
  0x73   : > { %2013 = vmatpush3.bf16.msra.mxu0 %v2240_v28 }
  0x74   : > { %2035 = vmatpush3.bf16.msra.mxu1 %v2242_v30  ;;  %2014 = vmatprep.subr.bf16.mxu0 %v2243_v31 }
  0x75   : > { %2036 = vmatprep.subr.bf16.mxu1 %v2245_v33 }
  0x77   : > { %2015 = vmatpush3.bf16.msra.mxu0 %v2244_v32 }
  0x78   : > { %2037 = vmatpush3.bf16.msra.mxu1 %v2246_v34  ;;  %2016 = vmatprep.subr.bf16.mxu0 %v2247_v35 }
  0x79   : > { %2038 = vmatprep.subr.bf16.mxu1 %v2249_v37 }
  0x7b   : > { %2017 = vmatpush3.bf16.msra.mxu0 %v2248_v36 }
  0x7c   : > { %2039 = vmatpush3.bf16.msra.mxu1 %v2250_v38  ;;  %2018 = vmatprep.subr.bf16.mxu0 %v2251_v39 }
  0x7d   : > { %2040 = vmatprep.subr.bf16.mxu1 %v2253_v41 }
  0x7f   : > { %2019 = vmatpush3.bf16.msra.mxu0 %v2252_v40 }
  0x80   : > { %2041 = vmatpush3.bf16.msra.mxu1 %v2254_v42  ;;  %2020 = vmatprep.subr.bf16.mxu0 %v2255_v43 }
  0x81   : > { %2042 = vmatprep.subr.bf16.mxu1 %v2257_v45 }
  0x83   : > { %2021 = vmatpush3.bf16.msra.mxu0 %v2256_v44 }
  0x84   : > { %2043 = vmatpush3.bf16.msra.mxu1 %v2258_v46  ;;  %2022 = vmatprep.subr.bf16.mxu0 %v2259_v47 }
  0x85   : > { %2044 = vmatprep.subr.bf16.mxu1 %v2261_v49 }
  0x87   : > { %2023 = vmatpush3.bf16.msra.mxu0 %v2260_v48 }
  0x88   : > { %2045 = vmatpush3.bf16.msra.mxu1 %v2262_v50  ;;  %2024 = vmatprep.subr.bf16.mxu0 %v2263_v51  ;;  %v329_v51 = vld [vmem:[#allocation2] sm:$0xff] }
  0x89   : > { %2046 = vmatprep.subr.bf16.mxu1 %v2265_v53 }
  0x8b   : > { %2025 = vmatpush3.bf16.msra.mxu0 %v2264_v52 }
  0x8c   : > { %2072 = vmatprep.subr.bf16.mxu0 %v2339_v57  ;;  %2047 = vmatpush3.bf16.msra.mxu1 %v2269_v56 }
  0x8e   : > { %1440 = vmatmul.mubr.bf16.vlgmr.msra.gmra.mrb[8].mxu0 %v2266_v54 }
  0x8f   : > { %2088 = vmatprep.mubr.msk.bf16.mxu0 %vm2340_vm0, %v2339_v57  ;;  %2073 = vmatpush3.bf16.msra.mxu0 %v2273_v60 }
  0x90   : > { %1481 = vmatmul.mubr.bf16.vlgmr.msra.gmra.mrb[8].mxu1 %v2270_v58  ;;  %2074 = vmatprep.subr.bf16.mxu0 %v2339_v57 }
  0x93   : > { %2075 = vmatpush3.bf16.msra.mxu0 %v2274_v61  ;;  %v2282_v61 = vld [vmem:[%s2604_s3] sm:$0xff] (!%p1906_p11)  }
  0x94   : > { %2076 = vmatprep.subr.bf16.mxu0 %v2339_v57 }
  0x97   : > { %2077 = vmatpush3.bf16.msra.mxu0 %v2275_v62  ;;  %v2341_v62 = vmov (!%p1906_p11), 0.0  }
  0x98   : > { %2078 = vmatprep.subr.bf16.mxu0 %v2339_v57 }
  0x9b   : > { %2079 = vmatpush3.bf16.msra.mxu0 %v2276_v63  ;;  %v2283_v63 = vld [vmem:[%s2604_s3 + $0x8] sm:$0xff] (!%p1906_p11)  }
  0x9c   : > { %2080 = vmatprep.subr.bf16.mxu0 %v2339_v57 }
  0x9f   : > { %2081 = vmatpush3.bf16.msra.mxu0 %v2277_v0  ;;  %v2284_v0 = vld [vmem:[%s2604_s3 + $0x10] sm:$0xff] (!%p1906_p11)  }
  0xa0   : > { %2082 = vmatprep.subr.bf16.mxu0 %v2339_v57 }
  0xa3   : > { %2083 = vmatpush3.bf16.msra.mxu0 %v2278_v1  ;;  %v2285_v1 = vld [vmem:[%s2604_s3 + $0x18] sm:$0xff] (!%p1906_p11)  }
  0xa4   : > { %2084 = vmatprep.subr.bf16.mxu0 %v2339_v57 }
  0xa7   : > { %2085 = vmatpush3.bf16.msra.mxu0 %v2279_v2  ;;  %v2286_v2 = vld [vmem:[%s2604_s3 + $0x20] sm:$0xff] (!%p1906_p11)  }
  0xa8   : > { %2086 = vmatprep.subr.bf16.mxu0 %v2339_v57 }
  0xab   : > { %2087 = vmatpush3.bf16.msra.mxu0 %v2280_v3  ;;  %v2287_v3 = vld [vmem:[%s2604_s3 + $0x28] sm:$0xff] (!%p1906_p11)  }
  0xac   : > { %2092 = vmatprep.subr.bf16.mxu0 (!%p1906_p11), %v2341_v62 }
  0xae   : > { %2089 = vmatmul.mubr.bf16.vlgmr.msra.gmra.mrb[12].mxu0 %v2281_v4 }
  0xaf   : > { %2093 = vmatpush3.bf16.msra.mxu0 (!%p1906_p11), %v2282_v61  ;;  %2108 = vmatprep.mubr.msk.bf16.mxu0 (!%p1906_p11), %vm2342_vm1, %v2341_v62 }
  0xb0   : > { %2094 = vmatprep.subr.bf16.mxu0 (!%p1906_p11), %v2341_v62 }
  0xb3   : > { %2095 = vmatpush3.bf16.msra.mxu0 (!%p1906_p11), %v2283_v63 }
  0xb4   : > { %2096 = vmatprep.subr.bf16.mxu0 (!%p1906_p11), %v2341_v62 }
  0xb7   : > { %2097 = vmatpush3.bf16.msra.mxu0 (!%p1906_p11), %v2284_v0 }
  0xb8   : > { %2098 = vmatprep.subr.bf16.mxu0 (!%p1906_p11), %v2341_v62 }
  0xbb   : > { %2099 = vmatpush3.bf16.msra.mxu0 (!%p1906_p11), %v2285_v1 }
  0xbc   : > { %2100 = vmatprep.subr.bf16.mxu0 (!%p1906_p11), %v2341_v62 }
  0xbf   : > { %2101 = vmatpush3.bf16.msra.mxu0 (!%p1906_p11), %v2286_v2 }
  0xc0   : > { %2102 = vmatprep.subr.bf16.mxu0 (!%p1906_p11), %v2341_v62 }
  0xc3   : > { %2103 = vmatpush3.bf16.msra.mxu0 (!%p1906_p11), %v2287_v3 }
  0xc4   : > { %2104 = vmatprep.subr.bf16.mxu0 (!%p1906_p11), %v2341_v62 }
 0x121   : > { %v1938_v5 = vpop.f32.mrb[0].mxu0 }
 0x122   : > { %v1960_v6 = vpop.f32.mrb[0].mxu1  ;;  %v1939_v7 = vpop.f32.mrb[1].mxu0 }
 0x123   : > { %v1940_v8 = vadd.f32 %v1939_v7, %v1938_v5  ;;  %v1961_v9 = vpop.f32.mrb[1].mxu1  ;;  %v1941_v10 = vpop.f32.mrb[2].mxu0 }
 0x124   : > { %v1962_v11 = vadd.f32 %v1961_v9, %v1960_v6  ;;  %v1963_v12 = vpop.f32.mrb[2].mxu1  ;;  %v1942_v13 = vpop.f32.mrb[3].mxu0  ;;  %v1907_v6 = vld [vmem:[%s2603_s2] ss:$0 sm:$0xff] (!%p1906_p11)  ;;  %v2288_v9 = vld [vmem:[%s2604_s3 + $0x30] sm:$0xff] (!%p1906_p11)  }
 0x125   : > { %v1943_v14 = vadd.f32 %v1942_v13, %v1941_v10  ;;  %v1964_v15 = vpop.f32.mrb[3].mxu1  ;;  %2105 = vmatpush3.bf16.msra.mxu0 (!%p1906_p11), %v2288_v9 }
 0x126   : > { %v1319_v16 = vadd.f32 %v1962_v11, %v1940_v8  ;;  %v1965_v17 = vadd.f32 %v1964_v15, %v1963_v12  ;;  %v2289_v12 = vld [vmem:[%s2604_s3 + $0x38] sm:$0xff] (!%p1906_p11)   ;;  %2106 = vmatprep.subr.bf16.mxu0 (!%p1906_p11), %v2341_v62 }
 0x128   : > { %v1322_v18 = vadd.f32 %v1965_v17, %v1943_v14  ;;  %v1664_v14 = vlaneseq (!%p1906_p11) }
 0x129   : > { %2107 = vmatpush3.bf16.msra.mxu0 (!%p1906_p11), %v2289_v12 }
 0x12a   : > { %v1665_v15 = vand.u32 (!%p1906_p11), 127, %v1664_v14 }
 0x12c   : > { %vm1666_vm2 = vcmp.lt.s32.totalorder (!%p1906_p11), %v1665_v15, 5 }
 0x141   : > { %v1982_v19 = vpop.f32.mrb[4].mxu0 }
 0x142   : > { %v1983_v20 = vpop.f32.mrb[5].mxu0  ;;  %v2004_v25 = vpop.f32.mrb[4].mxu1 }
 0x143   : > { %v1984_v21 = vadd.f32 %v1983_v20, %v1982_v19  ;;  %v1985_v22 = vpop.f32.mrb[6].mxu0  ;;  %v2005_v27 = vpop.f32.mrb[5].mxu1 }
 0x144   : > { %v1986_v23 = vpop.f32.mrb[7].mxu0  ;;  %v2006_v29 = vadd.f32 %v2005_v27, %v2004_v25  ;;  %v2007_v30 = vpop.f32.mrb[6].mxu1 }
 0x145   : > { %v1360_v24 = vadd.f32 %v1984_v21, %v1319_v16  ;;  %v1987_v26 = vadd.f32 %v1986_v23, %v1985_v22  ;;  %v2008_v31 = vpop.f32.mrb[7].mxu1  ;;  %v1908_v16 = vld [vmem:[%s2605_s4] ss:$0 sm:$0xff] (!%p1906_p11) }
 0x146   : > { %v2009_v33 = vadd.f32 %v2008_v31, %v2007_v30 }
 0x147   : > { %v1363_v28 = vadd.f32 %v1987_v26, %v1322_v18  ;;  %v1401_v32 = vadd.f32 %v2006_v29, %v1360_v24 }
 0x149   : > { %v1404_v34 = vadd.f32 %v2009_v33, %v1363_v28 }
 0x161   : > { %v2026_v35 = vpop.f32.mrb[8].mxu0 }
 0x162   : > { %v2027_v36 = vpop.f32.mrb[9].mxu0 }
 0x163   : > { %v2028_v37 = vadd.f32 %v2027_v36, %v2026_v35  ;;  %v2029_v38 = vpop.f32.mrb[10].mxu0  ;;  %v2048_v39 = vpop.f32.mrb[8].mxu1 }
 0x164   : > { %v2030_v40 = vpop.f32.mrb[11].mxu0  ;;  %v2049_v43 = vpop.f32.mrb[9].mxu1 }
 0x165   : > { %v1442_v41 = vadd.f32 %v2028_v37, %v1401_v32  ;;  %v2031_v42 = vadd.f32 %v2030_v40, %v2029_v38  ;;  %v2050_v44 = vadd.f32 %v2049_v43, %v2048_v39  ;;  %v2051_v45 = vpop.f32.mrb[10].mxu1 }
 0x166   : > { %v2052_v47 = vpop.f32.mrb[11].mxu1 }
 0x167   : > { %v1445_v46 = vadd.f32 %v2031_v42, %v1404_v34  ;;  %v2053_v48 = vadd.f32 %v2052_v47, %v2051_v45  ;;  %v1483_v49 = vadd.f32 %v2050_v44, %v1442_v41 }
 0x169   : > { %v1486_v50 = vadd.f32 %v2053_v48, %v1445_v46 }
 0x181   : > { %v1523_v52 = vpop.f32.mrb[12].mxu0 }
 0x182   : > { %v1524_v53 = vadd.f32 %v1523_v52, %v1483_v49  ;;  %v2090_v54 = vpop.f32.mrb[13].mxu0  ;;  %1537 = sbr.rel (%p1906_p11) target bundleno = 939 (0x3ab), region = 74 }
 0x183   : > { %v1526_v56 = vpop.f32.mrb[14].mxu0 }
 0x184   : > { %v1530_v57 = vadd.f32 %v1524_v53, %v329_v51  ;;  %v1527_v58 = vadd.f32 %v1526_v56, %v1486_v50  ;;  %v2091_v59 = vpop.f32.mrb[15].mxu0 }
 0x186   : > { %1532 = vst [vmem:[#allocation2] sm:$0xff] %v1530_v57  ;;  %v1531_v60 = vadd.f32 %v1527_v58, %v330_v55 }
 0x188   : > { %1533 = vst [vmem:[#allocation2 + $0x8] sm:$0xff] %v1531_v60 }
 0x18d   : > { %v1538_v4 = vld [vmem:[#allocation2] sm:$0xff] }
 0x18e   : > { %v1547_v7 = vadd.f32 %v1907_v6, %v1538_v4 }
 0x18f   : > { %v1539_v5 = vld [vmem:[#allocation2 + $0x8] sm:$0xff] }
 0x190   : > { %v1548_v8 = vadd.f32 %v1907_v6, %v1539_v5  ;;  %v1549_v10 = vmax.f32 %v1547_v7, 0.0 }
 0x192   : > { %v1550_v11 = vmax.f32 %v1548_v8, 0.0 }
 0x194   : > { %v1551_v13 = vpack.c.bf16 %v1550_v11, %v1549_v10 }
 0x196   : > { %2109 = vmatmul.mubr.bf16.vlgmr.msra.gmra.mrb[0].mxu0 %v1551_v13 }
 0x269   : > { %v1657_v17 = vpop.f32.mrb[0].mxu0 }
 0x26a   : > { %v1658_v18 = vadd.f32 %v1908_v16, %v1657_v17  ;;  %v2110_v19 = vpop.f32.mrb[1].mxu0 }
 0x26b   : > { %v1660_v20 = vpop.f32.mrb[2].mxu0 }
 0x26c   : > { %v1661_v21 = vadd.f32 %v1908_v16, %v1660_v20  ;;  %v2111_v22 = vpop.f32.mrb[3].mxu0  ;;  %v1667_v23 = vsel %vm1666_vm2, %v1658_v18, -inf }
 0x26d   : > { %1669 = vmax.xlane.f32.xlu0 %v1667_v23 }
 0x26e   : > { %v1668_v24 = vsel %vm1666_vm2, %v1661_v21, -inf }
 0x271   : > { %1671 = vmax.xlane.f32.xlu0 %v1668_v24 }
 0x2fa   : > { %v1670_v25 = vpop.xlane.xlu0 %1669 }
 0x2fb   : > { %v1673_v26 = vsub.f32 %v1667_v23, %v1670_v25 }
 0x2fd   : > { %v1675_v27 = vmul.f32 1.442695, %v1673_v26 }
 0x2fe   : > { %v1672_v28 = vpop.xlane.xlu0 %1671 }
 0x2ff   : > { %2290 = vpow2.f32 %v1675_v27  ;;  %v1674_v29 = vsub.f32 %v1668_v24, %v1672_v28 }
 0x301   : > { %v1677_v30 = vmul.f32 1.442695, %v1674_v29 }
 0x303   : > { %2292 = vpow2.f32 %v1677_v30 }
 0x309   : > { %v2291_v31 = vpop.eup %2290 }
 0x30a   : > { %1679 = vadd.xlane.f32.xlu1 %v2291_v31 }
 0x30d   : > { %v2293_v32 = vpop.eup %2292 }
 0x30e   : > { %1681 = vadd.xlane.f32.xlu1 %v2293_v32 }
 0x397   : > { %v1680_v33 = vpop.xlane.xlu1 %1679 }
 0x398   : > { %2294 = vrcp.f32 %v1680_v33 }
 0x39b   : > { %v1682_v34 = vpop.xlane.xlu1 %1681 }
 0x39c   : > { %2296 = vrcp.f32 %v1682_v34 }
 0x3a2   : > { %v2295_v35 = vpop.eup %2294 }
 0x3a3   : > { %v1684_v36 = vmul.f32 %v2295_v35, %v2291_v31 }
 0x3a5   : > { %v1687_v37 = vsel %vm1666_vm2, %v1684_v36, %v1658_v18 }
 0x3a6   : > { %v2297_v38 = vpop.eup %2296  ;;  %1689 = vst [vmem:[%s2606_s5] sm:$0xff] %v1687_v37 }
 0x3a7   : > { %v1686_v39 = vmul.f32 %v2297_v38, %v2293_v32 }
 0x3a9   : > { %v1688_v40 = vsel %vm1666_vm2, %v1686_v39, %v1661_v21 }
 0x3aa   : > { %1690 = vst [vmem:[%s2606_s5 + $0x8] sm:$0xff] %v1688_v40 }
 0x3ab PF: > { %s15_s22 = sadd.s32 1, %s2336_s22   ;;  %s2607_s18 = smov %s2324_s19 }
 0x3ac   : > { %p12_p12 = scmp.ge.s32.totalorder %s15_s22, 6   ;;  %s2608_s19 = smov %s2408_s26 }
 0x3ad   : > { %s2609_s20 = smov %s2332_s21  ;;  %s2610_s21 = smov %s2612_s23 }
 0x3ae   :  { %14 = sbr.rel (!%p12_p12) target bundleno = 3 (0x3), region = 118 }

</bundles_post_ra>
